<compile_context>
chip_gen: v5e
topology: v5e:2x2
jax: 0.10.0
libtpu: 0.0.40
codegen_flags: <defaults>
</compile_context>

<pallas_src>
import functools

import jax
import jax.numpy as jnp
from jax import lax
from jax.experimental import pallas as pl
from jax.experimental.pallas import tpu as pltpu

KSIZE = 4
_LANE = 128
_TP_MAX = 512          # max output-position rows per matmul tile
_LRELU_SLOPE = 0.2
_IN_EPS = 1e-5


def _round_up(x, m):
    return ((x + m - 1) // m) * m


@functools.lru_cache(maxsize=1)
def _vmem_limit_bytes():
    # Per-generation VMEM budget (~3/4 of physical); conservative fallback if the
    # query is unavailable.
    try:
        cap = int(pltpu.get_tpu_info().vmem_capacity_bytes)
    except Exception:
        cap = 64 * 1024 * 1024
    return max(32 * 1024 * 1024, min(cap * 3 // 4, 100 * 1024 * 1024))


# ---------------------------------------------------------------------------
# Pallas kernels
# ---------------------------------------------------------------------------
def _gemm_bias_act_kernel(x_ref, w_ref, b_ref, o_ref, *, relu):
    """(rows, Kp) @ (Kp, Coutp) + bias [+ LeakyReLU]; single MXU dot, lane-dense store."""
    y = jnp.dot(x_ref[...], w_ref[...], preferred_element_type=jnp.float32)
    y = y + b_ref[...]
    if relu:
        y = jnp.where(y >= 0, y, _LRELU_SLOPE * y)
    o_ref[...] = y.astype(o_ref.dtype)


def _gemm_in_lrelu_kernel(x_ref, w_ref, o_ref, conv_ref, *, n_pt, tp, p_true):
    """Per-sample conv-as-GEMM + InstanceNorm2d(affine=False) + LeakyReLU(0.2).

    x_ref   : (P_pad, Kp)    bf16 im2col patches for one sample
    w_ref   : (Kp, Coutp)    bf16 folded conv weight (zero-padded rows / cols)
    o_ref   : (P_pad, Coutp) output block (lane-dense)
    conv_ref: (P_pad, Coutp) f32 VMEM scratch holding the pre-norm conv result

    Stats are accumulated in a single pass (sum / sum of squares). P-padding rows are
    all-zero patches and (bias-free) contribute exactly zero to both sums; the mean
    divides by the true P. The conv bias is skipped (cancelled exactly by non-affine IN).
    """
    coutp = o_ref.shape[-1]
    s = jnp.zeros((1, coutp), jnp.float32)
    ss = jnp.zeros((1, coutp), jnp.float32)
    # Pass 1: per-tile matmul, stash pre-norm conv, accumulate sum / sumsq.
    for t in range(n_pt):                       # n_pt is a small static int (unrolled)
        ct = jnp.dot(x_ref[t * tp:(t + 1) * tp, :], w_ref[...],
                     preferred_element_type=jnp.float32)
        conv_ref[t * tp:(t + 1) * tp, :] = ct
        s = s + jnp.sum(ct, axis=0, keepdims=True)
        ss = ss + jnp.sum(ct * ct, axis=0, keepdims=True)
    inv_p = 1.0 / p_true
    mean = s * inv_p
    var = jnp.maximum(ss * inv_p - mean * mean, 0.0)    # clamp f32 cancellation
    scale = lax.rsqrt(var + _IN_EPS)
    # Pass 2: normalize + LeakyReLU + lane-dense store.
    for t in range(n_pt):
        y = (conv_ref[t * tp:(t + 1) * tp, :] - mean) * scale
        y = jnp.where(y >= 0, y, _LRELU_SLOPE * y)
        o_ref[t * tp:(t + 1) * tp, :] = y.astype(o_ref.dtype)


# ---------------------------------------------------------------------------
# Wrapper-side im2col (XLA glue) and layer driver
# ---------------------------------------------------------------------------
def _im2col(x, k, s):
    """x: (N, Hp, Wp, C) padded NHWC -> ((N, Ho*Wo, k*k*C), Ho, Wo); tap order (kh, kw, c)."""
    N, Hp, Wp, C = x.shape
    Ho = (Hp - k) // s + 1
    Wo = (Wp - k) // s + 1
    cols = []
    for dr in range(k):
        for dc in range(k):
            cols.append(lax.slice(
                x, (0, dr, dc, 0),
                (N, dr + (Ho - 1) * s + 1, dc + (Wo - 1) * s + 1, C),
                (1, s, s, 1)))
    patches = jnp.concatenate(cols, axis=-1)            # (N, Ho, Wo, k*k*C)
    return patches.reshape(N, Ho * Wo, k * k * C), Ho, Wo


def conv_layer_pallas(x, layer, *, is_last):
    """x: (N, H, W, Cp) bf16 NHWC (channel-padded) -> (N, Ho, Wo, Coutp)."""
    # TODO(synk): for very large resolutions, build the patch rows in-kernel from a
    # pl.ANY HBM ref (manual DMA) to avoid the im2col HBM expansion entirely.
    N = x.shape[0]
    k, s, p = KSIZE, layer["stride"], layer["pad"]
    if p:
        x = jnp.pad(x, ((0, 0), (p, p), (p, p), (0, 0)))
    patches, Ho, Wo = _im2col(x, k, s)                   # (N, P, k*k*Cp) bf16
    P, K = patches.shape[1], patches.shape[2]
    Kp, coutp = layer["w2d"].shape
    if Kp > K:                                           # lane-pad K (layer 1 only)
        patches = jnp.pad(patches, ((0, 0), (0, 0), (0, Kp - K)))
    out_dtype = jnp.float32 if is_last else jnp.bfloat16
    vmem = _vmem_limit_bytes()

    if P == 1 and not layer["norm"]:
        # 1x1 spatial output (final conv): fold the whole batch into one matmul.
        xf = patches.reshape(N, Kp)
        out = pl.pallas_call(
            functools.partial(_gemm_bias_act_kernel, relu=layer["relu"]),
            out_shape=jax.ShapeDtypeStruct((N, coutp), out_dtype),
            grid=(1,),
            in_specs=[pl.BlockSpec((N, Kp), lambda i: (0, 0)),
                      pl.BlockSpec((Kp, coutp), lambda i: (0, 0)),
                      pl.BlockSpec((1, coutp), lambda i: (0, 0))],
            out_specs=pl.BlockSpec((N, coutp), lambda i: (0, 0)),
            compiler_params=pltpu.CompilerParams(vmem_limit_bytes=vmem),
        )(xf, layer["w2d"], layer["b"])
        return out.reshape(N, 1, 1, coutp)

    # P tiling: tile rows a multiple of 8, K lane-dense (multiple of 128).
    P8 = _round_up(P, 8)
    tp = P8 if P8 <= _TP_MAX else _TP_MAX
    P_pad = _round_up(P, tp)
    n_pt = P_pad // tp
    if P_pad > P:
        patches = jnp.pad(patches, ((0, 0), (0, P_pad - P), (0, 0)))

    if layer["norm"]:
        # TODO(synk): at very large P add a P-tiled grid with a two-pass (stats, then
        # normalize) scheme instead of the whole-sample f32 VMEM scratch.
        kernel = functools.partial(_gemm_in_lrelu_kernel,
                                   n_pt=n_pt, tp=tp, p_true=float(P))
        out = pl.pallas_call(
            kernel,
            out_shape=jax.ShapeDtypeStruct((N, P_pad, coutp), out_dtype),
            grid=(N,),
            in_specs=[pl.BlockSpec((None, P_pad, Kp), lambda n: (n, 0, 0)),
                      pl.BlockSpec((Kp, coutp), lambda n: (0, 0))],
            out_specs=pl.BlockSpec((None, P_pad, coutp), lambda n: (n, 0, 0)),
            scratch_shapes=[pltpu.VMEM((P_pad, coutp), jnp.float32)],
            compiler_params=pltpu.CompilerParams(
                dimension_semantics=("parallel",), vmem_limit_bytes=vmem),
        )(patches, layer["w2d"])
    else:
        kernel = functools.partial(_gemm_bias_act_kernel, relu=layer["relu"])
        out = pl.pallas_call(
            kernel,
            out_shape=jax.ShapeDtypeStruct((N, P_pad, coutp), out_dtype),
            grid=(N, n_pt),
            in_specs=[pl.BlockSpec((None, tp, Kp), lambda n, t: (n, t, 0)),
                      pl.BlockSpec((Kp, coutp), lambda n, t: (0, 0)),
                      pl.BlockSpec((1, coutp), lambda n, t: (0, 0))],
            out_specs=pl.BlockSpec((None, tp, coutp), lambda n, t: (n, t, 0)),
            compiler_params=pltpu.CompilerParams(
                dimension_semantics=("parallel", "parallel"), vmem_limit_bytes=vmem),
        )(patches, layer["w2d"], layer["b"])

    if P_pad > P:
        out = out[:, :P, :]
    return out.reshape(N, Ho, Wo, coutp)


# ---------------------------------------------------------------------------
# Parameters and forward pass
# ---------------------------------------------------------------------------
def init_discriminator_params(key, input_nc, ndf):
    """Deterministic synthetic params; weights stored folded as (k*k*Cin_pad, Cout_pad) bf16.

    The padded channel width is carried between layers: each layer's weight is
    zero-padded in Cin to the previous layer's padded Cout, so no inter-layer
    channel slicing/padding of activations is needed.
    """
    # (Cin, Cout, stride, pad, norm, relu)
    cfg = [(input_nc, ndf, 2, 1, False, True)]
    for i in range(3):
        m = 2 ** i
        cfg.append((ndf * m, ndf * m * 2, 2, 1, True, True))
    cfg.append((ndf * 8, 1, 1, 0, False, False))

    params = []
    k = KSIZE
    prev_cp = input_nc                       # channel width the layer actually sees
    for (cin, cout, stride, pad, norm, relu) in cfg:
        key, kw_, kb_ = jax.random.split(key, 3)
        w = 0.02 * jax.random.normal(kw_, (k, k, cin, cout), dtype=jnp.float32)
        b = 0.01 * jax.random.normal(kb_, (cout,), dtype=jnp.float32)
        coutp = _round_up(cout, _LANE)       # lane-dense output channels
        cinp = prev_cp
        w_p = jnp.pad(w, ((0, 0), (0, 0), (0, cinp - cin), (0, coutp - cout)))
        K = k * k * cinp
        Kp = _round_up(K, _LANE)             # lane-dense contraction dim
        w2d = jnp.pad(w_p.reshape(K, coutp), ((0, Kp - K), (0, 0))).astype(jnp.bfloat16)
        # Bias is skipped entirely (no storage, no DMA) on InstanceNorm layers.
        b_pad = (None if norm else
                 jnp.pad(b, (0, coutp - cout)).reshape(1, coutp).astype(jnp.float32))
        params.append(dict(w2d=w2d, b=b_pad, cout=cout, stride=stride, pad=pad,
                           norm=norm, relu=relu))
        prev_cp = coutp
    return params


def discriminator_forward(x_nchw, params):
    """x_nchw: (N, C, H, W) float32 -> (N, Ho, Wo)  (PyTorch `squeeze(1)` semantics)."""
    x = jnp.transpose(x_nchw, (0, 2, 3, 1)).astype(jnp.bfloat16)   # NHWC, bf16
    n_layers = len(params)
    for li, layer in enumerate(params):
        x = conv_layer_pallas(x, layer, is_last=(li == n_layers - 1))
    # Final layer has true cout = 1 (channels 1..127 are zero padding): take channel 0.
    return x[..., 0].astype(jnp.float32)


if __name__ == "__main__":
    input_nc = 3
    ndf = 4
    batch = 2
    spatial = 64  # 64 -> 32 -> 16 -> 8 -> 4 -> 1 after the final k=4/s=1/p=0 conv

    key = jax.random.PRNGKey(0)
    key_x, key_p = jax.random.split(key)
    x = jax.random.normal(key_x, (batch, input_nc, spatial, spatial), dtype=jnp.float32)
    params = init_discriminator_params(key_p, input_nc, ndf)

    fwd = jax.jit(lambda inp: discriminator_forward(inp, params))
    out = jax.block_until_ready(fwd(x))

    assert out.shape == (batch, 1, 1), out.shape
    assert bool(jnp.all(jnp.isfinite(out)))
    print("KERNEL_OK")
</pallas_src>

<mosaic_0001>
module attributes {stable_mosaic.version = 11 : i64} {
  func.func @_gemm_bias_act_kernel(%arg0: i32, %arg1: i32, %arg2: memref<1x512x128xbf16, #tpu.memory_space<vmem>>, %arg3: memref<128x128xbf16, #tpu.memory_space<vmem>>, %arg4: memref<1x128xf32, #tpu.memory_space<vmem>>, %arg5: memref<1x512x128xbf16, #tpu.memory_space<vmem>>) attributes {dimension_semantics = [#tpu.dimension_semantics<parallel>, #tpu.dimension_semantics<parallel>], iteration_bounds = array<i64: 2, 2>, scalar_prefetch = 0 : i64, scratch_operands = 0 : i64, tpu.core_type = #tpu.core_type<tc>, window_params = [{transform_indices = @transform_0, window_bounds = array<i64: 1, 512, 128>}, {pipeline_mode = #tpu.pipeline_mode<synchronous>, transform_indices = @transform_1, window_bounds = array<i64: 128, 128>}, {pipeline_mode = #tpu.pipeline_mode<synchronous>, transform_indices = @transform_2, window_bounds = array<i64: 1, 128>}, {transform_indices = @transform_3, window_bounds = array<i64: 1, 512, 128>}]} {
    %c0 = arith.constant 0 : index
    %c0_0 = arith.constant 0 : index
    %c0_1 = arith.constant 0 : index
    %0 = vector.load %arg2[%c0, %c0_0, %c0_1] : memref<1x512x128xbf16, #tpu.memory_space<vmem>>, vector<1x512x128xbf16>
    %1 = vector.shape_cast %0 : vector<1x512x128xbf16> to vector<512x128xbf16>
    %c0_2 = arith.constant 0 : index
    %c0_3 = arith.constant 0 : index
    %2 = vector.load %arg3[%c0_2, %c0_3] : memref<128x128xbf16, #tpu.memory_space<vmem>>, vector<128x128xbf16>
    %cst = arith.constant dense<0.000000e+00> : vector<512x128xf32>
    %3 = tpu.matmul %1, %2, %cst {dimension_numbers = #tpu.dot_dimension_numbers<[1], [0], [0], [1], [0, 0, 1, 1], [], []>} : vector<512x128xbf16>, vector<128x128xbf16>, vector<512x128xf32> -> vector<512x128xf32>
    %c0_4 = arith.constant 0 : index
    %c0_5 = arith.constant 0 : index
    %4 = vector.load %arg4[%c0_4, %c0_5] : memref<1x128xf32, #tpu.memory_space<vmem>>, vector<1x128xf32>
    %5 = vector.broadcast %4 : vector<1x128xf32> to vector<512x128xf32>
    %6 = arith.addf %3, %5 : vector<512x128xf32>
    %cst_6 = arith.constant 0.000000e+00 : f32
    %7 = vector.broadcast %cst_6 : f32 to vector<512x128xf32>
    %8 = arith.cmpf oge, %6, %7 : vector<512x128xf32>
    %cst_7 = arith.constant 2.000000e-01 : f32
    %9 = vector.broadcast %cst_7 : f32 to vector<512x128xf32>
    %10 = arith.mulf %9, %6 : vector<512x128xf32>
    %11 = arith.select %8, %6, %10 : vector<512x128xi1>, vector<512x128xf32>
    %12 = arith.truncf %11 : vector<512x128xf32> to vector<512x128xbf16>
    %c0_8 = arith.constant 0 : index
    %c0_9 = arith.constant 0 : index
    %c0_10 = arith.constant 0 : index
    %13 = vector.load %arg5[%c0_8, %c0_9, %c0_10] : memref<1x512x128xbf16, #tpu.memory_space<vmem>>, vector<1x512x128xbf16>
    %14 = vector.shape_cast %13 : vector<1x512x128xbf16> to vector<512x128xbf16>
    %15 = vector.shape_cast %12 : vector<512x128xbf16> to vector<1x512x128xbf16>
    tpu.vector_store %arg5[%c0_8, %c0_9, %c0_10], %15 {strides = array<i32>} : memref<1x512x128xbf16, #tpu.memory_space<vmem>>, vector<1x512x128xbf16>,
    return
  }
  func.func @transform_0(%arg0: i32, %arg1: i32) -> (i32, i32, i32) {
    %c0_i32 = arith.constant 0 : i32
    %c0_i32_0 = arith.constant 0 : i32
    return %arg0, %arg1, %c0_i32 : i32, i32, i32
  }
  func.func @transform_1(%arg0: i32, %arg1: i32) -> (i32, i32) {
    %c0_i32 = arith.constant 0 : i32
    %c0_i32_0 = arith.constant 0 : i32
    %c0_i32_1 = arith.constant 0 : i32
    return %c0_i32, %c0_i32_0 : i32, i32
  }
  func.func @transform_2(%arg0: i32, %arg1: i32) -> (i32, i32) {
    %c0_i32 = arith.constant 0 : i32
    %c0_i32_0 = arith.constant 0 : i32
    %c0_i32_1 = arith.constant 0 : i32
    return %c0_i32, %c0_i32_0 : i32, i32
  }
  func.func @transform_3(%arg0: i32, %arg1: i32) -> (i32, i32, i32) {
    %c0_i32 = arith.constant 0 : i32
    %c0_i32_0 = arith.constant 0 : i32
    return %arg0, %arg1, %c0_i32 : i32, i32, i32
  }
}

module attributes {stable_mosaic.version = 11 : i64} {
  func.func @_gemm_in_lrelu_kernel(%arg0: i32, %arg1: memref<1x256x2048xbf16, #tpu.memory_space<vmem>>, %arg2: memref<2048x128xbf16, #tpu.memory_space<vmem>>, %arg3: memref<1x256x128xbf16, #tpu.memory_space<vmem>>, %arg4: memref<256x128xf32, #tpu.memory_space<vmem>>) attributes {dimension_semantics = [#tpu.dimension_semantics<parallel>], iteration_bounds = array<i64: 2>, scalar_prefetch = 0 : i64, scratch_operands = 1 : i64, tpu.core_type = #tpu.core_type<tc>, window_params = [{transform_indices = @transform_0, window_bounds = array<i64: 1, 256, 2048>}, {pipeline_mode = #tpu.pipeline_mode<synchronous>, transform_indices = @transform_1, window_bounds = array<i64: 2048, 128>}, {transform_indices = @transform_2, window_bounds = array<i64: 1, 256, 128>}]} {
    %cst = arith.constant 0.000000e+00 : f32
    %0 = vector.broadcast %cst : f32 to vector<1x128xf32>
    %cst_0 = arith.constant 0.000000e+00 : f32
    %1 = vector.broadcast %cst_0 : f32 to vector<1x128xf32>
    %c0 = arith.constant 0 : index
    %c0_1 = arith.constant 0 : index
    %c0_2 = arith.constant 0 : index
    %2 = vector.load %arg1[%c0, %c0_1, %c0_2] : memref<1x256x2048xbf16, #tpu.memory_space<vmem>>, vector<1x256x2048xbf16>
    %3 = vector.shape_cast %2 : vector<1x256x2048xbf16> to vector<256x2048xbf16>
    %c0_3 = arith.constant 0 : index
    %c0_4 = arith.constant 0 : index
    %4 = vector.load %arg2[%c0_3, %c0_4] : memref<2048x128xbf16, #tpu.memory_space<vmem>>, vector<2048x128xbf16>
    %cst_5 = arith.constant dense<0.000000e+00> : vector<256x128xf32>
    %5 = tpu.matmul %3, %4, %cst_5 {dimension_numbers = #tpu.dot_dimension_numbers<[1], [0], [0], [1], [0, 0, 1, 1], [], []>} : vector<256x2048xbf16>, vector<2048x128xbf16>, vector<256x128xf32> -> vector<256x128xf32>
    %c0_6 = arith.constant 0 : index
    %c0_7 = arith.constant 0 : index
    %6 = vector.load %arg4[%c0_6, %c0_7] : memref<256x128xf32, #tpu.memory_space<vmem>>, vector<256x128xf32>
    tpu.vector_store %arg4[%c0_6, %c0_7], %5 {strides = array<i32>} : memref<256x128xf32, #tpu.memory_space<vmem>>, vector<256x128xf32>,
    %cst_8 = arith.constant dense<0.000000e+00> : vector<128xf32>
    %7 = vector.multi_reduction <add>, %5, %cst_8 [0] : vector<256x128xf32> to vector<128xf32>
    %8 = vector.shape_cast %7 : vector<128xf32> to vector<1x128xf32>
    %9 = arith.addf %0, %8 : vector<1x128xf32>
    %10 = arith.mulf %5, %5 : vector<256x128xf32>
    %cst_9 = arith.constant dense<0.000000e+00> : vector<128xf32>
    %11 = vector.multi_reduction <add>, %10, %cst_9 [0] : vector<256x128xf32> to vector<128xf32>
    %12 = vector.shape_cast %11 : vector<128xf32> to vector<1x128xf32>
    %13 = arith.addf %1, %12 : vector<1x128xf32>
    %cst_10 = arith.constant 3.906250e-03 : f32
    %14 = vector.broadcast %cst_10 : f32 to vector<1x128xf32>
    %15 = arith.mulf %9, %14 : vector<1x128xf32>
    %cst_11 = arith.constant 3.906250e-03 : f32
    %16 = vector.broadcast %cst_11 : f32 to vector<1x128xf32>
    %17 = arith.mulf %13, %16 : vector<1x128xf32>
    %18 = arith.mulf %15, %15 : vector<1x128xf32>
    %19 = arith.subf %17, %18 : vector<1x128xf32>
    %cst_12 = arith.constant 0.000000e+00 : f32
    %20 = vector.broadcast %cst_12 : f32 to vector<1x128xf32>
    %21 = arith.maximumf %19, %20 : vector<1x128xf32>
    %cst_13 = arith.constant 9.99999974E-6 : f32
    %22 = vector.broadcast %cst_13 : f32 to vector<1x128xf32>
    %23 = arith.addf %21, %22 : vector<1x128xf32>
    %24 = math.rsqrt %23 : vector<1x128xf32>
    %c0_14 = arith.constant 0 : index
    %c0_15 = arith.constant 0 : index
    %25 = vector.load %arg4[%c0_14, %c0_15] : memref<256x128xf32, #tpu.memory_space<vmem>>, vector<256x128xf32>
    %26 = vector.broadcast %15 : vector<1x128xf32> to vector<256x128xf32>
    %27 = arith.subf %25, %26 : vector<256x128xf32>
    %28 = vector.broadcast %24 : vector<1x128xf32> to vector<256x128xf32>
    %29 = arith.mulf %27, %28 : vector<256x128xf32>
    %cst_16 = arith.constant 0.000000e+00 : f32
    %30 = vector.broadcast %cst_16 : f32 to vector<256x128xf32>
    %31 = arith.cmpf oge, %29, %30 : vector<256x128xf32>
    %cst_17 = arith.constant 2.000000e-01 : f32
    %32 = vector.broadcast %cst_17 : f32 to vector<256x128xf32>
    %33 = arith.mulf %32, %29 : vector<256x128xf32>
    %34 = arith.select %31, %29, %33 : vector<256x128xi1>, vector<256x128xf32>
    %35 = arith.truncf %34 : vector<256x128xf32> to vector<256x128xbf16>
    %c0_18 = arith.constant 0 : index
    %c0_19 = arith.constant 0 : index
    %c0_20 = arith.constant 0 : index
    %36 = vector.load %arg3[%c0_18, %c0_19, %c0_20] : memref<1x256x128xbf16, #tpu.memory_space<vmem>>, vector<1x256x128xbf16>
    %37 = vector.shape_cast %36 : vector<1x256x128xbf16> to vector<256x128xbf16>
    %38 = vector.shape_cast %35 : vector<256x128xbf16> to vector<1x256x128xbf16>
    tpu.vector_store %arg3[%c0_18, %c0_19, %c0_20], %38 {strides = array<i32>} : memref<1x256x128xbf16, #tpu.memory_space<vmem>>, vector<1x256x128xbf16>,
    return
  }
  func.func @transform_0(%arg0: i32) -> (i32, i32, i32) {
    %c0_i32 = arith.constant 0 : i32
    %c0_i32_0 = arith.constant 0 : i32
    %c0_i32_1 = arith.constant 0 : i32
    return %arg0, %c0_i32, %c0_i32_0 : i32, i32, i32
  }
  func.func @transform_1(%arg0: i32) -> (i32, i32) {
    %c0_i32 = arith.constant 0 : i32
    %c0_i32_0 = arith.constant 0 : i32
    %c0_i32_1 = arith.constant 0 : i32
    return %c0_i32, %c0_i32_0 : i32, i32
  }
  func.func @transform_2(%arg0: i32) -> (i32, i32, i32) {
    %c0_i32 = arith.constant 0 : i32
    %c0_i32_0 = arith.constant 0 : i32
    %c0_i32_1 = arith.constant 0 : i32
    return %arg0, %c0_i32, %c0_i32_0 : i32, i32, i32
  }
}

module attributes {stable_mosaic.version = 11 : i64} {
  func.func @_gemm_in_lrelu_kernel(%arg0: i32, %arg1: memref<1x64x2048xbf16, #tpu.memory_space<vmem>>, %arg2: memref<2048x128xbf16, #tpu.memory_space<vmem>>, %arg3: memref<1x64x128xbf16, #tpu.memory_space<vmem>>, %arg4: memref<64x128xf32, #tpu.memory_space<vmem>>) attributes {dimension_semantics = [#tpu.dimension_semantics<parallel>], iteration_bounds = array<i64: 2>, scalar_prefetch = 0 : i64, scratch_operands = 1 : i64, tpu.core_type = #tpu.core_type<tc>, window_params = [{transform_indices = @transform_0, window_bounds = array<i64: 1, 64, 2048>}, {pipeline_mode = #tpu.pipeline_mode<synchronous>, transform_indices = @transform_1, window_bounds = array<i64: 2048, 128>}, {transform_indices = @transform_2, window_bounds = array<i64: 1, 64, 128>}]} {
    %cst = arith.constant 0.000000e+00 : f32
    %0 = vector.broadcast %cst : f32 to vector<1x128xf32>
    %cst_0 = arith.constant 0.000000e+00 : f32
    %1 = vector.broadcast %cst_0 : f32 to vector<1x128xf32>
    %c0 = arith.constant 0 : index
    %c0_1 = arith.constant 0 : index
    %c0_2 = arith.constant 0 : index
    %2 = vector.load %arg1[%c0, %c0_1, %c0_2] : memref<1x64x2048xbf16, #tpu.memory_space<vmem>>, vector<1x64x2048xbf16>
    %3 = vector.shape_cast %2 : vector<1x64x2048xbf16> to vector<64x2048xbf16>
    %c0_3 = arith.constant 0 : index
    %c0_4 = arith.constant 0 : index
    %4 = vector.load %arg2[%c0_3, %c0_4] : memref<2048x128xbf16, #tpu.memory_space<vmem>>, vector<2048x128xbf16>
    %cst_5 = arith.constant dense<0.000000e+00> : vector<64x128xf32>
    %5 = tpu.matmul %3, %4, %cst_5 {dimension_numbers = #tpu.dot_dimension_numbers<[1], [0], [0], [1], [0, 0, 1, 1], [], []>} : vector<64x2048xbf16>, vector<2048x128xbf16>, vector<64x128xf32> -> vector<64x128xf32>
    %c0_6 = arith.constant 0 : index
    %c0_7 = arith.constant 0 : index
    %6 = vector.load %arg4[%c0_6, %c0_7] : memref<64x128xf32, #tpu.memory_space<vmem>>, vector<64x128xf32>
    tpu.vector_store %arg4[%c0_6, %c0_7], %5 {strides = array<i32>} : memref<64x128xf32, #tpu.memory_space<vmem>>, vector<64x128xf32>,
    %cst_8 = arith.constant dense<0.000000e+00> : vector<128xf32>
    %7 = vector.multi_reduction <add>, %5, %cst_8 [0] : vector<64x128xf32> to vector<128xf32>
    %8 = vector.shape_cast %7 : vector<128xf32> to vector<1x128xf32>
    %9 = arith.addf %0, %8 : vector<1x128xf32>
    %10 = arith.mulf %5, %5 : vector<64x128xf32>
    %cst_9 = arith.constant dense<0.000000e+00> : vector<128xf32>
    %11 = vector.multi_reduction <add>, %10, %cst_9 [0] : vector<64x128xf32> to vector<128xf32>
    %12 = vector.shape_cast %11 : vector<128xf32> to vector<1x128xf32>
    %13 = arith.addf %1, %12 : vector<1x128xf32>
    %cst_10 = arith.constant 1.562500e-02 : f32
    %14 = vector.broadcast %cst_10 : f32 to vector<1x128xf32>
    %15 = arith.mulf %9, %14 : vector<1x128xf32>
    %cst_11 = arith.constant 1.562500e-02 : f32
    %16 = vector.broadcast %cst_11 : f32 to vector<1x128xf32>
    %17 = arith.mulf %13, %16 : vector<1x128xf32>
    %18 = arith.mulf %15, %15 : vector<1x128xf32>
    %19 = arith.subf %17, %18 : vector<1x128xf32>
    %cst_12 = arith.constant 0.000000e+00 : f32
    %20 = vector.broadcast %cst_12 : f32 to vector<1x128xf32>
    %21 = arith.maximumf %19, %20 : vector<1x128xf32>
    %cst_13 = arith.constant 9.99999974E-6 : f32
    %22 = vector.broadcast %cst_13 : f32 to vector<1x128xf32>
    %23 = arith.addf %21, %22 : vector<1x128xf32>
    %24 = math.rsqrt %23 : vector<1x128xf32>
    %c0_14 = arith.constant 0 : index
    %c0_15 = arith.constant 0 : index
    %25 = vector.load %arg4[%c0_14, %c0_15] : memref<64x128xf32, #tpu.memory_space<vmem>>, vector<64x128xf32>
    %26 = vector.broadcast %15 : vector<1x128xf32> to vector<64x128xf32>
    %27 = arith.subf %25, %26 : vector<64x128xf32>
    %28 = vector.broadcast %24 : vector<1x128xf32> to vector<64x128xf32>
    %29 = arith.mulf %27, %28 : vector<64x128xf32>
    %cst_16 = arith.constant 0.000000e+00 : f32
    %30 = vector.broadcast %cst_16 : f32 to vector<64x128xf32>
    %31 = arith.cmpf oge, %29, %30 : vector<64x128xf32>
    %cst_17 = arith.constant 2.000000e-01 : f32
    %32 = vector.broadcast %cst_17 : f32 to vector<64x128xf32>
    %33 = arith.mulf %32, %29 : vector<64x128xf32>
    %34 = arith.select %31, %29, %33 : vector<64x128xi1>, vector<64x128xf32>
    %35 = arith.truncf %34 : vector<64x128xf32> to vector<64x128xbf16>
    %c0_18 = arith.constant 0 : index
    %c0_19 = arith.constant 0 : index
    %c0_20 = arith.constant 0 : index
    %36 = vector.load %arg3[%c0_18, %c0_19, %c0_20] : memref<1x64x128xbf16, #tpu.memory_space<vmem>>, vector<1x64x128xbf16>
    %37 = vector.shape_cast %36 : vector<1x64x128xbf16> to vector<64x128xbf16>
    %38 = vector.shape_cast %35 : vector<64x128xbf16> to vector<1x64x128xbf16>
    tpu.vector_store %arg3[%c0_18, %c0_19, %c0_20], %38 {strides = array<i32>} : memref<1x64x128xbf16, #tpu.memory_space<vmem>>, vector<1x64x128xbf16>,
    return
  }
  func.func @transform_0(%arg0: i32) -> (i32, i32, i32) {
    %c0_i32 = arith.constant 0 : i32
    %c0_i32_0 = arith.constant 0 : i32
    %c0_i32_1 = arith.constant 0 : i32
    return %arg0, %c0_i32, %c0_i32_0 : i32, i32, i32
  }
  func.func @transform_1(%arg0: i32) -> (i32, i32) {
    %c0_i32 = arith.constant 0 : i32
    %c0_i32_0 = arith.constant 0 : i32
    %c0_i32_1 = arith.constant 0 : i32
    return %c0_i32, %c0_i32_0 : i32, i32
  }
  func.func @transform_2(%arg0: i32) -> (i32, i32, i32) {
    %c0_i32 = arith.constant 0 : i32
    %c0_i32_0 = arith.constant 0 : i32
    %c0_i32_1 = arith.constant 0 : i32
    return %arg0, %c0_i32, %c0_i32_0 : i32, i32, i32
  }
}

module attributes {stable_mosaic.version = 11 : i64} {
  func.func @_gemm_in_lrelu_kernel(%arg0: i32, %arg1: memref<1x16x2048xbf16, #tpu.memory_space<vmem>>, %arg2: memref<2048x128xbf16, #tpu.memory_space<vmem>>, %arg3: memref<1x16x128xbf16, #tpu.memory_space<vmem>>, %arg4: memref<16x128xf32, #tpu.memory_space<vmem>>) attributes {dimension_semantics = [#tpu.dimension_semantics<parallel>], iteration_bounds = array<i64: 2>, scalar_prefetch = 0 : i64, scratch_operands = 1 : i64, tpu.core_type = #tpu.core_type<tc>, window_params = [{transform_indices = @transform_0, window_bounds = array<i64: 1, 16, 2048>}, {pipeline_mode = #tpu.pipeline_mode<synchronous>, transform_indices = @transform_1, window_bounds = array<i64: 2048, 128>}, {transform_indices = @transform_2, window_bounds = array<i64: 1, 16, 128>}]} {
    %cst = arith.constant 0.000000e+00 : f32
    %0 = vector.broadcast %cst : f32 to vector<1x128xf32>
    %cst_0 = arith.constant 0.000000e+00 : f32
    %1 = vector.broadcast %cst_0 : f32 to vector<1x128xf32>
    %c0 = arith.constant 0 : index
    %c0_1 = arith.constant 0 : index
    %c0_2 = arith.constant 0 : index
    %2 = vector.load %arg1[%c0, %c0_1, %c0_2] : memref<1x16x2048xbf16, #tpu.memory_space<vmem>>, vector<1x16x2048xbf16>
    %3 = vector.shape_cast %2 : vector<1x16x2048xbf16> to vector<16x2048xbf16>
    %c0_3 = arith.constant 0 : index
    %c0_4 = arith.constant 0 : index
    %4 = vector.load %arg2[%c0_3, %c0_4] : memref<2048x128xbf16, #tpu.memory_space<vmem>>, vector<2048x128xbf16>
    %cst_5 = arith.constant dense<0.000000e+00> : vector<16x128xf32>
    %5 = tpu.matmul %3, %4, %cst_5 {dimension_numbers = #tpu.dot_dimension_numbers<[1], [0], [0], [1], [0, 0, 1, 1], [], []>} : vector<16x2048xbf16>, vector<2048x128xbf16>, vector<16x128xf32> -> vector<16x128xf32>
    %c0_6 = arith.constant 0 : index
    %c0_7 = arith.constant 0 : index
    %6 = vector.load %arg4[%c0_6, %c0_7] : memref<16x128xf32, #tpu.memory_space<vmem>>, vector<16x128xf32>
    tpu.vector_store %arg4[%c0_6, %c0_7], %5 {strides = array<i32>} : memref<16x128xf32, #tpu.memory_space<vmem>>, vector<16x128xf32>,
    %cst_8 = arith.constant dense<0.000000e+00> : vector<128xf32>
    %7 = vector.multi_reduction <add>, %5, %cst_8 [0] : vector<16x128xf32> to vector<128xf32>
    %8 = vector.shape_cast %7 : vector<128xf32> to vector<1x128xf32>
    %9 = arith.addf %0, %8 : vector<1x128xf32>
    %10 = arith.mulf %5, %5 : vector<16x128xf32>
    %cst_9 = arith.constant dense<0.000000e+00> : vector<128xf32>
    %11 = vector.multi_reduction <add>, %10, %cst_9 [0] : vector<16x128xf32> to vector<128xf32>
    %12 = vector.shape_cast %11 : vector<128xf32> to vector<1x128xf32>
    %13 = arith.addf %1, %12 : vector<1x128xf32>
    %cst_10 = arith.constant 6.250000e-02 : f32
    %14 = vector.broadcast %cst_10 : f32 to vector<1x128xf32>
    %15 = arith.mulf %9, %14 : vector<1x128xf32>
    %cst_11 = arith.constant 6.250000e-02 : f32
    %16 = vector.broadcast %cst_11 : f32 to vector<1x128xf32>
    %17 = arith.mulf %13, %16 : vector<1x128xf32>
    %18 = arith.mulf %15, %15 : vector<1x128xf32>
    %19 = arith.subf %17, %18 : vector<1x128xf32>
    %cst_12 = arith.constant 0.000000e+00 : f32
    %20 = vector.broadcast %cst_12 : f32 to vector<1x128xf32>
    %21 = arith.maximumf %19, %20 : vector<1x128xf32>
    %cst_13 = arith.constant 9.99999974E-6 : f32
    %22 = vector.broadcast %cst_13 : f32 to vector<1x128xf32>
    %23 = arith.addf %21, %22 : vector<1x128xf32>
    %24 = math.rsqrt %23 : vector<1x128xf32>
    %c0_14 = arith.constant 0 : index
    %c0_15 = arith.constant 0 : index
    %25 = vector.load %arg4[%c0_14, %c0_15] : memref<16x128xf32, #tpu.memory_space<vmem>>, vector<16x128xf32>
    %26 = vector.broadcast %15 : vector<1x128xf32> to vector<16x128xf32>
    %27 = arith.subf %25, %26 : vector<16x128xf32>
    %28 = vector.broadcast %24 : vector<1x128xf32> to vector<16x128xf32>
    %29 = arith.mulf %27, %28 : vector<16x128xf32>
    %cst_16 = arith.constant 0.000000e+00 : f32
    %30 = vector.broadcast %cst_16 : f32 to vector<16x128xf32>
    %31 = arith.cmpf oge, %29, %30 : vector<16x128xf32>
    %cst_17 = arith.constant 2.000000e-01 : f32
    %32 = vector.broadcast %cst_17 : f32 to vector<16x128xf32>
    %33 = arith.mulf %32, %29 : vector<16x128xf32>
    %34 = arith.select %31, %29, %33 : vector<16x128xi1>, vector<16x128xf32>
    %35 = arith.truncf %34 : vector<16x128xf32> to vector<16x128xbf16>
    %c0_18 = arith.constant 0 : index
    %c0_19 = arith.constant 0 : index
    %c0_20 = arith.constant 0 : index
    %36 = vector.load %arg3[%c0_18, %c0_19, %c0_20] : memref<1x16x128xbf16, #tpu.memory_space<vmem>>, vector<1x16x128xbf16>
    %37 = vector.shape_cast %36 : vector<1x16x128xbf16> to vector<16x128xbf16>
    %38 = vector.shape_cast %35 : vector<16x128xbf16> to vector<1x16x128xbf16>
    tpu.vector_store %arg3[%c0_18, %c0_19, %c0_20], %38 {strides = array<i32>} : memref<1x16x128xbf16, #tpu.memory_space<vmem>>, vector<1x16x128xbf16>,
    return
  }
  func.func @transform_0(%arg0: i32) -> (i32, i32, i32) {
    %c0_i32 = arith.constant 0 : i32
    %c0_i32_0 = arith.constant 0 : i32
    %c0_i32_1 = arith.constant 0 : i32
    return %arg0, %c0_i32, %c0_i32_0 : i32, i32, i32
  }
  func.func @transform_1(%arg0: i32) -> (i32, i32) {
    %c0_i32 = arith.constant 0 : i32
    %c0_i32_0 = arith.constant 0 : i32
    %c0_i32_1 = arith.constant 0 : i32
    return %c0_i32, %c0_i32_0 : i32, i32
  }
  func.func @transform_2(%arg0: i32) -> (i32, i32, i32) {
    %c0_i32 = arith.constant 0 : i32
    %c0_i32_0 = arith.constant 0 : i32
    %c0_i32_1 = arith.constant 0 : i32
    return %arg0, %c0_i32, %c0_i32_0 : i32, i32, i32
  }
}

module attributes {stable_mosaic.version = 11 : i64} {
  func.func @_gemm_bias_act_kernel(%arg0: i32, %arg1: memref<2x2048xbf16, #tpu.memory_space<vmem>>, %arg2: memref<2048x128xbf16, #tpu.memory_space<vmem>>, %arg3: memref<1x128xf32, #tpu.memory_space<vmem>>, %arg4: memref<2x128xf32, #tpu.memory_space<vmem>>) attributes {dimension_semantics = [#tpu.dimension_semantics<arbitrary>], iteration_bounds = array<i64: 1>, scalar_prefetch = 0 : i64, scratch_operands = 0 : i64, tpu.core_type = #tpu.core_type<tc>, window_params = [{pipeline_mode = #tpu.pipeline_mode<synchronous>, transform_indices = @transform_0, window_bounds = array<i64: 2, 2048>}, {pipeline_mode = #tpu.pipeline_mode<synchronous>, transform_indices = @transform_1, window_bounds = array<i64: 2048, 128>}, {pipeline_mode = #tpu.pipeline_mode<synchronous>, transform_indices = @transform_2, window_bounds = array<i64: 1, 128>}, {pipeline_mode = #tpu.pipeline_mode<synchronous>, transform_indices = @transform_3, window_bounds = array<i64: 2, 128>}]} {
    %c0 = arith.constant 0 : index
    %c0_0 = arith.constant 0 : index
    %0 = vector.load %arg1[%c0, %c0_0] : memref<2x2048xbf16, #tpu.memory_space<vmem>>, vector<2x2048xbf16>
    %c0_1 = arith.constant 0 : index
    %c0_2 = arith.constant 0 : index
    %1 = vector.load %arg2[%c0_1, %c0_2] : memref<2048x128xbf16, #tpu.memory_space<vmem>>, vector<2048x128xbf16>
    %cst = arith.constant dense<0.000000e+00> : vector<2x128xf32>
    %2 = tpu.matmul %0, %1, %cst {dimension_numbers = #tpu.dot_dimension_numbers<[1], [0], [0], [1], [0, 0, 1, 1], [], []>} : vector<2x2048xbf16>, vector<2048x128xbf16>, vector<2x128xf32> -> vector<2x128xf32>
    %c0_3 = arith.constant 0 : index
    %c0_4 = arith.constant 0 : index
    %3 = vector.load %arg3[%c0_3, %c0_4] : memref<1x128xf32, #tpu.memory_space<vmem>>, vector<1x128xf32>
    %4 = vector.broadcast %3 : vector<1x128xf32> to vector<2x128xf32>
    %5 = arith.addf %2, %4 : vector<2x128xf32>
    %c0_5 = arith.constant 0 : index
    %c0_6 = arith.constant 0 : index
    %6 = vector.load %arg4[%c0_5, %c0_6] : memref<2x128xf32, #tpu.memory_space<vmem>>, vector<2x128xf32>
    tpu.vector_store %arg4[%c0_5, %c0_6], %5 {strides = array<i32>} : memref<2x128xf32, #tpu.memory_space<vmem>>, vector<2x128xf32>,
    return
  }
  func.func @transform_0(%arg0: i32) -> (i32, i32) {
    %c0_i32 = arith.constant 0 : i32
    %c0_i32_0 = arith.constant 0 : i32
    %c0_i32_1 = arith.constant 0 : i32
    return %c0_i32, %c0_i32_0 : i32, i32
  }
  func.func @transform_1(%arg0: i32) -> (i32, i32) {
    %c0_i32 = arith.constant 0 : i32
    %c0_i32_0 = arith.constant 0 : i32
    %c0_i32_1 = arith.constant 0 : i32
    return %c0_i32, %c0_i32_0 : i32, i32
  }
  func.func @transform_2(%arg0: i32) -> (i32, i32) {
    %c0_i32 = arith.constant 0 : i32
    %c0_i32_0 = arith.constant 0 : i32
    %c0_i32_1 = arith.constant 0 : i32
    return %c0_i32, %c0_i32_0 : i32, i32
  }
  func.func @transform_3(%arg0: i32) -> (i32, i32) {
    %c0_i32 = arith.constant 0 : i32
    %c0_i32_0 = arith.constant 0 : i32
    %c0_i32_1 = arith.constant 0 : i32
    return %c0_i32, %c0_i32_0 : i32, i32
  }
}

</mosaic_0001>

<bundles_post_ra>
// kernel: _lambda_.5
= control target key start
LH: loop header
LB: loop body
LE: loop exit
PB: predicated region body
PF: predicated region fallthrough
CT: control target
= control target key end

     0   :  { %s1642_s12 = smov 0   ;;  %s1644_s13 = smov 0   ;;  %s1868_s0 = inlined_call_operand.vmem [shape: bf16[2,1024,128], index: 0, kind: input, shape index: {}]   ;;  %s1869_s1 = inlined_call_operand.vmem [shape: bf16[128,128], index: 1, kind: input, shape index: {}]   ;;  %s1870_s2 = inlined_call_operand.vmem [shape: f32[1,128], index: 2, kind: input, shape index: {}]   ;;  %s1871_s3 = inlined_call_operand.vmem [shape: bf16[2,1024,128], index: 3, kind: output, shape index: {}]  }
   0x1   :  { %s1646_s14 = smov 0   ;;  %s1648_s15 = smov 0  }
   0x2   :  { %s1650_s16 = smov 0  }
   0x3 LB: > { %s22_s17 = sadd.s32 1, %s1612_s14  ;;  %s25_s18 = sadd.s32 1, %s1616_s15  ;;  %s1620_s16 = sphi %s1650_s16, %s13_s16   ;;  %s1616_s15 = sphi %s1648_s15, %s1875_s15   ;;  %s1612_s14 = sphi %s1646_s14, %s1874_s14   ;;  %s1608_s13 = sphi %s1644_s13, %s1873_s13   ;;  %s1604_s12 = sphi %s1642_s12, %s1872_s12  }
   0x4   : > { %p23_p0 = scmp.ge.s32.totalorder %s22_s17, 2  ;;  %p1117_p1 = scmp.ge.s32.totalorder %s1620_s16, 1 }
   0x5   : > { %p158_p2 = scmp.lt.s32.totalorder %s1620_s16, 5 }
   0x6   : > { %s1877_s17 = smov (%p23_p0, %s22_s17), 0  ;;  %s1879_s18 = smov (!%p23_p0, %s25_s18), %s1616_s15 }
   0x7   : > { %p159_p3 = pnand %p1117_p1, %p158_p2  ;;  %p27_p4 = scmp.ge.s32.totalorder %s1879_s18, 2 }
   0x8   : > { %s1118_s25 = sshll.u32 (!%p159_p3), %s1604_s12, 6  ;;  %p191_p5 = scmp.lt.s32.totalorder (!%p159_p3), %s1608_s13, 1 }
   0x9   : > { %s1881_s18 = smov (%p27_p4, %s1879_s18), 0  ;;  %162 = sbr.rel (%p159_p3) target bundleno = 308 (0x134), region = 32 }
   0xa   : > { %p193_p6 = scmp.lt.s32.totalorder (!%p159_p3), %s1118_s25, 127 }
   0xe   : > { %v1325_v0 = vld [vmem:[%s1869_s1 + $0x38] sm:$0xff]  ;;  %v1324_v1 = vld [vmem:[%s1869_s1 + $0x30] sm:$0xff]  ;;  %v1323_v2 = vld [vmem:[%s1869_s1 + $0x28] sm:$0xff]  ;;  %s1883_s13 = smov (!%p191_p5, %s1608_s13), 1  ;;  %s1885_s25 = smov (!%p193_p6, %s1118_s25), 127 }
   0xf   : > { %534 = vmatpush.bf16.msra.mxu0 %v1325_v0  ;;  %1517 = vmatpush.bf16.msra.mxu1 %v1325_v0  ;;  %v1322_v3 = vld [vmem:[%s1869_s1 + $0x20] sm:$0xff]  ;;  %v1321_v4 = vld [vmem:[%s1869_s1 + $0x18] sm:$0xff]  ;;  %s1119_s30 = sshll.u32 %s1883_s13, 7  ;;  %v1320_v5 = vld [vmem:[%s1869_s1 + $0x10] sm:$0xff] }
  0x10   : > { %1518 = vmatpush.bf16.msra.mxu2 %v1325_v0  ;;  %1519 = vmatpush.bf16.msra.mxu3 %v1325_v0  ;;  %s1697_s6 = sadd.s32 %s1119_s30, %s1885_s25  ;;  %v1319_v6 = vld [vmem:[%s1869_s1 + $0x8] sm:$0xff]  ;;  %v1318_v7 = vld [vmem:[%s1869_s1] sm:$0xff] }
  0x11   : > { %s1120_s9 = sshll.u32 %s1697_s6, 2  ;;  %v1748_v42 = vld [vmem:[%s1870_s2] ss:$0 sm:$0xff] }
  0x12   : > { %s1711_s19 = scalar_lea.vmem %s1868_s0, %s1120_s9  ;;  %s1761_s24 = scalar_lea.vmem %s1871_s3, %s1120_s9 }
  0x13   : > { %535 = vmatpush.bf16.msra.mxu0 %v1324_v1  ;;  %1520 = vmatpush.bf16.msra.mxu1 %v1324_v1  ;;  %v1286_v8 = vld [vmem:[%s1711_s19] sm:$0xff]  ;;  %v1287_v12 = vld [vmem:[%s1711_s19 + $0x8] sm:$0xff]  ;;  %v1288_v16 = vld [vmem:[%s1711_s19 + $0x10] sm:$0xff] }
  0x14   : > { %1521 = vmatpush.bf16.msra.mxu2 %v1324_v1  ;;  %1522 = vmatpush.bf16.msra.mxu3 %v1324_v1  ;;  %v1294_v9 = vld [vmem:[%s1711_s19 + $0x40] sm:$0xff]  ;;  %v1295_v13 = vld [vmem:[%s1711_s19 + $0x48] sm:$0xff]  ;;  %v1296_v17 = vld [vmem:[%s1711_s19 + $0x50] sm:$0xff] }
  0x15   : > { %v1302_v10 = vld [vmem:[%s1711_s19 + $0x80] sm:$0xff]  ;;  %v1303_v14 = vld [vmem:[%s1711_s19 + $0x88] sm:$0xff]  ;;  %v1304_v18 = vld [vmem:[%s1711_s19 + $0x90] sm:$0xff] }
  0x16   : > { %v1310_v11 = vld [vmem:[%s1711_s19 + $0xc0] sm:$0xff]  ;;  %v1311_v15 = vld [vmem:[%s1711_s19 + $0xc8] sm:$0xff]  ;;  %v1312_v19 = vld [vmem:[%s1711_s19 + $0xd0] sm:$0xff] }
  0x17   : > { %536 = vmatpush.bf16.msra.mxu0 %v1323_v2  ;;  %1523 = vmatpush.bf16.msra.mxu1 %v1323_v2  ;;  %v1289_v20 = vld [vmem:[%s1711_s19 + $0x18] sm:$0xff]  ;;  %v1290_v24 = vld [vmem:[%s1711_s19 + $0x20] sm:$0xff]  ;;  %v1291_v28 = vld [vmem:[%s1711_s19 + $0x28] sm:$0xff] }
  0x18   : > { %1524 = vmatpush.bf16.msra.mxu2 %v1323_v2  ;;  %1525 = vmatpush.bf16.msra.mxu3 %v1323_v2  ;;  %v1297_v21 = vld [vmem:[%s1711_s19 + $0x58] sm:$0xff]  ;;  %v1298_v25 = vld [vmem:[%s1711_s19 + $0x60] sm:$0xff]  ;;  %v1299_v29 = vld [vmem:[%s1711_s19 + $0x68] sm:$0xff] }
  0x19   : > { %v1305_v22 = vld [vmem:[%s1711_s19 + $0x98] sm:$0xff]  ;;  %v1306_v26 = vld [vmem:[%s1711_s19 + $0xa0] sm:$0xff]  ;;  %v1307_v30 = vld [vmem:[%s1711_s19 + $0xa8] sm:$0xff] }
  0x1a   : > { %v1313_v23 = vld [vmem:[%s1711_s19 + $0xd8] sm:$0xff]  ;;  %v1314_v27 = vld [vmem:[%s1711_s19 + $0xe0] sm:$0xff]  ;;  %v1315_v31 = vld [vmem:[%s1711_s19 + $0xe8] sm:$0xff] }
  0x1b   : > { %537 = vmatpush.bf16.msra.mxu0 %v1322_v3  ;;  %1526 = vmatpush.bf16.msra.mxu1 %v1322_v3  ;;  %v1292_v32 = vld [vmem:[%s1711_s19 + $0x30] sm:$0xff]  ;;  %v1293_v36 = vld [vmem:[%s1711_s19 + $0x38] sm:$0xff] }
  0x1c   : > { %1527 = vmatpush.bf16.msra.mxu2 %v1322_v3  ;;  %1528 = vmatpush.bf16.msra.mxu3 %v1322_v3  ;;  %v1300_v33 = vld [vmem:[%s1711_s19 + $0x70] sm:$0xff]  ;;  %v1301_v37 = vld [vmem:[%s1711_s19 + $0x78] sm:$0xff] }
  0x1d   : > { %v1308_v34 = vld [vmem:[%s1711_s19 + $0xb0] sm:$0xff]  ;;  %v1309_v38 = vld [vmem:[%s1711_s19 + $0xb8] sm:$0xff] }
  0x1e   : > { %v1316_v35 = vld [vmem:[%s1711_s19 + $0xf0] sm:$0xff]  ;;  %v1317_v39 = vld [vmem:[%s1711_s19 + $0xf8] sm:$0xff] }
  0x1f   : > { %538 = vmatpush.bf16.msra.mxu0 %v1321_v4  ;;  %1529 = vmatpush.bf16.msra.mxu1 %v1321_v4 }
  0x20   : > { %1530 = vmatpush.bf16.msra.mxu2 %v1321_v4  ;;  %1531 = vmatpush.bf16.msra.mxu3 %v1321_v4 }
  0x23   : > { %539 = vmatpush.bf16.msra.mxu0 %v1320_v5  ;;  %1532 = vmatpush.bf16.msra.mxu1 %v1320_v5 }
  0x24   : > { %1533 = vmatpush.bf16.msra.mxu2 %v1320_v5  ;;  %1534 = vmatpush.bf16.msra.mxu3 %v1320_v5 }
  0x27   : > { %540 = vmatpush.bf16.msra.mxu0 %v1319_v6  ;;  %1535 = vmatpush.bf16.msra.mxu1 %v1319_v6 }
  0x28   : > { %1536 = vmatpush.bf16.msra.mxu2 %v1319_v6  ;;  %1537 = vmatpush.bf16.msra.mxu3 %v1319_v6 }
  0x2b   : > { %541 = vmatpush.bf16.msra.mxu0 %v1318_v7  ;;  %1538 = vmatpush.bf16.msra.mxu1 %v1318_v7 }
  0x2c   : > { %1539 = vmatpush.bf16.msra.mxu2 %v1318_v7  ;;  %1540 = vmatpush.bf16.msra.mxu3 %v1318_v7 }
  0x2e   : > { %542 = vmatmul.bf16.vlgmr.msra.gmra.mxu0 %v1286_v8  ;;  %582 = vmatmul.bf16.vlgmr.msra.gmra.mxu1 %v1294_v9 }
  0x2f   : > { %622 = vmatmul.bf16.vlgmr.msra.gmra.mxu2 %v1302_v10  ;;  %662 = vmatmul.bf16.vlgmr.msra.gmra.mxu3 %v1310_v11 }
  0x3e   : > { %547 = vmatmul.bf16.gmra.mxu0 %v1287_v12  ;;  %587 = vmatmul.bf16.gmra.mxu1 %v1295_v13 }
  0x3f   : > { %627 = vmatmul.bf16.gmra.mxu2 %v1303_v14  ;;  %667 = vmatmul.bf16.gmra.mxu3 %v1311_v15 }
  0x4e   : > { %552 = vmatmul.bf16.gmra.mxu0 %v1288_v16  ;;  %592 = vmatmul.bf16.gmra.mxu1 %v1296_v17 }
  0x4f   : > { %632 = vmatmul.bf16.gmra.mxu2 %v1304_v18  ;;  %672 = vmatmul.bf16.gmra.mxu3 %v1312_v19 }
  0x5e   : > { %557 = vmatmul.bf16.gmra.mxu0 %v1289_v20  ;;  %597 = vmatmul.bf16.gmra.mxu1 %v1297_v21 }
  0x5f   : > { %637 = vmatmul.bf16.gmra.mxu2 %v1305_v22  ;;  %677 = vmatmul.bf16.gmra.mxu3 %v1313_v23 }
  0x6e   : > { %562 = vmatmul.bf16.gmra.mxu0 %v1290_v24  ;;  %602 = vmatmul.bf16.gmra.mxu1 %v1298_v25 }
  0x6f   : > { %642 = vmatmul.bf16.gmra.mxu2 %v1306_v26  ;;  %682 = vmatmul.bf16.gmra.mxu3 %v1314_v27 }
  0x7e   : > { %567 = vmatmul.bf16.gmra.mxu0 %v1291_v28  ;;  %607 = vmatmul.bf16.gmra.mxu1 %v1299_v29 }
  0x7f   : > { %647 = vmatmul.bf16.gmra.mxu2 %v1307_v30  ;;  %687 = vmatmul.bf16.gmra.mxu3 %v1315_v31 }
  0x8e   : > { %572 = vmatmul.bf16.gmra.mxu0 %v1292_v32  ;;  %612 = vmatmul.bf16.gmra.mxu1 %v1300_v33 }
  0x8f   : > { %652 = vmatmul.bf16.gmra.mxu2 %v1308_v34  ;;  %692 = vmatmul.bf16.gmra.mxu3 %v1316_v35 }
  0x9e   : > { %577 = vmatmul.bf16.gmra.mxu0 %v1293_v36  ;;  %617 = vmatmul.bf16.gmra.mxu1 %v1301_v37 }
  0x9f   : > { %657 = vmatmul.bf16.gmra.mxu2 %v1309_v38  ;;  %697 = vmatmul.bf16.gmra.mxu3 %v1317_v39 }
  0xab   : > { %v543_v40 = vpop.f32.mrf.mxu0  ;;  %v583_v41 = vpop.f32.mrf.mxu1 }
  0xac   : > { %v544_v43 = vadd.f32 %v1748_v42, %v543_v40  ;;  %v584_v44 = vadd.f32 %v1748_v42, %v583_v41 }
  0xae   : > { %v767_v49 = vmul.f32 0.2, %v544_v43  ;;  %v783_v50 = vmul.f32 0.2, %v584_v44  ;;  %vm703_vm0 = vcmp.ge.f32.partialorder %v544_v43, 0.0  ;;  %vm719_vm1 = vcmp.ge.f32.partialorder %v584_v44, 0.0 }
  0xb0   : > { %v831_v57 = vsel %vm703_vm0, %v544_v43, %v767_v49  ;;  %v847_v58 = vsel %vm719_vm1, %v584_v44, %v783_v50 }
  0xb2   : > { %v623_v45 = vpop.f32.mrf.mxu2  ;;  %v663_v46 = vpop.f32.mrf.mxu3 }
  0xb3   : > { %v545_v47 = vpop.f32.mrf.mxu0  ;;  %v585_v48 = vpop.f32.mrf.mxu1  ;;  %v624_v55 = vadd.f32 %v1748_v42, %v623_v45  ;;  %v664_v56 = vadd.f32 %v1748_v42, %v663_v46 }
  0xb4   : > { %v546_v51 = vadd.f32 %v1748_v42, %v545_v47  ;;  %v586_v52 = vadd.f32 %v1748_v42, %v585_v48 }
  0xb5   : > { %v799_v1 = vmul.f32 0.2, %v624_v55  ;;  %v815_v2 = vmul.f32 0.2, %v664_v56  ;;  %vm735_vm4 = vcmp.ge.f32.partialorder %v624_v55, 0.0  ;;  %vm751_vm5 = vcmp.ge.f32.partialorder %v664_v56, 0.0 }
  0xb6   : > { %vm704_vm2 = vcmp.ge.f32.partialorder %v546_v51, 0.0  ;;  %v768_v53 = vmul.f32 0.2, %v546_v51  ;;  %vm720_vm3 = vcmp.ge.f32.partialorder %v586_v52, 0.0  ;;  %v784_v54 = vmul.f32 0.2, %v586_v52 }
  0xb7   : > { %v863_v9 = vsel %vm735_vm4, %v624_v55, %v799_v1  ;;  %v879_v10 = vsel %vm751_vm5, %v664_v56, %v815_v2 }
  0xb8   : > { %v832_v59 = vsel %vm704_vm2, %v546_v51, %v768_v53  ;;  %v848_v60 = vsel %vm720_vm3, %v586_v52, %v784_v54 }
  0xb9   : > { %v1329_v61 = vpack.c.bf16 %v832_v59, %v831_v57  ;;  %v1369_v62 = vpack.c.bf16 %v848_v60, %v847_v58 }
  0xba   : > { %v625_v63 = vpop.f32.mrf.mxu2  ;;  %v665_v0 = vpop.f32.mrf.mxu3 }
  0xbb   : > { %1330 = vst [vmem:[%s1761_s24] sm:$0xff] %v1329_v61   ;;  %v626_v3 = vadd.f32 %v1748_v42, %v625_v63  ;;  %v666_v4 = vadd.f32 %v1748_v42, %v665_v0  ;;  %v548_v5 = vpop.f32.mrf.mxu0  ;;  %v588_v6 = vpop.f32.mrf.mxu1 }
  0xbc   : > { %1493 = vst [vmem:[%s1761_s24 + $0x40] sm:$0xff] %v1369_v62   ;;  %v549_v15 = vadd.f32 %v1748_v42, %v548_v5  ;;  %v589_v16 = vadd.f32 %v1748_v42, %v588_v6 }
  0xbd   : > { %vm736_vm6 = vcmp.ge.f32.partialorder %v626_v3, 0.0  ;;  %v800_v7 = vmul.f32 0.2, %v626_v3  ;;  %vm752_vm7 = vcmp.ge.f32.partialorder %v666_v4, 0.0  ;;  %v816_v8 = vmul.f32 0.2, %v666_v4 }
  0xbe   : > { %v769_v21 = vmul.f32 0.2, %v549_v15  ;;  %v785_v22 = vmul.f32 0.2, %v589_v16  ;;  %vm705_vm8 = vcmp.ge.f32.partialorder %v549_v15, 0.0  ;;  %vm721_vm9 = vcmp.ge.f32.partialorder %v589_v16, 0.0 }
  0xbf   : > { %v864_v11 = vsel %vm736_vm6, %v626_v3, %v800_v7  ;;  %v880_v12 = vsel %vm752_vm7, %v666_v4, %v816_v8 }
  0xc0   : > { %v1409_v13 = vpack.c.bf16 %v864_v11, %v863_v9  ;;  %v1449_v14 = vpack.c.bf16 %v880_v12, %v879_v10  ;;  %v833_v29 = vsel %vm705_vm8, %v549_v15, %v769_v21  ;;  %v849_v30 = vsel %vm721_vm9, %v589_v16, %v785_v22 }
  0xc2   : > { %1501 = vst [vmem:[%s1761_s24 + $0x80] sm:$0xff] %v1409_v13   ;;  %v628_v17 = vpop.f32.mrf.mxu2  ;;  %v668_v18 = vpop.f32.mrf.mxu3 }
  0xc3   : > { %1509 = vst [vmem:[%s1761_s24 + $0xc0] sm:$0xff] %v1449_v14   ;;  %v550_v19 = vpop.f32.mrf.mxu0  ;;  %v590_v20 = vpop.f32.mrf.mxu1  ;;  %v629_v27 = vadd.f32 %v1748_v42, %v628_v17  ;;  %v669_v28 = vadd.f32 %v1748_v42, %v668_v18 }
  0xc4   : > { %v551_v23 = vadd.f32 %v1748_v42, %v550_v19  ;;  %v591_v24 = vadd.f32 %v1748_v42, %v590_v20 }
  0xc5   : > { %v801_v37 = vmul.f32 0.2, %v629_v27  ;;  %v817_v38 = vmul.f32 0.2, %v669_v28  ;;  %vm737_vm12 = vcmp.ge.f32.partialorder %v629_v27, 0.0  ;;  %vm753_vm13 = vcmp.ge.f32.partialorder %v669_v28, 0.0 }
  0xc6   : > { %vm706_vm10 = vcmp.ge.f32.partialorder %v551_v23, 0.0  ;;  %v770_v25 = vmul.f32 0.2, %v551_v23  ;;  %vm722_vm11 = vcmp.ge.f32.partialorder %v591_v24, 0.0  ;;  %v786_v26 = vmul.f32 0.2, %v591_v24 }
  0xc7   : > { %v865_v46 = vsel %vm737_vm12, %v629_v27, %v801_v37  ;;  %v881_v47 = vsel %vm753_vm13, %v669_v28, %v817_v38 }
  0xc8   : > { %v834_v31 = vsel %vm706_vm10, %v551_v23, %v770_v25  ;;  %v850_v32 = vsel %vm722_vm11, %v591_v24, %v786_v26 }
  0xc9   : > { %v1334_v33 = vpack.c.bf16 %v834_v31, %v833_v29  ;;  %v1374_v34 = vpack.c.bf16 %v850_v32, %v849_v30 }
  0xca   : > { %v630_v35 = vpop.f32.mrf.mxu2  ;;  %v670_v36 = vpop.f32.mrf.mxu3 }
  0xcb   : > { %1486 = vst [vmem:[%s1761_s24 + $0x8] sm:$0xff] %v1334_v33   ;;  %v631_v39 = vadd.f32 %v1748_v42, %v630_v35  ;;  %v671_v40 = vadd.f32 %v1748_v42, %v670_v36  ;;  %v553_v41 = vpop.f32.mrf.mxu0  ;;  %v593_v43 = vpop.f32.mrf.mxu1 }
  0xcc   : > { %1494 = vst [vmem:[%s1761_s24 + $0x48] sm:$0xff] %v1374_v34   ;;  %v554_v52 = vadd.f32 %v1748_v42, %v553_v41  ;;  %v594_v53 = vadd.f32 %v1748_v42, %v593_v43 }
  0xcd   : > { %vm738_vm14 = vcmp.ge.f32.partialorder %v631_v39, 0.0  ;;  %v802_v44 = vmul.f32 0.2, %v631_v39  ;;  %vm754_vm15 = vcmp.ge.f32.partialorder %v671_v40, 0.0  ;;  %v818_v45 = vmul.f32 0.2, %v671_v40 }
  0xce   : > { %v771_v58 = vmul.f32 0.2, %v554_v52  ;;  %v787_v59 = vmul.f32 0.2, %v594_v53  ;;  %vm707_vm0 = vcmp.ge.f32.partialorder %v554_v52, 0.0  ;;  %vm723_vm1 = vcmp.ge.f32.partialorder %v594_v53, 0.0 }
  0xcf   : > { %v866_v48 = vsel %vm738_vm14, %v631_v39, %v802_v44  ;;  %v882_v49 = vsel %vm754_vm15, %v671_v40, %v818_v45 }
  0xd0   : > { %v1414_v50 = vpack.c.bf16 %v866_v48, %v865_v46  ;;  %v1454_v51 = vpack.c.bf16 %v882_v49, %v881_v47  ;;  %v835_v2 = vsel %vm707_vm0, %v554_v52, %v771_v58  ;;  %v851_v3 = vsel %vm723_vm1, %v594_v53, %v787_v59 }
  0xd2   : > { %1502 = vst [vmem:[%s1761_s24 + $0x88] sm:$0xff] %v1414_v50   ;;  %v633_v54 = vpop.f32.mrf.mxu2  ;;  %v673_v55 = vpop.f32.mrf.mxu3 }
  0xd3   : > { %1510 = vst [vmem:[%s1761_s24 + $0xc8] sm:$0xff] %v1454_v51   ;;  %v555_v56 = vpop.f32.mrf.mxu0  ;;  %v595_v57 = vpop.f32.mrf.mxu1  ;;  %v634_v0 = vadd.f32 %v1748_v42, %v633_v54  ;;  %v674_v1 = vadd.f32 %v1748_v42, %v673_v55 }
  0xd4   : > { %v556_v60 = vadd.f32 %v1748_v42, %v555_v56  ;;  %v596_v61 = vadd.f32 %v1748_v42, %v595_v57 }
  0xd5   : > { %v803_v10 = vmul.f32 0.2, %v634_v0  ;;  %v819_v11 = vmul.f32 0.2, %v674_v1  ;;  %vm739_vm4 = vcmp.ge.f32.partialorder %v634_v0, 0.0  ;;  %vm755_vm5 = vcmp.ge.f32.partialorder %v674_v1, 0.0 }
  0xd6   : > { %vm708_vm2 = vcmp.ge.f32.partialorder %v556_v60, 0.0  ;;  %v772_v62 = vmul.f32 0.2, %v556_v60  ;;  %vm724_vm3 = vcmp.ge.f32.partialorder %v596_v61, 0.0  ;;  %v788_v63 = vmul.f32 0.2, %v596_v61 }
  0xd7   : > { %v867_v18 = vsel %vm739_vm4, %v634_v0, %v803_v10  ;;  %v883_v19 = vsel %vm755_vm5, %v674_v1, %v819_v11 }
  0xd8   : > { %v836_v4 = vsel %vm708_vm2, %v556_v60, %v772_v62  ;;  %v852_v5 = vsel %vm724_vm3, %v596_v61, %v788_v63 }
  0xd9   : > { %v1339_v6 = vpack.c.bf16 %v836_v4, %v835_v2  ;;  %v1379_v7 = vpack.c.bf16 %v852_v5, %v851_v3 }
  0xda   : > { %v635_v8 = vpop.f32.mrf.mxu2  ;;  %v675_v9 = vpop.f32.mrf.mxu3 }
  0xdb   : > { %1487 = vst [vmem:[%s1761_s24 + $0x10] sm:$0xff] %v1339_v6   ;;  %v636_v12 = vadd.f32 %v1748_v42, %v635_v8  ;;  %v676_v13 = vadd.f32 %v1748_v42, %v675_v9  ;;  %v558_v14 = vpop.f32.mrf.mxu0  ;;  %v598_v15 = vpop.f32.mrf.mxu1 }
  0xdc   : > { %1495 = vst [vmem:[%s1761_s24 + $0x50] sm:$0xff] %v1379_v7   ;;  %v559_v24 = vadd.f32 %v1748_v42, %v558_v14  ;;  %v599_v25 = vadd.f32 %v1748_v42, %v598_v15 }
  0xdd   : > { %vm740_vm6 = vcmp.ge.f32.partialorder %v636_v12, 0.0  ;;  %v804_v16 = vmul.f32 0.2, %v636_v12  ;;  %vm756_vm7 = vcmp.ge.f32.partialorder %v676_v13, 0.0  ;;  %v820_v17 = vmul.f32 0.2, %v676_v13 }
  0xde   : > { %v773_v30 = vmul.f32 0.2, %v559_v24  ;;  %v789_v31 = vmul.f32 0.2, %v599_v25  ;;  %vm709_vm8 = vcmp.ge.f32.partialorder %v559_v24, 0.0  ;;  %vm725_vm9 = vcmp.ge.f32.partialorder %v599_v25, 0.0 }
  0xdf   : > { %v868_v20 = vsel %vm740_vm6, %v636_v12, %v804_v16  ;;  %v884_v21 = vsel %vm756_vm7, %v676_v13, %v820_v17 }
  0xe0   : > { %v1419_v22 = vpack.c.bf16 %v868_v20, %v867_v18  ;;  %v1459_v23 = vpack.c.bf16 %v884_v21, %v883_v19  ;;  %v837_v38 = vsel %vm709_vm8, %v559_v24, %v773_v30  ;;  %v853_v39 = vsel %vm725_vm9, %v599_v25, %v789_v31 }
  0xe2   : > { %1503 = vst [vmem:[%s1761_s24 + $0x90] sm:$0xff] %v1419_v22   ;;  %v638_v26 = vpop.f32.mrf.mxu2  ;;  %v678_v27 = vpop.f32.mrf.mxu3 }
  0xe3   : > { %1511 = vst [vmem:[%s1761_s24 + $0xd0] sm:$0xff] %v1459_v23   ;;  %v560_v28 = vpop.f32.mrf.mxu0  ;;  %v600_v29 = vpop.f32.mrf.mxu1  ;;  %v639_v36 = vadd.f32 %v1748_v42, %v638_v26  ;;  %v679_v37 = vadd.f32 %v1748_v42, %v678_v27 }
  0xe4   : > { %v561_v32 = vadd.f32 %v1748_v42, %v560_v28  ;;  %v601_v33 = vadd.f32 %v1748_v42, %v600_v29 }
  0xe5   : > { %v805_v47 = vmul.f32 0.2, %v639_v36  ;;  %v821_v48 = vmul.f32 0.2, %v679_v37  ;;  %vm741_vm12 = vcmp.ge.f32.partialorder %v639_v36, 0.0  ;;  %vm757_vm13 = vcmp.ge.f32.partialorder %v679_v37, 0.0 }
  0xe6   : > { %vm710_vm10 = vcmp.ge.f32.partialorder %v561_v32, 0.0  ;;  %v774_v34 = vmul.f32 0.2, %v561_v32  ;;  %vm726_vm11 = vcmp.ge.f32.partialorder %v601_v33, 0.0  ;;  %v790_v35 = vmul.f32 0.2, %v601_v33 }
  0xe7   : > { %v869_v55 = vsel %vm741_vm12, %v639_v36, %v805_v47  ;;  %v885_v56 = vsel %vm757_vm13, %v679_v37, %v821_v48 }
  0xe8   : > { %v838_v40 = vsel %vm710_vm10, %v561_v32, %v774_v34  ;;  %v854_v41 = vsel %vm726_vm11, %v601_v33, %v790_v35 }
  0xe9   : > { %v1344_v43 = vpack.c.bf16 %v838_v40, %v837_v38  ;;  %v1384_v44 = vpack.c.bf16 %v854_v41, %v853_v39 }
  0xea   : > { %v640_v45 = vpop.f32.mrf.mxu2  ;;  %v680_v46 = vpop.f32.mrf.mxu3 }
  0xeb   : > { %1488 = vst [vmem:[%s1761_s24 + $0x18] sm:$0xff] %v1344_v43   ;;  %v641_v49 = vadd.f32 %v1748_v42, %v640_v45  ;;  %v681_v50 = vadd.f32 %v1748_v42, %v680_v46  ;;  %v563_v51 = vpop.f32.mrf.mxu0  ;;  %v603_v52 = vpop.f32.mrf.mxu1 }
  0xec   : > { %1496 = vst [vmem:[%s1761_s24 + $0x58] sm:$0xff] %v1384_v44   ;;  %v564_v61 = vadd.f32 %v1748_v42, %v563_v51  ;;  %v604_v62 = vadd.f32 %v1748_v42, %v603_v52 }
  0xed   : > { %vm742_vm14 = vcmp.ge.f32.partialorder %v641_v49, 0.0  ;;  %v806_v53 = vmul.f32 0.2, %v641_v49  ;;  %vm758_vm15 = vcmp.ge.f32.partialorder %v681_v50, 0.0  ;;  %v822_v54 = vmul.f32 0.2, %v681_v50 }
  0xee   : > { %v775_v3 = vmul.f32 0.2, %v564_v61  ;;  %v791_v4 = vmul.f32 0.2, %v604_v62  ;;  %vm711_vm0 = vcmp.ge.f32.partialorder %v564_v61, 0.0  ;;  %vm727_vm1 = vcmp.ge.f32.partialorder %v604_v62, 0.0 }
  0xef   : > { %v870_v57 = vsel %vm742_vm14, %v641_v49, %v806_v53  ;;  %v886_v58 = vsel %vm758_vm15, %v681_v50, %v822_v54 }
  0xf0   : > { %v1424_v59 = vpack.c.bf16 %v870_v57, %v869_v55  ;;  %v1464_v60 = vpack.c.bf16 %v886_v58, %v885_v56  ;;  %v839_v11 = vsel %vm711_vm0, %v564_v61, %v775_v3  ;;  %v855_v12 = vsel %vm727_vm1, %v604_v62, %v791_v4 }
  0xf2   : > { %1504 = vst [vmem:[%s1761_s24 + $0x98] sm:$0xff] %v1424_v59   ;;  %v643_v63 = vpop.f32.mrf.mxu2  ;;  %v683_v0 = vpop.f32.mrf.mxu3 }
  0xf3   : > { %1512 = vst [vmem:[%s1761_s24 + $0xd8] sm:$0xff] %v1464_v60   ;;  %v565_v1 = vpop.f32.mrf.mxu0  ;;  %v605_v2 = vpop.f32.mrf.mxu1  ;;  %v644_v9 = vadd.f32 %v1748_v42, %v643_v63  ;;  %v684_v10 = vadd.f32 %v1748_v42, %v683_v0 }
  0xf4   : > { %v566_v5 = vadd.f32 %v1748_v42, %v565_v1  ;;  %v606_v6 = vadd.f32 %v1748_v42, %v605_v2 }
  0xf5   : > { %v807_v19 = vmul.f32 0.2, %v644_v9  ;;  %v823_v20 = vmul.f32 0.2, %v684_v10  ;;  %vm743_vm4 = vcmp.ge.f32.partialorder %v644_v9, 0.0  ;;  %vm759_vm5 = vcmp.ge.f32.partialorder %v684_v10, 0.0 }
  0xf6   : > { %vm712_vm2 = vcmp.ge.f32.partialorder %v566_v5, 0.0  ;;  %v776_v7 = vmul.f32 0.2, %v566_v5  ;;  %vm728_vm3 = vcmp.ge.f32.partialorder %v606_v6, 0.0  ;;  %v792_v8 = vmul.f32 0.2, %v606_v6 }
  0xf7   : > { %v871_v27 = vsel %vm743_vm4, %v644_v9, %v807_v19  ;;  %v887_v28 = vsel %vm759_vm5, %v684_v10, %v823_v20 }
  0xf8   : > { %v840_v13 = vsel %vm712_vm2, %v566_v5, %v776_v7  ;;  %v856_v14 = vsel %vm728_vm3, %v606_v6, %v792_v8 }
  0xf9   : > { %v1349_v15 = vpack.c.bf16 %v840_v13, %v839_v11  ;;  %v1389_v16 = vpack.c.bf16 %v856_v14, %v855_v12 }
  0xfa   : > { %v645_v17 = vpop.f32.mrf.mxu2  ;;  %v685_v18 = vpop.f32.mrf.mxu3 }
  0xfb   : > { %1489 = vst [vmem:[%s1761_s24 + $0x20] sm:$0xff] %v1349_v15   ;;  %v646_v21 = vadd.f32 %v1748_v42, %v645_v17  ;;  %v686_v22 = vadd.f32 %v1748_v42, %v685_v18  ;;  %v568_v23 = vpop.f32.mrf.mxu0  ;;  %v608_v24 = vpop.f32.mrf.mxu1 }
  0xfc   : > { %1497 = vst [vmem:[%s1761_s24 + $0x60] sm:$0xff] %v1389_v16   ;;  %v569_v33 = vadd.f32 %v1748_v42, %v568_v23  ;;  %v609_v34 = vadd.f32 %v1748_v42, %v608_v24 }
  0xfd   : > { %vm744_vm6 = vcmp.ge.f32.partialorder %v646_v21, 0.0  ;;  %v808_v25 = vmul.f32 0.2, %v646_v21  ;;  %vm760_vm7 = vcmp.ge.f32.partialorder %v686_v22, 0.0  ;;  %v824_v26 = vmul.f32 0.2, %v686_v22 }
  0xfe   : > { %v777_v39 = vmul.f32 0.2, %v569_v33  ;;  %v793_v40 = vmul.f32 0.2, %v609_v34  ;;  %vm713_vm8 = vcmp.ge.f32.partialorder %v569_v33, 0.0  ;;  %vm729_vm9 = vcmp.ge.f32.partialorder %v609_v34, 0.0 }
  0xff   : > { %v872_v29 = vsel %vm744_vm6, %v646_v21, %v808_v25  ;;  %v888_v30 = vsel %vm760_vm7, %v686_v22, %v824_v26 }
 0x100   : > { %v1429_v31 = vpack.c.bf16 %v872_v29, %v871_v27  ;;  %v1469_v32 = vpack.c.bf16 %v888_v30, %v887_v28  ;;  %v841_v48 = vsel %vm713_vm8, %v569_v33, %v777_v39  ;;  %v857_v49 = vsel %vm729_vm9, %v609_v34, %v793_v40 }
 0x102   : > { %1505 = vst [vmem:[%s1761_s24 + $0xa0] sm:$0xff] %v1429_v31   ;;  %v648_v35 = vpop.f32.mrf.mxu2  ;;  %v688_v36 = vpop.f32.mrf.mxu3 }
 0x103   : > { %1513 = vst [vmem:[%s1761_s24 + $0xe0] sm:$0xff] %v1469_v32   ;;  %v570_v37 = vpop.f32.mrf.mxu0  ;;  %v610_v38 = vpop.f32.mrf.mxu1  ;;  %v649_v46 = vadd.f32 %v1748_v42, %v648_v35  ;;  %v689_v47 = vadd.f32 %v1748_v42, %v688_v36 }
 0x104   : > { %v571_v41 = vadd.f32 %v1748_v42, %v570_v37  ;;  %v611_v43 = vadd.f32 %v1748_v42, %v610_v38 }
 0x105   : > { %v809_v56 = vmul.f32 0.2, %v649_v46  ;;  %v825_v57 = vmul.f32 0.2, %v689_v47  ;;  %vm745_vm12 = vcmp.ge.f32.partialorder %v649_v46, 0.0  ;;  %vm761_vm13 = vcmp.ge.f32.partialorder %v689_v47, 0.0 }
 0x106   : > { %vm714_vm10 = vcmp.ge.f32.partialorder %v571_v41, 0.0  ;;  %v778_v44 = vmul.f32 0.2, %v571_v41  ;;  %vm730_vm11 = vcmp.ge.f32.partialorder %v611_v43, 0.0  ;;  %v794_v45 = vmul.f32 0.2, %v611_v43 }
 0x107   : > { %v873_v0 = vsel %vm745_vm12, %v649_v46, %v809_v56  ;;  %v889_v1 = vsel %vm761_vm13, %v689_v47, %v825_v57 }
 0x108   : > { %v842_v50 = vsel %vm714_vm10, %v571_v41, %v778_v44  ;;  %v858_v51 = vsel %vm730_vm11, %v611_v43, %v794_v45 }
 0x109   : > { %v1354_v52 = vpack.c.bf16 %v842_v50, %v841_v48  ;;  %v1394_v53 = vpack.c.bf16 %v858_v51, %v857_v49 }
 0x10a   : > { %v650_v54 = vpop.f32.mrf.mxu2  ;;  %v690_v55 = vpop.f32.mrf.mxu3 }
 0x10b   : > { %1490 = vst [vmem:[%s1761_s24 + $0x28] sm:$0xff] %v1354_v52   ;;  %v651_v58 = vadd.f32 %v1748_v42, %v650_v54  ;;  %v691_v59 = vadd.f32 %v1748_v42, %v690_v55  ;;  %v573_v60 = vpop.f32.mrf.mxu0  ;;  %v613_v61 = vpop.f32.mrf.mxu1 }
 0x10c   : > { %1498 = vst [vmem:[%s1761_s24 + $0x68] sm:$0xff] %v1394_v53   ;;  %v574_v6 = vadd.f32 %v1748_v42, %v573_v60  ;;  %v614_v7 = vadd.f32 %v1748_v42, %v613_v61 }
 0x10d   : > { %vm746_vm14 = vcmp.ge.f32.partialorder %v651_v58, 0.0  ;;  %v810_v62 = vmul.f32 0.2, %v651_v58  ;;  %vm762_vm15 = vcmp.ge.f32.partialorder %v691_v59, 0.0  ;;  %v826_v63 = vmul.f32 0.2, %v691_v59 }
 0x10e   : > { %v779_v12 = vmul.f32 0.2, %v574_v6  ;;  %v795_v13 = vmul.f32 0.2, %v614_v7  ;;  %vm715_vm0 = vcmp.ge.f32.partialorder %v574_v6, 0.0  ;;  %vm731_vm1 = vcmp.ge.f32.partialorder %v614_v7, 0.0 }
 0x10f   : > { %v874_v2 = vsel %vm746_vm14, %v651_v58, %v810_v62  ;;  %v890_v3 = vsel %vm762_vm15, %v691_v59, %v826_v63 }
 0x110   : > { %v1434_v4 = vpack.c.bf16 %v874_v2, %v873_v0  ;;  %v1474_v5 = vpack.c.bf16 %v890_v3, %v889_v1  ;;  %v843_v20 = vsel %vm715_vm0, %v574_v6, %v779_v12  ;;  %v859_v21 = vsel %vm731_vm1, %v614_v7, %v795_v13 }
 0x112   : > { %1506 = vst [vmem:[%s1761_s24 + $0xa8] sm:$0xff] %v1434_v4   ;;  %v653_v8 = vpop.f32.mrf.mxu2  ;;  %v693_v9 = vpop.f32.mrf.mxu3 }
 0x113   : > { %1514 = vst [vmem:[%s1761_s24 + $0xe8] sm:$0xff] %v1474_v5   ;;  %v575_v10 = vpop.f32.mrf.mxu0  ;;  %v615_v11 = vpop.f32.mrf.mxu1  ;;  %v654_v18 = vadd.f32 %v1748_v42, %v653_v8  ;;  %v694_v19 = vadd.f32 %v1748_v42, %v693_v9 }
 0x114   : > { %v576_v14 = vadd.f32 %v1748_v42, %v575_v10  ;;  %v616_v15 = vadd.f32 %v1748_v42, %v615_v11 }
 0x115   : > { %v811_v28 = vmul.f32 0.2, %v654_v18  ;;  %v827_v29 = vmul.f32 0.2, %v694_v19  ;;  %vm747_vm4 = vcmp.ge.f32.partialorder %v654_v18, 0.0  ;;  %vm763_vm5 = vcmp.ge.f32.partialorder %v694_v19, 0.0 }
 0x116   : > { %vm716_vm2 = vcmp.ge.f32.partialorder %v576_v14, 0.0  ;;  %v780_v16 = vmul.f32 0.2, %v576_v14  ;;  %vm732_vm3 = vcmp.ge.f32.partialorder %v616_v15, 0.0  ;;  %v796_v17 = vmul.f32 0.2, %v616_v15 }
 0x117   : > { %v875_v36 = vsel %vm747_vm4, %v654_v18, %v811_v28  ;;  %v891_v37 = vsel %vm763_vm5, %v694_v19, %v827_v29 }
 0x118   : > { %v844_v22 = vsel %vm716_vm2, %v576_v14, %v780_v16  ;;  %v860_v23 = vsel %vm732_vm3, %v616_v15, %v796_v17 }
 0x119   : > { %v1359_v24 = vpack.c.bf16 %v844_v22, %v843_v20  ;;  %v1399_v25 = vpack.c.bf16 %v860_v23, %v859_v21 }
 0x11a   : > { %v655_v26 = vpop.f32.mrf.mxu2  ;;  %v695_v27 = vpop.f32.mrf.mxu3 }
 0x11b   : > { %1491 = vst [vmem:[%s1761_s24 + $0x30] sm:$0xff] %v1359_v24   ;;  %v656_v30 = vadd.f32 %v1748_v42, %v655_v26  ;;  %v696_v31 = vadd.f32 %v1748_v42, %v695_v27  ;;  %v578_v32 = vpop.f32.mrf.mxu0  ;;  %v618_v33 = vpop.f32.mrf.mxu1 }
 0x11c   : > { %1499 = vst [vmem:[%s1761_s24 + $0x70] sm:$0xff] %v1399_v25   ;;  %v579_v43 = vadd.f32 %v1748_v42, %v578_v32  ;;  %v619_v44 = vadd.f32 %v1748_v42, %v618_v33 }
 0x11d   : > { %vm748_vm6 = vcmp.ge.f32.partialorder %v656_v30, 0.0  ;;  %v812_v34 = vmul.f32 0.2, %v656_v30  ;;  %vm764_vm7 = vcmp.ge.f32.partialorder %v696_v31, 0.0  ;;  %v828_v35 = vmul.f32 0.2, %v696_v31 }
 0x11e   : > { %v781_v49 = vmul.f32 0.2, %v579_v43  ;;  %v797_v50 = vmul.f32 0.2, %v619_v44  ;;  %vm717_vm8 = vcmp.ge.f32.partialorder %v579_v43, 0.0  ;;  %vm733_vm9 = vcmp.ge.f32.partialorder %v619_v44, 0.0 }
 0x11f   : > { %v876_v38 = vsel %vm748_vm6, %v656_v30, %v812_v34  ;;  %v892_v39 = vsel %vm764_vm7, %v696_v31, %v828_v35 }
 0x120   : > { %v1439_v40 = vpack.c.bf16 %v876_v38, %v875_v36  ;;  %v1479_v41 = vpack.c.bf16 %v892_v39, %v891_v37  ;;  %v845_v57 = vsel %vm717_vm8, %v579_v43, %v781_v49  ;;  %v861_v58 = vsel %vm733_vm9, %v619_v44, %v797_v50 }
 0x122   : > { %1507 = vst [vmem:[%s1761_s24 + $0xb0] sm:$0xff] %v1439_v40   ;;  %v658_v45 = vpop.f32.mrf.mxu2  ;;  %v698_v46 = vpop.f32.mrf.mxu3 }
 0x123   : > { %1515 = vst [vmem:[%s1761_s24 + $0xf0] sm:$0xff] %v1479_v41   ;;  %v580_v47 = vpop.f32.mrf.mxu0  ;;  %v620_v48 = vpop.f32.mrf.mxu1  ;;  %v659_v55 = vadd.f32 %v1748_v42, %v658_v45  ;;  %v699_v56 = vadd.f32 %v1748_v42, %v698_v46 }
 0x124   : > { %v581_v51 = vadd.f32 %v1748_v42, %v580_v47  ;;  %v621_v52 = vadd.f32 %v1748_v42, %v620_v48 }
 0x125   : > { %v813_v1 = vmul.f32 0.2, %v659_v55  ;;  %v829_v2 = vmul.f32 0.2, %v699_v56  ;;  %vm749_vm12 = vcmp.ge.f32.partialorder %v659_v55, 0.0  ;;  %vm765_vm13 = vcmp.ge.f32.partialorder %v699_v56, 0.0 }
 0x126   : > { %vm718_vm10 = vcmp.ge.f32.partialorder %v581_v51, 0.0  ;;  %v782_v53 = vmul.f32 0.2, %v581_v51  ;;  %vm734_vm11 = vcmp.ge.f32.partialorder %v621_v52, 0.0  ;;  %v798_v54 = vmul.f32 0.2, %v621_v52 }
 0x127   : > { %v877_v7 = vsel %vm749_vm12, %v659_v55, %v813_v1  ;;  %v893_v8 = vsel %vm765_vm13, %v699_v56, %v829_v2 }
 0x128   : > { %v846_v59 = vsel %vm718_vm10, %v581_v51, %v782_v53  ;;  %v862_v60 = vsel %vm734_vm11, %v621_v52, %v798_v54 }
 0x129   : > { %v1364_v61 = vpack.c.bf16 %v846_v59, %v845_v57  ;;  %v1404_v62 = vpack.c.bf16 %v862_v60, %v861_v58 }
 0x12a   : > { %v660_v63 = vpop.f32.mrf.mxu2  ;;  %v700_v0 = vpop.f32.mrf.mxu3 }
 0x12b   : > { %1492 = vst [vmem:[%s1761_s24 + $0x38] sm:$0xff] %v1364_v61   ;;  %v661_v3 = vadd.f32 %v1748_v42, %v660_v63  ;;  %v701_v4 = vadd.f32 %v1748_v42, %v700_v0 }
 0x12c   : > { %1500 = vst [vmem:[%s1761_s24 + $0x78] sm:$0xff] %v1404_v62  }
 0x12d   : > { %vm750_vm14 = vcmp.ge.f32.partialorder %v661_v3, 0.0  ;;  %v814_v5 = vmul.f32 0.2, %v661_v3  ;;  %vm766_vm15 = vcmp.ge.f32.partialorder %v701_v4, 0.0  ;;  %v830_v6 = vmul.f32 0.2, %v701_v4 }
 0x12f   : > { %v878_v9 = vsel %vm750_vm14, %v661_v3, %v814_v5  ;;  %v894_v10 = vsel %vm766_vm15, %v701_v4, %v830_v6 }
 0x130   : > { %v1444_v11 = vpack.c.bf16 %v878_v9, %v877_v7  ;;  %v1484_v12 = vpack.c.bf16 %v894_v10, %v893_v8 }
 0x132   : > { %1508 = vst [vmem:[%s1761_s24 + $0xb8] sm:$0xff] %v1444_v11  }
 0x133   : > { %1516 = vst [vmem:[%s1761_s24 + $0xf8] sm:$0xff] %v1484_v12  }
 0x134 PF: > { %s13_s16 = sadd.s32 1, %s1620_s16   ;;  %s1872_s12 = smov %s1612_s14 }
 0x135   : > { %p10_p7 = scmp.ge.s32.totalorder %s13_s16, 6   ;;  %s1873_s13 = smov %s1616_s15 }
 0x136   : > { %s1874_s14 = smov %s1877_s17  ;;  %s1875_s15 = smov %s1881_s18 }
 0x137   :  { %12 = sbr.rel (!%p10_p7) target bundleno = 3 (0x3), region = 62 }

// kernel: _lambda_.6
= control target key start
LH: loop header
LB: loop body
LE: loop exit
PB: predicated region body
PF: predicated region fallthrough
CT: control target
= control target key end

     0   :  { %s6656_s9 = smov 0   ;;  %s8367_s0 = inlined_call_operand.vmem [shape: bf16[2,256,2048], index: 0, kind: input, shape index: {}]   ;;  %s8368_s1 = inlined_call_operand.vmem [shape: bf16[2048,128], index: 1, kind: input, shape index: {}]   ;;  %s8369_s2 = inlined_call_operand.vmem [shape: bf16[2,256,128], index: 2, kind: output, shape index: {}]  }
   0x1 LB: > { %s4595_s10 = sadd.s32 4294967295, %s6639_s9   ;;  %p4599_p0 = scmp.ge.s32.totalorder %s6639_s9, 1  ;;  %s6639_s9 = sphi %s6656_s9, %s12_s9  }
   0x2   : > { %p112_p1 = scmp.lt.s32.totalorder %s6639_s9, 3 }
   0x4   : > { %p113_p2 = pnand %p4599_p0, %p112_p1 }
   0x5   : > { %p134_p3 = scmp.lt.s32.totalorder (!%p113_p2), %s4595_s10, 1 }
   0x6   : > { %116 = sbr.rel (%p113_p2) target bundleno = 1289 (0x509), region = 28 }
   0xb   : > { %v6407_v0 = vld [vmem:[%s8368_s1 + $0x38] sm:$0xff]  ;;  %v6406_v4 = vld [vmem:[%s8368_s1 + $0x30] sm:$0xff]  ;;  %v6405_v8 = vld [vmem:[%s8368_s1 + $0x28] sm:$0xff]  ;;  %s8385_s10 = smov (!%p134_p3, %s4595_s10), 1 }
   0xc   : > { %v6415_v1 = vld [vmem:[%s8368_s1 + $0x78] sm:$0xff]  ;;  %2704 = vmatpush.bf16.msra.mxu0 %v6407_v0  ;;  %v6414_v5 = vld [vmem:[%s8368_s1 + $0x70] sm:$0xff]  ;;  %v6413_v9 = vld [vmem:[%s8368_s1 + $0x68] sm:$0xff]  ;;  %s6142_s5 = sshll.u32 %s8385_s10, 11 }
   0xd   : > { %v6423_v2 = vld [vmem:[%s8368_s1 + $0xb8] sm:$0xff]  ;;  %2793 = vmatpush.bf16.msra.mxu1 %v6415_v1  ;;  %v6422_v6 = vld [vmem:[%s8368_s1 + $0xb0] sm:$0xff]  ;;  %v6421_v10 = vld [vmem:[%s8368_s1 + $0xa8] sm:$0xff]  ;;  %s6752_s14 = scalar_lea.vmem %s8367_s0, %s6142_s5 }
   0xe   : > { %v6431_v3 = vld [vmem:[%s8368_s1 + $0xf8] sm:$0xff]  ;;  %2882 = vmatpush.bf16.msra.mxu2 %v6423_v2  ;;  %v6430_v7 = vld [vmem:[%s8368_s1 + $0xf0] sm:$0xff]  ;;  %v6429_v11 = vld [vmem:[%s8368_s1 + $0xe8] sm:$0xff] }
   0xf   : > { %2971 = vmatpush.bf16.msra.mxu3 %v6431_v3  ;;  %v6404_v12 = vld [vmem:[%s8368_s1 + $0x20] sm:$0xff]  ;;  %v6403_v16 = vld [vmem:[%s8368_s1 + $0x18] sm:$0xff]  ;;  %v6402_v20 = vld [vmem:[%s8368_s1 + $0x10] sm:$0xff] }
  0x10   : > { %2705 = vmatpush.bf16.msra.mxu0 %v6406_v4  ;;  %v6412_v13 = vld [vmem:[%s8368_s1 + $0x60] sm:$0xff]  ;;  %v6411_v17 = vld [vmem:[%s8368_s1 + $0x58] sm:$0xff]  ;;  %v6410_v21 = vld [vmem:[%s8368_s1 + $0x50] sm:$0xff] }
  0x11   : > { %2794 = vmatpush.bf16.msra.mxu1 %v6414_v5  ;;  %v6420_v14 = vld [vmem:[%s8368_s1 + $0xa0] sm:$0xff]  ;;  %v6419_v18 = vld [vmem:[%s8368_s1 + $0x98] sm:$0xff]  ;;  %v6418_v22 = vld [vmem:[%s8368_s1 + $0x90] sm:$0xff] }
  0x12   : > { %2883 = vmatpush.bf16.msra.mxu2 %v6422_v6  ;;  %v6428_v15 = vld [vmem:[%s8368_s1 + $0xe0] sm:$0xff]  ;;  %v6427_v19 = vld [vmem:[%s8368_s1 + $0xd8] sm:$0xff]  ;;  %v6426_v23 = vld [vmem:[%s8368_s1 + $0xd0] sm:$0xff] }
  0x13   : > { %2972 = vmatpush.bf16.msra.mxu3 %v6430_v7  ;;  %v6401_v24 = vld [vmem:[%s8368_s1 + $0x8] sm:$0xff]  ;;  %v6400_v28 = vld [vmem:[%s8368_s1] sm:$0xff]  ;;  %v6455_v40 = vld [vmem:[%s8368_s1 + $0x1b8] sm:$0xff] }
  0x14   : > { %2706 = vmatpush.bf16.msra.mxu0 %v6405_v8  ;;  %v6409_v25 = vld [vmem:[%s8368_s1 + $0x48] sm:$0xff]  ;;  %v6408_v29 = vld [vmem:[%s8368_s1 + $0x40] sm:$0xff]  ;;  %v6439_v41 = vld [vmem:[%s8368_s1 + $0x138] sm:$0xff] }
  0x15   : > { %2795 = vmatpush.bf16.msra.mxu1 %v6413_v9  ;;  %v6417_v26 = vld [vmem:[%s8368_s1 + $0x88] sm:$0xff]  ;;  %v6416_v30 = vld [vmem:[%s8368_s1 + $0x80] sm:$0xff]  ;;  %v6463_v46 = vld [vmem:[%s8368_s1 + $0x1f8] sm:$0xff] }
  0x16   : > { %2884 = vmatpush.bf16.msra.mxu2 %v6421_v10  ;;  %v6425_v27 = vld [vmem:[%s8368_s1 + $0xc8] sm:$0xff]  ;;  %v6424_v31 = vld [vmem:[%s8368_s1 + $0xc0] sm:$0xff]  ;;  %v6447_v47 = vld [vmem:[%s8368_s1 + $0x178] sm:$0xff] }
  0x17   : > { %2973 = vmatpush.bf16.msra.mxu3 %v6429_v11  ;;  %v4606_v32 = vld [vmem:[%s6752_s14] sm:$0xf]  ;;  %v6144_v34 = vld [vmem:[%s6752_s14 + $0x4] sm:$0xf]  ;;  %v4614_v36 = vld [vmem:[%s6752_s14 + $0x8] sm:$0xf] }
  0x18   : > { %2707 = vmatpush.bf16.msra.mxu0 %v6404_v12  ;;  %v6152_v33 = vld [vmem:[%s6752_s14 + $0x3c] sm:$0xf0]  ;;  %v4608_v35 = vld [vmem:[%s6752_s14 + $0x40] sm:$0xf0]  ;;  %v6153_v37 = vld [vmem:[%s6752_s14 + $0x44] sm:$0xf0] }
  0x19   : > { %2796 = vmatpush.bf16.msra.mxu1 %v6412_v13  ;;  %v6145_v38 = vld [vmem:[%s6752_s14 + $0xc] sm:$0xf]  ;;  %v4607_v42 = vor.u32 %v6152_v33, %v4606_v32  ;;  %v4611_v43 = vor.u32 %v6144_v34, %v4608_v35  ;;  %v4615_v44 = vor.u32 %v6153_v37, %v4614_v36  ;;  %v6454_v48 = vld [vmem:[%s8368_s1 + $0x1b0] sm:$0xff]  ;;  %v4670_v52 = vld [vmem:[%s6752_s14 + $0x80] sm:$0xf] }
  0x1a   : > { %2885 = vmatpush.bf16.msra.mxu2 %v6420_v14  ;;  %v4616_v39 = vld [vmem:[%s6752_s14 + $0x48] sm:$0xf0]  ;;  %v6438_v49 = vld [vmem:[%s8368_s1 + $0x130] sm:$0xff]  ;;  %v6168_v53 = vld [vmem:[%s6752_s14 + $0xbc] sm:$0xf0] }
  0x1b   : > { %2974 = vmatpush.bf16.msra.mxu3 %v6428_v15  ;;  %v4619_v45 = vor.u32 %v6145_v38, %v4616_v39  ;;  %v6462_v50 = vld [vmem:[%s8368_s1 + $0x1f0] sm:$0xff]  ;;  %v6160_v54 = vld [vmem:[%s6752_s14 + $0x84] sm:$0xf]  ;;  %v4678_v56 = vld [vmem:[%s6752_s14 + $0x88] sm:$0xf]  ;;  %v4671_v60 = vor.u32 %v6168_v53, %v4670_v52 }
  0x1c   : > { %2708 = vmatpush.bf16.msra.mxu0 %v6403_v16  ;;  %v6446_v51 = vld [vmem:[%s8368_s1 + $0x170] sm:$0xff]  ;;  %v4672_v55 = vld [vmem:[%s6752_s14 + $0xc0] sm:$0xf0]  ;;  %v6169_v57 = vld [vmem:[%s6752_s14 + $0xc4] sm:$0xf0] }
  0x1d   : > { %2797 = vmatpush.bf16.msra.mxu1 %v6411_v17  ;;  %v6161_v58 = vld [vmem:[%s6752_s14 + $0x8c] sm:$0xf]  ;;  %v4675_v61 = vor.u32 %v6160_v54, %v4672_v55  ;;  %v4679_v62 = vor.u32 %v6169_v57, %v4678_v56  ;;  %v4734_v0 = vld [vmem:[%s6752_s14 + $0x100] sm:$0xf]  ;;  %v6176_v2 = vld [vmem:[%s6752_s14 + $0x104] sm:$0xf] }
  0x1e   : > { %2886 = vmatpush.bf16.msra.mxu2 %v6419_v18  ;;  %v4680_v59 = vld [vmem:[%s6752_s14 + $0xc8] sm:$0xf0]  ;;  %v6184_v1 = vld [vmem:[%s6752_s14 + $0x13c] sm:$0xf0]  ;;  %v4736_v3 = vld [vmem:[%s6752_s14 + $0x140] sm:$0xf0] }
  0x1f   : > { %2975 = vmatpush.bf16.msra.mxu3 %v6427_v19  ;;  %v4683_v63 = vor.u32 %v6161_v58, %v4680_v59  ;;  %v4742_v4 = vld [vmem:[%s6752_s14 + $0x108] sm:$0xf]  ;;  %v6177_v6 = vld [vmem:[%s6752_s14 + $0x10c] sm:$0xf]  ;;  %v4735_v8 = vor.u32 %v6184_v1, %v4734_v0  ;;  %v4739_v9 = vor.u32 %v6176_v2, %v4736_v3  ;;  %v4798_v16 = vld [vmem:[%s6752_s14 + $0x180] sm:$0xf] }
  0x20   : > { %2709 = vmatpush.bf16.msra.mxu0 %v6402_v20  ;;  %v6185_v5 = vld [vmem:[%s6752_s14 + $0x144] sm:$0xf0]  ;;  %v4744_v7 = vld [vmem:[%s6752_s14 + $0x148] sm:$0xf0]  ;;  %v6200_v17 = vld [vmem:[%s6752_s14 + $0x1bc] sm:$0xf0] }
  0x21   : > { %2798 = vmatpush.bf16.msra.mxu1 %v6410_v21  ;;  %v4743_v10 = vor.u32 %v6185_v5, %v4742_v4  ;;  %v4747_v11 = vor.u32 %v6177_v6, %v4744_v7  ;;  %v6453_v12 = vld [vmem:[%s8368_s1 + $0x1a8] sm:$0xff]  ;;  %v6192_v18 = vld [vmem:[%s6752_s14 + $0x184] sm:$0xf]  ;;  %v4990_v56 = vld [vmem:[%s6752_s14 + $0x300] sm:$0xf] }
  0x22   : > { %2887 = vmatpush.bf16.msra.mxu2 %v6418_v22  ;;  %v6437_v13 = vld [vmem:[%s8368_s1 + $0x128] sm:$0xff]  ;;  %v4800_v19 = vld [vmem:[%s6752_s14 + $0x1c0] sm:$0xf0]  ;;  %v6248_v57 = vld [vmem:[%s6752_s14 + $0x33c] sm:$0xf0] }
  0x23   : > { %2976 = vmatpush.bf16.msra.mxu3 %v6426_v23  ;;  %v6461_v14 = vld [vmem:[%s8368_s1 + $0x1e8] sm:$0xff]  ;;  %v6240_v58 = vld [vmem:[%s6752_s14 + $0x304] sm:$0xf]  ;;  %v4991_v0 = vor.u32 %v6248_v57, %v4990_v56  ;;  %v6451_v4 = vld [vmem:[%s8368_s1 + $0x198] sm:$0xff] }
  0x24   : > { %2710 = vmatpush.bf16.msra.mxu0 %v6401_v24  ;;  %v6445_v15 = vld [vmem:[%s8368_s1 + $0x168] sm:$0xff]  ;;  %v4799_v24 = vor.u32 %v6200_v17, %v4798_v16  ;;  %v4992_v59 = vld [vmem:[%s6752_s14 + $0x340] sm:$0xf0]  ;;  %v6435_v5 = vld [vmem:[%s8368_s1 + $0x118] sm:$0xff] }
  0x25   : > { %2799 = vmatpush.bf16.msra.mxu1 %v6409_v25  ;;  %v4806_v20 = vld [vmem:[%s6752_s14 + $0x188] sm:$0xf]  ;;  %v6193_v22 = vld [vmem:[%s6752_s14 + $0x18c] sm:$0xf]  ;;  %v4803_v25 = vor.u32 %v6192_v18, %v4800_v19  ;;  %v4995_v1 = vor.u32 %v6240_v58, %v4992_v59  ;;  %v6459_v6 = vld [vmem:[%s8368_s1 + $0x1d8] sm:$0xff] }
  0x26   : > { %2888 = vmatpush.bf16.msra.mxu2 %v6417_v26  ;;  %v6201_v21 = vld [vmem:[%s6752_s14 + $0x1c4] sm:$0xf0]  ;;  %v4808_v23 = vld [vmem:[%s6752_s14 + $0x1c8] sm:$0xf0]  ;;  %v6443_v7 = vld [vmem:[%s8368_s1 + $0x158] sm:$0xff] }
  0x27   : > { %2977 = vmatpush.bf16.msra.mxu3 %v6425_v27  ;;  %v4807_v26 = vor.u32 %v6201_v21, %v4806_v20  ;;  %v4811_v27 = vor.u32 %v6193_v22, %v4808_v23  ;;  %v4870_v32 = vld [vmem:[%s6752_s14 + $0x208] sm:$0xf]  ;;  %v6209_v34 = vld [vmem:[%s6752_s14 + $0x20c] sm:$0xf]  ;;  %v5118_v20 = vld [vmem:[%s6752_s14 + $0x400] sm:$0xf] }
  0x28   : > { %2711 = vmatpush.bf16.msra.mxu0 %v6400_v28  ;;  %v4862_v28 = vld [vmem:[%s6752_s14 + $0x200] sm:$0xf]  ;;  %v6217_v33 = vld [vmem:[%s6752_s14 + $0x244] sm:$0xf0]  ;;  %v4872_v35 = vld [vmem:[%s6752_s14 + $0x248] sm:$0xf0] }
  0x29   : > { %2800 = vmatpush.bf16.msra.mxu1 %v6408_v29  ;;  %v6216_v29 = vld [vmem:[%s6752_s14 + $0x23c] sm:$0xf0]  ;;  %v4871_v38 = vor.u32 %v6217_v33, %v4870_v32  ;;  %v4875_v39 = vor.u32 %v6209_v34, %v4872_v35  ;;  %v6272_v22 = vld [vmem:[%s6752_s14 + $0x404] sm:$0xf]  ;;  %v6450_v35 = vld [vmem:[%s8368_s1 + $0x190] sm:$0xff] }
  0x2a   : > { %2889 = vmatpush.bf16.msra.mxu2 %v6416_v30  ;;  %v6208_v30 = vld [vmem:[%s6752_s14 + $0x204] sm:$0xf]  ;;  %v4863_v36 = vor.u32 %v6216_v29, %v4862_v28  ;;  %v6280_v21 = vld [vmem:[%s6752_s14 + $0x43c] sm:$0xf0] }
  0x2b   : > { %2978 = vmatpush.bf16.msra.mxu3 %v6424_v31  ;;  %2712 = vmatmul.bf16.vlgmr.msra.gmra.mxu0 %v4607_v42  ;;  %v4864_v31 = vld [vmem:[%s6752_s14 + $0x240] sm:$0xf0]  ;;  %v5119_v28 = vor.u32 %v6280_v21, %v5118_v20 }
  0x2c   : > { %3060 = vmatpush.bf16.msrb.mxu0 %v6439_v41  ;;  %2801 = vmatmul.bf16.vlgmr.msra.gmra.mxu1 %v4611_v43  ;;  %v4867_v37 = vor.u32 %v6208_v30, %v4864_v31  ;;  %v6436_v41 = vld [vmem:[%s8368_s1 + $0x120] sm:$0xff] }
  0x2d   : > { %2890 = vmatmul.bf16.vlgmr.msra.gmra.mxu2 %v4615_v44  ;;  %3149 = vmatpush.bf16.msrb.mxu1 %v6447_v47  ;;  %v6460_v42 = vld [vmem:[%s8368_s1 + $0x1e0] sm:$0xff] }
  0x2e   : > { %3238 = vmatpush.bf16.msrb.mxu2 %v6455_v40  ;;  %2979 = vmatmul.bf16.vlgmr.msra.gmra.mxu3 %v4619_v45  ;;  %v6452_v40 = vld [vmem:[%s8368_s1 + $0x1a0] sm:$0xff] }
  0x2f   : > { %3327 = vmatpush.bf16.msrb.mxu3 %v6463_v46  ;;  %v6444_v43 = vld [vmem:[%s8368_s1 + $0x160] sm:$0xff] }
  0x30   : > { %3061 = vmatpush.bf16.msrb.mxu0 %v6438_v49  ;;  %v4926_v44 = vld [vmem:[%s6752_s14 + $0x280] sm:$0xf]  ;;  %v6224_v46 = vld [vmem:[%s6752_s14 + $0x284] sm:$0xf]  ;;  %v6233_v49 = vld [vmem:[%s6752_s14 + $0x2c4] sm:$0xf0] }
  0x31   : > { %3150 = vmatpush.bf16.msrb.mxu1 %v6446_v51  ;;  %v6232_v45 = vld [vmem:[%s6752_s14 + $0x2bc] sm:$0xf0]  ;;  %v4928_v47 = vld [vmem:[%s6752_s14 + $0x2c0] sm:$0xf0]  ;;  %v4936_v51 = vld [vmem:[%s6752_s14 + $0x2c8] sm:$0xf0] }
  0x32   : > { %3239 = vmatpush.bf16.msrb.mxu2 %v6454_v48  ;;  %v4934_v48 = vld [vmem:[%s6752_s14 + $0x288] sm:$0xf]  ;;  %v4927_v52 = vor.u32 %v6232_v45, %v4926_v44  ;;  %v4931_v53 = vor.u32 %v6224_v46, %v4928_v47  ;;  %v5120_v23 = vld [vmem:[%s6752_s14 + $0x440] sm:$0xf0]  ;;  %v6442_v45 = vld [vmem:[%s8368_s1 + $0x150] sm:$0xff] }
  0x33   : > { %3328 = vmatpush.bf16.msrb.mxu3 %v6462_v50  ;;  %v6225_v50 = vld [vmem:[%s6752_s14 + $0x28c] sm:$0xf]  ;;  %v4935_v54 = vor.u32 %v6233_v49, %v4934_v48  ;;  %v5123_v29 = vor.u32 %v6272_v22, %v5120_v23  ;;  %v5182_v46 = vld [vmem:[%s6752_s14 + $0x480] sm:$0xf]  ;;  %v6288_v48 = vld [vmem:[%s6752_s14 + $0x484] sm:$0xf] }
  0x34   : > { %3062 = vmatpush.bf16.msrb.mxu0 %v6437_v13  ;;  %v4939_v55 = vor.u32 %v6225_v50, %v4936_v51  ;;  %v6265_v13 = vld [vmem:[%s6752_s14 + $0x3c4] sm:$0xf0]  ;;  %v6296_v47 = vld [vmem:[%s6752_s14 + $0x4bc] sm:$0xf0]  ;;  %v5184_v49 = vld [vmem:[%s6752_s14 + $0x4c0] sm:$0xf0] }
  0x35   : > { %3151 = vmatpush.bf16.msrb.mxu1 %v6445_v15  ;;  %v5064_v15 = vld [vmem:[%s6752_s14 + $0x3c8] sm:$0xf0]  ;;  %v5190_v50 = vld [vmem:[%s6752_s14 + $0x488] sm:$0xf]  ;;  %v5183_v56 = vor.u32 %v6296_v47, %v5182_v46  ;;  %v5187_v57 = vor.u32 %v6288_v48, %v5184_v49 }
  0x36   : > { %3240 = vmatpush.bf16.msrb.mxu2 %v6453_v12  ;;  %v5062_v12 = vld [vmem:[%s6752_s14 + $0x388] sm:$0xf]  ;;  %v5320_v46 = vld [vmem:[%s6752_s14 + $0x5c8] sm:$0xf0] }
  0x37   : > { %3329 = vmatpush.bf16.msrb.mxu3 %v6461_v14  ;;  %v6257_v14 = vld [vmem:[%s6752_s14 + $0x38c] sm:$0xf]  ;;  %v5063_v18 = vor.u32 %v6265_v13, %v5062_v12  ;;  %v6297_v51 = vld [vmem:[%s6752_s14 + $0x4c4] sm:$0xf0] }
  0x38   : > { %3063 = vmatpush.bf16.msrb.mxu0 %v6436_v41  ;;  %v5067_v19 = vor.u32 %v6257_v14, %v5064_v15  ;;  %v5254_v12 = vld [vmem:[%s6752_s14 + $0x508] sm:$0xf]  ;;  %v6305_v14 = vld [vmem:[%s6752_s14 + $0x50c] sm:$0xf] }
  0x39   : > { %3152 = vmatpush.bf16.msrb.mxu1 %v6444_v43  ;;  %v6313_v13 = vld [vmem:[%s6752_s14 + $0x544] sm:$0xf0]  ;;  %v5256_v15 = vld [vmem:[%s6752_s14 + $0x548] sm:$0xf0] }
  0x3a   : > { %3241 = vmatpush.bf16.msrb.mxu2 %v6452_v40  ;;  %v5255_v23 = vor.u32 %v6313_v13, %v5254_v12 }
  0x3b   : > { %2717 = vmatmul.bf16.gmra.mxu0 %v4671_v60  ;;  %3330 = vmatpush.bf16.msrb.mxu3 %v6460_v42  ;;  %v4998_v60 = vld [vmem:[%s6752_s14 + $0x308] sm:$0xf] }
  0x3c   : > { %2806 = vmatmul.bf16.gmra.mxu1 %v4675_v61  ;;  %v6249_v61 = vld [vmem:[%s6752_s14 + $0x344] sm:$0xf0]  ;;  %3064 = vmatpush.bf16.msrb.mxu0 %v6435_v5 }
  0x3d   : > { %2895 = vmatmul.bf16.gmra.mxu2 %v4679_v62  ;;  %v6241_v62 = vld [vmem:[%s6752_s14 + $0x30c] sm:$0xf]  ;;  %v4999_v2 = vor.u32 %v6249_v61, %v4998_v60  ;;  %3153 = vmatpush.bf16.msrb.mxu1 %v6443_v7  ;;  %v5191_v61 = vor.u32 %v6297_v51, %v5190_v50 }
  0x3e   : > { %2984 = vmatmul.bf16.gmra.mxu3 %v4683_v63  ;;  %v5000_v63 = vld [vmem:[%s6752_s14 + $0x348] sm:$0xf0]  ;;  %3242 = vmatpush.bf16.msrb.mxu2 %v6451_v4 }
  0x3f   : > { %v5003_v3 = vor.u32 %v6241_v62, %v5000_v63  ;;  %3331 = vmatpush.bf16.msrb.mxu3 %v6459_v6 }
  0x41   : > { %3154 = vmatpush.bf16.msrb.mxu1 %v6442_v45  ;;  %v6321_v45 = vld [vmem:[%s6752_s14 + $0x58c] sm:$0xf] }
  0x42   : > { %3243 = vmatpush.bf16.msrb.mxu2 %v6450_v35 }
  0x4b   : > { %2722 = vmatmul.bf16.gmra.mxu0 %v4735_v8  ;;  %v5054_v8 = vld [vmem:[%s6752_s14 + $0x380] sm:$0xf] }
  0x4c   : > { %2811 = vmatmul.bf16.gmra.mxu1 %v4739_v9  ;;  %v6264_v9 = vld [vmem:[%s6752_s14 + $0x3bc] sm:$0xf0] }
  0x4d   : > { %2900 = vmatmul.bf16.gmra.mxu2 %v4743_v10  ;;  %v6256_v10 = vld [vmem:[%s6752_s14 + $0x384] sm:$0xf]  ;;  %v5055_v16 = vor.u32 %v6264_v9, %v5054_v8  ;;  %v5246_v8 = vld [vmem:[%s6752_s14 + $0x500] sm:$0xf] }
  0x4e   : > { %2989 = vmatmul.bf16.gmra.mxu3 %v4747_v11  ;;  %v5056_v11 = vld [vmem:[%s6752_s14 + $0x3c0] sm:$0xf0]  ;;  %v6312_v9 = vld [vmem:[%s6752_s14 + $0x53c] sm:$0xf0] }
  0x4f   : > { %v5059_v17 = vor.u32 %v6256_v10, %v5056_v11  ;;  %v6304_v10 = vld [vmem:[%s6752_s14 + $0x504] sm:$0xf] }
  0x50   : > { %v5248_v11 = vld [vmem:[%s6752_s14 + $0x540] sm:$0xf0] }
  0x5b   : > { %2727 = vmatmul.bf16.gmra.mxu0 %v4799_v24  ;;  %v5126_v24 = vld [vmem:[%s6752_s14 + $0x408] sm:$0xf] }
  0x5c   : > { %2816 = vmatmul.bf16.gmra.mxu1 %v4803_v25  ;;  %v6281_v25 = vld [vmem:[%s6752_s14 + $0x444] sm:$0xf0] }
  0x5d   : > { %2905 = vmatmul.bf16.gmra.mxu2 %v4807_v26  ;;  %v6273_v26 = vld [vmem:[%s6752_s14 + $0x40c] sm:$0xf]  ;;  %v5127_v32 = vor.u32 %v6281_v25, %v5126_v24  ;;  %v5259_v24 = vor.u32 %v6305_v14, %v5256_v15 }
  0x5e   : > { %2994 = vmatmul.bf16.gmra.mxu3 %v4811_v27  ;;  %v5128_v27 = vld [vmem:[%s6752_s14 + $0x448] sm:$0xf0] }
  0x5f   : > { %v5131_v33 = vor.u32 %v6273_v26, %v5128_v27  ;;  %v6449_v27 = vld [vmem:[%s8368_s1 + $0x188] sm:$0xff] }
  0x60   : > { %3244 = vmatpush.bf16.msrb.mxu2 %v6449_v27 }
  0x6b   : > { %2732 = vmatmul.bf16.gmra.mxu0 %v4863_v36  ;;  %v6434_v36 = vld [vmem:[%s8368_s1 + $0x110] sm:$0xff] }
  0x6c   : > { %2821 = vmatmul.bf16.gmra.mxu1 %v4867_v37  ;;  %v6458_v37 = vld [vmem:[%s8368_s1 + $0x1d0] sm:$0xff]  ;;  %3065 = vmatpush.bf16.msrb.mxu0 %v6434_v36 }
  0x6d   : > { %2910 = vmatmul.bf16.gmra.mxu2 %v4871_v38  ;;  %3332 = vmatpush.bf16.msrb.mxu3 %v6458_v37  ;;  %v6441_v37 = vld [vmem:[%s8368_s1 + $0x148] sm:$0xff] }
  0x6e   : > { %2999 = vmatmul.bf16.gmra.mxu3 %v4875_v39  ;;  %3155 = vmatpush.bf16.msrb.mxu1 %v6441_v37  ;;  %v6352_v37 = vld [vmem:[%s6752_s14 + $0x684] sm:$0xf] }
  0x7b   : > { %2737 = vmatmul.bf16.gmra.mxu0 %v4927_v52  ;;  %v6289_v52 = vld [vmem:[%s6752_s14 + $0x48c] sm:$0xf] }
  0x7c   : > { %2826 = vmatmul.bf16.gmra.mxu1 %v4931_v53  ;;  %v5192_v53 = vld [vmem:[%s6752_s14 + $0x4c8] sm:$0xf0] }
  0x7d   : > { %2915 = vmatmul.bf16.gmra.mxu2 %v4935_v54  ;;  %v5195_v62 = vor.u32 %v6289_v52, %v5192_v53 }
  0x7e   : > { %3004 = vmatmul.bf16.gmra.mxu3 %v4939_v55 }
  0x8b   : > { %2742 = vmatmul.bf16.gmra.mxu0 %v4991_v0 }
  0x8c   : > { %2831 = vmatmul.bf16.gmra.mxu1 %v4995_v1 }
  0x8d   : > { %2920 = vmatmul.bf16.gmra.mxu2 %v4999_v2 }
  0x8e   : > { %3009 = vmatmul.bf16.gmra.mxu3 %v5003_v3 }
  0x9b   : > { %2747 = vmatmul.bf16.gmra.mxu0 %v5055_v16 }
  0x9c   : > { %2836 = vmatmul.bf16.gmra.mxu1 %v5059_v17 }
  0x9d   : > { %2925 = vmatmul.bf16.gmra.mxu2 %v5063_v18  ;;  %v5247_v18 = vor.u32 %v6312_v9, %v5246_v8  ;;  %v6345_v8 = vld [vmem:[%s6752_s14 + $0x644] sm:$0xf0]  ;;  %v6337_v9 = vld [vmem:[%s6752_s14 + $0x60c] sm:$0xf] }
  0x9e   : > { %3014 = vmatmul.bf16.gmra.mxu3 %v5067_v19  ;;  %v5251_v19 = vor.u32 %v6304_v10, %v5248_v11  ;;  %v5384_v10 = vld [vmem:[%s6752_s14 + $0x648] sm:$0xf0] }
  0xa8   : > { %v2713_v30 = vpop.f32.mrf.mxu0 }
  0xa9   : > { %v2802_v31 = vpop.f32.mrf.mxu1 }
  0xaa   : > { %v2803_v34 = vadd.f32 %v2802_v31, %v2713_v30 }
  0xab   : > { %2752 = vmatmul.bf16.gmra.mxu0 %v5119_v28  ;;  %v6433_v28 = vld [vmem:[%s8368_s1 + $0x108] sm:$0xff] }
  0xac   : > { %2841 = vmatmul.bf16.gmra.mxu1 %v5123_v29  ;;  %v6457_v29 = vld [vmem:[%s8368_s1 + $0x1c8] sm:$0xff]  ;;  %3066 = vmatpush.bf16.msrb.mxu0 %v6433_v28 }
  0xad   : > { %2930 = vmatmul.bf16.gmra.mxu2 %v5127_v32  ;;  %3333 = vmatpush.bf16.msrb.mxu3 %v6457_v29 }
  0xae   : > { %3019 = vmatmul.bf16.gmra.mxu3 %v5131_v33 }
  0xb0   : > { %v2891_v38 = vpop.f32.mrf.mxu2  ;;  %v2715_v41 = vpop.f32.mrf.mxu0 }
  0xb1   : > { %v2980_v39 = vpop.f32.mrf.mxu3  ;;  %v2892_v40 = vadd.f32 %v2891_v38, %v2803_v34  ;;  %v2804_v42 = vpop.f32.mrf.mxu1  ;;  %v5310_v38 = vld [vmem:[%s6752_s14 + $0x580] sm:$0xf] }
  0xb2   : > { %v2805_v43 = vadd.f32 %v2804_v42, %v2715_v41  ;;  %v5312_v41 = vld [vmem:[%s6752_s14 + $0x5c0] sm:$0xf0]  ;;  %v5318_v42 = vld [vmem:[%s6752_s14 + $0x588] sm:$0xf] }
  0xb3   : > { %v6913_v44 = vadd.f32 %v2980_v39, %v2892_v40  ;;  %v6328_v39 = vld [vmem:[%s6752_s14 + $0x5bc] sm:$0xf0]  ;;  %v6320_v40 = vld [vmem:[%s6752_s14 + $0x584] sm:$0xf] }
  0xb4   : > { %v5311_v49 = vor.u32 %v6328_v39, %v5310_v38  ;;  %v5315_v50 = vor.u32 %v6320_v40, %v5312_v41  ;;  %v5440_v38 = vld [vmem:[%s6752_s14 + $0x6c0] sm:$0xf0]  ;;  %v5446_v39 = vld [vmem:[%s6752_s14 + $0x688] sm:$0xf]  ;;  %v6353_v41 = vld [vmem:[%s6752_s14 + $0x68c] sm:$0xf] }
  0xb5   : > { %v6361_v40 = vld [vmem:[%s6752_s14 + $0x6c4] sm:$0xf0] }
  0xb8   : > { %v2893_v54 = vpop.f32.mrf.mxu2  ;;  %v2718_v59 = vpop.f32.mrf.mxu0 }
  0xb9   : > { %v2982_v55 = vpop.f32.mrf.mxu3  ;;  %v2894_v58 = vadd.f32 %v2893_v54, %v2805_v43  ;;  %v2807_v60 = vpop.f32.mrf.mxu1  ;;  %v6329_v43 = vld [vmem:[%s6752_s14 + $0x5c4] sm:$0xf0] }
  0xba   : > { %v2808_v63 = vadd.f32 %v2807_v60, %v2718_v59  ;;  %v5319_v54 = vor.u32 %v6329_v43, %v5318_v42  ;;  %v5448_v42 = vld [vmem:[%s6752_s14 + $0x6c8] sm:$0xf0] }
  0xbb   : > { %v6926_v0 = vadd.f32 %v2982_v55, %v2894_v58  ;;  %2757 = vmatmul.bf16.gmra.mxu0 %v5183_v56  ;;  %v5323_v55 = vor.u32 %v6321_v45, %v5320_v46 }
  0xbc   : > { %2846 = vmatmul.bf16.gmra.mxu1 %v5187_v57 }
  0xbd   : > { %2935 = vmatmul.bf16.gmra.mxu2 %v5191_v61 }
  0xbe   : > { %3024 = vmatmul.bf16.gmra.mxu3 %v5195_v62 }
  0xc0   : > { %v2896_v1 = vpop.f32.mrf.mxu2  ;;  %v2720_v4 = vpop.f32.mrf.mxu0 }
  0xc1   : > { %v2985_v2 = vpop.f32.mrf.mxu3  ;;  %v2897_v3 = vadd.f32 %v2896_v1, %v2808_v63  ;;  %v2809_v5 = vpop.f32.mrf.mxu1 }
  0xc2   : > { %v2810_v6 = vadd.f32 %v2809_v5, %v2720_v4  ;;  %v6336_v4 = vld [vmem:[%s6752_s14 + $0x604] sm:$0xf] }
  0xc3   : > { %v6928_v7 = vadd.f32 %v2985_v2, %v2897_v3  ;;  %v5374_v2 = vld [vmem:[%s6752_s14 + $0x600] sm:$0xf]  ;;  %v5376_v5 = vld [vmem:[%s6752_s14 + $0x640] sm:$0xf0] }
  0xc4   : > { %v6344_v3 = vld [vmem:[%s6752_s14 + $0x63c] sm:$0xf0]  ;;  %v5379_v14 = vor.u32 %v6336_v4, %v5376_v5  ;;  %v5504_v4 = vld [vmem:[%s6752_s14 + $0x740] sm:$0xf0]  ;;  %v5510_v5 = vld [vmem:[%s6752_s14 + $0x708] sm:$0xf] }
  0xc5   : > { %v5375_v13 = vor.u32 %v6344_v3, %v5374_v2  ;;  %v6376_v2 = vld [vmem:[%s6752_s14 + $0x73c] sm:$0xf0]  ;;  %v6368_v3 = vld [vmem:[%s6752_s14 + $0x704] sm:$0xf] }
  0xc8   : > { %v2898_v16 = vpop.f32.mrf.mxu2  ;;  %v2723_v21 = vpop.f32.mrf.mxu0 }
  0xc9   : > { %v2987_v17 = vpop.f32.mrf.mxu3  ;;  %v2899_v20 = vadd.f32 %v2898_v16, %v2810_v6  ;;  %v2812_v22 = vpop.f32.mrf.mxu1  ;;  %v5382_v6 = vld [vmem:[%s6752_s14 + $0x608] sm:$0xf] }
  0xca   : > { %v2813_v25 = vadd.f32 %v2812_v22, %v2723_v21  ;;  %v6448_v22 = vld [vmem:[%s8368_s1 + $0x180] sm:$0xff] }
  0xcb   : > { %v6938_v26 = vadd.f32 %v2987_v17, %v2899_v20  ;;  %2762 = vmatmul.bf16.gmra.mxu0 %v5247_v18  ;;  %v5383_v18 = vor.u32 %v6345_v8, %v5382_v6  ;;  %3245 = vmatpush.bf16.msrb.mxu2 %v6448_v22  ;;  %v6377_v6 = vld [vmem:[%s6752_s14 + $0x744] sm:$0xf0]  ;;  %v6369_v8 = vld [vmem:[%s6752_s14 + $0x70c] sm:$0xf]  ;;  %v6487_v22 = vld [vmem:[%s8368_s1 + $0x2b8] sm:$0xff] }
  0xcc   : > { %2851 = vmatmul.bf16.gmra.mxu1 %v5251_v19  ;;  %v5387_v19 = vor.u32 %v6337_v9, %v5384_v10  ;;  %v5512_v9 = vld [vmem:[%s6752_s14 + $0x748] sm:$0xf0] }
  0xcd   : > { %2940 = vmatmul.bf16.gmra.mxu2 %v5255_v23  ;;  %v6432_v23 = vld [vmem:[%s8368_s1 + $0x100] sm:$0xff] }
  0xce   : > { %3029 = vmatmul.bf16.gmra.mxu3 %v5259_v24  ;;  %v6456_v24 = vld [vmem:[%s8368_s1 + $0x1c0] sm:$0xff]  ;;  %3067 = vmatpush.bf16.msrb.mxu0 %v6432_v23  ;;  %v6471_v23 = vld [vmem:[%s8368_s1 + $0x238] sm:$0xff] }
  0xcf   : > { %3334 = vmatpush.bf16.msrb.mxu3 %v6456_v24  ;;  %v6495_v24 = vld [vmem:[%s8368_s1 + $0x2f8] sm:$0xff]  ;;  %3594 = vmatpush.bf16.msra.mxu2 %v6487_v22 }
  0xd0   : > { %v2901_v30 = vpop.f32.mrf.mxu2  ;;  %v2725_v33 = vpop.f32.mrf.mxu0 }
  0xd1   : > { %v2990_v31 = vpop.f32.mrf.mxu3  ;;  %v2902_v32 = vadd.f32 %v2901_v30, %v2813_v25  ;;  %v2814_v34 = vpop.f32.mrf.mxu1 }
  0xd2   : > { %v2815_v35 = vadd.f32 %v2814_v34, %v2725_v33  ;;  %v6440_v33 = vld [vmem:[%s8368_s1 + $0x140] sm:$0xff]  ;;  %3416 = vmatpush.bf16.msra.mxu0 %v6471_v23 }
  0xd3   : > { %v6949_v36 = vadd.f32 %v2990_v31, %v2902_v32  ;;  %v5438_v34 = vld [vmem:[%s6752_s14 + $0x680] sm:$0xf]  ;;  %3156 = vmatpush.bf16.msrb.mxu1 %v6440_v33  ;;  %3683 = vmatpush.bf16.msra.mxu3 %v6495_v24 }
  0xd8   : > { %v2903_v47 = vpop.f32.mrf.mxu2  ;;  %v2728_v52 = vpop.f32.mrf.mxu0 }
  0xd9   : > { %v2992_v48 = vpop.f32.mrf.mxu3  ;;  %v2904_v51 = vadd.f32 %v2903_v47, %v2815_v35  ;;  %v2817_v53 = vpop.f32.mrf.mxu1  ;;  %v6360_v35 = vld [vmem:[%s6752_s14 + $0x6bc] sm:$0xf0]  ;;  %v5443_v47 = vor.u32 %v6352_v37, %v5440_v38  ;;  %v6384_v38 = vld [vmem:[%s6752_s14 + $0x784] sm:$0xf] }
  0xda   : > { %v2818_v56 = vadd.f32 %v2817_v53, %v2728_v52  ;;  %v5439_v46 = vor.u32 %v6360_v35, %v5438_v34  ;;  %v5451_v52 = vor.u32 %v6353_v41, %v5448_v42  ;;  %v6479_v34 = vld [vmem:[%s8368_s1 + $0x278] sm:$0xff]  ;;  %v5566_v35 = vld [vmem:[%s6752_s14 + $0x780] sm:$0xf]  ;;  %v6393_v41 = vld [vmem:[%s6752_s14 + $0x7c4] sm:$0xf0] }
  0xdb   : > { %v6962_v57 = vadd.f32 %v2992_v48, %v2904_v51  ;;  %2767 = vmatmul.bf16.gmra.mxu0 %v5311_v49  ;;  %v5447_v51 = vor.u32 %v6361_v40, %v5446_v39  ;;  %v6392_v37 = vld [vmem:[%s6752_s14 + $0x7bc] sm:$0xf0]  ;;  %v5568_v39 = vld [vmem:[%s6752_s14 + $0x7c0] sm:$0xf0]  ;;  %v5574_v40 = vld [vmem:[%s6752_s14 + $0x788] sm:$0xf]  ;;  %3505 = vmatpush.bf16.msra.mxu1 %v6479_v34 }
  0xdc   : > { %2856 = vmatmul.bf16.gmra.mxu1 %v5315_v50  ;;  %v6385_v42 = vld [vmem:[%s6752_s14 + $0x78c] sm:$0xf] }
  0xdd   : > { %2945 = vmatmul.bf16.gmra.mxu2 %v5319_v54 }
  0xde   : > { %3034 = vmatmul.bf16.gmra.mxu3 %v5323_v55 }
  0xe0   : > { %v2906_v58 = vpop.f32.mrf.mxu2  ;;  %v2730_v61 = vpop.f32.mrf.mxu0 }
  0xe1   : > { %v2995_v59 = vpop.f32.mrf.mxu3  ;;  %v2907_v60 = vadd.f32 %v2906_v58, %v2818_v56  ;;  %v2819_v62 = vpop.f32.mrf.mxu1 }
  0xe2   : > { %v2820_v63 = vadd.f32 %v2819_v62, %v2730_v61 }
  0xe3   : > { %v6964_v1 = vadd.f32 %v2995_v59, %v2907_v60 }
  0xe8   : > { %v2908_v11 = vpop.f32.mrf.mxu2  ;;  %v2733_v16 = vpop.f32.mrf.mxu0 }
  0xe9   : > { %v2997_v12 = vpop.f32.mrf.mxu3  ;;  %v2909_v15 = vadd.f32 %v2908_v11, %v2820_v63  ;;  %v2822_v17 = vpop.f32.mrf.mxu1  ;;  %v5502_v63 = vld [vmem:[%s6752_s14 + $0x700] sm:$0xf] }
  0xea   : > { %v2823_v20 = vadd.f32 %v2822_v17, %v2733_v16  ;;  %v5511_v17 = vor.u32 %v6377_v6, %v5510_v5  ;;  %v6154_v5 = vld [vmem:[%s6752_s14 + $0x4c] sm:$0xf0]  ;;  %v6146_v6 = vld [vmem:[%s6752_s14 + $0x14] sm:$0xf] }
  0xeb   : > { %v6974_v21 = vadd.f32 %v2997_v12, %v2909_v15  ;;  %2772 = vmatmul.bf16.gmra.mxu0 %v5375_v13  ;;  %v5503_v12 = vor.u32 %v6376_v2, %v5502_v63  ;;  %v5507_v13 = vor.u32 %v6368_v3, %v5504_v4  ;;  %v4622_v4 = vld [vmem:[%s6752_s14 + $0x10] sm:$0xf] }
  0xec   : > { %2861 = vmatmul.bf16.gmra.mxu1 %v5379_v14 }
  0xed   : > { %2950 = vmatmul.bf16.gmra.mxu2 %v5383_v18  ;;  %v5515_v18 = vor.u32 %v6369_v8, %v5512_v9  ;;  %v4624_v8 = vld [vmem:[%s6752_s14 + $0x50] sm:$0xf0]  ;;  %v4630_v9 = vld [vmem:[%s6752_s14 + $0x18] sm:$0xf] }
  0xee   : > { %3039 = vmatmul.bf16.gmra.mxu3 %v5387_v19 }
  0xf0   : > { %v2911_v25 = vpop.f32.mrf.mxu2  ;;  %v2735_v29 = vpop.f32.mrf.mxu0 }
  0xf1   : > { %v3000_v27 = vpop.f32.mrf.mxu3  ;;  %v2912_v28 = vadd.f32 %v2911_v25, %v2823_v20  ;;  %v2824_v30 = vpop.f32.mrf.mxu1 }
  0xf2   : > { %v2825_v31 = vadd.f32 %v2824_v30, %v2735_v29 }
  0xf3   : > { %v6985_v32 = vadd.f32 %v3000_v27, %v2912_v28 }
  0xf8   : > { %v2913_v43 = vpop.f32.mrf.mxu2  ;;  %v2738_v49 = vpop.f32.mrf.mxu0 }
  0xf9   : > { %v3002_v45 = vpop.f32.mrf.mxu3  ;;  %v2914_v48 = vadd.f32 %v2913_v43, %v2825_v31  ;;  %v2827_v50 = vpop.f32.mrf.mxu1  ;;  %v5576_v43 = vld [vmem:[%s6752_s14 + $0x7c8] sm:$0xf0] }
  0xfa   : > { %v2828_v53 = vadd.f32 %v2827_v50, %v2738_v49 }
  0xfb   : > { %v6998_v54 = vadd.f32 %v3002_v45, %v2914_v48  ;;  %2777 = vmatmul.bf16.gmra.mxu0 %v5439_v46  ;;  %v5571_v48 = vor.u32 %v6384_v38, %v5568_v39 }
  0xfc   : > { %2866 = vmatmul.bf16.gmra.mxu1 %v5443_v47  ;;  %v5567_v47 = vor.u32 %v6392_v37, %v5566_v35 }
  0xfd   : > { %2955 = vmatmul.bf16.gmra.mxu2 %v5447_v51 }
  0xfe   : > { %3044 = vmatmul.bf16.gmra.mxu3 %v5451_v52  ;;  %v5575_v52 = vor.u32 %v6393_v41, %v5574_v40  ;;  %v6478_v40 = vld [vmem:[%s8368_s1 + $0x270] sm:$0xff] }
  0xff   : > { %v4686_v41 = vld [vmem:[%s6752_s14 + $0x90] sm:$0xf]  ;;  %3506 = vmatpush.bf16.msra.mxu1 %v6478_v40  ;;  %v6469_v40 = vld [vmem:[%s8368_s1 + $0x228] sm:$0xff] }
 0x100   : > { %v2916_v55 = vpop.f32.mrf.mxu2  ;;  %v2740_v59 = vpop.f32.mrf.mxu0 }
 0x101   : > { %v3005_v56 = vpop.f32.mrf.mxu3  ;;  %v2917_v58 = vadd.f32 %v2916_v55, %v2828_v53  ;;  %v2829_v60 = vpop.f32.mrf.mxu1  ;;  %v5579_v53 = vor.u32 %v6385_v42, %v5576_v43  ;;  %v6170_v42 = vld [vmem:[%s6752_s14 + $0xcc] sm:$0xf0]  ;;  %v6162_v43 = vld [vmem:[%s6752_s14 + $0x94] sm:$0xf] }
 0x102   : > { %v2830_v61 = vadd.f32 %v2829_v60, %v2740_v59 }
 0x103   : > { %v7000_v62 = vadd.f32 %v3005_v56, %v2917_v58 }
 0x108   : > { %v2918_v10 = vpop.f32.mrf.mxu2  ;;  %v2743_v15 = vpop.f32.mrf.mxu0 }
 0x109   : > { %v3007_v11 = vpop.f32.mrf.mxu3  ;;  %v2919_v14 = vadd.f32 %v2918_v10, %v2830_v61  ;;  %v2832_v16 = vpop.f32.mrf.mxu1  ;;  %v6155_v10 = vld [vmem:[%s6752_s14 + $0x54] sm:$0xf0] }
 0x10a   : > { %v2833_v19 = vadd.f32 %v2832_v16, %v2743_v15  ;;  %v4623_v15 = vor.u32 %v6154_v5, %v4622_v4  ;;  %v4627_v16 = vor.u32 %v6146_v6, %v4624_v8  ;;  %v4631_v22 = vor.u32 %v6155_v10, %v4630_v9 }
 0x10b   : > { %v7010_v20 = vadd.f32 %v3007_v11, %v2919_v14  ;;  %2782 = vmatmul.bf16.gmra.mxu0 %v5503_v12  ;;  %v6147_v11 = vld [vmem:[%s6752_s14 + $0x1c] sm:$0xf] }
 0x10c   : > { %2871 = vmatmul.bf16.gmra.mxu1 %v5507_v13  ;;  %v4632_v12 = vld [vmem:[%s6752_s14 + $0x58] sm:$0xf0] }
 0x10d   : > { %2960 = vmatmul.bf16.gmra.mxu2 %v5511_v17  ;;  %v4635_v23 = vor.u32 %v6147_v11, %v4632_v12  ;;  %v4750_v12 = vld [vmem:[%s6752_s14 + $0x110] sm:$0xf] }
 0x10e   : > { %3049 = vmatmul.bf16.gmra.mxu3 %v5515_v18 }
 0x110   : > { %v2921_v25 = vpop.f32.mrf.mxu2  ;;  %v2745_v29 = vpop.f32.mrf.mxu0 }
 0x111   : > { %v3010_v27 = vpop.f32.mrf.mxu3  ;;  %v2922_v28 = vadd.f32 %v2921_v25, %v2833_v19  ;;  %v2834_v30 = vpop.f32.mrf.mxu1 }
 0x112   : > { %v2835_v31 = vadd.f32 %v2834_v30, %v2745_v29  ;;  %v6494_v29 = vld [vmem:[%s8368_s1 + $0x2f0] sm:$0xff] }
 0x113   : > { %v7021_v33 = vadd.f32 %v3010_v27, %v2922_v28  ;;  %v6486_v27 = vld [vmem:[%s8368_s1 + $0x2b0] sm:$0xff]  ;;  %3684 = vmatpush.bf16.msra.mxu3 %v6494_v29 }
 0x114   : > { %v6470_v28 = vld [vmem:[%s8368_s1 + $0x230] sm:$0xff]  ;;  %3595 = vmatpush.bf16.msra.mxu2 %v6486_v27 }
 0x115   : > { %3417 = vmatpush.bf16.msra.mxu0 %v6470_v28 }
 0x118   : > { %v2923_v45 = vpop.f32.mrf.mxu2  ;;  %v2748_v50 = vpop.f32.mrf.mxu0 }
 0x119   : > { %v3012_v46 = vpop.f32.mrf.mxu3  ;;  %v2924_v49 = vadd.f32 %v2923_v45, %v2835_v31  ;;  %v2837_v51 = vpop.f32.mrf.mxu1  ;;  %v4688_v45 = vld [vmem:[%s6752_s14 + $0xd0] sm:$0xf0]  ;;  %3418 = vmatpush.bf16.msra.mxu0 %v6469_v40 }
 0x11a   : > { %v2838_v55 = vadd.f32 %v2837_v51, %v2748_v50 }
 0x11b   : > { %v7034_v56 = vadd.f32 %v3012_v46, %v2924_v49  ;;  %2787 = vmatmul.bf16.gmra.mxu0 %v5567_v47  ;;  %v4694_v46 = vld [vmem:[%s6752_s14 + $0x98] sm:$0xf]  ;;  %v4696_v49 = vld [vmem:[%s6752_s14 + $0xd8] sm:$0xf0] }
 0x11c   : > { %2876 = vmatmul.bf16.gmra.mxu1 %v5571_v48  ;;  %v6171_v47 = vld [vmem:[%s6752_s14 + $0xd4] sm:$0xf0]  ;;  %v6163_v48 = vld [vmem:[%s6752_s14 + $0x9c] sm:$0xf] }
 0x11d   : > { %2965 = vmatmul.bf16.gmra.mxu2 %v5575_v52  ;;  %v4687_v52 = vor.u32 %v6170_v42, %v4686_v41  ;;  %v6493_v41 = vld [vmem:[%s8368_s1 + $0x2e8] sm:$0xff] }
 0x11e   : > { %3054 = vmatmul.bf16.gmra.mxu3 %v5579_v53  ;;  %v4691_v53 = vor.u32 %v6162_v43, %v4688_v45 }
 0x11f   : > { %3685 = vmatpush.bf16.msra.mxu3 %v6493_v41 }
 0x120   : > { %v2926_v58 = vpop.f32.mrf.mxu2  ;;  %v2750_v61 = vpop.f32.mrf.mxu0 }
 0x121   : > { %v3015_v59 = vpop.f32.mrf.mxu3  ;;  %v2927_v60 = vadd.f32 %v2926_v58, %v2838_v55  ;;  %v2839_v63 = vpop.f32.mrf.mxu1 }
 0x122   : > { %v2840_v2 = vadd.f32 %v2839_v63, %v2750_v61  ;;  %v4699_v61 = vor.u32 %v6163_v48, %v4696_v49 }
 0x123   : > { %v7036_v3 = vadd.f32 %v3015_v59, %v2927_v60  ;;  %v4695_v60 = vor.u32 %v6171_v47, %v4694_v46 }
 0x128   : > { %v2928_v13 = vpop.f32.mrf.mxu2  ;;  %v2753_v18 = vpop.f32.mrf.mxu0 }
 0x129   : > { %v3017_v14 = vpop.f32.mrf.mxu3  ;;  %v2929_v17 = vadd.f32 %v2928_v13, %v2840_v2  ;;  %v2842_v19 = vpop.f32.mrf.mxu1  ;;  %v6186_v13 = vld [vmem:[%s6752_s14 + $0x14c] sm:$0xf0] }
 0x12a   : > { %v2843_v24 = vadd.f32 %v2842_v19, %v2753_v18  ;;  %v6179_v18 = vld [vmem:[%s6752_s14 + $0x11c] sm:$0xf] }
 0x12b   : > { %v7046_v25 = vadd.f32 %v3017_v14, %v2929_v17  ;;  %3068 = vmatmul.bf16.vlgmr.msrb.gmra.mxu0 %v4623_v15  ;;  %v6178_v14 = vld [vmem:[%s6752_s14 + $0x114] sm:$0xf]  ;;  %v6187_v17 = vld [vmem:[%s6752_s14 + $0x154] sm:$0xf0]  ;;  %v4760_v19 = vld [vmem:[%s6752_s14 + $0x158] sm:$0xf0] }
 0x12c   : > { %3157 = vmatmul.bf16.vlgmr.msrb.gmra.mxu1 %v4627_v16  ;;  %v4752_v15 = vld [vmem:[%s6752_s14 + $0x150] sm:$0xf0]  ;;  %v4758_v16 = vld [vmem:[%s6752_s14 + $0x118] sm:$0xf] }
 0x12d   : > { %3246 = vmatmul.bf16.vlgmr.msrb.gmra.mxu2 %v4631_v22  ;;  %v4755_v27 = vor.u32 %v6178_v14, %v4752_v15 }
 0x12e   : > { %3335 = vmatmul.bf16.vlgmr.msrb.gmra.mxu3 %v4635_v23 }
 0x130   : > { %v2931_v30 = vpop.f32.mrf.mxu2  ;;  %v2755_v35 = vpop.f32.mrf.mxu0 }
 0x131   : > { %v3020_v31 = vpop.f32.mrf.mxu3  ;;  %v2932_v34 = vadd.f32 %v2931_v30, %v2843_v24  ;;  %v2844_v37 = vpop.f32.mrf.mxu1  ;;  %v4751_v24 = vor.u32 %v6186_v13, %v4750_v12 }
 0x132   : > { %v2845_v38 = vadd.f32 %v2844_v37, %v2755_v35 }
 0x133   : > { %v7057_v39 = vadd.f32 %v3020_v31, %v2932_v34  ;;  %v4759_v31 = vor.u32 %v6187_v17, %v4758_v16  ;;  %v4763_v34 = vor.u32 %v6179_v18, %v4760_v19 }
 0x138   : > { %v2933_v50 = vpop.f32.mrf.mxu2  ;;  %v2758_v58 = vpop.f32.mrf.mxu0 }
 0x139   : > { %v3022_v51 = vpop.f32.mrf.mxu3  ;;  %v2934_v55 = vadd.f32 %v2933_v50, %v2845_v38  ;;  %v2847_v59 = vpop.f32.mrf.mxu1  ;;  %v6485_v38 = vld [vmem:[%s8368_s1 + $0x2a8] sm:$0xff] }
 0x13a   : > { %v2848_v63 = vadd.f32 %v2847_v59, %v2758_v58  ;;  %3596 = vmatpush.bf16.msra.mxu2 %v6485_v38  ;;  %v6477_v50 = vld [vmem:[%s8368_s1 + $0x268] sm:$0xff]  ;;  %v4822_v58 = vld [vmem:[%s6752_s14 + $0x198] sm:$0xf]  ;;  %v4888_v38 = vld [vmem:[%s6752_s14 + $0x258] sm:$0xf0] }
 0x13b   : > { %v7070_v2 = vadd.f32 %v3022_v51, %v2934_v55  ;;  %3073 = vmatmul.bf16.gmra.mxu0 %v4687_v52  ;;  %v4814_v51 = vld [vmem:[%s6752_s14 + $0x190] sm:$0xf]  ;;  %v4816_v55 = vld [vmem:[%s6752_s14 + $0x1d0] sm:$0xf0]  ;;  %3507 = vmatpush.bf16.msra.mxu1 %v6477_v50  ;;  %v6203_v59 = vld [vmem:[%s6752_s14 + $0x1d4] sm:$0xf0] }
 0x13c   : > { %3162 = vmatmul.bf16.gmra.mxu1 %v4691_v53  ;;  %v6202_v52 = vld [vmem:[%s6752_s14 + $0x1cc] sm:$0xf0]  ;;  %v6194_v53 = vld [vmem:[%s6752_s14 + $0x194] sm:$0xf]  ;;  %v4823_v12 = vor.u32 %v6203_v59, %v4822_v58  ;;  %v6492_v58 = vld [vmem:[%s8368_s1 + $0x2e0] sm:$0xff] }
 0x13d   : > { %3251 = vmatmul.bf16.gmra.mxu2 %v4695_v60  ;;  %v6195_v60 = vld [vmem:[%s6752_s14 + $0x19c] sm:$0xf]  ;;  %3686 = vmatpush.bf16.msra.mxu3 %v6492_v58  ;;  %v6251_v58 = vld [vmem:[%s6752_s14 + $0x354] sm:$0xf0] }
 0x13e   : > { %3340 = vmatmul.bf16.gmra.mxu3 %v4699_v61  ;;  %v4824_v61 = vld [vmem:[%s6752_s14 + $0x1d8] sm:$0xf0] }
 0x13f   : > { %v4827_v13 = vor.u32 %v6195_v60, %v4824_v61 }
 0x140   : > { %v2936_v4 = vpop.f32.mrf.mxu2  ;;  %v2760_v8 = vpop.f32.mrf.mxu0 }
 0x141   : > { %v3025_v5 = vpop.f32.mrf.mxu3  ;;  %v2937_v6 = vadd.f32 %v2936_v4, %v2848_v63  ;;  %v2849_v9 = vpop.f32.mrf.mxu1 }
 0x142   : > { %v2850_v10 = vadd.f32 %v2849_v9, %v2760_v8 }
 0x143   : > { %v7072_v11 = vadd.f32 %v3025_v5, %v2937_v6  ;;  %v4815_v5 = vor.u32 %v6202_v52, %v4814_v51  ;;  %v4819_v6 = vor.u32 %v6194_v53, %v4816_v55  ;;  %v6484_v53 = vld [vmem:[%s8368_s1 + $0x2a0] sm:$0xff] }
 0x144   : > { %v6468_v55 = vld [vmem:[%s8368_s1 + $0x220] sm:$0xff]  ;;  %3597 = vmatpush.bf16.msra.mxu2 %v6484_v53  ;;  %v5008_v53 = vld [vmem:[%s6752_s14 + $0x350] sm:$0xf0] }
 0x145   : > { %3419 = vmatpush.bf16.msra.mxu0 %v6468_v55  ;;  %v5014_v55 = vld [vmem:[%s6752_s14 + $0x318] sm:$0xf] }
 0x148   : > { %v2938_v22 = vpop.f32.mrf.mxu2  ;;  %v2763_v29 = vpop.f32.mrf.mxu0 }
 0x149   : > { %v3027_v23 = vpop.f32.mrf.mxu3  ;;  %v2939_v28 = vadd.f32 %v2938_v22, %v2850_v10  ;;  %v2852_v30 = vpop.f32.mrf.mxu1 }
 0x14a   : > { %v2853_v35 = vadd.f32 %v2852_v30, %v2763_v29  ;;  %v6210_v29 = vld [vmem:[%s6752_s14 + $0x214] sm:$0xf] }
 0x14b   : > { %v7082_v37 = vadd.f32 %v3027_v23, %v2939_v28  ;;  %3078 = vmatmul.bf16.gmra.mxu0 %v4751_v24  ;;  %v6218_v28 = vld [vmem:[%s6752_s14 + $0x24c] sm:$0xf0]  ;;  %v4880_v30 = vld [vmem:[%s6752_s14 + $0x250] sm:$0xf0] }
 0x14c   : > { %3167 = vmatmul.bf16.gmra.mxu1 %v4755_v27  ;;  %v4878_v27 = vld [vmem:[%s6752_s14 + $0x210] sm:$0xf] }
 0x14d   : > { %3256 = vmatmul.bf16.gmra.mxu2 %v4759_v31  ;;  %v4886_v31 = vld [vmem:[%s6752_s14 + $0x218] sm:$0xf] }
 0x14e   : > { %3345 = vmatmul.bf16.gmra.mxu3 %v4763_v34  ;;  %v6219_v34 = vld [vmem:[%s6752_s14 + $0x254] sm:$0xf0] }
 0x150   : > { %v2941_v42 = vpop.f32.mrf.mxu2  ;;  %v2765_v46 = vpop.f32.mrf.mxu0 }
 0x151   : > { %v3030_v43 = vpop.f32.mrf.mxu3  ;;  %v2942_v45 = vadd.f32 %v2941_v42, %v2853_v35  ;;  %v2854_v47 = vpop.f32.mrf.mxu1  ;;  %v6211_v35 = vld [vmem:[%s6752_s14 + $0x21c] sm:$0xf]  ;;  %v4879_v42 = vor.u32 %v6218_v28, %v4878_v27 }
 0x152   : > { %v2855_v48 = vadd.f32 %v2854_v47, %v2765_v46  ;;  %v4891_v50 = vor.u32 %v6211_v35, %v4888_v38 }
 0x153   : > { %v7093_v49 = vadd.f32 %v3030_v43, %v2942_v45  ;;  %v4883_v43 = vor.u32 %v6210_v29, %v4880_v30 }
 0x158   : > { %v2943_v63 = vpop.f32.mrf.mxu2  ;;  %v2768_v9 = vpop.f32.mrf.mxu0 }
 0x159   : > { %v3032_v4 = vpop.f32.mrf.mxu3  ;;  %v2944_v8 = vadd.f32 %v2943_v63, %v2855_v48  ;;  %v2857_v10 = vpop.f32.mrf.mxu1  ;;  %v4887_v48 = vor.u32 %v6219_v34, %v4886_v31 }
 0x15a   : > { %v2858_v14 = vadd.f32 %v2857_v10, %v2768_v9  ;;  %v4942_v9 = vld [vmem:[%s6752_s14 + $0x290] sm:$0xf] }
 0x15b   : > { %v7106_v15 = vadd.f32 %v3032_v4, %v2944_v8  ;;  %3083 = vmatmul.bf16.gmra.mxu0 %v4815_v5  ;;  %v6476_v8 = vld [vmem:[%s8368_s1 + $0x260] sm:$0xff]  ;;  %v6234_v10 = vld [vmem:[%s6752_s14 + $0x2cc] sm:$0xf0] }
 0x15c   : > { %3172 = vmatmul.bf16.gmra.mxu1 %v4819_v6 }
 0x15d   : > { %3261 = vmatmul.bf16.gmra.mxu2 %v4823_v12  ;;  %v6226_v12 = vld [vmem:[%s6752_s14 + $0x294] sm:$0xf]  ;;  %3508 = vmatpush.bf16.msra.mxu1 %v6476_v8 }
 0x15e   : > { %3350 = vmatmul.bf16.gmra.mxu3 %v4827_v13  ;;  %v4944_v13 = vld [vmem:[%s6752_s14 + $0x2d0] sm:$0xf0] }
 0x15f   : > { %v4947_v27 = vor.u32 %v6226_v12, %v4944_v13  ;;  %v5015_v12 = vor.u32 %v6251_v58, %v5014_v55 }
 0x160   : > { %v2946_v16 = vpop.f32.mrf.mxu2  ;;  %v2770_v19 = vpop.f32.mrf.mxu0 }
 0x161   : > { %v3035_v17 = vpop.f32.mrf.mxu3  ;;  %v2947_v18 = vadd.f32 %v2946_v16, %v2858_v14  ;;  %v2859_v22 = vpop.f32.mrf.mxu1  ;;  %v4950_v14 = vld [vmem:[%s6752_s14 + $0x298] sm:$0xf] }
 0x162   : > { %v2860_v23 = vadd.f32 %v2859_v22, %v2770_v19  ;;  %v6235_v16 = vld [vmem:[%s6752_s14 + $0x2d4] sm:$0xf0] }
 0x163   : > { %v7108_v24 = vadd.f32 %v3035_v17, %v2947_v18  ;;  %v6227_v17 = vld [vmem:[%s6752_s14 + $0x29c] sm:$0xf]  ;;  %v4951_v31 = vor.u32 %v6235_v16, %v4950_v14 }
 0x164   : > { %v4952_v18 = vld [vmem:[%s6752_s14 + $0x2d8] sm:$0xf0] }
 0x165   : > { %v4955_v34 = vor.u32 %v6227_v17, %v4952_v18  ;;  %v6483_v17 = vld [vmem:[%s8368_s1 + $0x298] sm:$0xff] }
 0x166   : > { %v6467_v18 = vld [vmem:[%s8368_s1 + $0x218] sm:$0xff]  ;;  %3598 = vmatpush.bf16.msra.mxu2 %v6483_v17 }
 0x167   : > { %3420 = vmatpush.bf16.msra.mxu0 %v6467_v18  ;;  %v5134_v18 = vld [vmem:[%s6752_s14 + $0x410] sm:$0xf] }
 0x168   : > { %v2948_v40 = vpop.f32.mrf.mxu2  ;;  %v2773_v46 = vpop.f32.mrf.mxu0 }
 0x169   : > { %v3037_v41 = vpop.f32.mrf.mxu3  ;;  %v2949_v45 = vadd.f32 %v2948_v40, %v2860_v23  ;;  %v2862_v47 = vpop.f32.mrf.mxu1  ;;  %v4943_v23 = vor.u32 %v6234_v10, %v4942_v9 }
 0x16a   : > { %v2863_v51 = vadd.f32 %v2862_v47, %v2773_v46 }
 0x16b   : > { %v7118_v52 = vadd.f32 %v3037_v41, %v2949_v45  ;;  %3088 = vmatmul.bf16.gmra.mxu0 %v4879_v42 }
 0x16c   : > { %3177 = vmatmul.bf16.gmra.mxu1 %v4883_v43 }
 0x16d   : > { %3266 = vmatmul.bf16.gmra.mxu2 %v4887_v48  ;;  %v5006_v48 = vld [vmem:[%s6752_s14 + $0x310] sm:$0xf] }
 0x16e   : > { %3355 = vmatmul.bf16.gmra.mxu3 %v4891_v50  ;;  %v6250_v50 = vld [vmem:[%s6752_s14 + $0x34c] sm:$0xf0] }
 0x170   : > { %v2951_v59 = vpop.f32.mrf.mxu2  ;;  %v2775_v63 = vpop.f32.mrf.mxu0 }
 0x171   : > { %v3040_v60 = vpop.f32.mrf.mxu3  ;;  %v2952_v61 = vadd.f32 %v2951_v59, %v2863_v51  ;;  %v2864_v4 = vpop.f32.mrf.mxu1  ;;  %v6242_v51 = vld [vmem:[%s6752_s14 + $0x314] sm:$0xf]  ;;  %v6243_v59 = vld [vmem:[%s6752_s14 + $0x31c] sm:$0xf] }
 0x172   : > { %v2865_v5 = vadd.f32 %v2864_v4, %v2775_v63  ;;  %v5007_v4 = vor.u32 %v6250_v50, %v5006_v48  ;;  %v5080_v48 = vld [vmem:[%s6752_s14 + $0x3d8] sm:$0xf0] }
 0x173   : > { %v7129_v6 = vadd.f32 %v3040_v60, %v2952_v61  ;;  %v5016_v60 = vld [vmem:[%s6752_s14 + $0x358] sm:$0xf0] }
 0x174   : > { %v5019_v13 = vor.u32 %v6243_v59, %v5016_v60 }
 0x178   : > { %v2953_v19 = vpop.f32.mrf.mxu2  ;;  %v2778_v29 = vpop.f32.mrf.mxu0 }
 0x179   : > { %v3042_v22 = vpop.f32.mrf.mxu3  ;;  %v2954_v28 = vadd.f32 %v2953_v19, %v2865_v5  ;;  %v2867_v30 = vpop.f32.mrf.mxu1  ;;  %v5011_v5 = vor.u32 %v6242_v51, %v5008_v53  ;;  %v6491_v19 = vld [vmem:[%s8368_s1 + $0x2d8] sm:$0xff] }
 0x17a   : > { %v2868_v35 = vadd.f32 %v2867_v30, %v2778_v29  ;;  %3687 = vmatpush.bf16.msra.mxu3 %v6491_v19  ;;  %v6282_v19 = vld [vmem:[%s6752_s14 + $0x44c] sm:$0xf0] }
 0x17b   : > { %v7142_v38 = vadd.f32 %v3042_v22, %v2954_v28  ;;  %3093 = vmatmul.bf16.gmra.mxu0 %v4943_v23 }
 0x17c   : > { %3182 = vmatmul.bf16.gmra.mxu1 %v4947_v27 }
 0x17d   : > { %3271 = vmatmul.bf16.gmra.mxu2 %v4951_v31 }
 0x17e   : > { %3360 = vmatmul.bf16.gmra.mxu3 %v4955_v34  ;;  %v6475_v34 = vld [vmem:[%s8368_s1 + $0x258] sm:$0xff] }
 0x17f   : > { %3509 = vmatpush.bf16.msra.mxu1 %v6475_v34 }
 0x180   : > { %v2956_v40 = vpop.f32.mrf.mxu2  ;;  %v2780_v43 = vpop.f32.mrf.mxu0 }
 0x181   : > { %v3045_v41 = vpop.f32.mrf.mxu3  ;;  %v2957_v42 = vadd.f32 %v2956_v40, %v2868_v35  ;;  %v2869_v45 = vpop.f32.mrf.mxu1  ;;  %v5070_v35 = vld [vmem:[%s6752_s14 + $0x390] sm:$0xf] }
 0x182   : > { %v2870_v46 = vadd.f32 %v2869_v45, %v2780_v43  ;;  %v6266_v40 = vld [vmem:[%s6752_s14 + $0x3cc] sm:$0xf0]  ;;  %v5078_v43 = vld [vmem:[%s6752_s14 + $0x398] sm:$0xf] }
 0x183   : > { %v7144_v47 = vadd.f32 %v3045_v41, %v2957_v42  ;;  %v6258_v41 = vld [vmem:[%s6752_s14 + $0x394] sm:$0xf]  ;;  %v6267_v45 = vld [vmem:[%s6752_s14 + $0x3d4] sm:$0xf0]  ;;  %v5071_v53 = vor.u32 %v6266_v40, %v5070_v35  ;;  %v5135_v40 = vor.u32 %v6282_v19, %v5134_v18 }
 0x184   : > { %v5072_v42 = vld [vmem:[%s6752_s14 + $0x3d0] sm:$0xf0] }
 0x185   : > { %v5075_v55 = vor.u32 %v6258_v41, %v5072_v42  ;;  %v6290_v18 = vld [vmem:[%s6752_s14 + $0x494] sm:$0xf] }
 0x186   : > { %v5200_v19 = vld [vmem:[%s6752_s14 + $0x4d0] sm:$0xf0] }
 0x188   : > { %v2958_v61 = vpop.f32.mrf.mxu2  ;;  %v2783_v9 = vpop.f32.mrf.mxu0 }
 0x189   : > { %v3047_v63 = vpop.f32.mrf.mxu3  ;;  %v2959_v8 = vadd.f32 %v2958_v61, %v2870_v46  ;;  %v2872_v10 = vpop.f32.mrf.mxu1  ;;  %v6259_v46 = vld [vmem:[%s6752_s14 + $0x39c] sm:$0xf]  ;;  %v5079_v61 = vor.u32 %v6267_v45, %v5078_v43 }
 0x18a   : > { %v2873_v14 = vadd.f32 %v2872_v10, %v2783_v9 }
 0x18b   : > { %v7154_v16 = vadd.f32 %v3047_v63, %v2959_v8  ;;  %3098 = vmatmul.bf16.gmra.mxu0 %v5007_v4  ;;  %v5083_v63 = vor.u32 %v6259_v46, %v5080_v48 }
 0x18c   : > { %3187 = vmatmul.bf16.gmra.mxu1 %v5011_v5 }
 0x18d   : > { %3276 = vmatmul.bf16.gmra.mxu2 %v5015_v12 }
 0x18e   : > { %3365 = vmatmul.bf16.gmra.mxu3 %v5019_v13 }
 0x190   : > { %v2961_v22 = vpop.f32.mrf.mxu2  ;;  %v2785_v28 = vpop.f32.mrf.mxu0 }
 0x191   : > { %v3050_v23 = vpop.f32.mrf.mxu3  ;;  %v2962_v27 = vadd.f32 %v2961_v22, %v2873_v14  ;;  %v2874_v29 = vpop.f32.mrf.mxu1  ;;  %v6274_v22 = vld [vmem:[%s6752_s14 + $0x414] sm:$0xf] }
 0x192   : > { %v2875_v30 = vadd.f32 %v2874_v29, %v2785_v28  ;;  %v6283_v28 = vld [vmem:[%s6752_s14 + $0x454] sm:$0xf0]  ;;  %v6275_v29 = vld [vmem:[%s6752_s14 + $0x41c] sm:$0xf] }
 0x193   : > { %v7165_v31 = vadd.f32 %v3050_v23, %v2962_v27  ;;  %v5136_v23 = vld [vmem:[%s6752_s14 + $0x450] sm:$0xf0]  ;;  %v5142_v27 = vld [vmem:[%s6752_s14 + $0x418] sm:$0xf] }
 0x194   : > { %v5139_v41 = vor.u32 %v6274_v22, %v5136_v23  ;;  %v5143_v46 = vor.u32 %v6283_v28, %v5142_v27  ;;  %v5206_v22 = vld [vmem:[%s6752_s14 + $0x498] sm:$0xf]  ;;  %v6291_v27 = vld [vmem:[%s6752_s14 + $0x49c] sm:$0xf] }
 0x195   : > { %v6299_v23 = vld [vmem:[%s6752_s14 + $0x4d4] sm:$0xf0]  ;;  %v5208_v28 = vld [vmem:[%s6752_s14 + $0x4d8] sm:$0xf0] }
 0x198   : > { %v2963_v50 = vpop.f32.mrf.mxu2  ;;  %v2788_v59 = vpop.f32.mrf.mxu0 }
 0x199   : > { %v3052_v51 = vpop.f32.mrf.mxu3  ;;  %v2964_v58 = vadd.f32 %v2963_v50, %v2875_v30  ;;  %v2877_v60 = vpop.f32.mrf.mxu1  ;;  %v5144_v30 = vld [vmem:[%s6752_s14 + $0x458] sm:$0xf0] }
 0x19a   : > { %v2878_v4 = vadd.f32 %v2877_v60, %v2788_v59  ;;  %v5147_v48 = vor.u32 %v6275_v29, %v5144_v30 }
 0x19b   : > { %v7178_v5 = vadd.f32 %v3052_v51, %v2964_v58  ;;  %3103 = vmatmul.bf16.gmra.mxu0 %v5071_v53  ;;  %v6466_v58 = vld [vmem:[%s8368_s1 + $0x210] sm:$0xff] }
 0x19c   : > { %3192 = vmatmul.bf16.gmra.mxu1 %v5075_v55  ;;  %v6482_v55 = vld [vmem:[%s8368_s1 + $0x290] sm:$0xff]  ;;  %3421 = vmatpush.bf16.msra.mxu0 %v6466_v58 }
 0x19d   : > { %3281 = vmatmul.bf16.gmra.mxu2 %v5079_v61 }
 0x19e   : > { %3370 = vmatmul.bf16.gmra.mxu3 %v5083_v63  ;;  %3599 = vmatpush.bf16.msra.mxu2 %v6482_v55 }
 0x1a0   : > { %v2966_v8 = vpop.f32.mrf.mxu2  ;;  %v2790_v12 = vpop.f32.mrf.mxu0 }
 0x1a1   : > { %v3055_v9 = vpop.f32.mrf.mxu3  ;;  %v2967_v10 = vadd.f32 %v2966_v8, %v2878_v4  ;;  %v2879_v13 = vpop.f32.mrf.mxu1 }
 0x1a2   : > { %v2880_v14 = vadd.f32 %v2879_v13, %v2790_v12  ;;  %v5198_v13 = vld [vmem:[%s6752_s14 + $0x490] sm:$0xf] }
 0x1a3   : > { %v7180_v17 = vadd.f32 %v3055_v9, %v2967_v10  ;;  %v6474_v10 = vld [vmem:[%s8368_s1 + $0x250] sm:$0xff] }
 0x1a4   : > { %3510 = vmatpush.bf16.msra.mxu1 %v6474_v10  ;;  %v5270_v10 = vld [vmem:[%s6752_s14 + $0x518] sm:$0xf] }
 0x1a8   : > { %v2968_v34 = vpop.f32.mrf.mxu2  ;;  %v3069_v43 = vpop.f32.mrf.mxu0 }
 0x1a9   : > { %v3057_v35 = vpop.f32.mrf.mxu3  ;;  %v2969_v42 = vadd.f32 %v2968_v34, %v2880_v14  ;;  %v3158_v45 = vpop.f32.mrf.mxu1  ;;  %v3070_v50 = vadd.f32 %v3069_v43, %v6913_v44  ;;  %v6490_v44 = vld [vmem:[%s8368_s1 + $0x2d0] sm:$0xff]  ;;  %v5211_v43 = vor.u32 %v6291_v27, %v5208_v28 }
 0x1aa   : > { %3688 = vmatpush.bf16.msra.mxu3 %v6490_v44  ;;  %v6298_v14 = vld [vmem:[%s6752_s14 + $0x4cc] sm:$0xf0] }
 0x1ab   : > { %v7191_v51 = vadd.f32 %v3057_v35, %v2969_v42  ;;  %v3159_v53 = vadd.f32 %v3158_v45, %v3070_v50  ;;  %3108 = vmatmul.bf16.gmra.mxu0 %v5135_v40  ;;  %v5199_v34 = vor.u32 %v6298_v14, %v5198_v13  ;;  %v5207_v42 = vor.u32 %v6299_v23, %v5206_v22  ;;  %v6307_v13 = vld [vmem:[%s6752_s14 + $0x51c] sm:$0xf] }
 0x1ac   : > { %3197 = vmatmul.bf16.gmra.mxu1 %v5139_v41  ;;  %v5272_v14 = vld [vmem:[%s6752_s14 + $0x558] sm:$0xf0] }
 0x1ad   : > { %3286 = vmatmul.bf16.gmra.mxu2 %v5143_v46 }
 0x1ae   : > { %3375 = vmatmul.bf16.gmra.mxu3 %v5147_v48 }
 0x1b0   : > { %v3247_v59 = vpop.f32.mrf.mxu2  ;;  %v3071_v63 = vpop.f32.mrf.mxu0 }
 0x1b1   : > { %v3336_v60 = vpop.f32.mrf.mxu3  ;;  %v3248_v61 = vadd.f32 %v3247_v59, %v3159_v53  ;;  %v3160_v4 = vpop.f32.mrf.mxu1  ;;  %v3072_v8 = vadd.f32 %v3071_v63, %v6926_v0  ;;  %v5203_v0 = vor.u32 %v6290_v18, %v5200_v19  ;;  %v6314_v63 = vld [vmem:[%s6752_s14 + $0x54c] sm:$0xf0] }
 0x1b3   : > { %v7203_v9 = vadd.f32 %v3336_v60, %v3248_v61  ;;  %v3161_v12 = vadd.f32 %v3160_v4, %v3072_v8  ;;  %v5262_v61 = vld [vmem:[%s6752_s14 + $0x510] sm:$0xf]  ;;  %v6306_v4 = vld [vmem:[%s6752_s14 + $0x514] sm:$0xf] }
 0x1b4   : > { %v5264_v8 = vld [vmem:[%s6752_s14 + $0x550] sm:$0xf0]  ;;  %v5263_v22 = vor.u32 %v6314_v63, %v5262_v61 }
 0x1b5   : > { %v5267_v23 = vor.u32 %v6306_v4, %v5264_v8  ;;  %v6322_v61 = vld [vmem:[%s6752_s14 + $0x594] sm:$0xf]  ;;  %v5334_v4 = vld [vmem:[%s6752_s14 + $0x598] sm:$0xf] }
 0x1b6   : > { %v5328_v63 = vld [vmem:[%s6752_s14 + $0x5d0] sm:$0xf0]  ;;  %v6331_v8 = vld [vmem:[%s6752_s14 + $0x5d4] sm:$0xf0] }
 0x1b8   : > { %v3249_v29 = vpop.f32.mrf.mxu2  ;;  %v3074_v40 = vpop.f32.mrf.mxu0 }
 0x1b9   : > { %v3338_v30 = vpop.f32.mrf.mxu3  ;;  %v3250_v35 = vadd.f32 %v3249_v29, %v3161_v12  ;;  %v3163_v41 = vpop.f32.mrf.mxu1  ;;  %v3075_v45 = vadd.f32 %v3074_v40, %v6928_v7  ;;  %v6315_v12 = vld [vmem:[%s6752_s14 + $0x554] sm:$0xf0]  ;;  %v6481_v40 = vld [vmem:[%s8368_s1 + $0x288] sm:$0xff] }
 0x1ba   : > { %3600 = vmatpush.bf16.msra.mxu2 %v6481_v40 }
 0x1bb   : > { %v7217_v46 = vadd.f32 %v3338_v30, %v3250_v35  ;;  %v3164_v48 = vadd.f32 %v3163_v41, %v3075_v45  ;;  %3113 = vmatmul.bf16.gmra.mxu0 %v5199_v34  ;;  %v5271_v30 = vor.u32 %v6315_v12, %v5270_v10  ;;  %v6465_v41 = vld [vmem:[%s8368_s1 + $0x208] sm:$0xff]  ;;  %v6323_v10 = vld [vmem:[%s6752_s14 + $0x59c] sm:$0xf] }
 0x1bc   : > { %3202 = vmatmul.bf16.gmra.mxu1 %v5203_v0  ;;  %3422 = vmatpush.bf16.msra.mxu0 %v6465_v41  ;;  %v5336_v12 = vld [vmem:[%s6752_s14 + $0x5d8] sm:$0xf0] }
 0x1bd   : > { %3291 = vmatmul.bf16.gmra.mxu2 %v5207_v42 }
 0x1be   : > { %3380 = vmatmul.bf16.gmra.mxu3 %v5211_v43 }
 0x1c0   : > { %v3252_v50 = vpop.f32.mrf.mxu2  ;;  %v3076_v58 = vpop.f32.mrf.mxu0 }
 0x1c1   : > { %v3341_v53 = vpop.f32.mrf.mxu3  ;;  %v3253_v55 = vadd.f32 %v3252_v50, %v3164_v48  ;;  %v3165_v44 = vpop.f32.mrf.mxu1  ;;  %v3077_v7 = vadd.f32 %v3076_v58, %v6938_v26  ;;  %v5275_v26 = vor.u32 %v6307_v13, %v5272_v14  ;;  %v6473_v58 = vld [vmem:[%s8368_s1 + $0x248] sm:$0xff] }
 0x1c2   : > { %3511 = vmatpush.bf16.msra.mxu1 %v6473_v58  ;;  %v5398_v58 = vld [vmem:[%s6752_s14 + $0x618] sm:$0xf] }
 0x1c3   : > { %v7220_v59 = vadd.f32 %v3341_v53, %v3253_v55  ;;  %v3166_v60 = vadd.f32 %v3165_v44, %v3077_v7  ;;  %v5326_v7 = vld [vmem:[%s6752_s14 + $0x590] sm:$0xf] }
 0x1c8   : > { %v3254_v18 = vpop.f32.mrf.mxu2  ;;  %v3079_v28 = vpop.f32.mrf.mxu0 }
 0x1c9   : > { %v3343_v19 = vpop.f32.mrf.mxu3  ;;  %v3255_v27 = vadd.f32 %v3254_v18, %v3166_v60  ;;  %v3168_v29 = vpop.f32.mrf.mxu1  ;;  %v3080_v34 = vadd.f32 %v3079_v28, %v6949_v36  ;;  %v6489_v36 = vld [vmem:[%s8368_s1 + $0x2c8] sm:$0xff]  ;;  %v6330_v60 = vld [vmem:[%s6752_s14 + $0x5cc] sm:$0xf0]  ;;  %v5339_v28 = vor.u32 %v6323_v10, %v5336_v12 }
 0x1ca   : > { %3689 = vmatpush.bf16.msra.mxu3 %v6489_v36  ;;  %v5327_v18 = vor.u32 %v6330_v60, %v5326_v7  ;;  %v6339_v7 = vld [vmem:[%s6752_s14 + $0x61c] sm:$0xf] }
 0x1cb   : > { %v7231_v0 = vadd.f32 %v3343_v19, %v3255_v27  ;;  %v3169_v35 = vadd.f32 %v3168_v29, %v3080_v34  ;;  %3118 = vmatmul.bf16.gmra.mxu0 %v5263_v22  ;;  %v5335_v27 = vor.u32 %v6331_v8, %v5334_v4  ;;  %v5400_v60 = vld [vmem:[%s6752_s14 + $0x658] sm:$0xf0] }
 0x1cc   : > { %3207 = vmatmul.bf16.gmra.mxu1 %v5267_v23 }
 0x1cd   : > { %3296 = vmatmul.bf16.gmra.mxu2 %v5271_v30 }
 0x1ce   : > { %3385 = vmatmul.bf16.gmra.mxu3 %v5275_v26 }
 0x1d0   : > { %v3257_v42 = vpop.f32.mrf.mxu2  ;;  %v3081_v48 = vpop.f32.mrf.mxu0 }
 0x1d1   : > { %v3346_v43 = vpop.f32.mrf.mxu3  ;;  %v3258_v45 = vadd.f32 %v3257_v42, %v3169_v35  ;;  %v3170_v50 = vpop.f32.mrf.mxu1  ;;  %v3082_v53 = vadd.f32 %v3081_v48, %v6962_v57  ;;  %v5331_v57 = vor.u32 %v6322_v61, %v5328_v63  ;;  %v6346_v48 = vld [vmem:[%s6752_s14 + $0x64c] sm:$0xf0] }
 0x1d3   : > { %v7243_v55 = vadd.f32 %v3346_v43, %v3258_v45  ;;  %v3171_v44 = vadd.f32 %v3170_v50, %v3082_v53  ;;  %v5390_v45 = vld [vmem:[%s6752_s14 + $0x610] sm:$0xf]  ;;  %v6338_v50 = vld [vmem:[%s6752_s14 + $0x614] sm:$0xf] }
 0x1d4   : > { %v5392_v53 = vld [vmem:[%s6752_s14 + $0x650] sm:$0xf0]  ;;  %v5391_v4 = vor.u32 %v6346_v48, %v5390_v45 }
 0x1d5   : > { %v5395_v8 = vor.u32 %v6338_v50, %v5392_v53  ;;  %v6354_v45 = vld [vmem:[%s6752_s14 + $0x694] sm:$0xf]  ;;  %v5462_v50 = vld [vmem:[%s6752_s14 + $0x698] sm:$0xf] }
 0x1d6   : > { %v5456_v48 = vld [vmem:[%s6752_s14 + $0x6d0] sm:$0xf0]  ;;  %v6363_v53 = vld [vmem:[%s6752_s14 + $0x6d4] sm:$0xf0] }
 0x1d8   : > { %v3259_v13 = vpop.f32.mrf.mxu2  ;;  %v3084_v22 = vpop.f32.mrf.mxu0 }
 0x1d9   : > { %v3348_v14 = vpop.f32.mrf.mxu3  ;;  %v3260_v19 = vadd.f32 %v3259_v13, %v3171_v44  ;;  %v3173_v23 = vpop.f32.mrf.mxu1  ;;  %v3085_v29 = vadd.f32 %v3084_v22, %v6964_v1  ;;  %v6347_v44 = vld [vmem:[%s6752_s14 + $0x654] sm:$0xf0]  ;;  %v6480_v22 = vld [vmem:[%s8368_s1 + $0x280] sm:$0xff] }
 0x1da   : > { %3601 = vmatpush.bf16.msra.mxu2 %v6480_v22 }
 0x1db   : > { %v7257_v30 = vadd.f32 %v3348_v14, %v3260_v19  ;;  %v3174_v26 = vadd.f32 %v3173_v23, %v3085_v29  ;;  %3123 = vmatmul.bf16.gmra.mxu0 %v5327_v18  ;;  %v5399_v14 = vor.u32 %v6347_v44, %v5398_v58  ;;  %v6464_v23 = vld [vmem:[%s8368_s1 + $0x200] sm:$0xff]  ;;  %v6355_v58 = vld [vmem:[%s6752_s14 + $0x69c] sm:$0xf] }
 0x1dc   : > { %3212 = vmatmul.bf16.gmra.mxu1 %v5331_v57  ;;  %3423 = vmatpush.bf16.msra.mxu0 %v6464_v23  ;;  %v5464_v44 = vld [vmem:[%s6752_s14 + $0x6d8] sm:$0xf0] }
 0x1dd   : > { %3301 = vmatmul.bf16.gmra.mxu2 %v5335_v27 }
 0x1de   : > { %3390 = vmatmul.bf16.gmra.mxu3 %v5339_v28 }
 0x1e0   : > { %v3262_v34 = vpop.f32.mrf.mxu2  ;;  %v3086_v41 = vpop.f32.mrf.mxu0 }
 0x1e1   : > { %v3351_v35 = vpop.f32.mrf.mxu3  ;;  %v3263_v40 = vadd.f32 %v3262_v34, %v3174_v26  ;;  %v3175_v36 = vpop.f32.mrf.mxu1  ;;  %v3087_v1 = vadd.f32 %v3086_v41, %v6974_v21  ;;  %v5403_v21 = vor.u32 %v6339_v7, %v5400_v60  ;;  %v6472_v41 = vld [vmem:[%s8368_s1 + $0x240] sm:$0xff] }
 0x1e2   : > { %3512 = vmatpush.bf16.msra.mxu1 %v6472_v41  ;;  %v5526_v41 = vld [vmem:[%s6752_s14 + $0x718] sm:$0xf] }
 0x1e3   : > { %v7260_v42 = vadd.f32 %v3351_v35, %v3263_v40  ;;  %v3176_v43 = vadd.f32 %v3175_v36, %v3087_v1  ;;  %v5454_v1 = vld [vmem:[%s6752_s14 + $0x690] sm:$0xf] }
 0x1e8   : > { %v3264_v61 = vpop.f32.mrf.mxu2  ;;  %v3089_v12 = vpop.f32.mrf.mxu0 }
 0x1e9   : > { %v3353_v63 = vpop.f32.mrf.mxu3  ;;  %v3265_v10 = vadd.f32 %v3264_v61, %v3176_v43  ;;  %v3178_v13 = vpop.f32.mrf.mxu1  ;;  %v3090_v18 = vadd.f32 %v3089_v12, %v6985_v32  ;;  %v6488_v32 = vld [vmem:[%s8368_s1 + $0x2c0] sm:$0xff]  ;;  %v6362_v43 = vld [vmem:[%s6752_s14 + $0x6cc] sm:$0xf0]  ;;  %v5467_v12 = vor.u32 %v6355_v58, %v5464_v44 }
 0x1ea   : > { %3690 = vmatpush.bf16.msra.mxu3 %v6488_v32  ;;  %v5455_v61 = vor.u32 %v6362_v43, %v5454_v1  ;;  %v6371_v1 = vld [vmem:[%s6752_s14 + $0x71c] sm:$0xf] }
 0x1eb   : > { %v7271_v57 = vadd.f32 %v3353_v63, %v3265_v10  ;;  %v3179_v19 = vadd.f32 %v3178_v13, %v3090_v18  ;;  %3128 = vmatmul.bf16.gmra.mxu0 %v5391_v4  ;;  %v5463_v10 = vor.u32 %v6363_v53, %v5462_v50  ;;  %v5528_v43 = vld [vmem:[%s6752_s14 + $0x758] sm:$0xf0] }
 0x1ec   : > { %3217 = vmatmul.bf16.gmra.mxu1 %v5395_v8 }
 0x1ed   : > { %3306 = vmatmul.bf16.gmra.mxu2 %v5399_v14 }
 0x1ee   : > { %3395 = vmatmul.bf16.gmra.mxu3 %v5403_v21 }
 0x1f0   : > { %v3267_v27 = vpop.f32.mrf.mxu2  ;;  %v3091_v26 = vpop.f32.mrf.mxu0 }
 0x1f1   : > { %v3356_v28 = vpop.f32.mrf.mxu3  ;;  %v3268_v29 = vadd.f32 %v3267_v27, %v3179_v19  ;;  %v3180_v34 = vpop.f32.mrf.mxu1  ;;  %v3092_v35 = vadd.f32 %v3091_v26, %v6998_v54  ;;  %v5459_v54 = vor.u32 %v6354_v45, %v5456_v48  ;;  %v6378_v26 = vld [vmem:[%s6752_s14 + $0x74c] sm:$0xf0] }
 0x1f3   : > { %v7283_v40 = vadd.f32 %v3356_v28, %v3268_v29  ;;  %v3181_v36 = vadd.f32 %v3180_v34, %v3092_v35  ;;  %v5518_v29 = vld [vmem:[%s6752_s14 + $0x710] sm:$0xf]  ;;  %v6370_v34 = vld [vmem:[%s6752_s14 + $0x714] sm:$0xf] }
 0x1f4   : > { %v5520_v35 = vld [vmem:[%s6752_s14 + $0x750] sm:$0xf0]  ;;  %v5519_v50 = vor.u32 %v6378_v26, %v5518_v29 }
 0x1f5   : > { %v5523_v53 = vor.u32 %v6370_v34, %v5520_v35  ;;  %v6386_v29 = vld [vmem:[%s6752_s14 + $0x794] sm:$0xf]  ;;  %v5590_v34 = vld [vmem:[%s6752_s14 + $0x798] sm:$0xf] }
 0x1f6   : > { %v5584_v26 = vld [vmem:[%s6752_s14 + $0x7d0] sm:$0xf0]  ;;  %v6395_v35 = vld [vmem:[%s6752_s14 + $0x7d4] sm:$0xf0] }
 0x1f8   : > { %v3269_v7 = vpop.f32.mrf.mxu2  ;;  %v3094_v4 = vpop.f32.mrf.mxu0 }
 0x1f9   : > { %v3358_v60 = vpop.f32.mrf.mxu3  ;;  %v3270_v63 = vadd.f32 %v3269_v7, %v3181_v36  ;;  %v3183_v8 = vpop.f32.mrf.mxu1  ;;  %v3095_v13 = vadd.f32 %v3094_v4, %v7000_v62  ;;  %v6379_v36 = vld [vmem:[%s6752_s14 + $0x754] sm:$0xf0] }
 0x1fa   : > { %v6519_v4 = vld [vmem:[%s8368_s1 + $0x3b8] sm:$0xff] }
 0x1fb   : > { %v7297_v14 = vadd.f32 %v3358_v60, %v3270_v63  ;;  %v3184_v21 = vadd.f32 %v3183_v8, %v3095_v13  ;;  %3133 = vmatmul.bf16.gmra.mxu0 %v5455_v61  ;;  %v5527_v60 = vor.u32 %v6379_v36, %v5526_v41  ;;  %v6503_v8 = vld [vmem:[%s8368_s1 + $0x338] sm:$0xff]  ;;  %3950 = vmatpush.bf16.msrb.mxu2 %v6519_v4 }
 0x1fc   : > { %3222 = vmatmul.bf16.gmra.mxu1 %v5459_v54  ;;  %3772 = vmatpush.bf16.msrb.mxu0 %v6503_v8  ;;  %v6387_v41 = vld [vmem:[%s6752_s14 + $0x79c] sm:$0xf] }
 0x1fd   : > { %3311 = vmatmul.bf16.gmra.mxu2 %v5463_v10  ;;  %v5592_v36 = vld [vmem:[%s6752_s14 + $0x7d8] sm:$0xf0] }
 0x1fe   : > { %3400 = vmatmul.bf16.gmra.mxu3 %v5467_v12 }
 0x200   : > { %v3272_v18 = vpop.f32.mrf.mxu2  ;;  %v3096_v23 = vpop.f32.mrf.mxu0 }
 0x201   : > { %v3361_v19 = vpop.f32.mrf.mxu3  ;;  %v3273_v22 = vadd.f32 %v3272_v18, %v3184_v21  ;;  %v3185_v32 = vpop.f32.mrf.mxu1  ;;  %v3097_v62 = vadd.f32 %v3096_v23, %v7010_v20  ;;  %v5531_v20 = vor.u32 %v6371_v1, %v5528_v43  ;;  %v6511_v23 = vld [vmem:[%s8368_s1 + $0x378] sm:$0xff] }
 0x202   : > { %3861 = vmatpush.bf16.msrb.mxu1 %v6511_v23  ;;  %v4646_v23 = vld [vmem:[%s6752_s14 + $0x28] sm:$0xf] }
 0x203   : > { %v7300_v27 = vadd.f32 %v3361_v19, %v3273_v22  ;;  %v3186_v28 = vadd.f32 %v3185_v32, %v3097_v62  ;;  %v5582_v62 = vld [vmem:[%s6752_s14 + $0x790] sm:$0xf] }
 0x208   : > { %v3274_v45 = vpop.f32.mrf.mxu2  ;;  %v3099_v44 = vpop.f32.mrf.mxu0 }
 0x209   : > { %v3363_v48 = vpop.f32.mrf.mxu3  ;;  %v3275_v58 = vadd.f32 %v3274_v45, %v3186_v28  ;;  %v3188_v7 = vpop.f32.mrf.mxu1  ;;  %v3100_v61 = vadd.f32 %v3099_v44, %v7021_v33  ;;  %v6527_v33 = vld [vmem:[%s8368_s1 + $0x3f8] sm:$0xff]  ;;  %v6394_v28 = vld [vmem:[%s6752_s14 + $0x7cc] sm:$0xf0]  ;;  %v5595_v44 = vor.u32 %v6387_v41, %v5592_v36 }
 0x20a   : > { %4039 = vmatpush.bf16.msrb.mxu3 %v6527_v33  ;;  %v5583_v45 = vor.u32 %v6394_v28, %v5582_v62  ;;  %v6149_v62 = vld [vmem:[%s6752_s14 + $0x2c] sm:$0xf] }
 0x20b   : > { %v7311_v54 = vadd.f32 %v3363_v48, %v3275_v58  ;;  %v3189_v63 = vadd.f32 %v3188_v7, %v3100_v61  ;;  %3138 = vmatmul.bf16.gmra.mxu0 %v5519_v50  ;;  %v5591_v58 = vor.u32 %v6395_v35, %v5590_v34  ;;  %v4648_v28 = vld [vmem:[%s6752_s14 + $0x68] sm:$0xf0] }
 0x20c   : > { %3227 = vmatmul.bf16.gmra.mxu1 %v5523_v53 }
 0x20d   : > { %3316 = vmatmul.bf16.gmra.mxu2 %v5527_v60 }
 0x20e   : > { %3405 = vmatmul.bf16.gmra.mxu3 %v5531_v20 }
 0x210   : > { %v3277_v10 = vpop.f32.mrf.mxu2  ;;  %v3101_v21 = vpop.f32.mrf.mxu0 }
 0x211   : > { %v3366_v12 = vpop.f32.mrf.mxu3  ;;  %v3278_v13 = vadd.f32 %v3277_v10, %v3189_v63  ;;  %v3190_v18 = vpop.f32.mrf.mxu1  ;;  %v3102_v19 = vadd.f32 %v3101_v21, %v7034_v56  ;;  %v5587_v56 = vor.u32 %v6386_v29, %v5584_v26  ;;  %v6156_v21 = vld [vmem:[%s6752_s14 + $0x5c] sm:$0xf0] }
 0x213   : > { %v7323_v22 = vadd.f32 %v3366_v12, %v3278_v13  ;;  %v3191_v32 = vadd.f32 %v3190_v18, %v3102_v19  ;;  %v4638_v13 = vld [vmem:[%s6752_s14 + $0x20] sm:$0xf]  ;;  %v6148_v18 = vld [vmem:[%s6752_s14 + $0x24] sm:$0xf] }
 0x214   : > { %v4640_v19 = vld [vmem:[%s6752_s14 + $0x60] sm:$0xf0]  ;;  %v4639_v34 = vor.u32 %v6156_v21, %v4638_v13 }
 0x215   : > { %v4643_v35 = vor.u32 %v6148_v18, %v4640_v19  ;;  %v6164_v13 = vld [vmem:[%s6752_s14 + $0xa4] sm:$0xf]  ;;  %v4710_v18 = vld [vmem:[%s6752_s14 + $0xa8] sm:$0xf] }
 0x216   : > { %v4704_v21 = vld [vmem:[%s6752_s14 + $0xe0] sm:$0xf0]  ;;  %v6173_v19 = vld [vmem:[%s6752_s14 + $0xe4] sm:$0xf0] }
 0x218   : > { %v3279_v1 = vpop.f32.mrf.mxu2  ;;  %v3104_v50 = vpop.f32.mrf.mxu0 }
 0x219   : > { %v3368_v43 = vpop.f32.mrf.mxu3  ;;  %v3280_v48 = vadd.f32 %v3279_v1, %v3191_v32  ;;  %v3193_v53 = vpop.f32.mrf.mxu1  ;;  %v3105_v7 = vadd.f32 %v3104_v50, %v7036_v3  ;;  %v6157_v32 = vld [vmem:[%s6752_s14 + $0x64] sm:$0xf0]  ;;  %v6518_v50 = vld [vmem:[%s8368_s1 + $0x3b0] sm:$0xff] }
 0x21a   : > { %3951 = vmatpush.bf16.msrb.mxu2 %v6518_v50 }
 0x21b   : > { %v7337_v60 = vadd.f32 %v3368_v43, %v3280_v48  ;;  %v3194_v20 = vadd.f32 %v3193_v53, %v3105_v7  ;;  %3143 = vmatmul.bf16.gmra.mxu0 %v5583_v45  ;;  %v4647_v43 = vor.u32 %v6157_v32, %v4646_v23  ;;  %v6502_v53 = vld [vmem:[%s8368_s1 + $0x330] sm:$0xff]  ;;  %v6165_v23 = vld [vmem:[%s6752_s14 + $0xac] sm:$0xf] }
 0x21c   : > { %3232 = vmatmul.bf16.gmra.mxu1 %v5587_v56  ;;  %3773 = vmatpush.bf16.msrb.mxu0 %v6502_v53  ;;  %v4712_v32 = vld [vmem:[%s6752_s14 + $0xe8] sm:$0xf0] }
 0x21d   : > { %3321 = vmatmul.bf16.gmra.mxu2 %v5591_v58 }
 0x21e   : > { %3410 = vmatmul.bf16.gmra.mxu3 %v5595_v44 }
 0x220   : > { %v3282_v61 = vpop.f32.mrf.mxu2  ;;  %v3106_v8 = vpop.f32.mrf.mxu0 }
 0x221   : > { %v3371_v63 = vpop.f32.mrf.mxu3  ;;  %v3283_v4 = vadd.f32 %v3282_v61, %v3194_v20  ;;  %v3195_v33 = vpop.f32.mrf.mxu1  ;;  %v3107_v3 = vadd.f32 %v3106_v8, %v7046_v25  ;;  %v4651_v25 = vor.u32 %v6149_v62, %v4648_v28  ;;  %v6510_v8 = vld [vmem:[%s8368_s1 + $0x370] sm:$0xff] }
 0x222   : > { %3862 = vmatpush.bf16.msrb.mxu1 %v6510_v8  ;;  %v4774_v8 = vld [vmem:[%s6752_s14 + $0x128] sm:$0xf] }
 0x223   : > { %v7340_v10 = vadd.f32 %v3371_v63, %v3283_v4  ;;  %v3196_v12 = vadd.f32 %v3195_v33, %v3107_v3  ;;  %v4702_v3 = vld [vmem:[%s6752_s14 + $0xa0] sm:$0xf] }
 0x228   : > { %v3284_v29 = vpop.f32.mrf.mxu2  ;;  %v3109_v36 = vpop.f32.mrf.mxu0 }
 0x229   : > { %v3373_v26 = vpop.f32.mrf.mxu3  ;;  %v3285_v41 = vadd.f32 %v3284_v29, %v3196_v12  ;;  %v3198_v1 = vpop.f32.mrf.mxu1  ;;  %v3110_v45 = vadd.f32 %v3109_v36, %v7057_v39  ;;  %v6526_v39 = vld [vmem:[%s8368_s1 + $0x3f0] sm:$0xff]  ;;  %v6172_v12 = vld [vmem:[%s6752_s14 + $0xdc] sm:$0xf0]  ;;  %v4715_v36 = vor.u32 %v6165_v23, %v4712_v32 }
 0x22a   : > { %4040 = vmatpush.bf16.msrb.mxu3 %v6526_v39  ;;  %v4703_v29 = vor.u32 %v6172_v12, %v4702_v3  ;;  %v6181_v3 = vld [vmem:[%s6752_s14 + $0x12c] sm:$0xf] }
 0x22b   : > { %v7351_v56 = vadd.f32 %v3373_v26, %v3285_v41  ;;  %v3199_v48 = vadd.f32 %v3198_v1, %v3110_v45  ;;  %3424 = vmatmul.bf16.vlgmr.msra.gmra.mxu0 %v4639_v34  ;;  %v4711_v41 = vor.u32 %v6173_v19, %v4710_v18  ;;  %v4776_v12 = vld [vmem:[%s6752_s14 + $0x168] sm:$0xf0] }
 0x22c   : > { %3513 = vmatmul.bf16.vlgmr.msra.gmra.mxu1 %v4643_v35 }
 0x22d   : > { %3602 = vmatmul.bf16.vlgmr.msra.gmra.mxu2 %v4647_v43 }
 0x22e   : > { %3691 = vmatmul.bf16.vlgmr.msra.gmra.mxu3 %v4651_v25 }
 0x230   : > { %v3287_v58 = vpop.f32.mrf.mxu2  ;;  %v3111_v20 = vpop.f32.mrf.mxu0 }
 0x231   : > { %v3376_v44 = vpop.f32.mrf.mxu3  ;;  %v3288_v7 = vadd.f32 %v3287_v58, %v3199_v48  ;;  %v3200_v61 = vpop.f32.mrf.mxu1  ;;  %v3112_v63 = vadd.f32 %v3111_v20, %v7070_v2  ;;  %v4707_v2 = vor.u32 %v6164_v13, %v4704_v21  ;;  %v6188_v20 = vld [vmem:[%s6752_s14 + $0x15c] sm:$0xf0] }
 0x233   : > { %v7363_v4 = vadd.f32 %v3376_v44, %v3288_v7  ;;  %v3201_v33 = vadd.f32 %v3200_v61, %v3112_v63  ;;  %v4766_v7 = vld [vmem:[%s6752_s14 + $0x120] sm:$0xf]  ;;  %v6180_v61 = vld [vmem:[%s6752_s14 + $0x124] sm:$0xf] }
 0x234   : > { %v4768_v63 = vld [vmem:[%s6752_s14 + $0x160] sm:$0xf0]  ;;  %v4767_v18 = vor.u32 %v6188_v20, %v4766_v7 }
 0x235   : > { %v4771_v19 = vor.u32 %v6180_v61, %v4768_v63  ;;  %v6196_v7 = vld [vmem:[%s6752_s14 + $0x1a4] sm:$0xf]  ;;  %v4838_v61 = vld [vmem:[%s6752_s14 + $0x1a8] sm:$0xf] }
 0x236   : > { %v4832_v20 = vld [vmem:[%s6752_s14 + $0x1e0] sm:$0xf0]  ;;  %v6205_v63 = vld [vmem:[%s6752_s14 + $0x1e4] sm:$0xf0] }
 0x238   : > { %v3289_v62 = vpop.f32.mrf.mxu2  ;;  %v3114_v34 = vpop.f32.mrf.mxu0 }
 0x239   : > { %v3378_v28 = vpop.f32.mrf.mxu3  ;;  %v3290_v26 = vadd.f32 %v3289_v62, %v3201_v33  ;;  %v3203_v35 = vpop.f32.mrf.mxu1  ;;  %v3115_v1 = vadd.f32 %v3114_v34, %v7072_v11  ;;  %v6189_v33 = vld [vmem:[%s6752_s14 + $0x164] sm:$0xf0] }
 0x23a   : > { %v6517_v34 = vld [vmem:[%s8368_s1 + $0x3a8] sm:$0xff] }
 0x23b   : > { %v7377_v43 = vadd.f32 %v3378_v28, %v3290_v26  ;;  %v3204_v25 = vadd.f32 %v3203_v35, %v3115_v1  ;;  %3429 = vmatmul.bf16.gmra.mxu0 %v4703_v29  ;;  %v4775_v28 = vor.u32 %v6189_v33, %v4774_v8  ;;  %v6501_v35 = vld [vmem:[%s8368_s1 + $0x328] sm:$0xff]  ;;  %3952 = vmatpush.bf16.msrb.mxu2 %v6517_v34 }
 0x23c   : > { %3518 = vmatmul.bf16.gmra.mxu1 %v4707_v2  ;;  %3774 = vmatpush.bf16.msrb.mxu0 %v6501_v35  ;;  %v6197_v8 = vld [vmem:[%s6752_s14 + $0x1ac] sm:$0xf] }
 0x23d   : > { %3607 = vmatmul.bf16.gmra.mxu2 %v4711_v41  ;;  %v4840_v33 = vld [vmem:[%s6752_s14 + $0x1e8] sm:$0xf0] }
 0x23e   : > { %3696 = vmatmul.bf16.gmra.mxu3 %v4715_v36 }
 0x240   : > { %v3292_v45 = vpop.f32.mrf.mxu2  ;;  %v3116_v53 = vpop.f32.mrf.mxu0 }
 0x241   : > { %v3381_v48 = vpop.f32.mrf.mxu3  ;;  %v3293_v50 = vadd.f32 %v3292_v45, %v3204_v25  ;;  %v3205_v39 = vpop.f32.mrf.mxu1  ;;  %v3117_v11 = vadd.f32 %v3116_v53, %v7082_v37  ;;  %v4779_v37 = vor.u32 %v6181_v3, %v4776_v12  ;;  %v6509_v53 = vld [vmem:[%s8368_s1 + $0x368] sm:$0xff] }
 0x242   : > { %3863 = vmatpush.bf16.msrb.mxu1 %v6509_v53  ;;  %v4902_v53 = vld [vmem:[%s6752_s14 + $0x228] sm:$0xf] }
 0x243   : > { %v7380_v58 = vadd.f32 %v3381_v48, %v3293_v50  ;;  %v3206_v44 = vadd.f32 %v3205_v39, %v3117_v11  ;;  %v4830_v11 = vld [vmem:[%s6752_s14 + $0x1a0] sm:$0xf] }
 0x248   : > { %v3294_v13 = vpop.f32.mrf.mxu2  ;;  %v3119_v32 = vpop.f32.mrf.mxu0 }
 0x249   : > { %v3383_v21 = vpop.f32.mrf.mxu3  ;;  %v3295_v23 = vadd.f32 %v3294_v13, %v3206_v44  ;;  %v3208_v62 = vpop.f32.mrf.mxu1  ;;  %v3120_v29 = vadd.f32 %v3119_v32, %v7093_v49  ;;  %v6525_v49 = vld [vmem:[%s8368_s1 + $0x3e8] sm:$0xff]  ;;  %v6204_v44 = vld [vmem:[%s6752_s14 + $0x1dc] sm:$0xf0]  ;;  %v4843_v32 = vor.u32 %v6197_v8, %v4840_v33 }
 0x24a   : > { %4041 = vmatpush.bf16.msrb.mxu3 %v6525_v49  ;;  %v4831_v13 = vor.u32 %v6204_v44, %v4830_v11  ;;  %v6213_v11 = vld [vmem:[%s6752_s14 + $0x22c] sm:$0xf] }
 0x24b   : > { %v7391_v2 = vadd.f32 %v3383_v21, %v3295_v23  ;;  %v3209_v26 = vadd.f32 %v3208_v62, %v3120_v29  ;;  %3434 = vmatmul.bf16.gmra.mxu0 %v4767_v18  ;;  %v4839_v23 = vor.u32 %v6205_v63, %v4838_v61  ;;  %v4904_v44 = vld [vmem:[%s6752_s14 + $0x268] sm:$0xf0] }
 0x24c   : > { %3523 = vmatmul.bf16.gmra.mxu1 %v4771_v19 }
 0x24d   : > { %3612 = vmatmul.bf16.gmra.mxu2 %v4775_v28 }
 0x24e   : > { %3701 = vmatmul.bf16.gmra.mxu3 %v4779_v37 }
 0x250   : > { %v3297_v41 = vpop.f32.mrf.mxu2  ;;  %v3121_v25 = vpop.f32.mrf.mxu0 }
 0x251   : > { %v3386_v36 = vpop.f32.mrf.mxu3  ;;  %v3298_v1 = vadd.f32 %v3297_v41, %v3209_v26  ;;  %v3210_v45 = vpop.f32.mrf.mxu1  ;;  %v3122_v48 = vadd.f32 %v3121_v25, %v7106_v15  ;;  %v4835_v15 = vor.u32 %v6196_v7, %v4832_v20  ;;  %v6220_v25 = vld [vmem:[%s6752_s14 + $0x25c] sm:$0xf0] }
 0x253   : > { %v7403_v50 = vadd.f32 %v3386_v36, %v3298_v1  ;;  %v3211_v39 = vadd.f32 %v3210_v45, %v3122_v48  ;;  %v4894_v1 = vld [vmem:[%s6752_s14 + $0x220] sm:$0xf]  ;;  %v6212_v45 = vld [vmem:[%s6752_s14 + $0x224] sm:$0xf] }
 0x254   : > { %v4896_v48 = vld [vmem:[%s6752_s14 + $0x260] sm:$0xf0]  ;;  %v4895_v61 = vor.u32 %v6220_v25, %v4894_v1 }
 0x255   : > { %v4899_v63 = vor.u32 %v6212_v45, %v4896_v48  ;;  %v6228_v1 = vld [vmem:[%s6752_s14 + $0x2a4] sm:$0xf]  ;;  %v4966_v45 = vld [vmem:[%s6752_s14 + $0x2a8] sm:$0xf] }
 0x256   : > { %v4960_v25 = vld [vmem:[%s6752_s14 + $0x2e0] sm:$0xf0]  ;;  %v6237_v48 = vld [vmem:[%s6752_s14 + $0x2e4] sm:$0xf0] }
 0x258   : > { %v3299_v3 = vpop.f32.mrf.mxu2  ;;  %v3124_v18 = vpop.f32.mrf.mxu0 }
 0x259   : > { %v3388_v12 = vpop.f32.mrf.mxu3  ;;  %v3300_v21 = vadd.f32 %v3299_v3, %v3211_v39  ;;  %v3213_v19 = vpop.f32.mrf.mxu1  ;;  %v3125_v62 = vadd.f32 %v3124_v18, %v7108_v24  ;;  %v6221_v39 = vld [vmem:[%s6752_s14 + $0x264] sm:$0xf0]  ;;  %v6516_v18 = vld [vmem:[%s8368_s1 + $0x3a0] sm:$0xff] }
 0x25a   : > { %3953 = vmatpush.bf16.msrb.mxu2 %v6516_v18 }
 0x25b   : > { %v7417_v28 = vadd.f32 %v3388_v12, %v3300_v21  ;;  %v3214_v37 = vadd.f32 %v3213_v19, %v3125_v62  ;;  %3439 = vmatmul.bf16.gmra.mxu0 %v4831_v13  ;;  %v4903_v12 = vor.u32 %v6221_v39, %v4902_v53  ;;  %v6500_v19 = vld [vmem:[%s8368_s1 + $0x320] sm:$0xff]  ;;  %v6229_v53 = vld [vmem:[%s6752_s14 + $0x2ac] sm:$0xf] }
 0x25c   : > { %3528 = vmatmul.bf16.gmra.mxu1 %v4835_v15  ;;  %3775 = vmatpush.bf16.msrb.mxu0 %v6500_v19  ;;  %v4968_v39 = vld [vmem:[%s6752_s14 + $0x2e8] sm:$0xf0] }
 0x25d   : > { %3617 = vmatmul.bf16.gmra.mxu2 %v4839_v23 }
 0x25e   : > { %3706 = vmatmul.bf16.gmra.mxu3 %v4843_v32 }
 0x260   : > { %v3302_v29 = vpop.f32.mrf.mxu2  ;;  %v3126_v35 = vpop.f32.mrf.mxu0 }
 0x261   : > { %v3391_v26 = vpop.f32.mrf.mxu3  ;;  %v3303_v34 = vadd.f32 %v3302_v29, %v3214_v37  ;;  %v3215_v49 = vpop.f32.mrf.mxu1  ;;  %v3127_v24 = vadd.f32 %v3126_v35, %v7118_v52  ;;  %v4907_v52 = vor.u32 %v6213_v11, %v4904_v44  ;;  %v6508_v35 = vld [vmem:[%s8368_s1 + $0x360] sm:$0xff] }
 0x262   : > { %3864 = vmatpush.bf16.msrb.mxu1 %v6508_v35  ;;  %v5030_v35 = vld [vmem:[%s6752_s14 + $0x328] sm:$0xf] }
 0x263   : > { %v7420_v41 = vadd.f32 %v3391_v26, %v3303_v34  ;;  %v3216_v36 = vadd.f32 %v3215_v49, %v3127_v24  ;;  %v4958_v24 = vld [vmem:[%s6752_s14 + $0x2a0] sm:$0xf] }
 0x268   : > { %v3304_v7 = vpop.f32.mrf.mxu2  ;;  %v3129_v33 = vpop.f32.mrf.mxu0 }
 0x269   : > { %v3393_v20 = vpop.f32.mrf.mxu3  ;;  %v3305_v8 = vadd.f32 %v3304_v7, %v3216_v36  ;;  %v3218_v3 = vpop.f32.mrf.mxu1  ;;  %v3130_v13 = vadd.f32 %v3129_v33, %v7129_v6  ;;  %v6524_v6 = vld [vmem:[%s8368_s1 + $0x3e0] sm:$0xff]  ;;  %v4971_v33 = vor.u32 %v6229_v53, %v4968_v39 }
 0x26a   : > { %4042 = vmatpush.bf16.msrb.mxu3 %v6524_v6  ;;  %v6236_v36 = vld [vmem:[%s6752_s14 + $0x2dc] sm:$0xf0] }
 0x26b   : > { %v7431_v15 = vadd.f32 %v3393_v20, %v3305_v8  ;;  %v3219_v21 = vadd.f32 %v3218_v3, %v3130_v13  ;;  %3444 = vmatmul.bf16.gmra.mxu0 %v4895_v61  ;;  %v4959_v7 = vor.u32 %v6236_v36, %v4958_v24  ;;  %v4967_v8 = vor.u32 %v6237_v48, %v4966_v45  ;;  %v6245_v24 = vld [vmem:[%s6752_s14 + $0x32c] sm:$0xf] }
 0x26c   : > { %3533 = vmatmul.bf16.gmra.mxu1 %v4899_v63  ;;  %v5032_v36 = vld [vmem:[%s6752_s14 + $0x368] sm:$0xf0] }
 0x26d   : > { %3622 = vmatmul.bf16.gmra.mxu2 %v4903_v12 }
 0x26e   : > { %3711 = vmatmul.bf16.gmra.mxu3 %v4907_v52 }
 0x270   : > { %v3307_v23 = vpop.f32.mrf.mxu2  ;;  %v3131_v37 = vpop.f32.mrf.mxu0 }
 0x271   : > { %v3396_v32 = vpop.f32.mrf.mxu3  ;;  %v3308_v62 = vadd.f32 %v3307_v23, %v3219_v21  ;;  %v3220_v29 = vpop.f32.mrf.mxu1  ;;  %v3132_v26 = vadd.f32 %v3131_v37, %v7142_v38  ;;  %v4963_v38 = vor.u32 %v6228_v1, %v4960_v25  ;;  %v6252_v37 = vld [vmem:[%s6752_s14 + $0x35c] sm:$0xf0] }
 0x273   : > { %v7443_v34 = vadd.f32 %v3396_v32, %v3308_v62  ;;  %v3221_v49 = vadd.f32 %v3220_v29, %v3132_v26  ;;  %v5022_v62 = vld [vmem:[%s6752_s14 + $0x320] sm:$0xf]  ;;  %v6244_v29 = vld [vmem:[%s6752_s14 + $0x324] sm:$0xf] }
 0x274   : > { %v5024_v26 = vld [vmem:[%s6752_s14 + $0x360] sm:$0xf0]  ;;  %v5023_v45 = vor.u32 %v6252_v37, %v5022_v62 }
 0x275   : > { %v5027_v48 = vor.u32 %v6244_v29, %v5024_v26  ;;  %v6260_v62 = vld [vmem:[%s6752_s14 + $0x3a4] sm:$0xf]  ;;  %v5094_v29 = vld [vmem:[%s6752_s14 + $0x3a8] sm:$0xf] }
 0x276   : > { %v5088_v37 = vld [vmem:[%s6752_s14 + $0x3e0] sm:$0xf0]  ;;  %v6269_v26 = vld [vmem:[%s6752_s14 + $0x3e4] sm:$0xf0] }
 0x278   : > { %v3309_v11 = vpop.f32.mrf.mxu2  ;;  %v3134_v61 = vpop.f32.mrf.mxu0 }
 0x279   : > { %v3398_v44 = vpop.f32.mrf.mxu3  ;;  %v3310_v20 = vadd.f32 %v3309_v11, %v3221_v49  ;;  %v3223_v63 = vpop.f32.mrf.mxu1  ;;  %v3135_v3 = vadd.f32 %v3134_v61, %v7144_v47  ;;  %v6253_v49 = vld [vmem:[%s6752_s14 + $0x364] sm:$0xf0]  ;;  %v6515_v61 = vld [vmem:[%s8368_s1 + $0x398] sm:$0xff] }
 0x27a   : > { %3954 = vmatpush.bf16.msrb.mxu2 %v6515_v61 }
 0x27b   : > { %v7457_v12 = vadd.f32 %v3398_v44, %v3310_v20  ;;  %v3224_v52 = vadd.f32 %v3223_v63, %v3135_v3  ;;  %3449 = vmatmul.bf16.gmra.mxu0 %v4959_v7  ;;  %v5031_v44 = vor.u32 %v6253_v49, %v5030_v35  ;;  %v6499_v63 = vld [vmem:[%s8368_s1 + $0x318] sm:$0xff]  ;;  %v6261_v35 = vld [vmem:[%s6752_s14 + $0x3ac] sm:$0xf] }
 0x27c   : > { %3538 = vmatmul.bf16.gmra.mxu1 %v4963_v38  ;;  %3776 = vmatpush.bf16.msrb.mxu0 %v6499_v63  ;;  %v5096_v49 = vld [vmem:[%s6752_s14 + $0x3e8] sm:$0xf0] }
 0x27d   : > { %3627 = vmatmul.bf16.gmra.mxu2 %v4967_v8 }
 0x27e   : > { %3716 = vmatmul.bf16.gmra.mxu3 %v4971_v33 }
 0x280   : > { %v3312_v13 = vpop.f32.mrf.mxu2  ;;  %v3136_v19 = vpop.f32.mrf.mxu0 }
 0x281   : > { %v3401_v21 = vpop.f32.mrf.mxu3  ;;  %v3313_v18 = vadd.f32 %v3312_v13, %v3224_v52  ;;  %v3225_v6 = vpop.f32.mrf.mxu1  ;;  %v3137_v47 = vadd.f32 %v3136_v19, %v7154_v16  ;;  %v5035_v16 = vor.u32 %v6245_v24, %v5032_v36  ;;  %v6507_v19 = vld [vmem:[%s8368_s1 + $0x358] sm:$0xff] }
 0x282   : > { %3865 = vmatpush.bf16.msrb.mxu1 %v6507_v19  ;;  %v5158_v19 = vld [vmem:[%s6752_s14 + $0x428] sm:$0xf] }
 0x283   : > { %v7460_v23 = vadd.f32 %v3401_v21, %v3313_v18  ;;  %v3226_v32 = vadd.f32 %v3225_v6, %v3137_v47  ;;  %v5086_v47 = vld [vmem:[%s6752_s14 + $0x3a0] sm:$0xf] }
 0x288   : > { %v3314_v1 = vpop.f32.mrf.mxu2  ;;  %v3139_v39 = vpop.f32.mrf.mxu0 }
 0x289   : > { %v3403_v25 = vpop.f32.mrf.mxu3  ;;  %v3315_v53 = vadd.f32 %v3314_v1, %v3226_v32  ;;  %v3228_v11 = vpop.f32.mrf.mxu1  ;;  %v3140_v7 = vadd.f32 %v3139_v39, %v7165_v31  ;;  %v6523_v31 = vld [vmem:[%s8368_s1 + $0x3d8] sm:$0xff]  ;;  %v6268_v32 = vld [vmem:[%s6752_s14 + $0x3dc] sm:$0xf0]  ;;  %v5099_v39 = vor.u32 %v6261_v35, %v5096_v49 }
 0x28a   : > { %4043 = vmatpush.bf16.msrb.mxu3 %v6523_v31  ;;  %v5087_v1 = vor.u32 %v6268_v32, %v5086_v47  ;;  %v6277_v47 = vld [vmem:[%s6752_s14 + $0x42c] sm:$0xf] }
 0x28b   : > { %v7471_v38 = vadd.f32 %v3403_v25, %v3315_v53  ;;  %v3229_v20 = vadd.f32 %v3228_v11, %v3140_v7  ;;  %3454 = vmatmul.bf16.gmra.mxu0 %v5023_v45  ;;  %v5095_v53 = vor.u32 %v6269_v26, %v5094_v29  ;;  %v5160_v32 = vld [vmem:[%s6752_s14 + $0x468] sm:$0xf0] }
 0x28c   : > { %3543 = vmatmul.bf16.gmra.mxu1 %v5027_v48 }
 0x28d   : > { %3632 = vmatmul.bf16.gmra.mxu2 %v5031_v44 }
 0x28e   : > { %3721 = vmatmul.bf16.gmra.mxu3 %v5035_v16 }
 0x290   : > { %v3317_v8 = vpop.f32.mrf.mxu2  ;;  %v3141_v52 = vpop.f32.mrf.mxu0 }
 0x291   : > { %v3406_v33 = vpop.f32.mrf.mxu3  ;;  %v3318_v3 = vadd.f32 %v3317_v8, %v3229_v20  ;;  %v3230_v13 = vpop.f32.mrf.mxu1  ;;  %v3142_v21 = vadd.f32 %v3141_v52, %v7178_v5  ;;  %v5091_v5 = vor.u32 %v6260_v62, %v5088_v37  ;;  %v6284_v52 = vld [vmem:[%s6752_s14 + $0x45c] sm:$0xf0] }
 0x293   : > { %v7483_v18 = vadd.f32 %v3406_v33, %v3318_v3  ;;  %v3231_v6 = vadd.f32 %v3230_v13, %v3142_v21  ;;  %v5150_v3 = vld [vmem:[%s6752_s14 + $0x420] sm:$0xf]  ;;  %v6276_v13 = vld [vmem:[%s6752_s14 + $0x424] sm:$0xf] }
 0x294   : > { %v5152_v21 = vld [vmem:[%s6752_s14 + $0x460] sm:$0xf0]  ;;  %v5151_v29 = vor.u32 %v6284_v52, %v5150_v3 }
 0x295   : > { %v5155_v26 = vor.u32 %v6276_v13, %v5152_v21  ;;  %v6292_v3 = vld [vmem:[%s6752_s14 + $0x4a4] sm:$0xf]  ;;  %v5222_v13 = vld [vmem:[%s6752_s14 + $0x4a8] sm:$0xf] }
 0x296   : > { %v5216_v52 = vld [vmem:[%s6752_s14 + $0x4e0] sm:$0xf0]  ;;  %v6301_v21 = vld [vmem:[%s6752_s14 + $0x4e4] sm:$0xf0] }
 0x298   : > { %v3319_v24 = vpop.f32.mrf.mxu2  ;;  %v3144_v45 = vpop.f32.mrf.mxu0 }
 0x299   : > { %v3408_v36 = vpop.f32.mrf.mxu3  ;;  %v3320_v25 = vadd.f32 %v3319_v24, %v3231_v6  ;;  %v3233_v48 = vpop.f32.mrf.mxu1  ;;  %v3145_v11 = vadd.f32 %v3144_v45, %v7180_v17  ;;  %v6285_v6 = vld [vmem:[%s6752_s14 + $0x464] sm:$0xf0]  ;;  %v6514_v45 = vld [vmem:[%s8368_s1 + $0x390] sm:$0xff] }
 0x29a   : > { %3955 = vmatpush.bf16.msrb.mxu2 %v6514_v45 }
 0x29b   : > { %v7497_v44 = vadd.f32 %v3408_v36, %v3320_v25  ;;  %v3234_v16 = vadd.f32 %v3233_v48, %v3145_v11  ;;  %3459 = vmatmul.bf16.gmra.mxu0 %v5087_v1  ;;  %v5159_v36 = vor.u32 %v6285_v6, %v5158_v19  ;;  %v6498_v48 = vld [vmem:[%s8368_s1 + $0x310] sm:$0xff]  ;;  %v6293_v19 = vld [vmem:[%s6752_s14 + $0x4ac] sm:$0xf] }
 0x29c   : > { %3548 = vmatmul.bf16.gmra.mxu1 %v5091_v5  ;;  %3777 = vmatpush.bf16.msrb.mxu0 %v6498_v48  ;;  %v5224_v6 = vld [vmem:[%s6752_s14 + $0x4e8] sm:$0xf0] }
 0x29d   : > { %3637 = vmatmul.bf16.gmra.mxu2 %v5095_v53 }
 0x29e   : > { %3726 = vmatmul.bf16.gmra.mxu3 %v5099_v39 }
 0x2a0   : > { %v3322_v7 = vpop.f32.mrf.mxu2  ;;  %v3146_v63 = vpop.f32.mrf.mxu0 }
 0x2a1   : > { %v3411_v20 = vpop.f32.mrf.mxu3  ;;  %v3323_v61 = vadd.f32 %v3322_v7, %v3234_v16  ;;  %v3235_v31 = vpop.f32.mrf.mxu1  ;;  %v3147_v17 = vadd.f32 %v3146_v63, %v7191_v51  ;;  %v5163_v51 = vor.u32 %v6277_v47, %v5160_v32  ;;  %v6506_v63 = vld [vmem:[%s8368_s1 + $0x350] sm:$0xff] }
 0x2a2   : > { %3866 = vmatpush.bf16.msrb.mxu1 %v6506_v63  ;;  %v5286_v63 = vld [vmem:[%s6752_s14 + $0x528] sm:$0xf] }
 0x2a3   : > { %v7500_v8 = vadd.f32 %v3411_v20, %v3323_v61  ;;  %v3236_v33 = vadd.f32 %v3235_v31, %v3147_v17  ;;  %v5214_v17 = vld [vmem:[%s6752_s14 + $0x4a0] sm:$0xf] }
 0x2a8   : > { %v3324_v62 = vpop.f32.mrf.mxu2  ;;  %v3425_v49 = vpop.f32.mrf.mxu0 }
 0x2a9   : > { %v3413_v37 = vpop.f32.mrf.mxu3  ;;  %v3325_v35 = vadd.f32 %v3324_v62, %v3236_v33  ;;  %v3514_v24 = vpop.f32.mrf.mxu1  ;;  %v3426_v1 = vadd.f32 %v3425_v49, %v7203_v9  ;;  %v6522_v9 = vld [vmem:[%s8368_s1 + $0x3d0] sm:$0xff]  ;;  %v6300_v33 = vld [vmem:[%s6752_s14 + $0x4dc] sm:$0xf0]  ;;  %v5227_v49 = vor.u32 %v6293_v19, %v5224_v6 }
 0x2aa   : > { %4044 = vmatpush.bf16.msrb.mxu3 %v6522_v9  ;;  %v5215_v62 = vor.u32 %v6300_v33, %v5214_v17  ;;  %v6309_v17 = vld [vmem:[%s6752_s14 + $0x52c] sm:$0xf] }
 0x2ab   : > { %v7511_v5 = vadd.f32 %v3413_v37, %v3325_v35  ;;  %v3515_v25 = vadd.f32 %v3514_v24, %v3426_v1  ;;  %3464 = vmatmul.bf16.gmra.mxu0 %v5151_v29  ;;  %v5223_v35 = vor.u32 %v6301_v21, %v5222_v13  ;;  %v5288_v33 = vld [vmem:[%s6752_s14 + $0x568] sm:$0xf0] }
 0x2ac   : > { %3553 = vmatmul.bf16.gmra.mxu1 %v5155_v26 }
 0x2ad   : > { %3642 = vmatmul.bf16.gmra.mxu2 %v5159_v36 }
 0x2ae   : > { %3731 = vmatmul.bf16.gmra.mxu3 %v5163_v51 }
 0x2b0   : > { %v3603_v53 = vpop.f32.mrf.mxu2  ;;  %v3427_v16 = vpop.f32.mrf.mxu0 }
 0x2b1   : > { %v3692_v39 = vpop.f32.mrf.mxu3  ;;  %v3604_v11 = vadd.f32 %v3603_v53, %v3515_v25  ;;  %v3516_v7 = vpop.f32.mrf.mxu1  ;;  %v3428_v20 = vadd.f32 %v3427_v16, %v7217_v46  ;;  %v5219_v46 = vor.u32 %v6292_v3, %v5216_v52  ;;  %v6316_v16 = vld [vmem:[%s6752_s14 + $0x55c] sm:$0xf0] }
 0x2b3   : > { %v7523_v61 = vadd.f32 %v3692_v39, %v3604_v11  ;;  %v3517_v31 = vadd.f32 %v3516_v7, %v3428_v20  ;;  %v5278_v11 = vld [vmem:[%s6752_s14 + $0x520] sm:$0xf]  ;;  %v6308_v7 = vld [vmem:[%s6752_s14 + $0x524] sm:$0xf] }
 0x2b4   : > { %v5280_v20 = vld [vmem:[%s6752_s14 + $0x560] sm:$0xf0]  ;;  %v5279_v13 = vor.u32 %v6316_v16, %v5278_v11 }
 0x2b5   : > { %v5283_v21 = vor.u32 %v6308_v7, %v5280_v20  ;;  %v6324_v11 = vld [vmem:[%s6752_s14 + $0x5a4] sm:$0xf]  ;;  %v5350_v7 = vld [vmem:[%s6752_s14 + $0x5a8] sm:$0xf] }
 0x2b6   : > { %v5344_v16 = vld [vmem:[%s6752_s14 + $0x5e0] sm:$0xf0]  ;;  %v6333_v20 = vld [vmem:[%s6752_s14 + $0x5e4] sm:$0xf0] }
 0x2b8   : > { %v3605_v47 = vpop.f32.mrf.mxu2  ;;  %v3430_v29 = vpop.f32.mrf.mxu0 }
 0x2b9   : > { %v3694_v32 = vpop.f32.mrf.mxu3  ;;  %v3606_v37 = vadd.f32 %v3605_v47, %v3517_v31  ;;  %v3519_v26 = vpop.f32.mrf.mxu1  ;;  %v3431_v24 = vadd.f32 %v3430_v29, %v7220_v59  ;;  %v6317_v31 = vld [vmem:[%s6752_s14 + $0x564] sm:$0xf0] }
 0x2ba   : > { %v6513_v29 = vld [vmem:[%s8368_s1 + $0x388] sm:$0xff] }
 0x2bb   : > { %v7537_v36 = vadd.f32 %v3694_v32, %v3606_v37  ;;  %v3520_v51 = vadd.f32 %v3519_v26, %v3431_v24  ;;  %3469 = vmatmul.bf16.gmra.mxu0 %v5215_v62  ;;  %v5287_v32 = vor.u32 %v6317_v31, %v5286_v63  ;;  %v6497_v26 = vld [vmem:[%s8368_s1 + $0x308] sm:$0xff]  ;;  %3956 = vmatpush.bf16.msrb.mxu2 %v6513_v29 }
 0x2bc   : > { %3558 = vmatmul.bf16.gmra.mxu1 %v5219_v46  ;;  %3778 = vmatpush.bf16.msrb.mxu0 %v6497_v26  ;;  %v6325_v63 = vld [vmem:[%s6752_s14 + $0x5ac] sm:$0xf] }
 0x2bd   : > { %3647 = vmatmul.bf16.gmra.mxu2 %v5223_v35  ;;  %v5352_v31 = vld [vmem:[%s6752_s14 + $0x5e8] sm:$0xf0] }
 0x2be   : > { %3736 = vmatmul.bf16.gmra.mxu3 %v5227_v49 }
 0x2c0   : > { %v3608_v1 = vpop.f32.mrf.mxu2  ;;  %v3432_v48 = vpop.f32.mrf.mxu0 }
 0x2c1   : > { %v3697_v25 = vpop.f32.mrf.mxu3  ;;  %v3609_v45 = vadd.f32 %v3608_v1, %v3520_v51  ;;  %v3521_v9 = vpop.f32.mrf.mxu1  ;;  %v3433_v59 = vadd.f32 %v3432_v48, %v7231_v0  ;;  %v5291_v0 = vor.u32 %v6309_v17, %v5288_v33  ;;  %v6505_v48 = vld [vmem:[%s8368_s1 + $0x348] sm:$0xff] }
 0x2c2   : > { %3867 = vmatpush.bf16.msrb.mxu1 %v6505_v48  ;;  %v5414_v48 = vld [vmem:[%s6752_s14 + $0x628] sm:$0xf] }
 0x2c3   : > { %v7540_v53 = vadd.f32 %v3697_v25, %v3609_v45  ;;  %v3522_v39 = vadd.f32 %v3521_v9, %v3433_v59  ;;  %v5342_v59 = vld [vmem:[%s6752_s14 + $0x5a0] sm:$0xf] }
 0x2c8   : > { %v3610_v3 = vpop.f32.mrf.mxu2  ;;  %v3435_v6 = vpop.f32.mrf.mxu0 }
 0x2c9   : > { %v3699_v52 = vpop.f32.mrf.mxu3  ;;  %v3611_v19 = vadd.f32 %v3610_v3, %v3522_v39  ;;  %v3524_v47 = vpop.f32.mrf.mxu1  ;;  %v3436_v62 = vadd.f32 %v3435_v6, %v7243_v55  ;;  %v6521_v55 = vld [vmem:[%s8368_s1 + $0x3c8] sm:$0xff]  ;;  %v6332_v39 = vld [vmem:[%s6752_s14 + $0x5dc] sm:$0xf0]  ;;  %v5355_v6 = vor.u32 %v6325_v63, %v5352_v31 }
 0x2ca   : > { %4045 = vmatpush.bf16.msrb.mxu3 %v6521_v55  ;;  %v5343_v3 = vor.u32 %v6332_v39, %v5342_v59  ;;  %v6341_v59 = vld [vmem:[%s6752_s14 + $0x62c] sm:$0xf] }
 0x2cb   : > { %v7551_v46 = vadd.f32 %v3699_v52, %v3611_v19  ;;  %v3525_v37 = vadd.f32 %v3524_v47, %v3436_v62  ;;  %3474 = vmatmul.bf16.gmra.mxu0 %v5279_v13  ;;  %v5351_v19 = vor.u32 %v6333_v20, %v5350_v7  ;;  %v5416_v39 = vld [vmem:[%s6752_s14 + $0x668] sm:$0xf0] }
 0x2cc   : > { %3563 = vmatmul.bf16.gmra.mxu1 %v5283_v21 }
 0x2cd   : > { %3652 = vmatmul.bf16.gmra.mxu2 %v5287_v32 }
 0x2ce   : > { %3741 = vmatmul.bf16.gmra.mxu3 %v5291_v0 }
 0x2d0   : > { %v3613_v35 = vpop.f32.mrf.mxu2  ;;  %v3437_v51 = vpop.f32.mrf.mxu0 }
 0x2d1   : > { %v3702_v49 = vpop.f32.mrf.mxu3  ;;  %v3614_v24 = vadd.f32 %v3613_v35, %v3525_v37  ;;  %v3526_v1 = vpop.f32.mrf.mxu1  ;;  %v3438_v25 = vadd.f32 %v3437_v51, %v7257_v30  ;;  %v5347_v30 = vor.u32 %v6324_v11, %v5344_v16  ;;  %v6348_v51 = vld [vmem:[%s6752_s14 + $0x65c] sm:$0xf0] }
 0x2d3   : > { %v7563_v45 = vadd.f32 %v3702_v49, %v3614_v24  ;;  %v3527_v9 = vadd.f32 %v3526_v1, %v3438_v25  ;;  %v5406_v24 = vld [vmem:[%s6752_s14 + $0x620] sm:$0xf]  ;;  %v6340_v1 = vld [vmem:[%s6752_s14 + $0x624] sm:$0xf] }
 0x2d4   : > { %v5408_v25 = vld [vmem:[%s6752_s14 + $0x660] sm:$0xf0]  ;;  %v5407_v7 = vor.u32 %v6348_v51, %v5406_v24 }
 0x2d5   : > { %v5411_v20 = vor.u32 %v6340_v1, %v5408_v25  ;;  %v6356_v24 = vld [vmem:[%s6752_s14 + $0x6a4] sm:$0xf]  ;;  %v5478_v1 = vld [vmem:[%s6752_s14 + $0x6a8] sm:$0xf] }
 0x2d6   : > { %v5472_v51 = vld [vmem:[%s6752_s14 + $0x6e0] sm:$0xf0]  ;;  %v6365_v25 = vld [vmem:[%s6752_s14 + $0x6e4] sm:$0xf0] }
 0x2d8   : > { %v3615_v17 = vpop.f32.mrf.mxu2  ;;  %v3440_v13 = vpop.f32.mrf.mxu0 }
 0x2d9   : > { %v3704_v33 = vpop.f32.mrf.mxu3  ;;  %v3616_v52 = vadd.f32 %v3615_v17, %v3527_v9  ;;  %v3529_v21 = vpop.f32.mrf.mxu1  ;;  %v3441_v47 = vadd.f32 %v3440_v13, %v7260_v42  ;;  %v6349_v9 = vld [vmem:[%s6752_s14 + $0x664] sm:$0xf0]  ;;  %v6512_v13 = vld [vmem:[%s8368_s1 + $0x380] sm:$0xff] }
 0x2da   : > { %3957 = vmatpush.bf16.msrb.mxu2 %v6512_v13 }
 0x2db   : > { %v7577_v32 = vadd.f32 %v3704_v33, %v3616_v52  ;;  %v3530_v0 = vadd.f32 %v3529_v21, %v3441_v47  ;;  %3479 = vmatmul.bf16.gmra.mxu0 %v5343_v3  ;;  %v5415_v33 = vor.u32 %v6349_v9, %v5414_v48  ;;  %v6496_v21 = vld [vmem:[%s8368_s1 + $0x300] sm:$0xff]  ;;  %v6357_v48 = vld [vmem:[%s6752_s14 + $0x6ac] sm:$0xf] }
 0x2dc   : > { %3568 = vmatmul.bf16.gmra.mxu1 %v5347_v30  ;;  %3779 = vmatpush.bf16.msrb.mxu0 %v6496_v21  ;;  %v5480_v9 = vld [vmem:[%s6752_s14 + $0x6e8] sm:$0xf0] }
 0x2dd   : > { %3657 = vmatmul.bf16.gmra.mxu2 %v5351_v19 }
 0x2de   : > { %3746 = vmatmul.bf16.gmra.mxu3 %v5355_v6 }
 0x2e0   : > { %v3618_v62 = vpop.f32.mrf.mxu2  ;;  %v3442_v26 = vpop.f32.mrf.mxu0 }
 0x2e1   : > { %v3707_v37 = vpop.f32.mrf.mxu3  ;;  %v3619_v29 = vadd.f32 %v3618_v62, %v3530_v0  ;;  %v3531_v55 = vpop.f32.mrf.mxu1  ;;  %v3443_v42 = vadd.f32 %v3442_v26, %v7271_v57  ;;  %v5419_v57 = vor.u32 %v6341_v59, %v5416_v39  ;;  %v6504_v26 = vld [vmem:[%s8368_s1 + $0x340] sm:$0xff] }
 0x2e2   : > { %3868 = vmatpush.bf16.msrb.mxu1 %v6504_v26  ;;  %v5542_v26 = vld [vmem:[%s6752_s14 + $0x728] sm:$0xf] }
 0x2e3   : > { %v7580_v35 = vadd.f32 %v3707_v37, %v3619_v29  ;;  %v3532_v49 = vadd.f32 %v3531_v55, %v3443_v42  ;;  %v5470_v42 = vld [vmem:[%s6752_s14 + $0x6a0] sm:$0xf] }
 0x2e8   : > { %v3620_v11 = vpop.f32.mrf.mxu2  ;;  %v3445_v31 = vpop.f32.mrf.mxu0 }
 0x2e9   : > { %v3709_v16 = vpop.f32.mrf.mxu3  ;;  %v3621_v63 = vadd.f32 %v3620_v11, %v3532_v49  ;;  %v3534_v17 = vpop.f32.mrf.mxu1  ;;  %v3446_v3 = vadd.f32 %v3445_v31, %v7283_v40  ;;  %v6520_v40 = vld [vmem:[%s8368_s1 + $0x3c0] sm:$0xff]  ;;  %v5483_v31 = vor.u32 %v6357_v48, %v5480_v9 }
 0x2ea   : > { %4046 = vmatpush.bf16.msrb.mxu3 %v6520_v40  ;;  %v6364_v49 = vld [vmem:[%s6752_s14 + $0x6dc] sm:$0xf0] }
 0x2eb   : > { %v7591_v30 = vadd.f32 %v3709_v16, %v3621_v63  ;;  %v3535_v52 = vadd.f32 %v3534_v17, %v3446_v3  ;;  %3484 = vmatmul.bf16.gmra.mxu0 %v5407_v7  ;;  %v5471_v11 = vor.u32 %v6364_v49, %v5470_v42  ;;  %v5479_v63 = vor.u32 %v6365_v25, %v5478_v1  ;;  %v6373_v42 = vld [vmem:[%s6752_s14 + $0x72c] sm:$0xf] }
 0x2ec   : > { %3573 = vmatmul.bf16.gmra.mxu1 %v5411_v20  ;;  %v5544_v49 = vld [vmem:[%s6752_s14 + $0x768] sm:$0xf0] }
 0x2ed   : > { %3662 = vmatmul.bf16.gmra.mxu2 %v5415_v33 }
 0x2ee   : > { %3751 = vmatmul.bf16.gmra.mxu3 %v5419_v57 }
 0x2f0   : > { %v3623_v19 = vpop.f32.mrf.mxu2  ;;  %v3447_v0 = vpop.f32.mrf.mxu0 }
 0x2f1   : > { %v3712_v6 = vpop.f32.mrf.mxu3  ;;  %v3624_v47 = vadd.f32 %v3623_v19, %v3535_v52  ;;  %v3536_v62 = vpop.f32.mrf.mxu1  ;;  %v3448_v37 = vadd.f32 %v3447_v0, %v7297_v14  ;;  %v5475_v14 = vor.u32 %v6356_v24, %v5472_v51  ;;  %v6380_v0 = vld [vmem:[%s6752_s14 + $0x75c] sm:$0xf0] }
 0x2f3   : > { %v7603_v29 = vadd.f32 %v3712_v6, %v3624_v47  ;;  %v3537_v55 = vadd.f32 %v3536_v62, %v3448_v37  ;;  %v5534_v47 = vld [vmem:[%s6752_s14 + $0x720] sm:$0xf]  ;;  %v6372_v62 = vld [vmem:[%s6752_s14 + $0x724] sm:$0xf] }
 0x2f4   : > { %v5536_v37 = vld [vmem:[%s6752_s14 + $0x760] sm:$0xf0]  ;;  %v5535_v1 = vor.u32 %v6380_v0, %v5534_v47  ;;  %v6389_v47 = vld [vmem:[%s6752_s14 + $0x7ac] sm:$0xf] }
 0x2f5   : > { %v5539_v25 = vor.u32 %v6372_v62, %v5536_v37  ;;  %v5608_v0 = vld [vmem:[%s6752_s14 + $0x7e8] sm:$0xf0] }
 0x2f8   : > { %v3625_v59 = vpop.f32.mrf.mxu2  ;;  %v3450_v7 = vpop.f32.mrf.mxu0 }
 0x2f9   : > { %v3714_v39 = vpop.f32.mrf.mxu3  ;;  %v3626_v16 = vadd.f32 %v3625_v59, %v3537_v55  ;;  %v3539_v20 = vpop.f32.mrf.mxu1  ;;  %v3451_v17 = vadd.f32 %v3450_v7, %v7300_v27  ;;  %v6381_v55 = vld [vmem:[%s6752_s14 + $0x764] sm:$0xf0] }
 0x2fb   : > { %v7617_v33 = vadd.f32 %v3714_v39, %v3626_v16  ;;  %v3540_v57 = vadd.f32 %v3539_v20, %v3451_v17  ;;  %3489 = vmatmul.bf16.gmra.mxu0 %v5471_v11  ;;  %v5543_v39 = vor.u32 %v6381_v55, %v5542_v26 }
 0x2fc   : > { %3578 = vmatmul.bf16.gmra.mxu1 %v5475_v14 }
 0x2fd   : > { %3667 = vmatmul.bf16.gmra.mxu2 %v5479_v63 }
 0x2fe   : > { %3756 = vmatmul.bf16.gmra.mxu3 %v5483_v31 }
 0x300   : > { %v3628_v3 = vpop.f32.mrf.mxu2  ;;  %v3452_v21 = vpop.f32.mrf.mxu0 }
 0x301   : > { %v3717_v52 = vpop.f32.mrf.mxu3  ;;  %v3629_v13 = vadd.f32 %v3628_v3, %v3540_v57  ;;  %v3541_v40 = vpop.f32.mrf.mxu1  ;;  %v3453_v27 = vadd.f32 %v3452_v21, %v7311_v54  ;;  %v5547_v54 = vor.u32 %v6373_v42, %v5544_v49  ;;  %v6388_v21 = vld [vmem:[%s6752_s14 + $0x7a4] sm:$0xf] }
 0x303   : > { %v7620_v19 = vadd.f32 %v3717_v52, %v3629_v13  ;;  %v3542_v6 = vadd.f32 %v3541_v40, %v3453_v27  ;;  %v5598_v52 = vld [vmem:[%s6752_s14 + $0x7a0] sm:$0xf]  ;;  %v5600_v40 = vld [vmem:[%s6752_s14 + $0x7e0] sm:$0xf0]  ;;  %v5606_v27 = vld [vmem:[%s6752_s14 + $0x7a8] sm:$0xf] }
 0x304   : > { %v6396_v13 = vld [vmem:[%s6752_s14 + $0x7dc] sm:$0xf0]  ;;  %v5603_v55 = vor.u32 %v6388_v21, %v5600_v40 }
 0x305   : > { %v5599_v26 = vor.u32 %v6396_v13, %v5598_v52  ;;  %v6151_v52 = vld [vmem:[%s6752_s14 + $0x3c] sm:$0xf] }
 0x306   : > { %v4664_v13 = vld [vmem:[%s6752_s14 + $0x78] sm:$0xf0] }
 0x308   : > { %v3630_v24 = vpop.f32.mrf.mxu2  ;;  %v3455_v9 = vpop.f32.mrf.mxu0 }
 0x309   : > { %v3719_v51 = vpop.f32.mrf.mxu3  ;;  %v3631_v48 = vadd.f32 %v3630_v24, %v3542_v6  ;;  %v3544_v59 = vpop.f32.mrf.mxu1  ;;  %v3456_v11 = vadd.f32 %v3455_v9, %v7323_v22  ;;  %v6397_v6 = vld [vmem:[%s6752_s14 + $0x7e4] sm:$0xf0] }
 0x30b   : > { %v7631_v14 = vadd.f32 %v3719_v51, %v3631_v48  ;;  %v3545_v16 = vadd.f32 %v3544_v59, %v3456_v11  ;;  %3494 = vmatmul.bf16.gmra.mxu0 %v5535_v1  ;;  %v5607_v51 = vor.u32 %v6397_v6, %v5606_v27 }
 0x30c   : > { %3583 = vmatmul.bf16.gmra.mxu1 %v5539_v25 }
 0x30d   : > { %3672 = vmatmul.bf16.gmra.mxu2 %v5543_v39 }
 0x30e   : > { %3761 = vmatmul.bf16.gmra.mxu3 %v5547_v54 }
 0x310   : > { %v3633_v7 = vpop.f32.mrf.mxu2  ;;  %v3457_v31 = vpop.f32.mrf.mxu0 }
 0x311   : > { %v3722_v20 = vpop.f32.mrf.mxu3  ;;  %v3634_v63 = vadd.f32 %v3633_v7, %v3545_v16  ;;  %v3546_v17 = vpop.f32.mrf.mxu1  ;;  %v3458_v22 = vadd.f32 %v3457_v31, %v7337_v60  ;;  %v5611_v60 = vor.u32 %v6389_v47, %v5608_v0  ;;  %v6150_v31 = vld [vmem:[%s6752_s14 + $0x34] sm:$0xf] }
 0x313   : > { %v7634_v57 = vadd.f32 %v3722_v20, %v3634_v63  ;;  %v3547_v3 = vadd.f32 %v3546_v17, %v3458_v22  ;;  %v4654_v20 = vld [vmem:[%s6752_s14 + $0x30] sm:$0xf]  ;;  %v4656_v17 = vld [vmem:[%s6752_s14 + $0x70] sm:$0xf0]  ;;  %v4662_v22 = vld [vmem:[%s6752_s14 + $0x38] sm:$0xf] }
 0x314   : > { %v6158_v63 = vld [vmem:[%s6752_s14 + $0x6c] sm:$0xf0]  ;;  %v4659_v6 = vor.u32 %v6150_v31, %v4656_v17 }
 0x315   : > { %v4655_v27 = vor.u32 %v6158_v63, %v4654_v20  ;;  %v6167_v20 = vld [vmem:[%s6752_s14 + $0xbc] sm:$0xf] }
 0x316   : > { %v4728_v63 = vld [vmem:[%s6752_s14 + $0xf8] sm:$0xf0] }
 0x318   : > { %v3635_v62 = vpop.f32.mrf.mxu2  ;;  %v3460_v49 = vpop.f32.mrf.mxu0 }
 0x319   : > { %v3724_v37 = vpop.f32.mrf.mxu3  ;;  %v3636_v42 = vadd.f32 %v3635_v62, %v3547_v3  ;;  %v3549_v24 = vpop.f32.mrf.mxu1  ;;  %v3461_v1 = vadd.f32 %v3460_v49, %v7340_v10  ;;  %v6159_v3 = vld [vmem:[%s6752_s14 + $0x74] sm:$0xf0] }
 0x31b   : > { %v7645_v25 = vadd.f32 %v3724_v37, %v3636_v42  ;;  %v3550_v48 = vadd.f32 %v3549_v24, %v3461_v1  ;;  %3499 = vmatmul.bf16.gmra.mxu0 %v5599_v26  ;;  %v4663_v37 = vor.u32 %v6159_v3, %v4662_v22 }
 0x31c   : > { %3588 = vmatmul.bf16.gmra.mxu1 %v5603_v55 }
 0x31d   : > { %3677 = vmatmul.bf16.gmra.mxu2 %v5607_v51 }
 0x31e   : > { %3766 = vmatmul.bf16.gmra.mxu3 %v5611_v60 }
 0x320   : > { %v3638_v9 = vpop.f32.mrf.mxu2  ;;  %v3462_v54 = vpop.f32.mrf.mxu0 }
 0x321   : > { %v3727_v59 = vpop.f32.mrf.mxu3  ;;  %v3639_v39 = vadd.f32 %v3638_v9, %v3550_v48  ;;  %v3551_v11 = vpop.f32.mrf.mxu1  ;;  %v3463_v10 = vadd.f32 %v3462_v54, %v7351_v56  ;;  %v4667_v56 = vor.u32 %v6151_v52, %v4664_v13  ;;  %v6166_v54 = vld [vmem:[%s6752_s14 + $0xb4] sm:$0xf] }
 0x323   : > { %v7648_v16 = vadd.f32 %v3727_v59, %v3639_v39  ;;  %v3552_v7 = vadd.f32 %v3551_v11, %v3463_v10  ;;  %v4718_v59 = vld [vmem:[%s6752_s14 + $0xb0] sm:$0xf]  ;;  %v4720_v11 = vld [vmem:[%s6752_s14 + $0xf0] sm:$0xf0]  ;;  %v4726_v10 = vld [vmem:[%s6752_s14 + $0xb8] sm:$0xf] }
 0x324   : > { %v6174_v39 = vld [vmem:[%s6752_s14 + $0xec] sm:$0xf0]  ;;  %v4723_v3 = vor.u32 %v6166_v54, %v4720_v11 }
 0x325   : > { %v4719_v22 = vor.u32 %v6174_v39, %v4718_v59  ;;  %v6183_v59 = vld [vmem:[%s6752_s14 + $0x13c] sm:$0xf] }
 0x326   : > { %v4792_v39 = vld [vmem:[%s6752_s14 + $0x178] sm:$0xf0] }
 0x328   : > { %v3640_v21 = vpop.f32.mrf.mxu2  ;;  %v3465_v0 = vpop.f32.mrf.mxu0 }
 0x329   : > { %v3729_v40 = vpop.f32.mrf.mxu3  ;;  %v3641_v47 = vadd.f32 %v3640_v21, %v3552_v7  ;;  %v3554_v62 = vpop.f32.mrf.mxu1  ;;  %v3466_v26 = vadd.f32 %v3465_v0, %v7363_v4  ;;  %v6175_v7 = vld [vmem:[%s6752_s14 + $0xf4] sm:$0xf0] }
 0x32b   : > { %v7659_v55 = vadd.f32 %v3729_v40, %v3641_v47  ;;  %v3555_v42 = vadd.f32 %v3554_v62, %v3466_v26  ;;  %3780 = vmatmul.bf16.vlgmr.msrb.gmra.mxu0 %v4655_v27  ;;  %v4727_v40 = vor.u32 %v6175_v7, %v4726_v10 }
 0x32c   : > { %3869 = vmatmul.bf16.vlgmr.msrb.gmra.mxu1 %v4659_v6 }
 0x32d   : > { %3958 = vmatmul.bf16.vlgmr.msrb.gmra.mxu2 %v4663_v37 }
 0x32e   : > { %4047 = vmatmul.bf16.vlgmr.msrb.gmra.mxu3 %v4667_v56 }
 0x330   : > { %v3643_v49 = vpop.f32.mrf.mxu2  ;;  %v3467_v60 = vpop.f32.mrf.mxu0 }
 0x331   : > { %v3732_v24 = vpop.f32.mrf.mxu3  ;;  %v3644_v51 = vadd.f32 %v3643_v49, %v3555_v42  ;;  %v3556_v1 = vpop.f32.mrf.mxu1  ;;  %v3468_v4 = vadd.f32 %v3467_v60, %v7377_v43  ;;  %v4731_v43 = vor.u32 %v6167_v20, %v4728_v63  ;;  %v6182_v60 = vld [vmem:[%s6752_s14 + $0x134] sm:$0xf] }
 0x333   : > { %v7662_v48 = vadd.f32 %v3732_v24, %v3644_v51  ;;  %v3557_v9 = vadd.f32 %v3556_v1, %v3468_v4  ;;  %v4782_v24 = vld [vmem:[%s6752_s14 + $0x130] sm:$0xf]  ;;  %v4784_v1 = vld [vmem:[%s6752_s14 + $0x170] sm:$0xf0]  ;;  %v4790_v4 = vld [vmem:[%s6752_s14 + $0x138] sm:$0xf] }
 0x334   : > { %v6190_v51 = vld [vmem:[%s6752_s14 + $0x16c] sm:$0xf0]  ;;  %v4787_v7 = vor.u32 %v6182_v60, %v4784_v1 }
 0x335   : > { %v4783_v10 = vor.u32 %v6190_v51, %v4782_v24  ;;  %v6199_v24 = vld [vmem:[%s6752_s14 + $0x1bc] sm:$0xf] }
 0x336   : > { %v4856_v51 = vld [vmem:[%s6752_s14 + $0x1f8] sm:$0xf0] }
 0x338   : > { %v3645_v31 = vpop.f32.mrf.mxu2  ;;  %v3470_v13 = vpop.f32.mrf.mxu0 }
 0x339   : > { %v3734_v17 = vpop.f32.mrf.mxu3  ;;  %v3646_v52 = vadd.f32 %v3645_v31, %v3557_v9  ;;  %v3559_v21 = vpop.f32.mrf.mxu1  ;;  %v3471_v27 = vadd.f32 %v3470_v13, %v7380_v58  ;;  %v6191_v9 = vld [vmem:[%s6752_s14 + $0x174] sm:$0xf0] }
 0x33b   : > { %v7673_v6 = vadd.f32 %v3734_v17, %v3646_v52  ;;  %v3560_v47 = vadd.f32 %v3559_v21, %v3471_v27  ;;  %3785 = vmatmul.bf16.gmra.mxu0 %v4719_v22  ;;  %v4791_v17 = vor.u32 %v6191_v9, %v4790_v4 }
 0x33c   : > { %3874 = vmatmul.bf16.gmra.mxu1 %v4723_v3 }
 0x33d   : > { %3963 = vmatmul.bf16.gmra.mxu2 %v4727_v40 }
 0x33e   : > { %4052 = vmatmul.bf16.gmra.mxu3 %v4731_v43 }
 0x340   : > { %v3648_v0 = vpop.f32.mrf.mxu2  ;;  %v3472_v56 = vpop.f32.mrf.mxu0 }
 0x341   : > { %v3737_v62 = vpop.f32.mrf.mxu3  ;;  %v3649_v37 = vadd.f32 %v3648_v0, %v3560_v47  ;;  %v3561_v26 = vpop.f32.mrf.mxu1  ;;  %v3473_v58 = vadd.f32 %v3472_v56, %v7391_v2  ;;  %v4795_v2 = vor.u32 %v6183_v59, %v4792_v39  ;;  %v6198_v56 = vld [vmem:[%s6752_s14 + $0x1b4] sm:$0xf] }
 0x343   : > { %v7676_v42 = vadd.f32 %v3737_v62, %v3649_v37  ;;  %v3562_v49 = vadd.f32 %v3561_v26, %v3473_v58  ;;  %v4846_v62 = vld [vmem:[%s6752_s14 + $0x1b0] sm:$0xf]  ;;  %v4848_v26 = vld [vmem:[%s6752_s14 + $0x1f0] sm:$0xf0]  ;;  %v4854_v58 = vld [vmem:[%s6752_s14 + $0x1b8] sm:$0xf] }
 0x344   : > { %v6206_v37 = vld [vmem:[%s6752_s14 + $0x1ec] sm:$0xf0]  ;;  %v4851_v9 = vor.u32 %v6198_v56, %v4848_v26 }
 0x345   : > { %v4847_v4 = vor.u32 %v6206_v37, %v4846_v62  ;;  %v6215_v62 = vld [vmem:[%s6752_s14 + $0x23c] sm:$0xf] }
 0x346   : > { %v4920_v37 = vld [vmem:[%s6752_s14 + $0x278] sm:$0xf0] }
 0x348   : > { %v3650_v54 = vpop.f32.mrf.mxu2  ;;  %v3475_v63 = vpop.f32.mrf.mxu0 }
 0x349   : > { %v3739_v11 = vpop.f32.mrf.mxu3  ;;  %v3651_v20 = vadd.f32 %v3650_v54, %v3562_v49  ;;  %v3564_v31 = vpop.f32.mrf.mxu1  ;;  %v3476_v22 = vadd.f32 %v3475_v63, %v7403_v50  ;;  %v6207_v49 = vld [vmem:[%s6752_s14 + $0x1f4] sm:$0xf0] }
 0x34b   : > { %v7687_v3 = vadd.f32 %v3739_v11, %v3651_v20  ;;  %v3565_v52 = vadd.f32 %v3564_v31, %v3476_v22  ;;  %3790 = vmatmul.bf16.gmra.mxu0 %v4783_v10  ;;  %v4855_v11 = vor.u32 %v6207_v49, %v4854_v58 }
 0x34c   : > { %3879 = vmatmul.bf16.gmra.mxu1 %v4787_v7 }
 0x34d   : > { %3968 = vmatmul.bf16.gmra.mxu2 %v4791_v17 }
 0x34e   : > { %4057 = vmatmul.bf16.gmra.mxu3 %v4795_v2 }
 0x350   : > { %v3653_v13 = vpop.f32.mrf.mxu2  ;;  %v3477_v43 = vpop.f32.mrf.mxu0 }
 0x351   : > { %v3742_v21 = vpop.f32.mrf.mxu3  ;;  %v3654_v40 = vadd.f32 %v3653_v13, %v3565_v52  ;;  %v3566_v27 = vpop.f32.mrf.mxu1  ;;  %v3478_v50 = vadd.f32 %v3477_v43, %v7417_v28  ;;  %v4859_v28 = vor.u32 %v6199_v24, %v4856_v51  ;;  %v6214_v43 = vld [vmem:[%s6752_s14 + $0x234] sm:$0xf] }
 0x353   : > { %v7690_v47 = vadd.f32 %v3742_v21, %v3654_v40  ;;  %v3567_v0 = vadd.f32 %v3566_v27, %v3478_v50  ;;  %v4910_v21 = vld [vmem:[%s6752_s14 + $0x230] sm:$0xf]  ;;  %v4912_v27 = vld [vmem:[%s6752_s14 + $0x270] sm:$0xf0]  ;;  %v4918_v50 = vld [vmem:[%s6752_s14 + $0x238] sm:$0xf] }
 0x354   : > { %v6222_v40 = vld [vmem:[%s6752_s14 + $0x26c] sm:$0xf0]  ;;  %v4915_v49 = vor.u32 %v6214_v43, %v4912_v27 }
 0x355   : > { %v4911_v58 = vor.u32 %v6222_v40, %v4910_v21  ;;  %v6231_v21 = vld [vmem:[%s6752_s14 + $0x2bc] sm:$0xf] }
 0x356   : > { %v4984_v40 = vld [vmem:[%s6752_s14 + $0x2f8] sm:$0xf0] }
 0x358   : > { %v3655_v60 = vpop.f32.mrf.mxu2  ;;  %v3480_v39 = vpop.f32.mrf.mxu0 }
 0x359   : > { %v3744_v1 = vpop.f32.mrf.mxu3  ;;  %v3656_v59 = vadd.f32 %v3655_v60, %v3567_v0  ;;  %v3569_v54 = vpop.f32.mrf.mxu1  ;;  %v3481_v10 = vadd.f32 %v3480_v39, %v7420_v41  ;;  %v6223_v0 = vld [vmem:[%s6752_s14 + $0x274] sm:$0xf0] }
 0x35b   : > { %v7701_v7 = vadd.f32 %v3744_v1, %v3656_v59  ;;  %v3570_v20 = vadd.f32 %v3569_v54, %v3481_v10  ;;  %3795 = vmatmul.bf16.gmra.mxu0 %v4847_v4  ;;  %v4919_v1 = vor.u32 %v6223_v0, %v4918_v50 }
 0x35c   : > { %3884 = vmatmul.bf16.gmra.mxu1 %v4851_v9 }
 0x35d   : > { %3973 = vmatmul.bf16.gmra.mxu2 %v4855_v11 }
 0x35e   : > { %4062 = vmatmul.bf16.gmra.mxu3 %v4859_v28 }
 0x360   : > { %v3658_v63 = vpop.f32.mrf.mxu2  ;;  %v3482_v2 = vpop.f32.mrf.mxu0 }
 0x361   : > { %v3747_v31 = vpop.f32.mrf.mxu3  ;;  %v3659_v17 = vadd.f32 %v3658_v63, %v3570_v20  ;;  %v3571_v22 = vpop.f32.mrf.mxu1  ;;  %v3483_v41 = vadd.f32 %v3482_v2, %v7431_v15  ;;  %v4923_v15 = vor.u32 %v6215_v62, %v4920_v37  ;;  %v6230_v2 = vld [vmem:[%s6752_s14 + $0x2b4] sm:$0xf] }
 0x363   : > { %v7704_v52 = vadd.f32 %v3747_v31, %v3659_v17  ;;  %v3572_v13 = vadd.f32 %v3571_v22, %v3483_v41  ;;  %v4974_v31 = vld [vmem:[%s6752_s14 + $0x2b0] sm:$0xf]  ;;  %v4976_v22 = vld [vmem:[%s6752_s14 + $0x2f0] sm:$0xf0]  ;;  %v4982_v41 = vld [vmem:[%s6752_s14 + $0x2b8] sm:$0xf] }
 0x364   : > { %v6238_v17 = vld [vmem:[%s6752_s14 + $0x2ec] sm:$0xf0]  ;;  %v4979_v0 = vor.u32 %v6230_v2, %v4976_v22 }
 0x365   : > { %v4975_v50 = vor.u32 %v6238_v17, %v4974_v31  ;;  %v6247_v31 = vld [vmem:[%s6752_s14 + $0x33c] sm:$0xf] }
 0x366   : > { %v5048_v17 = vld [vmem:[%s6752_s14 + $0x378] sm:$0xf0] }
 0x368   : > { %v3660_v56 = vpop.f32.mrf.mxu2  ;;  %v3485_v51 = vpop.f32.mrf.mxu0 }
 0x369   : > { %v3749_v26 = vpop.f32.mrf.mxu3  ;;  %v3661_v24 = vadd.f32 %v3660_v56, %v3572_v13  ;;  %v3574_v60 = vpop.f32.mrf.mxu1  ;;  %v3486_v4 = vadd.f32 %v3485_v51, %v7443_v34  ;;  %v6239_v13 = vld [vmem:[%s6752_s14 + $0x2f4] sm:$0xf0] }
 0x36b   : > { %v7715_v9 = vadd.f32 %v3749_v26, %v3661_v24  ;;  %v3575_v59 = vadd.f32 %v3574_v60, %v3486_v4  ;;  %3800 = vmatmul.bf16.gmra.mxu0 %v4911_v58  ;;  %v4983_v26 = vor.u32 %v6239_v13, %v4982_v41 }
 0x36c   : > { %3889 = vmatmul.bf16.gmra.mxu1 %v4915_v49 }
 0x36d   : > { %3978 = vmatmul.bf16.gmra.mxu2 %v4919_v1 }
 0x36e   : > { %4067 = vmatmul.bf16.gmra.mxu3 %v4923_v15 }
 0x370   : > { %v3663_v39 = vpop.f32.mrf.mxu2  ;;  %v3487_v28 = vpop.f32.mrf.mxu0 }
 0x371   : > { %v3752_v54 = vpop.f32.mrf.mxu3  ;;  %v3664_v11 = vadd.f32 %v3663_v39, %v3575_v59  ;;  %v3576_v10 = vpop.f32.mrf.mxu1  ;;  %v3488_v34 = vadd.f32 %v3487_v28, %v7457_v12  ;;  %v4987_v12 = vor.u32 %v6231_v21, %v4984_v40  ;;  %v6246_v28 = vld [vmem:[%s6752_s14 + $0x334] sm:$0xf] }
 0x373   : > { %v7718_v20 = vadd.f32 %v3752_v54, %v3664_v11  ;;  %v3577_v63 = vadd.f32 %v3576_v10, %v3488_v34  ;;  %v5038_v54 = vld [vmem:[%s6752_s14 + $0x330] sm:$0xf]  ;;  %v5040_v10 = vld [vmem:[%s6752_s14 + $0x370] sm:$0xf0]  ;;  %v5046_v34 = vld [vmem:[%s6752_s14 + $0x338] sm:$0xf] }
 0x374   : > { %v6254_v11 = vld [vmem:[%s6752_s14 + $0x36c] sm:$0xf0]  ;;  %v5043_v13 = vor.u32 %v6246_v28, %v5040_v10 }
 0x375   : > { %v5039_v41 = vor.u32 %v6254_v11, %v5038_v54  ;;  %v6263_v54 = vld [vmem:[%s6752_s14 + $0x3bc] sm:$0xf] }
 0x376   : > { %v5112_v11 = vld [vmem:[%s6752_s14 + $0x3f8] sm:$0xf0] }
 0x378   : > { %v3665_v43 = vpop.f32.mrf.mxu2  ;;  %v3490_v37 = vpop.f32.mrf.mxu0 }
 0x379   : > { %v3754_v27 = vpop.f32.mrf.mxu3  ;;  %v3666_v62 = vadd.f32 %v3665_v43, %v3577_v63  ;;  %v3579_v56 = vpop.f32.mrf.mxu1  ;;  %v3491_v58 = vadd.f32 %v3490_v37, %v7460_v23  ;;  %v6255_v63 = vld [vmem:[%s6752_s14 + $0x374] sm:$0xf0] }
 0x37b   : > { %v7729_v49 = vadd.f32 %v3754_v27, %v3666_v62  ;;  %v3580_v24 = vadd.f32 %v3579_v56, %v3491_v58  ;;  %3805 = vmatmul.bf16.gmra.mxu0 %v4975_v50  ;;  %v5047_v27 = vor.u32 %v6255_v63, %v5046_v34 }
 0x37c   : > { %3894 = vmatmul.bf16.gmra.mxu1 %v4979_v0 }
 0x37d   : > { %3983 = vmatmul.bf16.gmra.mxu2 %v4983_v26 }
 0x37e   : > { %4072 = vmatmul.bf16.gmra.mxu3 %v4987_v12 }
 0x380   : > { %v3668_v51 = vpop.f32.mrf.mxu2  ;;  %v3492_v15 = vpop.f32.mrf.mxu0 }
 0x381   : > { %v3757_v60 = vpop.f32.mrf.mxu3  ;;  %v3669_v1 = vadd.f32 %v3668_v51, %v3580_v24  ;;  %v3581_v4 = vpop.f32.mrf.mxu1  ;;  %v3493_v23 = vadd.f32 %v3492_v15, %v7471_v38  ;;  %v5051_v38 = vor.u32 %v6247_v31, %v5048_v17  ;;  %v6262_v15 = vld [vmem:[%s6752_s14 + $0x3b4] sm:$0xf] }
 0x383   : > { %v7732_v59 = vadd.f32 %v3757_v60, %v3669_v1  ;;  %v3582_v39 = vadd.f32 %v3581_v4, %v3493_v23  ;;  %v5102_v60 = vld [vmem:[%s6752_s14 + $0x3b0] sm:$0xf]  ;;  %v5104_v4 = vld [vmem:[%s6752_s14 + $0x3f0] sm:$0xf0]  ;;  %v5110_v23 = vld [vmem:[%s6752_s14 + $0x3b8] sm:$0xf] }
 0x384   : > { %v6270_v1 = vld [vmem:[%s6752_s14 + $0x3ec] sm:$0xf0]  ;;  %v5107_v63 = vor.u32 %v6262_v15, %v5104_v4 }
 0x385   : > { %v5103_v34 = vor.u32 %v6270_v1, %v5102_v60  ;;  %v6279_v60 = vld [vmem:[%s6752_s14 + $0x43c] sm:$0xf] }
 0x386   : > { %v5176_v1 = vld [vmem:[%s6752_s14 + $0x478] sm:$0xf0] }
 0x388   : > { %v3670_v2 = vpop.f32.mrf.mxu2  ;;  %v3495_v40 = vpop.f32.mrf.mxu0 }
 0x389   : > { %v3759_v22 = vpop.f32.mrf.mxu3  ;;  %v3671_v21 = vadd.f32 %v3670_v2, %v3582_v39  ;;  %v3584_v43 = vpop.f32.mrf.mxu1  ;;  %v3496_v50 = vadd.f32 %v3495_v40, %v7483_v18  ;;  %v6271_v39 = vld [vmem:[%s6752_s14 + $0x3f4] sm:$0xf0] }
 0x38b   : > { %v7743_v0 = vadd.f32 %v3759_v22, %v3671_v21  ;;  %v3585_v62 = vadd.f32 %v3584_v43, %v3496_v50  ;;  %3810 = vmatmul.bf16.gmra.mxu0 %v5039_v41  ;;  %v5111_v22 = vor.u32 %v6271_v39, %v5110_v23 }
 0x38c   : > { %3899 = vmatmul.bf16.gmra.mxu1 %v5043_v13 }
 0x38d   : > { %3988 = vmatmul.bf16.gmra.mxu2 %v5047_v27 }
 0x38e   : > { %4077 = vmatmul.bf16.gmra.mxu3 %v5051_v38 }
 0x390   : > { %v3673_v37 = vpop.f32.mrf.mxu2  ;;  %v3497_v12 = vpop.f32.mrf.mxu0 }
 0x391   : > { %v3762_v56 = vpop.f32.mrf.mxu3  ;;  %v3674_v26 = vadd.f32 %v3673_v37, %v3585_v62  ;;  %v3586_v58 = vpop.f32.mrf.mxu1  ;;  %v3498_v18 = vadd.f32 %v3497_v12, %v7497_v44  ;;  %v5115_v44 = vor.u32 %v6263_v54, %v5112_v11  ;;  %v6278_v12 = vld [vmem:[%s6752_s14 + $0x434] sm:$0xf] }
 0x393   : > { %v7746_v24 = vadd.f32 %v3762_v56, %v3674_v26  ;;  %v3587_v51 = vadd.f32 %v3586_v58, %v3498_v18  ;;  %v5166_v56 = vld [vmem:[%s6752_s14 + $0x430] sm:$0xf]  ;;  %v5168_v58 = vld [vmem:[%s6752_s14 + $0x470] sm:$0xf0]  ;;  %v5174_v18 = vld [vmem:[%s6752_s14 + $0x438] sm:$0xf] }
 0x394   : > { %v6286_v26 = vld [vmem:[%s6752_s14 + $0x46c] sm:$0xf0]  ;;  %v5171_v39 = vor.u32 %v6278_v12, %v5168_v58 }
 0x395   : > { %v5167_v23 = vor.u32 %v6286_v26, %v5166_v56  ;;  %v6295_v56 = vld [vmem:[%s6752_s14 + $0x4bc] sm:$0xf] }
 0x396   : > { %v5240_v26 = vld [vmem:[%s6752_s14 + $0x4f8] sm:$0xf0] }
 0x398   : > { %v3675_v28 = vpop.f32.mrf.mxu2  ;;  %v3500_v17 = vpop.f32.mrf.mxu0 }
 0x399   : > { %v3764_v10 = vpop.f32.mrf.mxu3  ;;  %v3676_v31 = vadd.f32 %v3675_v28, %v3587_v51  ;;  %v3589_v2 = vpop.f32.mrf.mxu1  ;;  %v3501_v41 = vadd.f32 %v3500_v17, %v7500_v8  ;;  %v6287_v51 = vld [vmem:[%s6752_s14 + $0x474] sm:$0xf0] }
 0x39b   : > { %v7757_v13 = vadd.f32 %v3764_v10, %v3676_v31  ;;  %v3590_v21 = vadd.f32 %v3589_v2, %v3501_v41  ;;  %3815 = vmatmul.bf16.gmra.mxu0 %v5103_v34  ;;  %v5175_v10 = vor.u32 %v6287_v51, %v5174_v18 }
 0x39c   : > { %3904 = vmatmul.bf16.gmra.mxu1 %v5107_v63 }
 0x39d   : > { %3993 = vmatmul.bf16.gmra.mxu2 %v5111_v22 }
 0x39e   : > { %4082 = vmatmul.bf16.gmra.mxu3 %v5115_v44 }
 0x3a0   : > { %v3678_v40 = vpop.f32.mrf.mxu2  ;;  %v3502_v38 = vpop.f32.mrf.mxu0 }
 0x3a1   : > { %v3767_v43 = vpop.f32.mrf.mxu3  ;;  %v3679_v27 = vadd.f32 %v3678_v40, %v3590_v21  ;;  %v3591_v50 = vpop.f32.mrf.mxu1  ;;  %v3503_v8 = vadd.f32 %v3502_v38, %v7511_v5  ;;  %v5179_v5 = vor.u32 %v6279_v60, %v5176_v1  ;;  %v6294_v38 = vld [vmem:[%s6752_s14 + $0x4b4] sm:$0xf] }
 0x3a3   : > { %v7760_v62 = vadd.f32 %v3767_v43, %v3679_v27  ;;  %v3592_v37 = vadd.f32 %v3591_v50, %v3503_v8  ;;  %v5230_v43 = vld [vmem:[%s6752_s14 + $0x4b0] sm:$0xf]  ;;  %v5232_v50 = vld [vmem:[%s6752_s14 + $0x4f0] sm:$0xf0]  ;;  %v5238_v8 = vld [vmem:[%s6752_s14 + $0x4b8] sm:$0xf] }
 0x3a4   : > { %v6302_v27 = vld [vmem:[%s6752_s14 + $0x4ec] sm:$0xf0]  ;;  %v5235_v51 = vor.u32 %v6294_v38, %v5232_v50 }
 0x3a5   : > { %v5231_v18 = vor.u32 %v6302_v27, %v5230_v43  ;;  %v6311_v43 = vld [vmem:[%s6752_s14 + $0x53c] sm:$0xf] }
 0x3a6   : > { %v5304_v27 = vld [vmem:[%s6752_s14 + $0x578] sm:$0xf0] }
 0x3a8   : > { %v3680_v15 = vpop.f32.mrf.mxu2  ;;  %v3781_v11 = vpop.f32.mrf.mxu0 }
 0x3a9   : > { %v3769_v4 = vpop.f32.mrf.mxu3  ;;  %v3681_v54 = vadd.f32 %v3680_v15, %v3592_v37  ;;  %v3870_v28 = vpop.f32.mrf.mxu1  ;;  %v3782_v34 = vadd.f32 %v3781_v11, %v7523_v61  ;;  %v6303_v37 = vld [vmem:[%s6752_s14 + $0x4f4] sm:$0xf0] }
 0x3ab   : > { %v7771_v63 = vadd.f32 %v3769_v4, %v3681_v54  ;;  %v3871_v31 = vadd.f32 %v3870_v28, %v3782_v34  ;;  %3820 = vmatmul.bf16.gmra.mxu0 %v5167_v23  ;;  %v5239_v4 = vor.u32 %v6303_v37, %v5238_v8 }
 0x3ac   : > { %3909 = vmatmul.bf16.gmra.mxu1 %v5171_v39 }
 0x3ad   : > { %3998 = vmatmul.bf16.gmra.mxu2 %v5175_v10 }
 0x3ae   : > { %4087 = vmatmul.bf16.gmra.mxu3 %v5179_v5 }
 0x3b0   : > { %v3959_v17 = vpop.f32.mrf.mxu2  ;;  %v3783_v44 = vpop.f32.mrf.mxu0 }
 0x3b1   : > { %v4048_v2 = vpop.f32.mrf.mxu3  ;;  %v3960_v22 = vadd.f32 %v3959_v17, %v3871_v31  ;;  %v3872_v41 = vpop.f32.mrf.mxu1  ;;  %v3784_v61 = vadd.f32 %v3783_v44, %v7537_v36  ;;  %v5243_v36 = vor.u32 %v6295_v56, %v5240_v26  ;;  %v6310_v44 = vld [vmem:[%s6752_s14 + $0x534] sm:$0xf] }
 0x3b3   : > { %v7774_v21 = vadd.f32 %v4048_v2, %v3960_v22  ;;  %v3873_v40 = vadd.f32 %v3872_v41, %v3784_v61  ;;  %v5294_v2 = vld [vmem:[%s6752_s14 + $0x530] sm:$0xf]  ;;  %v5296_v41 = vld [vmem:[%s6752_s14 + $0x570] sm:$0xf0]  ;;  %v5302_v61 = vld [vmem:[%s6752_s14 + $0x538] sm:$0xf] }
 0x3b4   : > { %v6318_v22 = vld [vmem:[%s6752_s14 + $0x56c] sm:$0xf0]  ;;  %v5299_v37 = vor.u32 %v6310_v44, %v5296_v41 }
 0x3b5   : > { %v5295_v8 = vor.u32 %v6318_v22, %v5294_v2  ;;  %v6327_v2 = vld [vmem:[%s6752_s14 + $0x5bc] sm:$0xf] }
 0x3b6   : > { %v5368_v22 = vld [vmem:[%s6752_s14 + $0x5f8] sm:$0xf0] }
 0x3b8   : > { %v3961_v12 = vpop.f32.mrf.mxu2  ;;  %v3786_v1 = vpop.f32.mrf.mxu0 }
 0x3b9   : > { %v4050_v58 = vpop.f32.mrf.mxu3  ;;  %v3962_v60 = vadd.f32 %v3961_v12, %v3873_v40  ;;  %v3875_v15 = vpop.f32.mrf.mxu1  ;;  %v3787_v23 = vadd.f32 %v3786_v1, %v7540_v53  ;;  %v6319_v40 = vld [vmem:[%s6752_s14 + $0x574] sm:$0xf0] }
 0x3bb   : > { %v7785_v39 = vadd.f32 %v4050_v58, %v3962_v60  ;;  %v3876_v54 = vadd.f32 %v3875_v15, %v3787_v23  ;;  %3825 = vmatmul.bf16.gmra.mxu0 %v5231_v18  ;;  %v5303_v58 = vor.u32 %v6319_v40, %v5302_v61 }
 0x3bc   : > { %3914 = vmatmul.bf16.gmra.mxu1 %v5235_v51 }
 0x3bd   : > { %4003 = vmatmul.bf16.gmra.mxu2 %v5239_v4 }
 0x3be   : > { %4092 = vmatmul.bf16.gmra.mxu3 %v5243_v36 }
 0x3c0   : > { %v3964_v11 = vpop.f32.mrf.mxu2  ;;  %v3788_v5 = vpop.f32.mrf.mxu0 }
 0x3c1   : > { %v4053_v28 = vpop.f32.mrf.mxu3  ;;  %v3965_v10 = vadd.f32 %v3964_v11, %v3876_v54  ;;  %v3877_v34 = vpop.f32.mrf.mxu1  ;;  %v3789_v53 = vadd.f32 %v3788_v5, %v7551_v46  ;;  %v5307_v46 = vor.u32 %v6311_v43, %v5304_v27  ;;  %v6326_v5 = vld [vmem:[%s6752_s14 + $0x5b4] sm:$0xf] }
 0x3c3   : > { %v7788_v31 = vadd.f32 %v4053_v28, %v3965_v10  ;;  %v3878_v17 = vadd.f32 %v3877_v34, %v3789_v53  ;;  %v5358_v28 = vld [vmem:[%s6752_s14 + $0x5b0] sm:$0xf]  ;;  %v5360_v34 = vld [vmem:[%s6752_s14 + $0x5f0] sm:$0xf0]  ;;  %v5366_v53 = vld [vmem:[%s6752_s14 + $0x5b8] sm:$0xf] }
 0x3c4   : > { %v6334_v10 = vld [vmem:[%s6752_s14 + $0x5ec] sm:$0xf0]  ;;  %v5363_v40 = vor.u32 %v6326_v5, %v5360_v34 }
 0x3c5   : > { %v5359_v61 = vor.u32 %v6334_v10, %v5358_v28  ;;  %v6343_v28 = vld [vmem:[%s6752_s14 + $0x63c] sm:$0xf] }
 0x3c6   : > { %v5432_v10 = vld [vmem:[%s6752_s14 + $0x678] sm:$0xf0] }
 0x3c8   : > { %v3966_v38 = vpop.f32.mrf.mxu2  ;;  %v3791_v26 = vpop.f32.mrf.mxu0 }
 0x3c9   : > { %v4055_v50 = vpop.f32.mrf.mxu3  ;;  %v3967_v56 = vadd.f32 %v3966_v38, %v3878_v17  ;;  %v3880_v12 = vpop.f32.mrf.mxu1  ;;  %v3792_v18 = vadd.f32 %v3791_v26, %v7563_v45  ;;  %v6335_v17 = vld [vmem:[%s6752_s14 + $0x5f4] sm:$0xf0] }
 0x3cb   : > { %v7799_v51 = vadd.f32 %v4055_v50, %v3967_v56  ;;  %v3881_v60 = vadd.f32 %v3880_v12, %v3792_v18  ;;  %3830 = vmatmul.bf16.gmra.mxu0 %v5295_v8  ;;  %v5367_v50 = vor.u32 %v6335_v17, %v5366_v53 }
 0x3cc   : > { %3919 = vmatmul.bf16.gmra.mxu1 %v5299_v37 }
 0x3cd   : > { %4008 = vmatmul.bf16.gmra.mxu2 %v5303_v58 }
 0x3ce   : > { %4097 = vmatmul.bf16.gmra.mxu3 %v5307_v46 }
 0x3d0   : > { %v3969_v1 = vpop.f32.mrf.mxu2  ;;  %v3793_v36 = vpop.f32.mrf.mxu0 }
 0x3d1   : > { %v4058_v15 = vpop.f32.mrf.mxu3  ;;  %v3970_v4 = vadd.f32 %v3969_v1, %v3881_v60  ;;  %v3882_v23 = vpop.f32.mrf.mxu1  ;;  %v3794_v45 = vadd.f32 %v3793_v36, %v7577_v32  ;;  %v5371_v32 = vor.u32 %v6327_v2, %v5368_v22  ;;  %v6342_v36 = vld [vmem:[%s6752_s14 + $0x634] sm:$0xf] }
 0x3d3   : > { %v7802_v54 = vadd.f32 %v4058_v15, %v3970_v4  ;;  %v3883_v11 = vadd.f32 %v3882_v23, %v3794_v45  ;;  %v5422_v15 = vld [vmem:[%s6752_s14 + $0x630] sm:$0xf]  ;;  %v5424_v23 = vld [vmem:[%s6752_s14 + $0x670] sm:$0xf0]  ;;  %v5430_v45 = vld [vmem:[%s6752_s14 + $0x638] sm:$0xf] }
 0x3d4   : > { %v6350_v4 = vld [vmem:[%s6752_s14 + $0x66c] sm:$0xf0]  ;;  %v5427_v17 = vor.u32 %v6342_v36, %v5424_v23 }
 0x3d5   : > { %v5423_v53 = vor.u32 %v6350_v4, %v5422_v15  ;;  %v6359_v15 = vld [vmem:[%s6752_s14 + $0x6bc] sm:$0xf] }
 0x3d6   : > { %v5496_v4 = vld [vmem:[%s6752_s14 + $0x6f8] sm:$0xf0] }
 0x3d8   : > { %v3971_v44 = vpop.f32.mrf.mxu2  ;;  %v3796_v27 = vpop.f32.mrf.mxu0 }
 0x3d9   : > { %v4060_v41 = vpop.f32.mrf.mxu3  ;;  %v3972_v43 = vadd.f32 %v3971_v44, %v3883_v11  ;;  %v3885_v38 = vpop.f32.mrf.mxu1  ;;  %v3797_v8 = vadd.f32 %v3796_v27, %v7580_v35  ;;  %v6351_v11 = vld [vmem:[%s6752_s14 + $0x674] sm:$0xf0] }
 0x3db   : > { %v7813_v37 = vadd.f32 %v4060_v41, %v3972_v43  ;;  %v3886_v56 = vadd.f32 %v3885_v38, %v3797_v8  ;;  %3835 = vmatmul.bf16.gmra.mxu0 %v5359_v61  ;;  %v5431_v41 = vor.u32 %v6351_v11, %v5430_v45 }
 0x3dc   : > { %3924 = vmatmul.bf16.gmra.mxu1 %v5363_v40 }
 0x3dd   : > { %4013 = vmatmul.bf16.gmra.mxu2 %v5367_v50 }
 0x3de   : > { %4102 = vmatmul.bf16.gmra.mxu3 %v5371_v32 }
 0x3e0   : > { %v3974_v26 = vpop.f32.mrf.mxu2  ;;  %v3798_v46 = vpop.f32.mrf.mxu0 }
 0x3e1   : > { %v4063_v12 = vpop.f32.mrf.mxu3  ;;  %v3975_v58 = vadd.f32 %v3974_v26, %v3886_v56  ;;  %v3887_v18 = vpop.f32.mrf.mxu1  ;;  %v3799_v35 = vadd.f32 %v3798_v46, %v7591_v30  ;;  %v5435_v30 = vor.u32 %v6343_v28, %v5432_v10  ;;  %v6358_v46 = vld [vmem:[%s6752_s14 + $0x6b4] sm:$0xf] }
 0x3e3   : > { %v7816_v60 = vadd.f32 %v4063_v12, %v3975_v58  ;;  %v3888_v1 = vadd.f32 %v3887_v18, %v3799_v35  ;;  %v5486_v12 = vld [vmem:[%s6752_s14 + $0x6b0] sm:$0xf]  ;;  %v5488_v18 = vld [vmem:[%s6752_s14 + $0x6f0] sm:$0xf0]  ;;  %v5494_v35 = vld [vmem:[%s6752_s14 + $0x6b8] sm:$0xf] }
 0x3e4   : > { %v6366_v58 = vld [vmem:[%s6752_s14 + $0x6ec] sm:$0xf0]  ;;  %v5491_v11 = vor.u32 %v6358_v46, %v5488_v18 }
 0x3e5   : > { %v5487_v45 = vor.u32 %v6366_v58, %v5486_v12  ;;  %v6375_v12 = vld [vmem:[%s6752_s14 + $0x73c] sm:$0xf] }
 0x3e6   : > { %v5560_v58 = vld [vmem:[%s6752_s14 + $0x778] sm:$0xf0] }
 0x3e8   : > { %v3976_v5 = vpop.f32.mrf.mxu2  ;;  %v3801_v22 = vpop.f32.mrf.mxu0 }
 0x3e9   : > { %v4065_v34 = vpop.f32.mrf.mxu3  ;;  %v3977_v2 = vadd.f32 %v3976_v5, %v3888_v1  ;;  %v3890_v44 = vpop.f32.mrf.mxu1  ;;  %v3802_v61 = vadd.f32 %v3801_v22, %v7603_v29  ;;  %v6367_v1 = vld [vmem:[%s6752_s14 + $0x6f4] sm:$0xf0] }
 0x3eb   : > { %v7827_v40 = vadd.f32 %v4065_v34, %v3977_v2  ;;  %v3891_v43 = vadd.f32 %v3890_v44, %v3802_v61  ;;  %3840 = vmatmul.bf16.gmra.mxu0 %v5423_v53  ;;  %v5495_v34 = vor.u32 %v6367_v1, %v5494_v35 }
 0x3ec   : > { %3929 = vmatmul.bf16.gmra.mxu1 %v5427_v17 }
 0x3ed   : > { %4018 = vmatmul.bf16.gmra.mxu2 %v5431_v41 }
 0x3ee   : > { %4107 = vmatmul.bf16.gmra.mxu3 %v5435_v30 }
 0x3f0   : > { %v3979_v27 = vpop.f32.mrf.mxu2  ;;  %v3803_v32 = vpop.f32.mrf.mxu0 }
 0x3f1   : > { %v4068_v38 = vpop.f32.mrf.mxu3  ;;  %v3980_v50 = vadd.f32 %v3979_v27, %v3891_v43  ;;  %v3892_v8 = vpop.f32.mrf.mxu1  ;;  %v3804_v29 = vadd.f32 %v3803_v32, %v7617_v33  ;;  %v5499_v33 = vor.u32 %v6359_v15, %v5496_v4  ;;  %v6374_v32 = vld [vmem:[%s6752_s14 + $0x734] sm:$0xf] }
 0x3f3   : > { %v7830_v56 = vadd.f32 %v4068_v38, %v3980_v50  ;;  %v3893_v26 = vadd.f32 %v3892_v8, %v3804_v29  ;;  %v5550_v38 = vld [vmem:[%s6752_s14 + $0x730] sm:$0xf]  ;;  %v5552_v8 = vld [vmem:[%s6752_s14 + $0x770] sm:$0xf0]  ;;  %v5558_v29 = vld [vmem:[%s6752_s14 + $0x738] sm:$0xf] }
 0x3f4   : > { %v6382_v50 = vld [vmem:[%s6752_s14 + $0x76c] sm:$0xf0]  ;;  %v5555_v1 = vor.u32 %v6374_v32, %v5552_v8 }
 0x3f5   : > { %v5551_v35 = vor.u32 %v6382_v50, %v5550_v38  ;;  %v6391_v38 = vld [vmem:[%s6752_s14 + $0x7bc] sm:$0xf] }
 0x3f6   : > { %v5624_v50 = vld [vmem:[%s6752_s14 + $0x7f8] sm:$0xf0] }
 0x3f8   : > { %v3981_v36 = vpop.f32.mrf.mxu2  ;;  %v3806_v10 = vpop.f32.mrf.mxu0 }
 0x3f9   : > { %v4070_v23 = vpop.f32.mrf.mxu3  ;;  %v3982_v28 = vadd.f32 %v3981_v36, %v3893_v26  ;;  %v3895_v5 = vpop.f32.mrf.mxu1  ;;  %v3807_v53 = vadd.f32 %v3806_v10, %v7620_v19  ;;  %v6383_v26 = vld [vmem:[%s6752_s14 + $0x774] sm:$0xf0] }
 0x3fb   : > { %v7841_v17 = vadd.f32 %v4070_v23, %v3982_v28  ;;  %v3896_v2 = vadd.f32 %v3895_v5, %v3807_v53  ;;  %3845 = vmatmul.bf16.gmra.mxu0 %v5487_v45  ;;  %v5559_v23 = vor.u32 %v6383_v26, %v5558_v29 }
 0x3fc   : > { %3934 = vmatmul.bf16.gmra.mxu1 %v5491_v11 }
 0x3fd   : > { %4023 = vmatmul.bf16.gmra.mxu2 %v5495_v34 }
 0x3fe   : > { %4112 = vmatmul.bf16.gmra.mxu3 %v5499_v33 }
 0x400   : > { %v3984_v22 = vpop.f32.mrf.mxu2  ;;  %v3808_v30 = vpop.f32.mrf.mxu0 }
 0x401   : > { %v4073_v44 = vpop.f32.mrf.mxu3  ;;  %v3985_v41 = vadd.f32 %v3984_v22, %v3896_v2  ;;  %v3897_v61 = vpop.f32.mrf.mxu1  ;;  %v3809_v19 = vadd.f32 %v3808_v30, %v7631_v14  ;;  %v5563_v14 = vor.u32 %v6375_v12, %v5560_v58  ;;  %v6390_v30 = vld [vmem:[%s6752_s14 + $0x7b4] sm:$0xf] }
 0x403   : > { %v7844_v43 = vadd.f32 %v4073_v44, %v3985_v41  ;;  %v3898_v27 = vadd.f32 %v3897_v61, %v3809_v19  ;;  %v5614_v44 = vld [vmem:[%s6752_s14 + $0x7b0] sm:$0xf]  ;;  %v5616_v61 = vld [vmem:[%s6752_s14 + $0x7f0] sm:$0xf0]  ;;  %v5622_v19 = vld [vmem:[%s6752_s14 + $0x7b8] sm:$0xf] }
 0x404   : > { %v6398_v41 = vld [vmem:[%s6752_s14 + $0x7ec] sm:$0xf0]  ;;  %v5619_v26 = vor.u32 %v6390_v30, %v5616_v61 }
 0x405   : > { %v5615_v29 = vor.u32 %v6398_v41, %v5614_v44 }
 0x408   : > { %v3986_v46 = vpop.f32.mrf.mxu2  ;;  %v3811_v4 = vpop.f32.mrf.mxu0 }
 0x409   : > { %v4075_v18 = vpop.f32.mrf.mxu3  ;;  %v3987_v15 = vadd.f32 %v3986_v46, %v3898_v27  ;;  %v3900_v36 = vpop.f32.mrf.mxu1  ;;  %v3812_v45 = vadd.f32 %v3811_v4, %v7634_v57  ;;  %v6399_v27 = vld [vmem:[%s6752_s14 + $0x7f4] sm:$0xf0]  ;;  %s6143_s14 = sshll.u32 %s8385_s10, 7 }
 0x40a   : > { %s8326_s20 = scalar_lea.vmem %s8369_s2, %s6143_s14 }
 0x40b   : > { %v7855_v11 = vadd.f32 %v4075_v18, %v3987_v15  ;;  %v3901_v28 = vadd.f32 %v3900_v36, %v3812_v45  ;;  %3850 = vmatmul.bf16.gmra.mxu0 %v5551_v35  ;;  %v5623_v18 = vor.u32 %v6399_v27, %v5622_v19 }
 0x40c   : > { %3939 = vmatmul.bf16.gmra.mxu1 %v5555_v1 }
 0x40d   : > { %4028 = vmatmul.bf16.gmra.mxu2 %v5559_v23 }
 0x40e   : > { %4117 = vmatmul.bf16.gmra.mxu3 %v5563_v14 }
 0x410   : > { %v3989_v10 = vpop.f32.mrf.mxu2  ;;  %v3813_v33 = vpop.f32.mrf.mxu0 }
 0x411   : > { %v4078_v5 = vpop.f32.mrf.mxu3  ;;  %v3990_v34 = vadd.f32 %v3989_v10, %v3901_v28  ;;  %v3902_v53 = vpop.f32.mrf.mxu1  ;;  %v3814_v57 = vadd.f32 %v3813_v33, %v7645_v25  ;;  %v5627_v25 = vor.u32 %v6391_v38, %v5624_v50 }
 0x413   : > { %v7858_v2 = vadd.f32 %v4078_v5, %v3990_v34  ;;  %v3903_v22 = vadd.f32 %v3902_v53, %v3814_v57 }
 0x418   : > { %v3991_v32 = vpop.f32.mrf.mxu2  ;;  %v3816_v58 = vpop.f32.mrf.mxu0 }
 0x419   : > { %v4080_v8 = vpop.f32.mrf.mxu3  ;;  %v3992_v12 = vadd.f32 %v3991_v32, %v3903_v22  ;;  %v3905_v46 = vpop.f32.mrf.mxu1  ;;  %v3817_v35 = vadd.f32 %v3816_v58, %v7648_v16 }
 0x41b   : > { %v7869_v1 = vadd.f32 %v4080_v8, %v3992_v12  ;;  %v3906_v15 = vadd.f32 %v3905_v46, %v3817_v35  ;;  %3855 = vmatmul.bf16.gmra.mxu0 %v5615_v29 }
 0x41c   : > { %3944 = vmatmul.bf16.gmra.mxu1 %v5619_v26 }
 0x41d   : > { %4033 = vmatmul.bf16.gmra.mxu2 %v5623_v18 }
 0x41e   : > { %4122 = vmatmul.bf16.gmra.mxu3 %v5627_v25 }
 0x420   : > { %v3994_v4 = vpop.f32.mrf.mxu2  ;;  %v3818_v14 = vpop.f32.mrf.mxu0 }
 0x421   : > { %v4083_v36 = vpop.f32.mrf.mxu3  ;;  %v3995_v23 = vadd.f32 %v3994_v4, %v3906_v15  ;;  %v3907_v45 = vpop.f32.mrf.mxu1  ;;  %v3819_v28 = vadd.f32 %v3818_v14, %v7659_v55 }
 0x423   : > { %v7872_v10 = vadd.f32 %v4083_v36, %v3995_v23  ;;  %v3908_v5 = vadd.f32 %v3907_v45, %v3819_v28 }
 0x428   : > { %v3996_v34 = vpop.f32.mrf.mxu2  ;;  %v3821_v53 = vpop.f32.mrf.mxu0 }
 0x429   : > { %v4085_v33 = vpop.f32.mrf.mxu3  ;;  %v3997_v16 = vadd.f32 %v3996_v34, %v3908_v5  ;;  %v3910_v57 = vpop.f32.mrf.mxu1  ;;  %v3822_v22 = vadd.f32 %v3821_v53, %v7662_v48 }
 0x42b   : > { %v7875_v44 = vadd.f32 %v4085_v33, %v3997_v16  ;;  %v3911_v41 = vadd.f32 %v3910_v57, %v3822_v22  ;;  %v4199_v57 = vmul.f32 %v7785_v39, %v7785_v39 }
 0x430   : > { %v3999_v30 = vpop.f32.mrf.mxu2  ;;  %v3823_v27 = vpop.f32.mrf.mxu0 }
 0x431   : > { %v4088_v61 = vpop.f32.mrf.mxu3  ;;  %v4000_v19 = vadd.f32 %v3999_v30, %v3911_v41  ;;  %v3912_v38 = vpop.f32.mrf.mxu1  ;;  %v3824_v55 = vadd.f32 %v3823_v27, %v7673_v6  ;;  %v4200_v27 = vmul.f32 %v7788_v31, %v7788_v31 }
 0x433   : > { %v7878_v50 = vadd.f32 %v4088_v61, %v4000_v19  ;;  %v3913_v32 = vadd.f32 %v3912_v38, %v3824_v55  ;;  %v4198_v19 = vmul.f32 %v7774_v21, %v7774_v21 }
 0x435   : > { %v4230_v55 = vadd.f32 %v4199_v57, %v4198_v19  ;;  %v4207_v57 = vmul.f32 %v7841_v17, %v7841_v17 }
 0x438   : > { %v4001_v8 = vpop.f32.mrf.mxu2  ;;  %v3826_v12 = vpop.f32.mrf.mxu0 }
 0x439   : > { %v4090_v29 = vpop.f32.mrf.mxu3  ;;  %v4002_v26 = vadd.f32 %v4001_v8, %v3913_v32  ;;  %v3915_v58 = vpop.f32.mrf.mxu1  ;;  %v3827_v48 = vadd.f32 %v3826_v12, %v7676_v42  ;;  %v4201_v32 = vmul.f32 %v7799_v51, %v7799_v51 }
 0x43b   : > { %v7881_v46 = vadd.f32 %v4090_v29, %v4002_v26  ;;  %v3916_v18 = vadd.f32 %v3915_v58, %v3827_v48  ;;  %v4231_v29 = vadd.f32 %v4230_v55, %v4200_v27  ;;  %v4202_v26 = vmul.f32 %v7802_v54, %v7802_v54 }
 0x43c   : > { %v4203_v48 = vmul.f32 %v7813_v37, %v7813_v37  ;;  %v4208_v55 = vmul.f32 %v7844_v43, %v7844_v43 }
 0x43d   : > { %v4232_v58 = vadd.f32 %v4231_v29, %v4201_v32  ;;  %v4209_v29 = vmul.f32 %v7855_v11, %v7855_v11 }
 0x440   : > { %v4004_v25 = vpop.f32.mrf.mxu2  ;;  %v3828_v4 = vpop.f32.mrf.mxu0 }
 0x441   : > { %v4093_v35 = vpop.f32.mrf.mxu3  ;;  %v4005_v15 = vadd.f32 %v4004_v25, %v3916_v18  ;;  %v3917_v36 = vpop.f32.mrf.mxu1  ;;  %v3829_v6 = vadd.f32 %v3828_v4, %v7687_v3 }
 0x443   : > { %v7884_v23 = vadd.f32 %v4093_v35, %v4005_v15  ;;  %v3918_v14 = vadd.f32 %v3917_v36, %v3829_v6  ;;  %v4233_v36 = vadd.f32 %v4232_v58, %v4202_v26  ;;  %v4204_v6 = vmul.f32 %v7816_v60, %v7816_v60 }
 0x444   : > { %v4210_v58 = vmul.f32 %v7858_v2, %v7858_v2 }
 0x448   : > { %v4006_v45 = vpop.f32.mrf.mxu2  ;;  %v3831_v34 = vpop.f32.mrf.mxu0 }
 0x449   : > { %v4095_v28 = vpop.f32.mrf.mxu3  ;;  %v4007_v5 = vadd.f32 %v4006_v45, %v3918_v14  ;;  %v3920_v33 = vpop.f32.mrf.mxu1  ;;  %v3832_v42 = vadd.f32 %v3831_v34, %v7690_v47  ;;  %v4160_v47 = vadd.f32 %v7785_v39, %v7774_v21  ;;  %v4234_v45 = vadd.f32 %v4233_v36, %v4203_v48 }
 0x44a   : > { %v4211_v36 = vmul.f32 %v7869_v1, %v7869_v1 }
 0x44b   : > { %v7887_v16 = vadd.f32 %v4095_v28, %v4007_v5  ;;  %v3921_v53 = vadd.f32 %v3920_v33, %v3832_v42  ;;  %v4161_v8 = vadd.f32 %v4160_v47, %v7788_v31  ;;  %v4205_v28 = vmul.f32 %v7827_v40, %v7827_v40 }
 0x44c   : > { %v4235_v34 = vadd.f32 %v4234_v45, %v4204_v6  ;;  %v4206_v33 = vmul.f32 %v7830_v56, %v7830_v56 }
 0x44d   : > { %v4162_v12 = vadd.f32 %v4161_v8, %v7799_v51 }
 0x44f   : > { %v4163_v35 = vadd.f32 %v4162_v12, %v7802_v54 }
 0x450   : > { %v4009_v22 = vpop.f32.mrf.mxu2  ;;  %v3833_v3 = vpop.f32.mrf.mxu0 }
 0x451   : > { %v4098_v41 = vpop.f32.mrf.mxu3  ;;  %v4010_v30 = vadd.f32 %v4009_v22, %v3921_v53  ;;  %v3922_v61 = vpop.f32.mrf.mxu1  ;;  %v4164_v14 = vadd.f32 %v4163_v35, %v7813_v37  ;;  %v4236_v53 = vadd.f32 %v4235_v34, %v4205_v28 }
 0x453   : > { %v7897_v38 = vadd.f32 %v4098_v41, %v4010_v30  ;;  %v4165_v5 = vadd.f32 %v4164_v14, %v7816_v60  ;;  %v4237_v47 = vadd.f32 %v4236_v53, %v4206_v33  ;;  %v4212_v33 = vmul.f32 %v7872_v10, %v7872_v10 }
 0x454   : > { %v3834_v53 = vadd.f32 %v3833_v3, %v7701_v7  ;;  %v4215_v7 = vmul.f32 %v7881_v46, %v7881_v46 }
 0x455   : > { %v4166_v42 = vadd.f32 %v4165_v5, %v7827_v40  ;;  %v4238_v8 = vadd.f32 %v4237_v47, %v4207_v57 }
 0x457   : > { %v4167_v30 = vadd.f32 %v4166_v42, %v7830_v56  ;;  %v4239_v12 = vadd.f32 %v4238_v8, %v4208_v55  ;;  %v4214_v8 = vmul.f32 %v7878_v50, %v7878_v50 }
 0x458   : > { %v4011_v18 = vpop.f32.mrf.mxu2  ;;  %v3836_v15 = vpop.f32.mrf.mxu0 }
 0x459   : > { %v7907_v25 = vpop.f32.mrf.mxu3  ;;  %v3925_v4 = vpop.f32.mrf.mxu1  ;;  %v4168_v32 = vadd.f32 %v4167_v30, %v7841_v17  ;;  %v4240_v35 = vadd.f32 %v4239_v12, %v4209_v29  ;;  %v4213_v30 = vmul.f32 %v7875_v44, %v7875_v44  ;;  %v3837_v55 = vadd.f32 %v3836_v15, %v7704_v52 }
 0x45b   : > { %v4169_v26 = vadd.f32 %v4168_v32, %v7844_v43  ;;  %v4241_v34 = vadd.f32 %v4240_v35, %v4210_v58 }
 0x45d   : > { %v4170_v48 = vadd.f32 %v4169_v26, %v7855_v11  ;;  %v4242_v57 = vadd.f32 %v4241_v34, %v4211_v36  ;;  %v3923_v26 = vadd.f32 %v3922_v61, %v3834_v53  ;;  %v4216_v61 = vmul.f32 %v7884_v23, %v7884_v23 }
 0x45f   : > { %v4171_v45 = vadd.f32 %v4170_v48, %v7858_v2  ;;  %v4243_v32 = vadd.f32 %v4242_v57, %v4212_v33  ;;  %v4012_v36 = vadd.f32 %v4011_v18, %v3923_v26 }
 0x460   : > { %v4014_v22 = vpop.f32.mrf.mxu2  ;;  %v3838_v19 = vpop.f32.mrf.mxu0 }
 0x461   : > { %v4103_v41 = vpop.f32.mrf.mxu3  ;;  %v3927_v27 = vpop.f32.mrf.mxu1  ;;  %v4172_v42 = vadd.f32 %v4171_v45, %v7869_v1  ;;  %v3839_v12 = vadd.f32 %v3838_v19, %v7715_v9  ;;  %v4244_v58 = vadd.f32 %v4243_v32, %v4213_v30  ;;  %v3926_v45 = vadd.f32 %v3925_v4, %v3837_v55 }
 0x462   : > { %v4217_v30 = vmul.f32 %v7887_v16, %v7887_v16  ;;  %v4218_v55 = vmul.f32 %v7897_v38, %v7897_v38 }
 0x463   : > { %v4173_v47 = vadd.f32 %v4172_v42, %v7872_v10  ;;  %v4245_v33 = vadd.f32 %v4244_v58, %v4214_v8  ;;  %v4015_v19 = vadd.f32 %v4014_v22, %v3926_v45  ;;  %v3928_v42 = vadd.f32 %v3927_v27, %v3839_v12 }
 0x465   : > { %v4174_v29 = vadd.f32 %v4173_v47, %v7875_v44  ;;  %v4246_v57 = vadd.f32 %v4245_v33, %v4215_v7  ;;  %v7963_v27 = vadd.f32 %v4103_v41, %v4015_v19 }
 0x467   : > { %v4175_v35 = vadd.f32 %v4174_v29, %v7878_v50  ;;  %v4247_v47 = vadd.f32 %v4246_v57, %v4216_v61  ;;  %v4220_v41 = vmul.f32 %v7963_v27, %v7963_v27 }
 0x468   : > { %v4016_v6 = vpop.f32.mrf.mxu2  ;;  %v3841_v28 = vpop.f32.mrf.mxu0 }
 0x469   : > { %v4105_v14 = vpop.f32.mrf.mxu3  ;;  %v3930_v5 = vpop.f32.mrf.mxu1  ;;  %v3842_v52 = vadd.f32 %v3841_v28, %v7718_v20  ;;  %v4176_v9 = vadd.f32 %v4175_v35, %v7881_v46  ;;  %v7958_v20 = vadd.f32 %v7907_v25, %v4012_v36  ;;  %v4017_v4 = vadd.f32 %v4016_v6, %v3928_v42 }
 0x46a   : > { %v4248_v8 = vadd.f32 %v4247_v47, %v4217_v30 }
 0x46b   : > { %v4177_v18 = vadd.f32 %v4176_v9, %v7884_v23  ;;  %v3931_v28 = vadd.f32 %v3930_v5, %v3842_v52  ;;  %v4219_v25 = vmul.f32 %v7958_v20, %v7958_v20  ;;  %v7968_v6 = vadd.f32 %v4105_v14, %v4017_v4 }
 0x46c   : > { %v4249_v35 = vadd.f32 %v4248_v8, %v4218_v55 }
 0x46d   : > { %v4178_v22 = vadd.f32 %v4177_v18, %v7887_v16  ;;  %v4221_v14 = vmul.f32 %v7968_v6, %v7968_v6 }
 0x46e   : > { %v4250_v52 = vadd.f32 %v4249_v35, %v4219_v25 }
 0x46f   : > { %v4179_v12 = vadd.f32 %v4178_v22, %v7897_v38 }
 0x470   : > { %v4019_v3 = vpop.f32.mrf.mxu2  ;;  %v3843_v15 = vpop.f32.mrf.mxu0  ;;  %v4251_v33 = vadd.f32 %v4250_v52, %v4220_v41 }
 0x471   : > { %v4108_v48 = vpop.f32.mrf.mxu3  ;;  %v3932_v34 = vpop.f32.mrf.mxu1  ;;  %v3844_v53 = vadd.f32 %v3843_v15, %v7729_v49  ;;  %v4020_v49 = vadd.f32 %v4019_v3, %v3931_v28  ;;  %v4180_v36 = vadd.f32 %v4179_v12, %v7958_v20 }
 0x473   : > { %v3933_v32 = vadd.f32 %v3932_v34, %v3844_v53  ;;  %v7973_v3 = vadd.f32 %v4108_v48, %v4020_v49  ;;  %v4181_v15 = vadd.f32 %v4180_v36, %v7963_v27  ;;  %v4252_v53 = vadd.f32 %v4251_v33, %v4221_v14 }
 0x475   : > { %v4182_v61 = vadd.f32 %v4181_v15, %v7968_v6  ;;  %v4222_v9 = vmul.f32 %v7973_v3, %v7973_v3 }
 0x477   : > { %v4253_v28 = vadd.f32 %v4252_v53, %v4222_v9 }
 0x478   : > { %v4021_v29 = vpop.f32.mrf.mxu2  ;;  %v3846_v58 = vpop.f32.mrf.mxu0 }
 0x479   : > { %v4110_v26 = vpop.f32.mrf.mxu3  ;;  %v4022_v5 = vadd.f32 %v4021_v29, %v3933_v32  ;;  %v3935_v7 = vpop.f32.mrf.mxu1  ;;  %v3847_v45 = vadd.f32 %v3846_v58, %v7732_v59  ;;  %v4183_v59 = vadd.f32 %v4182_v61, %v7973_v3 }
 0x47b   : > { %v7979_v34 = vadd.f32 %v4110_v26, %v4022_v5  ;;  %v3936_v19 = vadd.f32 %v3935_v7, %v3847_v45 }
 0x47d   : > { %v4223_v57 = vmul.f32 %v7979_v34, %v7979_v34  ;;  %v4184_v47 = vadd.f32 %v4183_v59, %v7979_v34 }
 0x47f   : > { %v4254_v49 = vadd.f32 %v4253_v28, %v4223_v57 }
 0x480   : > { %v4024_v42 = vpop.f32.mrf.mxu2  ;;  %v3848_v18 = vpop.f32.mrf.mxu0 }
 0x481   : > { %v4113_v48 = vpop.f32.mrf.mxu3  ;;  %v4025_v30 = vadd.f32 %v4024_v42, %v3936_v19  ;;  %v3937_v4 = vpop.f32.mrf.mxu1  ;;  %v3849_v22 = vadd.f32 %v3848_v18, %v7743_v0 }
 0x483   : > { %v7988_v55 = vadd.f32 %v4113_v48, %v4025_v30  ;;  %v3938_v26 = vadd.f32 %v3937_v4, %v3849_v22 }
 0x485   : > { %v4185_v32 = vadd.f32 %v4184_v47, %v7988_v55  ;;  %v4224_v8 = vmul.f32 %v7988_v55, %v7988_v55 }
 0x487   : > { %v4255_v29 = vadd.f32 %v4254_v49, %v4224_v8 }
 0x488   : > { %v4026_v12 = vpop.f32.mrf.mxu2  ;;  %v3851_v58 = vpop.f32.mrf.mxu0 }
 0x489   : > { %v4115_v25 = vpop.f32.mrf.mxu3  ;;  %v4027_v5 = vadd.f32 %v4026_v12, %v3938_v26  ;;  %v3940_v7 = vpop.f32.mrf.mxu1  ;;  %v3852_v36 = vadd.f32 %v3851_v58, %v7746_v24 }
 0x48b   : > { %v7994_v35 = vadd.f32 %v4115_v25, %v4027_v5  ;;  %v3941_v52 = vadd.f32 %v3940_v7, %v3852_v36 }
 0x48d   : > { %v4186_v41 = vadd.f32 %v4185_v32, %v7994_v35  ;;  %v4225_v0 = vmul.f32 %v7994_v35, %v7994_v35 }
 0x48f   : > { %v4256_v45 = vadd.f32 %v4255_v29, %v4225_v0 }
 0x490   : > { %v4029_v15 = vpop.f32.mrf.mxu2  ;;  %v3853_v61 = vpop.f32.mrf.mxu0 }
 0x491   : > { %v4118_v14 = vpop.f32.mrf.mxu3  ;;  %v4030_v33 = vadd.f32 %v4029_v15, %v3941_v52  ;;  %v3942_v9 = vpop.f32.mrf.mxu1  ;;  %v3854_v42 = vadd.f32 %v3853_v61, %v7757_v13 }
 0x493   : > { %v8000_v19 = vadd.f32 %v4118_v14, %v4030_v33  ;;  %v3943_v59 = vadd.f32 %v3942_v9, %v3854_v42 }
 0x495   : > { %v4187_v48 = vadd.f32 %v4186_v41, %v8000_v19  ;;  %v4226_v24 = vmul.f32 %v8000_v19, %v8000_v19 }
 0x497   : > { %v4257_v53 = vadd.f32 %v4256_v45, %v4226_v24 }
 0x498   : > { %v4031_v57 = vpop.f32.mrf.mxu2  ;;  %v3856_v4 = vpop.f32.mrf.mxu0 }
 0x499   : > { %v4120_v30 = vpop.f32.mrf.mxu3  ;;  %v4032_v18 = vadd.f32 %v4031_v57, %v3943_v59  ;;  %v3857_v47 = vadd.f32 %v3856_v4, %v7760_v62  ;;  %v3945_v22 = vpop.f32.mrf.mxu1 }
 0x49b   : > { %v8006_v28 = vadd.f32 %v4120_v30, %v4032_v18  ;;  %v3946_v8 = vadd.f32 %v3945_v22, %v3857_v47 }
 0x49d   : > { %v4188_v49 = vadd.f32 %v4187_v48, %v8006_v28  ;;  %v4227_v13 = vmul.f32 %v8006_v28, %v8006_v28 }
 0x49f   : > { %v4258_v32 = vadd.f32 %v4257_v53, %v4227_v13 }
 0x4a0   : > { %v4034_v29 = vpop.f32.mrf.mxu2  ;;  %v3858_v25 = vpop.f32.mrf.mxu0 }
 0x4a1   : > { %v4123_v26 = vpop.f32.mrf.mxu3  ;;  %v4035_v12 = vadd.f32 %v4034_v29, %v3946_v8  ;;  %v3859_v58 = vadd.f32 %v3858_v25, %v7771_v63  ;;  %v3947_v36 = vpop.f32.mrf.mxu1 }
 0x4a3   : > { %v8012_v5 = vadd.f32 %v4123_v26, %v4035_v12  ;;  %v3948_v0 = vadd.f32 %v3947_v36, %v3859_v58 }
 0x4a5   : > { %v4189_v7 = vadd.f32 %v4188_v49, %v8012_v5  ;;  %v4228_v62 = vmul.f32 %v8012_v5, %v8012_v5 }
 0x4a7   : > { %v4259_v41 = vadd.f32 %v4258_v32, %v4228_v62 }
 0x4a8   : > { %v4036_v45 = vpop.f32.mrf.mxu2 }
 0x4a9   : > { %v4037_v52 = vadd.f32 %v4036_v45, %v3948_v0  ;;  %v4125_v15 = vpop.f32.mrf.mxu3 }
 0x4ab   : > { %v8018_v14 = vadd.f32 %v4125_v15, %v4037_v52 }
 0x4ad   : > { %v4190_v33 = vadd.f32 %v4189_v7, %v8018_v14  ;;  %v4229_v61 = vmul.f32 %v8018_v14, %v8018_v14 }
 0x4af   : > { %v4191_v9 = vrot.slane %v4190_v33, 4  ;;  %v4260_v63 = vadd.f32 %v4259_v41, %v4229_v61 }
 0x4b1   : > { %v4192_v42 = vadd.f32 %v4191_v9, %v4190_v33  ;;  %v4261_v48 = vrot.slane %v4260_v63, 4 }
 0x4b3   : > { %v4193_v24 = vrot.slane %v4192_v42, 2  ;;  %v4262_v53 = vadd.f32 %v4261_v48, %v4260_v63 }
 0x4b5   : > { %v4194_v59 = vadd.f32 %v4193_v24, %v4192_v42  ;;  %v4263_v57 = vrot.slane %v4262_v53, 2 }
 0x4b7   : > { %v4195_v30 = vrot.slane %v4194_v59, 1  ;;  %v4264_v18 = vadd.f32 %v4263_v57, %v4262_v53 }
 0x4b9   : > { %v4196_v4 = vadd.f32 %v4195_v30, %v4194_v59  ;;  %v4265_v47 = vrot.slane %v4264_v18, 1 }
 0x4bb   : > { %v4266_v22 = vadd.f32 %v4265_v47, %v4264_v18  ;;  %v8023_v49 = vmul.f32 0.00390625, %v4196_v4 }
 0x4bd   : > { %v4269_v13 = vmul.f32 0.00390625, %v4266_v22  ;;  %v4270_v32 = vmul.f32 %v8023_v49, %v8023_v49  ;;  %v4341_v12 = vsub.f32 %v7979_v34, %v8023_v49  ;;  %v4342_v25 = vsub.f32 %v7988_v55, %v8023_v49 }
 0x4be   : > { %v4343_v58 = vsub.f32 %v7994_v35, %v8023_v49  ;;  %v4344_v7 = vsub.f32 %v8000_v19, %v8023_v49  ;;  %v4345_v62 = vsub.f32 %v8006_v28, %v8023_v49  ;;  %v4346_v36 = vsub.f32 %v8012_v5, %v8023_v49 }
 0x4bf   : > { %v4271_v8 = vsub.f32 %v4269_v13, %v4270_v32  ;;  %v4347_v41 = vsub.f32 %v8018_v14, %v8023_v49  ;;  %v4316_v15 = vsub.f32 %v7774_v21, %v8023_v49  ;;  %v4317_v33 = vsub.f32 %v7785_v39, %v8023_v49 }
 0x4c0   : > { %v4318_v61 = vsub.f32 %v7788_v31, %v8023_v49  ;;  %v4319_v63 = vsub.f32 %v7799_v51, %v8023_v49  ;;  %v4320_v42 = vsub.f32 %v7802_v54, %v8023_v49  ;;  %v4321_v48 = vsub.f32 %v7813_v37, %v8023_v49 }
 0x4c1   : > { %v4272_v29 = vmax.f32 %v4271_v8, 0.0  ;;  %v4322_v24 = vsub.f32 %v7816_v60, %v8023_v49  ;;  %v4323_v21 = vsub.f32 %v7827_v40, %v8023_v49  ;;  %v4324_v39 = vsub.f32 %v7830_v56, %v8023_v49 }
 0x4c2   : > { %v4325_v31 = vsub.f32 %v7841_v17, %v8023_v49  ;;  %v4326_v51 = vsub.f32 %v7844_v43, %v8023_v49  ;;  %v4327_v54 = vsub.f32 %v7855_v11, %v8023_v49  ;;  %v4328_v37 = vsub.f32 %v7858_v2, %v8023_v49 }
 0x4c3   : > { %v4273_v26 = vadd.f32 1e-05, %v4272_v29  ;;  %v4329_v60 = vsub.f32 %v7869_v1, %v8023_v49  ;;  %v4330_v40 = vsub.f32 %v7872_v10, %v8023_v49  ;;  %v4331_v56 = vsub.f32 %v7875_v44, %v8023_v49 }
 0x4c4   : > { %v4332_v43 = vsub.f32 %v7878_v50, %v8023_v49  ;;  %v4333_v11 = vsub.f32 %v7881_v46, %v8023_v49  ;;  %v4334_v2 = vsub.f32 %v7884_v23, %v8023_v49  ;;  %v4335_v1 = vsub.f32 %v7887_v16, %v8023_v49 }
 0x4c5   : > { %6631 = vrsqrt.f32 %v4273_v26  ;;  %vm4280_vm1 = vweird.f32 %v4273_v26  ;;  %v4336_v10 = vsub.f32 %v7897_v38, %v8023_v49  ;;  %v4337_v44 = vsub.f32 %v7958_v20, %v8023_v49 }
 0x4c6   : > { %v4338_v50 = vsub.f32 %v7963_v27, %v8023_v49  ;;  %v4339_v46 = vsub.f32 %v7968_v6, %v8023_v49  ;;  %v4340_v57 = vsub.f32 %v7973_v3, %v8023_v49 }
 0x4cb   : > { %v6632_v0 = vpop.eup %6631 }
 0x4cc   : > { %v4275_v45 = vmul.f32 %v6632_v0, %v4273_v26  ;;  %vm4281_vm0 = vweird.f32 %v6632_v0 }
 0x4cd   : > { %vm4282_vm2 = vmor %vm4280_vm1, %vm4281_vm0 }
 0x4ce   : > { %v4276_v52 = vmul.f32 %v6632_v0, %v4275_v45 }
 0x4d0   : > { %v4277_v9 = vmul.f32 0.5, %v4276_v52 }
 0x4d2   : > { %v4278_v53 = vsub.f32 1.5, %v4277_v9 }
 0x4d4   : > { %v4279_v17 = vmul.f32 %v6632_v0, %v4278_v53 }
 0x4d6   : > { %v4283_v59 = vsel %vm4282_vm2, %v6632_v0, %v4279_v17 }
 0x4d7   : > { %v8091_v23 = vmul.f32 %v4316_v15, %v4283_v59  ;;  %v8093_v30 = vmul.f32 %v4317_v33, %v4283_v59  ;;  %v8095_v16 = vmul.f32 %v4318_v61, %v4283_v59  ;;  %v8097_v38 = vmul.f32 %v4319_v63, %v4283_v59 }
 0x4d8   : > { %v8099_v18 = vmul.f32 %v4320_v42, %v4283_v59  ;;  %v8101_v20 = vmul.f32 %v4321_v48, %v4283_v59  ;;  %v8103_v4 = vmul.f32 %v4322_v24, %v4283_v59  ;;  %v8105_v27 = vmul.f32 %v4323_v21, %v4283_v59 }
 0x4d9   : > { %v8107_v6 = vmul.f32 %v4324_v39, %v4283_v59  ;;  %v8109_v47 = vmul.f32 %v4325_v31, %v4283_v59  ;;  %v8111_v3 = vmul.f32 %v4326_v51, %v4283_v59  ;;  %v8113_v22 = vmul.f32 %v4327_v54, %v4283_v59 }
 0x4da   : > { %v8115_v13 = vmul.f32 %v4328_v37, %v4283_v59  ;;  %v8117_v32 = vmul.f32 %v4329_v60, %v4283_v59  ;;  %v8119_v8 = vmul.f32 %v4330_v40, %v4283_v59  ;;  %v8121_v29 = vmul.f32 %v4331_v56, %v4283_v59 }
 0x4db   : > { %v8123_v26 = vmul.f32 %v4332_v43, %v4283_v59  ;;  %v8125_v0 = vmul.f32 %v4333_v11, %v4283_v59  ;;  %v8127_v45 = vmul.f32 %v4334_v2, %v4283_v59  ;;  %v8129_v52 = vmul.f32 %v4335_v1, %v4283_v59 }
 0x4dc   : > { %v8131_v15 = vmul.f32 %v4336_v10, %v4283_v59  ;;  %v8133_v33 = vmul.f32 %v4337_v44, %v4283_v59  ;;  %v8135_v61 = vmul.f32 %v4338_v50, %v4283_v59  ;;  %v8137_v9 = vmul.f32 %v4339_v46, %v4283_v59 }
 0x4dd   : > { %v8139_v63 = vmul.f32 %v4340_v57, %v4283_v59  ;;  %v8144_v42 = vmul.f32 %v4341_v12, %v4283_v59  ;;  %v8149_v48 = vmul.f32 %v4342_v25, %v4283_v59  ;;  %v8154_v24 = vmul.f32 %v4343_v58, %v4283_v59 }
 0x4de   : > { %v8159_v21 = vmul.f32 %v4344_v7, %v4283_v59  ;;  %v8164_v34 = vmul.f32 %v4345_v62, %v4283_v59  ;;  %v8169_v55 = vmul.f32 %v4346_v36, %v4283_v59  ;;  %v8174_v35 = vmul.f32 %v4347_v41, %v4283_v59 }
 0x4df   : > { %vm4380_vm3 = vcmp.ge.f32.partialorder %v8091_v23, 0.0  ;;  %vm4381_vm4 = vcmp.ge.f32.partialorder %v8093_v30, 0.0  ;;  %vm4382_vm5 = vcmp.ge.f32.partialorder %v8095_v16, 0.0  ;;  %vm4383_vm6 = vcmp.ge.f32.partialorder %v8097_v38, 0.0 }
 0x4e0   : > { %vm4384_vm7 = vcmp.ge.f32.partialorder %v8099_v18, 0.0  ;;  %vm4385_vm8 = vcmp.ge.f32.partialorder %v8101_v20, 0.0  ;;  %vm4386_vm9 = vcmp.ge.f32.partialorder %v8103_v4, 0.0  ;;  %vm4387_vm10 = vcmp.ge.f32.partialorder %v8105_v27, 0.0 }
 0x4e1   : > { %vm4388_vm11 = vcmp.ge.f32.partialorder %v8107_v6, 0.0  ;;  %v4412_v19 = vmul.f32 0.2, %v8091_v23  ;;  %v4413_v28 = vmul.f32 0.2, %v8093_v30  ;;  %vm4395_vm2 = vcmp.ge.f32.partialorder %v8121_v29, 0.0 }
 0x4e2   : > { %v4414_v5 = vmul.f32 0.2, %v8095_v16  ;;  %vm4396_vm12 = vcmp.ge.f32.partialorder %v8123_v26, 0.0  ;;  %v4415_v14 = vmul.f32 0.2, %v8097_v38  ;;  %vm4401_vm1 = vcmp.ge.f32.partialorder %v8133_v33, 0.0 }
 0x4e3   : > { %v4416_v49 = vmul.f32 0.2, %v8099_v18  ;;  %v4417_v12 = vmul.f32 0.2, %v8101_v20  ;;  %v4418_v25 = vmul.f32 0.2, %v8103_v4  ;;  %v8210_v62 = vsel %vm4380_vm3, %v8091_v23, %v4412_v19 }
 0x4e4   : > { %v4419_v58 = vmul.f32 0.2, %v8105_v27  ;;  %v4420_v7 = vmul.f32 0.2, %v8107_v6  ;;  %vm4405_vm14 = vcmp.ge.f32.partialorder %v8144_v42, 0.0  ;;  %v8222_v31 = vsel %vm4381_vm4, %v8093_v30, %v4413_v28 }
 0x4e5   : > { %v4421_v36 = vmul.f32 0.2, %v8109_v47  ;;  %v4422_v41 = vmul.f32 0.2, %v8111_v3  ;;  %v4423_v39 = vmul.f32 0.2, %v8113_v22  ;;  %v4446_v37 = vsel %vm4382_vm5, %v8095_v16, %v4414_v5 }
 0x4e6   : > { %vm4407_vm13 = vcmp.ge.f32.partialorder %v8154_v24, 0.0  ;;  %vm4408_vm0 = vcmp.ge.f32.partialorder %v8159_v21, 0.0  ;;  %vm4409_vm15 = vcmp.ge.f32.partialorder %v8164_v34, 0.0  ;;  %v4424_v53 = vmul.f32 0.2, %v8115_v13 }
 0x4e7   : > { %v4425_v51 = vmul.f32 0.2, %v8117_v32  ;;  %v4426_v54 = vmul.f32 0.2, %v8119_v8  ;;  %vm4410_vm4 = vcmp.ge.f32.partialorder %v8169_v55, 0.0  ;;  %vm4411_vm3 = vcmp.ge.f32.partialorder %v8174_v35, 0.0 }
 0x4e8   : > { %v4427_v60 = vmul.f32 0.2, %v8121_v29  ;;  %v4428_v40 = vmul.f32 0.2, %v8123_v26  ;;  %v4429_v56 = vmul.f32 0.2, %v8125_v0  ;;  %v4447_v17 = vsel %vm4383_vm6, %v8097_v38, %v4415_v14 }
 0x4e9   : > { %v4430_v43 = vmul.f32 0.2, %v8127_v45  ;;  %v4431_v11 = vmul.f32 0.2, %v8129_v52  ;;  %v4432_v2 = vmul.f32 0.2, %v8131_v15  ;;  %v4448_v1 = vsel %vm4384_vm7, %v8099_v18, %v4416_v49 }
 0x4ea   : > { %v4433_v10 = vmul.f32 0.2, %v8133_v33  ;;  %v4434_v44 = vmul.f32 0.2, %v8135_v61  ;;  %v4435_v59 = vmul.f32 0.2, %v8137_v9  ;;  %v4449_v50 = vsel %vm4385_vm8, %v8101_v20, %v4417_v12 }
 0x4eb   : > { %v4436_v46 = vmul.f32 0.2, %v8139_v63  ;;  %v4437_v57 = vmul.f32 0.2, %v8144_v42  ;;  %v4438_v23 = vmul.f32 0.2, %v8149_v48  ;;  %v4450_v30 = vsel %vm4386_vm9, %v8103_v4, %v4418_v25 }
 0x4ec   : > { %v4439_v16 = vmul.f32 0.2, %v8154_v24  ;;  %v4440_v38 = vmul.f32 0.2, %v8159_v21  ;;  %v4441_v18 = vmul.f32 0.2, %v8164_v34  ;;  %v4451_v20 = vsel %vm4387_vm10, %v8105_v27, %v4419_v58 }
 0x4ed   : > { %v4442_v19 = vmul.f32 0.2, %v8169_v55  ;;  %v4443_v28 = vmul.f32 0.2, %v8174_v35  ;;  %v4452_v5 = vsel %vm4388_vm11, %v8107_v6, %v4420_v7  ;;  %vm8370_vm5 = vcmp.ge.f32.partialorder %v8109_v47, 0.0 }
 0x4ee   : > { %v4453_v4 = vsel %vm8370_vm5, %v8109_v47, %v4421_v36  ;;  %vm8371_vm6 = vcmp.ge.f32.partialorder %v8111_v3, 0.0  ;;  %vm8372_vm7 = vcmp.ge.f32.partialorder %v8113_v22, 0.0  ;;  %vm8373_vm8 = vcmp.ge.f32.partialorder %v8115_v13, 0.0 }
 0x4ef   : > { %v4454_v14 = vsel %vm8371_vm6, %v8111_v3, %v4422_v41  ;;  %v4455_v27 = vsel %vm8372_vm7, %v8113_v22, %v4423_v39  ;;  %v4456_v49 = vsel %vm8373_vm8, %v8115_v13, %v4424_v53  ;;  %vm8374_vm9 = vcmp.ge.f32.partialorder %v8117_v32, 0.0 }
 0x4f0   : > { %v4457_v6 = vsel %vm8374_vm9, %v8117_v32, %v4425_v51  ;;  %vm8375_vm10 = vcmp.ge.f32.partialorder %v8119_v8, 0.0  ;;  %v4459_v3 = vsel %vm4395_vm2, %v8121_v29, %v4427_v60  ;;  %v4460_v22 = vsel %vm4396_vm12, %v8123_v26, %v4428_v40 }
 0x4f1   : > { %v4458_v47 = vsel %vm8375_vm10, %v8119_v8, %v4426_v54  ;;  %vm8376_vm11 = vcmp.ge.f32.partialorder %v8125_v0, 0.0  ;;  %vm8377_vm5 = vcmp.ge.f32.partialorder %v8127_v45, 0.0  ;;  %vm8378_vm6 = vcmp.ge.f32.partialorder %v8129_v52, 0.0 }
 0x4f2   : > { %v4461_v13 = vsel %vm8376_vm11, %v8125_v0, %v4429_v56  ;;  %v4462_v32 = vsel %vm8377_vm5, %v8127_v45, %v4430_v43  ;;  %v4463_v8 = vsel %vm8378_vm6, %v8129_v52, %v4431_v11  ;;  %vm8379_vm7 = vcmp.ge.f32.partialorder %v8131_v15, 0.0 }
 0x4f3   : > { %v4464_v29 = vsel %vm8379_vm7, %v8131_v15, %v4432_v2  ;;  %v4465_v26 = vsel %vm4401_vm1, %v8133_v33, %v4433_v10  ;;  %vm8380_vm12 = vcmp.ge.f32.partialorder %v8135_v61, 0.0  ;;  %vm8381_vm2 = vcmp.ge.f32.partialorder %v8137_v9, 0.0 }
 0x4f4   : > { %v4466_v0 = vsel %vm8380_vm12, %v8135_v61, %v4434_v44  ;;  %v4467_v45 = vsel %vm8381_vm2, %v8137_v9, %v4435_v59  ;;  %vm8382_vm8 = vcmp.ge.f32.partialorder %v8139_v63, 0.0  ;;  %v4469_v15 = vsel %vm4405_vm14, %v8144_v42, %v4437_v57 }
 0x4f5   : > { %v4468_v52 = vsel %vm8382_vm8, %v8139_v63, %v4436_v46  ;;  %vm8383_vm1 = vcmp.ge.f32.partialorder %v8149_v48, 0.0  ;;  %v4471_v61 = vsel %vm4407_vm13, %v8154_v24, %v4439_v16  ;;  %v4472_v9 = vsel %vm4408_vm0, %v8159_v21, %v4440_v38 }
 0x4f6   : > { %v4470_v33 = vsel %vm8383_vm1, %v8149_v48, %v4438_v23  ;;  %v4473_v63 = vsel %vm4409_vm15, %v8164_v34, %v4441_v18  ;;  %v4474_v42 = vsel %vm4410_vm4, %v8169_v55, %v4442_v19  ;;  %v4475_v48 = vsel %vm4411_vm3, %v8174_v35, %v4443_v28 }
 0x4f7   : > { %v6531_v24 = vpack.c.bf16 %v8222_v31, %v8210_v62  ;;  %v6536_v12 = vpack.c.bf16 %v4447_v17, %v4446_v37  ;;  %v6541_v25 = vpack.c.bf16 %v4449_v50, %v4448_v1  ;;  %v6546_v58 = vpack.c.bf16 %v4451_v20, %v4450_v30 }
 0x4f8   : > { %v6551_v21 = vpack.c.bf16 %v4453_v4, %v4452_v5  ;;  %v6556_v7 = vpack.c.bf16 %v4455_v27, %v4454_v14  ;;  %v6561_v34 = vpack.c.bf16 %v4457_v6, %v4456_v49  ;;  %v6566_v55 = vpack.c.bf16 %v4459_v3, %v4458_v47 }
 0x4f9   : > { %6532 = vst [vmem:[%s8326_s20] sm:$0xff] %v6531_v24   ;;  %v6571_v36 = vpack.c.bf16 %v4461_v13, %v4460_v22  ;;  %v6576_v35 = vpack.c.bf16 %v4463_v8, %v4462_v32  ;;  %v6581_v62 = vpack.c.bf16 %v4465_v26, %v4464_v29  ;;  %v6586_v41 = vpack.c.bf16 %v4467_v45, %v4466_v0 }
 0x4fa   : > { %6608 = vst [vmem:[%s8326_s20 + $0x8] sm:$0xff] %v6536_v12   ;;  %v6591_v39 = vpack.c.bf16 %v4469_v15, %v4468_v52  ;;  %v6596_v31 = vpack.c.bf16 %v4471_v61, %v4470_v33  ;;  %v6601_v53 = vpack.c.bf16 %v4473_v63, %v4472_v9  ;;  %v6606_v51 = vpack.c.bf16 %v4475_v48, %v4474_v42 }
 0x4fb   : > { %6609 = vst [vmem:[%s8326_s20 + $0x10] sm:$0xff] %v6541_v25  }
 0x4fc   : > { %6610 = vst [vmem:[%s8326_s20 + $0x18] sm:$0xff] %v6546_v58  }
 0x4fd   : > { %6611 = vst [vmem:[%s8326_s20 + $0x20] sm:$0xff] %v6551_v21  }
 0x4fe   : > { %6612 = vst [vmem:[%s8326_s20 + $0x28] sm:$0xff] %v6556_v7  }
 0x4ff   : > { %6613 = vst [vmem:[%s8326_s20 + $0x30] sm:$0xff] %v6561_v34  }
 0x500   : > { %6614 = vst [vmem:[%s8326_s20 + $0x38] sm:$0xff] %v6566_v55  }
 0x501   : > { %6615 = vst [vmem:[%s8326_s20 + $0x40] sm:$0xff] %v6571_v36  }
 0x502   : > { %6616 = vst [vmem:[%s8326_s20 + $0x48] sm:$0xff] %v6576_v35  }
 0x503   : > { %6617 = vst [vmem:[%s8326_s20 + $0x50] sm:$0xff] %v6581_v62  }
 0x504   : > { %6618 = vst [vmem:[%s8326_s20 + $0x58] sm:$0xff] %v6586_v41  }
 0x505   : > { %6619 = vst [vmem:[%s8326_s20 + $0x60] sm:$0xff] %v6591_v39  }
 0x506   : > { %6620 = vst [vmem:[%s8326_s20 + $0x68] sm:$0xff] %v6596_v31  }
 0x507   : > { %6621 = vst [vmem:[%s8326_s20 + $0x70] sm:$0xff] %v6601_v53  }
 0x508   : > { %6622 = vst [vmem:[%s8326_s20 + $0x78] sm:$0xff] %v6606_v51  }
 0x509 PF: > { %s12_s9 = sadd.s32 1, %s6639_s9  }
 0x50a   : > { %p9_p4 = scmp.ge.s32.totalorder %s12_s9, 4  }
 0x50c   :  { %11 = sbr.rel (!%p9_p4) target bundleno = 1 (0x1), region = 58 }

// kernel: _lambda_.7
= control target key start
LH: loop header
LB: loop body
LE: loop exit
PB: predicated region body
PF: predicated region fallthrough
CT: control target
= control target key end

     0   :  { %s3224_s9 = smov 0   ;;  %s3864_s0 = inlined_call_operand.vmem [shape: bf16[2,64,2048], index: 0, kind: input, shape index: {}]   ;;  %s3865_s1 = inlined_call_operand.vmem [shape: bf16[2048,128], index: 1, kind: input, shape index: {}]   ;;  %s3866_s2 = inlined_call_operand.vmem [shape: bf16[2,64,128], index: 2, kind: output, shape index: {}]  }
   0x1 LB: > { %s2195_s10 = sadd.s32 4294967295, %s3207_s9   ;;  %p2199_p0 = scmp.ge.s32.totalorder %s3207_s9, 1  ;;  %s3207_s9 = sphi %s3224_s9, %s12_s9  }
   0x2   : > { %p112_p1 = scmp.lt.s32.totalorder %s3207_s9, 3 }
   0x4   : > { %p113_p2 = pnand %p2199_p0, %p112_p1 }
   0x5   : > { %p134_p3 = scmp.lt.s32.totalorder (!%p113_p2), %s2195_s10, 1 }
   0x6   : > { %116 = sbr.rel (%p113_p2) target bundleno = 485 (0x1e5), region = 28 }
   0xb   : > { %v3047_v0 = vld [vmem:[%s3865_s1 + $0x38] sm:$0xff]  ;;  %v3046_v4 = vld [vmem:[%s3865_s1 + $0x30] sm:$0xff]  ;;  %v3045_v8 = vld [vmem:[%s3865_s1 + $0x28] sm:$0xff]  ;;  %s3868_s10 = smov (!%p134_p3, %s2195_s10), 1 }
   0xc   : > { %v3055_v1 = vld [vmem:[%s3865_s1 + $0x78] sm:$0xff]  ;;  %1552 = vmatpush.bf16.msra.mxu0 %v3047_v0  ;;  %v3054_v5 = vld [vmem:[%s3865_s1 + $0x70] sm:$0xff]  ;;  %v3053_v9 = vld [vmem:[%s3865_s1 + $0x68] sm:$0xff]  ;;  %s2974_s5 = sshll.u32 %s3868_s10, 9 }
   0xd   : > { %v3063_v2 = vld [vmem:[%s3865_s1 + $0xb8] sm:$0xff]  ;;  %1581 = vmatpush.bf16.msra.mxu1 %v3055_v1  ;;  %v3062_v6 = vld [vmem:[%s3865_s1 + $0xb0] sm:$0xff]  ;;  %v3061_v10 = vld [vmem:[%s3865_s1 + $0xa8] sm:$0xff]  ;;  %s3320_s14 = scalar_lea.vmem %s3864_s0, %s2974_s5 }
   0xe   : > { %v3071_v3 = vld [vmem:[%s3865_s1 + $0xf8] sm:$0xff]  ;;  %1610 = vmatpush.bf16.msra.mxu2 %v3063_v2  ;;  %v3070_v7 = vld [vmem:[%s3865_s1 + $0xf0] sm:$0xff]  ;;  %v3069_v11 = vld [vmem:[%s3865_s1 + $0xe8] sm:$0xff] }
   0xf   : > { %1639 = vmatpush.bf16.msra.mxu3 %v3071_v3  ;;  %v3044_v12 = vld [vmem:[%s3865_s1 + $0x20] sm:$0xff]  ;;  %v3043_v16 = vld [vmem:[%s3865_s1 + $0x18] sm:$0xff]  ;;  %v3042_v20 = vld [vmem:[%s3865_s1 + $0x10] sm:$0xff] }
  0x10   : > { %1553 = vmatpush.bf16.msra.mxu0 %v3046_v4  ;;  %v3052_v13 = vld [vmem:[%s3865_s1 + $0x60] sm:$0xff]  ;;  %v3051_v17 = vld [vmem:[%s3865_s1 + $0x58] sm:$0xff]  ;;  %v3050_v21 = vld [vmem:[%s3865_s1 + $0x50] sm:$0xff] }
  0x11   : > { %1582 = vmatpush.bf16.msra.mxu1 %v3054_v5  ;;  %v3060_v14 = vld [vmem:[%s3865_s1 + $0xa0] sm:$0xff]  ;;  %v3059_v18 = vld [vmem:[%s3865_s1 + $0x98] sm:$0xff]  ;;  %v3058_v22 = vld [vmem:[%s3865_s1 + $0x90] sm:$0xff] }
  0x12   : > { %1611 = vmatpush.bf16.msra.mxu2 %v3062_v6  ;;  %v3068_v15 = vld [vmem:[%s3865_s1 + $0xe0] sm:$0xff]  ;;  %v3067_v19 = vld [vmem:[%s3865_s1 + $0xd8] sm:$0xff]  ;;  %v3066_v23 = vld [vmem:[%s3865_s1 + $0xd0] sm:$0xff] }
  0x13   : > { %1640 = vmatpush.bf16.msra.mxu3 %v3070_v7  ;;  %v3041_v24 = vld [vmem:[%s3865_s1 + $0x8] sm:$0xff]  ;;  %v3040_v28 = vld [vmem:[%s3865_s1] sm:$0xff]  ;;  %v3095_v40 = vld [vmem:[%s3865_s1 + $0x1b8] sm:$0xff] }
  0x14   : > { %1554 = vmatpush.bf16.msra.mxu0 %v3045_v8  ;;  %v3049_v25 = vld [vmem:[%s3865_s1 + $0x48] sm:$0xff]  ;;  %v3048_v29 = vld [vmem:[%s3865_s1 + $0x40] sm:$0xff]  ;;  %v3079_v41 = vld [vmem:[%s3865_s1 + $0x138] sm:$0xff] }
  0x15   : > { %1583 = vmatpush.bf16.msra.mxu1 %v3053_v9  ;;  %v3057_v26 = vld [vmem:[%s3865_s1 + $0x88] sm:$0xff]  ;;  %v3056_v30 = vld [vmem:[%s3865_s1 + $0x80] sm:$0xff]  ;;  %v3103_v46 = vld [vmem:[%s3865_s1 + $0x1f8] sm:$0xff] }
  0x16   : > { %1612 = vmatpush.bf16.msra.mxu2 %v3061_v10  ;;  %v3065_v27 = vld [vmem:[%s3865_s1 + $0xc8] sm:$0xff]  ;;  %v3064_v31 = vld [vmem:[%s3865_s1 + $0xc0] sm:$0xff]  ;;  %v3087_v47 = vld [vmem:[%s3865_s1 + $0x178] sm:$0xff] }
  0x17   : > { %1641 = vmatpush.bf16.msra.mxu3 %v3069_v11  ;;  %v2206_v32 = vld [vmem:[%s3320_s14] sm:$0xf]  ;;  %v2976_v34 = vld [vmem:[%s3320_s14 + $0x4] sm:$0xf]  ;;  %v2214_v36 = vld [vmem:[%s3320_s14 + $0x8] sm:$0xf] }
  0x18   : > { %1555 = vmatpush.bf16.msra.mxu0 %v3044_v12  ;;  %v2984_v33 = vld [vmem:[%s3320_s14 + $0x3c] sm:$0xf0]  ;;  %v2208_v35 = vld [vmem:[%s3320_s14 + $0x40] sm:$0xf0]  ;;  %v2985_v37 = vld [vmem:[%s3320_s14 + $0x44] sm:$0xf0] }
  0x19   : > { %1584 = vmatpush.bf16.msra.mxu1 %v3052_v13  ;;  %v2977_v38 = vld [vmem:[%s3320_s14 + $0xc] sm:$0xf]  ;;  %v2207_v42 = vor.u32 %v2984_v33, %v2206_v32  ;;  %v2211_v43 = vor.u32 %v2976_v34, %v2208_v35  ;;  %v2215_v44 = vor.u32 %v2985_v37, %v2214_v36  ;;  %v3094_v48 = vld [vmem:[%s3865_s1 + $0x1b0] sm:$0xff]  ;;  %v2270_v56 = vld [vmem:[%s3320_s14 + $0x80] sm:$0xf] }
  0x1a   : > { %1613 = vmatpush.bf16.msra.mxu2 %v3060_v14  ;;  %v2216_v39 = vld [vmem:[%s3320_s14 + $0x48] sm:$0xf0]  ;;  %v3078_v49 = vld [vmem:[%s3865_s1 + $0x130] sm:$0xff]  ;;  %v3092_v57 = vld [vmem:[%s3865_s1 + $0x1a0] sm:$0xff] }
  0x1b   : > { %1642 = vmatpush.bf16.msra.mxu3 %v3068_v15  ;;  %v2219_v45 = vor.u32 %v2977_v38, %v2216_v39  ;;  %v3102_v50 = vld [vmem:[%s3865_s1 + $0x1f0] sm:$0xff]  ;;  %v3093_v52 = vld [vmem:[%s3865_s1 + $0x1a8] sm:$0xff]  ;;  %v3076_v58 = vld [vmem:[%s3865_s1 + $0x120] sm:$0xff] }
  0x1c   : > { %1556 = vmatpush.bf16.msra.mxu0 %v3043_v16  ;;  %v3086_v51 = vld [vmem:[%s3865_s1 + $0x170] sm:$0xff]  ;;  %v3077_v53 = vld [vmem:[%s3865_s1 + $0x128] sm:$0xff]  ;;  %v3000_v59 = vld [vmem:[%s3320_s14 + $0xbc] sm:$0xf0] }
  0x1d   : > { %1585 = vmatpush.bf16.msra.mxu1 %v3051_v17  ;;  %v3101_v54 = vld [vmem:[%s3865_s1 + $0x1e8] sm:$0xff]  ;;  %v2992_v60 = vld [vmem:[%s3320_s14 + $0x84] sm:$0xf]  ;;  %v3091_v4 = vld [vmem:[%s3865_s1 + $0x198] sm:$0xff]  ;;  %v2271_v6 = vor.u32 %v3000_v59, %v2270_v56 }
  0x1e   : > { %1614 = vmatpush.bf16.msra.mxu2 %v3059_v18  ;;  %v3085_v55 = vld [vmem:[%s3865_s1 + $0x168] sm:$0xff]  ;;  %v2272_v61 = vld [vmem:[%s3320_s14 + $0xc0] sm:$0xf0]  ;;  %v3075_v5 = vld [vmem:[%s3865_s1 + $0x118] sm:$0xff] }
  0x1f   : > { %1643 = vmatpush.bf16.msra.mxu3 %v3067_v19  ;;  %v2278_v62 = vld [vmem:[%s3320_s14 + $0x88] sm:$0xf]  ;;  %v2993_v0 = vld [vmem:[%s3320_s14 + $0x8c] sm:$0xf]  ;;  %v3100_v2 = vld [vmem:[%s3865_s1 + $0x1e0] sm:$0xff]  ;;  %v2275_v7 = vor.u32 %v2992_v60, %v2272_v61 }
  0x20   : > { %1557 = vmatpush.bf16.msra.mxu0 %v3042_v20  ;;  %v3001_v63 = vld [vmem:[%s3320_s14 + $0xc4] sm:$0xf0]  ;;  %v2280_v1 = vld [vmem:[%s3320_s14 + $0xc8] sm:$0xf0]  ;;  %v3084_v3 = vld [vmem:[%s3865_s1 + $0x160] sm:$0xff] }
  0x21   : > { %1586 = vmatpush.bf16.msra.mxu1 %v3050_v21  ;;  %v2279_v8 = vor.u32 %v3001_v63, %v2278_v62  ;;  %v2283_v9 = vor.u32 %v2993_v0, %v2280_v1  ;;  %v3099_v10 = vld [vmem:[%s3865_s1 + $0x1d8] sm:$0xff]  ;;  %v3090_v12 = vld [vmem:[%s3865_s1 + $0x190] sm:$0xff]  ;;  %v3089_v16 = vld [vmem:[%s3865_s1 + $0x188] sm:$0xff] }
  0x22   : > { %1615 = vmatpush.bf16.msra.mxu2 %v3058_v22  ;;  %v3083_v11 = vld [vmem:[%s3865_s1 + $0x158] sm:$0xff]  ;;  %v3074_v13 = vld [vmem:[%s3865_s1 + $0x110] sm:$0xff]  ;;  %v3073_v17 = vld [vmem:[%s3865_s1 + $0x108] sm:$0xff] }
  0x23   : > { %1644 = vmatpush.bf16.msra.mxu3 %v3066_v23  ;;  %v3098_v14 = vld [vmem:[%s3865_s1 + $0x1d0] sm:$0xff]  ;;  %v3097_v18 = vld [vmem:[%s3865_s1 + $0x1c8] sm:$0xff]  ;;  %v2334_v20 = vld [vmem:[%s3320_s14 + $0x100] sm:$0xf] }
  0x24   : > { %1558 = vmatpush.bf16.msra.mxu0 %v3041_v24  ;;  %v3082_v15 = vld [vmem:[%s3865_s1 + $0x150] sm:$0xff]  ;;  %v3081_v19 = vld [vmem:[%s3865_s1 + $0x148] sm:$0xff]  ;;  %v3088_v21 = vld [vmem:[%s3865_s1 + $0x180] sm:$0xff] }
  0x25   : > { %1587 = vmatpush.bf16.msra.mxu1 %v3049_v25  ;;  %v3072_v22 = vld [vmem:[%s3865_s1 + $0x100] sm:$0xff]  ;;  %v3127_v36 = vld [vmem:[%s3865_s1 + $0x2b8] sm:$0xff]  ;;  %v3125_v56 = vld [vmem:[%s3865_s1 + $0x2a8] sm:$0xff] }
  0x26   : > { %1616 = vmatpush.bf16.msra.mxu2 %v3057_v26  ;;  %v3016_v23 = vld [vmem:[%s3320_s14 + $0x13c] sm:$0xf0]  ;;  %v3008_v24 = vld [vmem:[%s3320_s14 + $0x104] sm:$0xf]  ;;  %v2342_v26 = vld [vmem:[%s3320_s14 + $0x108] sm:$0xf] }
  0x27   : > { %1645 = vmatpush.bf16.msra.mxu3 %v3065_v27  ;;  %v2336_v25 = vld [vmem:[%s3320_s14 + $0x140] sm:$0xf0]  ;;  %v3017_v27 = vld [vmem:[%s3320_s14 + $0x144] sm:$0xf0]  ;;  %v2335_v32 = vor.u32 %v3016_v23, %v2334_v20  ;;  %v3111_v37 = vld [vmem:[%s3865_s1 + $0x238] sm:$0xff] }
  0x28   : > { %1559 = vmatpush.bf16.msra.mxu0 %v3040_v28  ;;  %v3009_v28 = vld [vmem:[%s3320_s14 + $0x10c] sm:$0xf]  ;;  %v2339_v33 = vor.u32 %v3008_v24, %v2336_v25  ;;  %v2343_v34 = vor.u32 %v3017_v27, %v2342_v26  ;;  %v3135_v38 = vld [vmem:[%s3865_s1 + $0x2f8] sm:$0xff]  ;;  %v3124_v60 = vld [vmem:[%s3865_s1 + $0x2a0] sm:$0xff] }
  0x29   : > { %1588 = vmatpush.bf16.msra.mxu1 %v3048_v29  ;;  %v2344_v29 = vld [vmem:[%s3320_s14 + $0x148] sm:$0xf0]  ;;  %v3119_v39 = vld [vmem:[%s3865_s1 + $0x278] sm:$0xff]  ;;  %v3108_v61 = vld [vmem:[%s3865_s1 + $0x220] sm:$0xff] }
  0x2a   : > { %1617 = vmatpush.bf16.msra.mxu2 %v3056_v30  ;;  %v3096_v30 = vld [vmem:[%s3865_s1 + $0x1c0] sm:$0xff]  ;;  %v2347_v35 = vor.u32 %v3009_v28, %v2344_v29  ;;  %v3117_v59 = vld [vmem:[%s3865_s1 + $0x268] sm:$0xff]  ;;  %v2222_v0 = vld [vmem:[%s3320_s14 + $0x10] sm:$0xf] }
  0x2b   : > { %1646 = vmatpush.bf16.msra.mxu3 %v3064_v31  ;;  %1560 = vmatmul.bf16.vlgmr.msra.gmra.mxu0 %v2207_v42  ;;  %v3080_v31 = vld [vmem:[%s3865_s1 + $0x140] sm:$0xff]  ;;  %v3134_v42 = vld [vmem:[%s3865_s1 + $0x2f0] sm:$0xff]  ;;  %v2294_v24 = vld [vmem:[%s3320_s14 + $0x98] sm:$0xf] }
  0x2c   : > { %1668 = vmatpush.bf16.msrb.mxu0 %v3079_v41  ;;  %1589 = vmatmul.bf16.vlgmr.msra.gmra.mxu1 %v2211_v43  ;;  %v3110_v41 = vld [vmem:[%s3865_s1 + $0x230] sm:$0xff]  ;;  %v3132_v62 = vld [vmem:[%s3865_s1 + $0x2e0] sm:$0xff]  ;;  %v3003_v25 = vld [vmem:[%s3320_s14 + $0xd4] sm:$0xf0] }
  0x2d   : > { %1618 = vmatmul.bf16.vlgmr.msra.gmra.mxu2 %v2215_v44  ;;  %1697 = vmatpush.bf16.msrb.mxu1 %v3087_v47  ;;  %v3118_v43 = vld [vmem:[%s3865_s1 + $0x270] sm:$0xff]  ;;  %v2398_v44 = vld [vmem:[%s3320_s14 + $0x180] sm:$0xf]  ;;  %v2400_v47 = vld [vmem:[%s3320_s14 + $0x1c0] sm:$0xf0] }
  0x2e   : > { %1726 = vmatpush.bf16.msrb.mxu2 %v3095_v40  ;;  %1647 = vmatmul.bf16.vlgmr.msra.gmra.mxu3 %v2219_v45  ;;  %v3126_v40 = vld [vmem:[%s3865_s1 + $0x2b0] sm:$0xff]  ;;  %v3032_v45 = vld [vmem:[%s3320_s14 + $0x1bc] sm:$0xf0]  ;;  %v2995_v26 = vld [vmem:[%s3320_s14 + $0x9c] sm:$0xf] }
  0x2f   : > { %1755 = vmatpush.bf16.msrb.mxu3 %v3103_v46  ;;  %v3024_v46 = vld [vmem:[%s3320_s14 + $0x184] sm:$0xf]  ;;  %v2986_v1 = vld [vmem:[%s3320_s14 + $0x4c] sm:$0xf0]  ;;  %v2288_v23 = vld [vmem:[%s3320_s14 + $0xd0] sm:$0xf0] }
  0x30   : > { %1669 = vmatpush.bf16.msrb.mxu0 %v3078_v49  ;;  %v3033_v49 = vld [vmem:[%s3320_s14 + $0x1c4] sm:$0xf0]  ;;  %v3116_v63 = vld [vmem:[%s3865_s1 + $0x260] sm:$0xff]  ;;  %v2286_v20 = vld [vmem:[%s3320_s14 + $0x90] sm:$0xf] }
  0x31   : > { %1698 = vmatpush.bf16.msrb.mxu1 %v3086_v51  ;;  %v2408_v51 = vld [vmem:[%s3320_s14 + $0x1c8] sm:$0xf0]  ;;  %v2296_v27 = vld [vmem:[%s3320_s14 + $0xd8] sm:$0xf0] }
  0x32   : > { %1727 = vmatpush.bf16.msrb.mxu2 %v3094_v48  ;;  %v2406_v48 = vld [vmem:[%s3320_s14 + $0x188] sm:$0xf] }
  0x33   : > { %1756 = vmatpush.bf16.msrb.mxu3 %v3102_v50  ;;  %v3025_v50 = vld [vmem:[%s3320_s14 + $0x18c] sm:$0xf] }
  0x34   : > { %1670 = vmatpush.bf16.msrb.mxu0 %v3077_v53  ;;  %v2403_v53 = vor.u32 %v3024_v46, %v2400_v47  ;;  %v3011_v46 = vld [vmem:[%s3320_s14 + $0x11c] sm:$0xf] }
  0x35   : > { %1699 = vmatpush.bf16.msrb.mxu1 %v3085_v55  ;;  %v2411_v55 = vor.u32 %v3025_v50, %v2408_v51  ;;  %v2360_v47 = vld [vmem:[%s3320_s14 + $0x158] sm:$0xf0] }
  0x36   : > { %1728 = vmatpush.bf16.msrb.mxu2 %v3093_v52  ;;  %v2399_v52 = vor.u32 %v3032_v45, %v2398_v44  ;;  %v2358_v44 = vld [vmem:[%s3320_s14 + $0x118] sm:$0xf]  ;;  %v2363_v51 = vor.u32 %v3011_v46, %v2360_v47  ;;  %v3162_v46 = vld [vmem:[%s3865_s1 + $0x3d0] sm:$0xff]  ;;  %v2996_v47 = vld [vmem:[%s3320_s14 + $0xa4] sm:$0xf] }
  0x37   : > { %1757 = vmatpush.bf16.msrb.mxu3 %v3101_v54  ;;  %v2407_v54 = vor.u32 %v3033_v49, %v2406_v48  ;;  %v3019_v45 = vld [vmem:[%s3320_s14 + $0x154] sm:$0xf0] }
  0x38   : > { %1671 = vmatpush.bf16.msrb.mxu0 %v3076_v58  ;;  %v3133_v58 = vld [vmem:[%s3865_s1 + $0x2e8] sm:$0xff]  ;;  %v2359_v50 = vor.u32 %v3019_v45, %v2358_v44  ;;  %v2302_v44 = vld [vmem:[%s3320_s14 + $0xa0] sm:$0xf] }
  0x39   : > { %1700 = vmatpush.bf16.msrb.mxu1 %v3084_v3  ;;  %v2224_v3 = vld [vmem:[%s3320_s14 + $0x50] sm:$0xf0]  ;;  %v3004_v45 = vld [vmem:[%s3320_s14 + $0xdc] sm:$0xf0] }
  0x3a   : > { %1729 = vmatpush.bf16.msrb.mxu2 %v3092_v57  ;;  %v3109_v57 = vld [vmem:[%s3865_s1 + $0x228] sm:$0xff] }
  0x3b   : > { %1758 = vmatpush.bf16.msrb.mxu3 %v3100_v2  ;;  %1565 = vmatmul.bf16.gmra.mxu0 %v2271_v6  ;;  %v2978_v2 = vld [vmem:[%s3320_s14 + $0x14] sm:$0xf]  ;;  %v2979_v6 = vld [vmem:[%s3320_s14 + $0x1c] sm:$0xf] }
  0x3c   : > { %1672 = vmatpush.bf16.msrb.mxu0 %v3075_v5  ;;  %1594 = vmatmul.bf16.gmra.mxu1 %v2275_v7  ;;  %v2987_v5 = vld [vmem:[%s3320_s14 + $0x54] sm:$0xf0]  ;;  %v2232_v7 = vld [vmem:[%s3320_s14 + $0x58] sm:$0xf0] }
  0x3d   : > { %1623 = vmatmul.bf16.gmra.mxu2 %v2279_v8  ;;  %1701 = vmatpush.bf16.msrb.mxu1 %v3083_v11  ;;  %v2223_v8 = vor.u32 %v2986_v1, %v2222_v0  ;;  %v2235_v11 = vor.u32 %v2979_v6, %v2232_v7  ;;  %v3035_v0 = vld [vmem:[%s3320_s14 + $0x1d4] sm:$0xf0]  ;;  %v3027_v1 = vld [vmem:[%s3320_s14 + $0x19c] sm:$0xf]  ;;  %v3150_v7 = vld [vmem:[%s3865_s1 + $0x370] sm:$0xff] }
  0x3e   : > { %1730 = vmatpush.bf16.msrb.mxu2 %v3091_v4  ;;  %1652 = vmatmul.bf16.gmra.mxu3 %v2283_v9  ;;  %v2230_v4 = vld [vmem:[%s3320_s14 + $0x18] sm:$0xf]  ;;  %v2227_v9 = vor.u32 %v2978_v2, %v2224_v3  ;;  %v2424_v2 = vld [vmem:[%s3320_s14 + $0x1d8] sm:$0xf0] }
  0x3f   : > { %1759 = vmatpush.bf16.msrb.mxu3 %v3099_v10  ;;  %v2231_v10 = vor.u32 %v2987_v5, %v2230_v4  ;;  %v2427_v6 = vor.u32 %v3027_v1, %v2424_v2  ;;  %v3153_v1 = vld [vmem:[%s3865_s1 + $0x388] sm:$0xff] }
  0x40   : > { %1673 = vmatpush.bf16.msrb.mxu0 %v3074_v13  ;;  %v3107_v13 = vld [vmem:[%s3865_s1 + $0x218] sm:$0xff]  ;;  %v3137_v2 = vld [vmem:[%s3865_s1 + $0x308] sm:$0xff] }
  0x41   : > { %1702 = vmatpush.bf16.msrb.mxu1 %v3082_v15  ;;  %v3115_v15 = vld [vmem:[%s3865_s1 + $0x258] sm:$0xff] }
  0x42   : > { %1731 = vmatpush.bf16.msrb.mxu2 %v3090_v12  ;;  %v3123_v12 = vld [vmem:[%s3865_s1 + $0x298] sm:$0xff] }
  0x43   : > { %1760 = vmatpush.bf16.msrb.mxu3 %v3098_v14  ;;  %v3131_v14 = vld [vmem:[%s3865_s1 + $0x2d8] sm:$0xff] }
  0x44   : > { %1674 = vmatpush.bf16.msrb.mxu0 %v3073_v17  ;;  %v3106_v17 = vld [vmem:[%s3865_s1 + $0x210] sm:$0xff] }
  0x45   : > { %1703 = vmatpush.bf16.msrb.mxu1 %v3081_v19  ;;  %v3114_v19 = vld [vmem:[%s3865_s1 + $0x250] sm:$0xff] }
  0x46   : > { %1732 = vmatpush.bf16.msrb.mxu2 %v3089_v16  ;;  %v3122_v16 = vld [vmem:[%s3865_s1 + $0x290] sm:$0xff] }
  0x47   : > { %1761 = vmatpush.bf16.msrb.mxu3 %v3097_v18  ;;  %v3130_v18 = vld [vmem:[%s3865_s1 + $0x2d0] sm:$0xff] }
  0x48   : > { %1675 = vmatpush.bf16.msrb.mxu0 %v3072_v22  ;;  %v2994_v22 = vld [vmem:[%s3320_s14 + $0x94] sm:$0xf] }
  0x49   : > { %1704 = vmatpush.bf16.msrb.mxu1 %v3080_v31  ;;  %v2291_v29 = vor.u32 %v2994_v22, %v2288_v23  ;;  %v2299_v31 = vor.u32 %v2995_v26, %v2296_v27  ;;  %v2248_v22 = vld [vmem:[%s3320_s14 + $0x68] sm:$0xf0] }
  0x4a   : > { %1733 = vmatpush.bf16.msrb.mxu2 %v3088_v21  ;;  %v3002_v21 = vld [vmem:[%s3320_s14 + $0xcc] sm:$0xf0] }
  0x4b   : > { %1762 = vmatpush.bf16.msrb.mxu3 %v3096_v30  ;;  %1570 = vmatmul.bf16.gmra.mxu0 %v2335_v32  ;;  %v2287_v28 = vor.u32 %v3002_v21, %v2286_v20  ;;  %v2295_v30 = vor.u32 %v3003_v25, %v2294_v24  ;;  %v3121_v32 = vld [vmem:[%s3865_s1 + $0x288] sm:$0xff] }
  0x4c   : > { %1599 = vmatmul.bf16.gmra.mxu1 %v2339_v33  ;;  %1784 = vmatpush.bf16.msra.mxu0 %v3111_v37  ;;  %v3105_v33 = vld [vmem:[%s3865_s1 + $0x208] sm:$0xff]  ;;  %v3104_v37 = vld [vmem:[%s3865_s1 + $0x200] sm:$0xff] }
  0x4d   : > { %1628 = vmatmul.bf16.gmra.mxu2 %v2343_v34  ;;  %1813 = vmatpush.bf16.msra.mxu1 %v3119_v39  ;;  %v3129_v34 = vld [vmem:[%s3865_s1 + $0x2c8] sm:$0xff]  ;;  %v3112_v39 = vld [vmem:[%s3865_s1 + $0x240] sm:$0xff] }
  0x4e   : > { %1657 = vmatmul.bf16.gmra.mxu3 %v2347_v35  ;;  %1842 = vmatpush.bf16.msra.mxu2 %v3127_v36  ;;  %v3113_v35 = vld [vmem:[%s3865_s1 + $0x248] sm:$0xff]  ;;  %v3120_v36 = vld [vmem:[%s3865_s1 + $0x280] sm:$0xff] }
  0x4f   : > { %1871 = vmatpush.bf16.msra.mxu3 %v3135_v38  ;;  %v3128_v38 = vld [vmem:[%s3865_s1 + $0x2c0] sm:$0xff]  ;;  %v2989_v20 = vld [vmem:[%s3320_s14 + $0x64] sm:$0xf0]  ;;  %v2981_v21 = vld [vmem:[%s3320_s14 + $0x2c] sm:$0xf] }
  0x50   : > { %1785 = vmatpush.bf16.msra.mxu0 %v3110_v41  ;;  %v3018_v41 = vld [vmem:[%s3320_s14 + $0x14c] sm:$0xf0] }
  0x51   : > { %1814 = vmatpush.bf16.msra.mxu1 %v3118_v43  ;;  %v2352_v43 = vld [vmem:[%s3320_s14 + $0x150] sm:$0xf0] }
  0x52   : > { %1843 = vmatpush.bf16.msra.mxu2 %v3126_v40  ;;  %v2350_v40 = vld [vmem:[%s3320_s14 + $0x110] sm:$0xf] }
  0x53   : > { %1872 = vmatpush.bf16.msra.mxu3 %v3134_v42  ;;  %v3010_v42 = vld [vmem:[%s3320_s14 + $0x114] sm:$0xf]  ;;  %v2351_v48 = vor.u32 %v3018_v41, %v2350_v40  ;;  %v3147_v41 = vld [vmem:[%s3865_s1 + $0x358] sm:$0xff] }
  0x54   : > { %1786 = vmatpush.bf16.msra.mxu0 %v3109_v57  ;;  %v2355_v49 = vor.u32 %v3010_v42, %v2352_v43  ;;  %v3142_v57 = vld [vmem:[%s3865_s1 + $0x330] sm:$0xff] }
  0x55   : > { %1815 = vmatpush.bf16.msra.mxu1 %v3117_v59  ;;  %v3034_v59 = vld [vmem:[%s3320_s14 + $0x1cc] sm:$0xf0] }
  0x56   : > { %1844 = vmatpush.bf16.msra.mxu2 %v3125_v56  ;;  %v3158_v56 = vld [vmem:[%s3865_s1 + $0x3b0] sm:$0xff] }
  0x57   : > { %1873 = vmatpush.bf16.msra.mxu3 %v3133_v58  ;;  %v2414_v58 = vld [vmem:[%s3320_s14 + $0x190] sm:$0xf] }
  0x58   : > { %1787 = vmatpush.bf16.msra.mxu0 %v3108_v61  ;;  %v3026_v61 = vld [vmem:[%s3320_s14 + $0x194] sm:$0xf]  ;;  %v2415_v3 = vor.u32 %v3034_v59, %v2414_v58 }
  0x59   : > { %1816 = vmatpush.bf16.msra.mxu1 %v3116_v63  ;;  %v2422_v63 = vld [vmem:[%s3320_s14 + $0x198] sm:$0xf]  ;;  %v3154_v42 = vld [vmem:[%s3865_s1 + $0x390] sm:$0xff] }
  0x5a   : > { %1845 = vmatpush.bf16.msra.mxu2 %v3124_v60  ;;  %v3166_v60 = vld [vmem:[%s3865_s1 + $0x3f0] sm:$0xff]  ;;  %v2423_v5 = vor.u32 %v3035_v0, %v2422_v63 }
  0x5b   : > { %1575 = vmatmul.bf16.gmra.mxu0 %v2399_v52  ;;  %1874 = vmatpush.bf16.msra.mxu3 %v3132_v62  ;;  %v3159_v52 = vld [vmem:[%s3865_s1 + $0x3b8] sm:$0xff]  ;;  %v2416_v62 = vld [vmem:[%s3320_s14 + $0x1d0] sm:$0xf0] }
  0x5c   : > { %1604 = vmatmul.bf16.gmra.mxu1 %v2403_v53  ;;  %1788 = vmatpush.bf16.msra.mxu0 %v3107_v13  ;;  %v3143_v53 = vld [vmem:[%s3865_s1 + $0x338] sm:$0xff]  ;;  %v2419_v4 = vor.u32 %v3026_v61, %v2416_v62  ;;  %v3140_v13 = vld [vmem:[%s3865_s1 + $0x320] sm:$0xff]  ;;  %v3138_v43 = vld [vmem:[%s3865_s1 + $0x310] sm:$0xff] }
  0x5d   : > { %1633 = vmatmul.bf16.gmra.mxu2 %v2407_v54  ;;  %1817 = vmatpush.bf16.msra.mxu1 %v3115_v15  ;;  %v3167_v54 = vld [vmem:[%s3865_s1 + $0x3f8] sm:$0xff]  ;;  %v2988_v15 = vld [vmem:[%s3320_s14 + $0x5c] sm:$0xf0]  ;;  %v3146_v0 = vld [vmem:[%s3865_s1 + $0x350] sm:$0xff] }
  0x5e   : > { %1662 = vmatmul.bf16.gmra.mxu3 %v2411_v55  ;;  %1846 = vmatpush.bf16.msra.mxu2 %v3123_v12  ;;  %v3151_v55 = vld [vmem:[%s3865_s1 + $0x378] sm:$0xff]  ;;  %v3156_v12 = vld [vmem:[%s3865_s1 + $0x3a0] sm:$0xff] }
  0x5f   : > { %1875 = vmatpush.bf16.msra.mxu3 %v3131_v14  ;;  %v2238_v14 = vld [vmem:[%s3320_s14 + $0x20] sm:$0xf] }
  0x60   : > { %1789 = vmatpush.bf16.msra.mxu0 %v3106_v17  ;;  %v2980_v17 = vld [vmem:[%s3320_s14 + $0x24] sm:$0xf]  ;;  %v2239_v23 = vor.u32 %v2988_v15, %v2238_v14  ;;  %v2366_v14 = vld [vmem:[%s3320_s14 + $0x120] sm:$0xf] }
  0x61   : > { %1818 = vmatpush.bf16.msra.mxu1 %v3114_v19  ;;  %v2246_v19 = vld [vmem:[%s3320_s14 + $0x28] sm:$0xf]  ;;  %v3020_v15 = vld [vmem:[%s3320_s14 + $0x15c] sm:$0xf0] }
  0x62   : > { %1847 = vmatpush.bf16.msra.mxu2 %v3122_v16  ;;  %v3164_v16 = vld [vmem:[%s3865_s1 + $0x3e0] sm:$0xff]  ;;  %v2247_v27 = vor.u32 %v2989_v20, %v2246_v19  ;;  %v2374_v19 = vld [vmem:[%s3320_s14 + $0x128] sm:$0xf] }
  0x63   : > { %1876 = vmatpush.bf16.msra.mxu3 %v3130_v18  ;;  %v2240_v18 = vld [vmem:[%s3320_s14 + $0x60] sm:$0xf0]  ;;  %v3021_v20 = vld [vmem:[%s3320_s14 + $0x164] sm:$0xf0] }
  0x64   : > { %1790 = vmatpush.bf16.msra.mxu0 %v3105_v33  ;;  %v2243_v24 = vor.u32 %v2980_v17, %v2240_v18  ;;  %v3163_v33 = vld [vmem:[%s3865_s1 + $0x3d8] sm:$0xff]  ;;  %v3012_v17 = vld [vmem:[%s3320_s14 + $0x124] sm:$0xf] }
  0x65   : > { %1819 = vmatpush.bf16.msra.mxu1 %v3113_v35  ;;  %v2368_v18 = vld [vmem:[%s3320_s14 + $0x160] sm:$0xf0] }
  0x66   : > { %1848 = vmatpush.bf16.msra.mxu2 %v3121_v32  ;;  %v3139_v32 = vld [vmem:[%s3865_s1 + $0x318] sm:$0xff] }
  0x67   : > { %1877 = vmatpush.bf16.msra.mxu3 %v3129_v34 }
  0x68   : > { %1791 = vmatpush.bf16.msra.mxu0 %v3104_v37 }
  0x69   : > { %1820 = vmatpush.bf16.msra.mxu1 %v3112_v39 }
  0x6a   : > { %1849 = vmatpush.bf16.msra.mxu2 %v3120_v36 }
  0x6b   : > { %1676 = vmatmul.bf16.vlgmr.msrb.gmra.mxu0 %v2223_v8  ;;  %1878 = vmatpush.bf16.msra.mxu3 %v3128_v38  ;;  %v3157_v8 = vld [vmem:[%s3865_s1 + $0x3a8] sm:$0xff] }
  0x6c   : > { %1705 = vmatmul.bf16.vlgmr.msrb.gmra.mxu1 %v2227_v9  ;;  %1900 = vmatpush.bf16.msrb.mxu0 %v3143_v53  ;;  %v3141_v9 = vld [vmem:[%s3865_s1 + $0x328] sm:$0xff] }
  0x6d   : > { %1734 = vmatmul.bf16.vlgmr.msrb.gmra.mxu2 %v2231_v10  ;;  %1929 = vmatpush.bf16.msrb.mxu1 %v3151_v55  ;;  %v3165_v10 = vld [vmem:[%s3865_s1 + $0x3e8] sm:$0xff]  ;;  %v2303_v55 = vor.u32 %v3004_v45, %v2302_v44  ;;  %v3036_v44 = vld [vmem:[%s3320_s14 + $0x1dc] sm:$0xf0]  ;;  %v3028_v45 = vld [vmem:[%s3320_s14 + $0x1a4] sm:$0xf] }
  0x6e   : > { %1763 = vmatmul.bf16.vlgmr.msrb.gmra.mxu3 %v2235_v11  ;;  %1958 = vmatpush.bf16.msrb.mxu2 %v3159_v52  ;;  %v3149_v11 = vld [vmem:[%s3865_s1 + $0x368] sm:$0xff] }
  0x6f   : > { %1987 = vmatpush.bf16.msrb.mxu3 %v3167_v54  ;;  %v2312_v52 = vld [vmem:[%s3320_s14 + $0xe8] sm:$0xf0] }
  0x70   : > { %1901 = vmatpush.bf16.msrb.mxu0 %v3142_v57 }
  0x71   : > { %1930 = vmatpush.bf16.msrb.mxu1 %v3150_v7 }
  0x72   : > { %1959 = vmatpush.bf16.msrb.mxu2 %v3158_v56 }
  0x73   : > { %1988 = vmatpush.bf16.msrb.mxu3 %v3166_v60 }
  0x74   : > { %1902 = vmatpush.bf16.msrb.mxu0 %v3141_v9 }
  0x75   : > { %1931 = vmatpush.bf16.msrb.mxu1 %v3149_v11  ;;  %v3145_v11 = vld [vmem:[%s3865_s1 + $0x348] sm:$0xff] }
  0x76   : > { %1960 = vmatpush.bf16.msrb.mxu2 %v3157_v8 }
  0x77   : > { %1989 = vmatpush.bf16.msrb.mxu3 %v3165_v10 }
  0x78   : > { %1903 = vmatpush.bf16.msrb.mxu0 %v3140_v13  ;;  %v3136_v13 = vld [vmem:[%s3865_s1 + $0x300] sm:$0xff] }
  0x7a   : > { %1961 = vmatpush.bf16.msrb.mxu2 %v3156_v12  ;;  %v3152_v12 = vld [vmem:[%s3865_s1 + $0x380] sm:$0xff] }
  0x7b   : > { %1681 = vmatmul.bf16.gmra.mxu0 %v2287_v28  ;;  %1990 = vmatpush.bf16.msrb.mxu3 %v3164_v16  ;;  %v2251_v28 = vor.u32 %v2981_v21, %v2248_v22  ;;  %v3160_v16 = vld [vmem:[%s3865_s1 + $0x3c0] sm:$0xff]  ;;  %v3013_v21 = vld [vmem:[%s3320_s14 + $0x12c] sm:$0xf] }
  0x7c   : > { %1710 = vmatmul.bf16.gmra.mxu1 %v2291_v29  ;;  %1904 = vmatpush.bf16.msrb.mxu0 %v3139_v32  ;;  %v2376_v22 = vld [vmem:[%s3320_s14 + $0x168] sm:$0xf0] }
  0x7d   : > { %1739 = vmatmul.bf16.gmra.mxu2 %v2295_v30  ;;  %v3148_v30 = vld [vmem:[%s3865_s1 + $0x360] sm:$0xff]  ;;  %v2379_v32 = vor.u32 %v3013_v21, %v2376_v22 }
  0x7e   : > { %1768 = vmatmul.bf16.gmra.mxu3 %v2299_v31  ;;  %v3155_v31 = vld [vmem:[%s3865_s1 + $0x398] sm:$0xff]  ;;  %1932 = vmatpush.bf16.msrb.mxu1 %v3148_v30 }
  0x7f   : > { %1962 = vmatpush.bf16.msrb.mxu2 %v3155_v31  ;;  %1991 = vmatpush.bf16.msrb.mxu3 %v3163_v33  ;;  %v2375_v31 = vor.u32 %v3021_v20, %v2374_v19 }
  0x80   : > { %1905 = vmatpush.bf16.msrb.mxu0 %v3138_v43  ;;  %v2430_v43 = vld [vmem:[%s3320_s14 + $0x1a0] sm:$0xf] }
  0x82   : > { %1933 = vmatpush.bf16.msrb.mxu1 %v3147_v41 }
  0x83   : > { %1963 = vmatpush.bf16.msrb.mxu2 %v3154_v42  ;;  %1992 = vmatpush.bf16.msrb.mxu3 %v3162_v46  ;;  %v2432_v46 = vld [vmem:[%s3320_s14 + $0x1e0] sm:$0xf0] }
  0x84   : > { %1906 = vmatpush.bf16.msrb.mxu0 %v3137_v2 }
  0x86   : > { %1934 = vmatpush.bf16.msrb.mxu1 %v3146_v0 }
  0x87   : > { %1964 = vmatpush.bf16.msrb.mxu2 %v3153_v1 }
  0x88   : > { %1907 = vmatpush.bf16.msrb.mxu0 %v3136_v13  ;;  %v2983_v13 = vld [vmem:[%s3320_s14 + $0x3c] sm:$0xf] }
  0x8a   : > { %1935 = vmatpush.bf16.msrb.mxu1 %v3145_v11  ;;  %v2262_v11 = vld [vmem:[%s3320_s14 + $0x38] sm:$0xf] }
  0x8b   : > { %1686 = vmatmul.bf16.gmra.mxu0 %v2351_v48  ;;  %v2304_v48 = vld [vmem:[%s3320_s14 + $0xe0] sm:$0xf0]  ;;  %1965 = vmatpush.bf16.msrb.mxu2 %v3152_v12  ;;  %v2991_v12 = vld [vmem:[%s3320_s14 + $0x74] sm:$0xf0] }
  0x8c   : > { %1715 = vmatmul.bf16.gmra.mxu1 %v2355_v49  ;;  %v2310_v49 = vld [vmem:[%s3320_s14 + $0xa8] sm:$0xf]  ;;  %v2307_v56 = vor.u32 %v2996_v47, %v2304_v48  ;;  %v2263_v22 = vor.u32 %v2991_v12, %v2262_v11 }
  0x8d   : > { %1744 = vmatmul.bf16.gmra.mxu2 %v2359_v50  ;;  %v3005_v50 = vld [vmem:[%s3320_s14 + $0xe4] sm:$0xf0] }
  0x8e   : > { %1773 = vmatmul.bf16.gmra.mxu3 %v2363_v51  ;;  %v2997_v51 = vld [vmem:[%s3320_s14 + $0xac] sm:$0xf]  ;;  %v2311_v60 = vor.u32 %v3005_v50, %v2310_v49  ;;  %v2438_v47 = vld [vmem:[%s3320_s14 + $0x1a8] sm:$0xf] }
  0x8f   : > { %v2315_v61 = vor.u32 %v2997_v51, %v2312_v52  ;;  %v3037_v48 = vld [vmem:[%s3320_s14 + $0x1e4] sm:$0xf0]  ;;  %v3029_v49 = vld [vmem:[%s3320_s14 + $0x1ac] sm:$0xf] }
  0x90   : > { %v2440_v50 = vld [vmem:[%s3320_s14 + $0x1e8] sm:$0xf0] }
  0x9b   : > { %1691 = vmatmul.bf16.gmra.mxu0 %v2415_v3  ;;  %v3161_v3 = vld [vmem:[%s3865_s1 + $0x3c8] sm:$0xff] }
  0x9c   : > { %1720 = vmatmul.bf16.gmra.mxu1 %v2419_v4  ;;  %1993 = vmatpush.bf16.msrb.mxu3 %v3161_v3 }
  0x9d   : > { %1749 = vmatmul.bf16.gmra.mxu2 %v2423_v5 }
  0x9e   : > { %1778 = vmatmul.bf16.gmra.mxu3 %v2427_v6 }
  0xa0   : > { %1994 = vmatpush.bf16.msrb.mxu3 %v3160_v16 }
  0xa8   : > { %v1561_v25 = vpop.f32.mrf.mxu0 }
  0xa9   : > { %v1590_v26 = vpop.f32.mrf.mxu1 }
  0xaa   : > { %v1591_v29 = vadd.f32 %v1590_v26, %v1561_v25  ;;  %v2367_v25 = vor.u32 %v3020_v15, %v2366_v14  ;;  %v2371_v26 = vor.u32 %v3012_v17, %v2368_v18  ;;  %v2264_v14 = vld [vmem:[%s3320_s14 + $0x78] sm:$0xf0] }
  0xab   : > { %1792 = vmatmul.bf16.vlgmr.msra.gmra.mxu0 %v2239_v23 }
  0xac   : > { %1821 = vmatmul.bf16.vlgmr.msra.gmra.mxu1 %v2243_v24 }
  0xad   : > { %1850 = vmatmul.bf16.vlgmr.msra.gmra.mxu2 %v2247_v27  ;;  %v3144_v27 = vld [vmem:[%s3865_s1 + $0x340] sm:$0xff] }
  0xae   : > { %1879 = vmatmul.bf16.vlgmr.msra.gmra.mxu3 %v2251_v28  ;;  %1936 = vmatpush.bf16.msrb.mxu1 %v3144_v27 }
  0xb0   : > { %v1619_v34 = vpop.f32.mrf.mxu2  ;;  %v1563_v37 = vpop.f32.mrf.mxu0 }
  0xb1   : > { %v1648_v35 = vpop.f32.mrf.mxu3  ;;  %v1620_v36 = vadd.f32 %v1619_v34, %v1591_v29  ;;  %v1592_v38 = vpop.f32.mrf.mxu1 }
  0xb2   : > { %v1593_v39 = vadd.f32 %v1592_v38, %v1563_v37 }
  0xb3   : > { %v3661_v40 = vadd.f32 %v1648_v35, %v1620_v36 }
  0xb8   : > { %v1621_v53 = vpop.f32.mrf.mxu2  ;;  %v1566_v58 = vpop.f32.mrf.mxu0 }
  0xb9   : > { %v1650_v54 = vpop.f32.mrf.mxu3  ;;  %v1622_v57 = vadd.f32 %v1621_v53, %v1593_v39  ;;  %v1595_v59 = vpop.f32.mrf.mxu1  ;;  %v2431_v53 = vor.u32 %v3036_v44, %v2430_v43  ;;  %v2999_v43 = vld [vmem:[%s3320_s14 + $0xbc] sm:$0xf] }
  0xba   : > { %v1596_v62 = vadd.f32 %v1595_v59, %v1566_v58  ;;  %v2439_v58 = vor.u32 %v3037_v48, %v2438_v47  ;;  %v2443_v59 = vor.u32 %v3029_v49, %v2440_v50  ;;  %v2328_v44 = vld [vmem:[%s3320_s14 + $0xf8] sm:$0xf0] }
  0xbb   : > { %v3683_v63 = vadd.f32 %v1650_v54, %v1622_v57  ;;  %1797 = vmatmul.bf16.gmra.mxu0 %v2303_v55  ;;  %v2435_v54 = vor.u32 %v3028_v45, %v2432_v46 }
  0xbc   : > { %1826 = vmatmul.bf16.gmra.mxu1 %v2307_v56 }
  0xbd   : > { %1855 = vmatmul.bf16.gmra.mxu2 %v2311_v60 }
  0xbe   : > { %1884 = vmatmul.bf16.gmra.mxu3 %v2315_v61 }
  0xc0   : > { %v1624_v4 = vpop.f32.mrf.mxu2  ;;  %v1568_v7 = vpop.f32.mrf.mxu0 }
  0xc1   : > { %v1653_v5 = vpop.f32.mrf.mxu3  ;;  %v1625_v6 = vadd.f32 %v1624_v4, %v1596_v62  ;;  %v1597_v8 = vpop.f32.mrf.mxu1 }
  0xc2   : > { %v1598_v9 = vadd.f32 %v1597_v8, %v1568_v7  ;;  %v2990_v7 = vld [vmem:[%s3320_s14 + $0x6c] sm:$0xf0]  ;;  %v2982_v8 = vld [vmem:[%s3320_s14 + $0x34] sm:$0xf] }
  0xc3   : > { %v3697_v10 = vadd.f32 %v1653_v5, %v1625_v6  ;;  %v2254_v6 = vld [vmem:[%s3320_s14 + $0x30] sm:$0xf] }
  0xc4   : > { %v2255_v17 = vor.u32 %v2990_v7, %v2254_v6  ;;  %v2390_v6 = vld [vmem:[%s3320_s14 + $0x138] sm:$0xf] }
  0xc5   : > { %v3023_v7 = vld [vmem:[%s3320_s14 + $0x174] sm:$0xf0] }
  0xc8   : > { %v1626_v23 = vpop.f32.mrf.mxu2  ;;  %v1571_v29 = vpop.f32.mrf.mxu0 }
  0xc9   : > { %v1655_v24 = vpop.f32.mrf.mxu3  ;;  %v1627_v28 = vadd.f32 %v1626_v23, %v1598_v9  ;;  %v1600_v30 = vpop.f32.mrf.mxu1  ;;  %v2256_v9 = vld [vmem:[%s3320_s14 + $0x70] sm:$0xf0]  ;;  %v2267_v23 = vor.u32 %v2983_v13, %v2264_v14 }
  0xca   : > { %v1601_v33 = vadd.f32 %v1600_v30, %v1571_v29  ;;  %v2259_v18 = vor.u32 %v2982_v8, %v2256_v9  ;;  %v3015_v8 = vld [vmem:[%s3320_s14 + $0x13c] sm:$0xf] }
  0xcb   : > { %v3722_v34 = vadd.f32 %v1655_v24, %v1627_v28  ;;  %1802 = vmatmul.bf16.gmra.mxu0 %v2367_v25  ;;  %v2392_v9 = vld [vmem:[%s3320_s14 + $0x178] sm:$0xf0] }
  0xcc   : > { %1831 = vmatmul.bf16.gmra.mxu1 %v2371_v26 }
  0xcd   : > { %1860 = vmatmul.bf16.gmra.mxu2 %v2375_v31 }
  0xce   : > { %1889 = vmatmul.bf16.gmra.mxu3 %v2379_v32 }
  0xd0   : > { %v1629_v35 = vpop.f32.mrf.mxu2  ;;  %v1573_v38 = vpop.f32.mrf.mxu0 }
  0xd1   : > { %v1658_v36 = vpop.f32.mrf.mxu3  ;;  %v1630_v37 = vadd.f32 %v1629_v35, %v1601_v33  ;;  %v1602_v39 = vpop.f32.mrf.mxu1  ;;  %v2318_v35 = vld [vmem:[%s3320_s14 + $0xb0] sm:$0xf] }
  0xd2   : > { %v1603_v41 = vadd.f32 %v1602_v39, %v1573_v38  ;;  %v2320_v38 = vld [vmem:[%s3320_s14 + $0xf0] sm:$0xf0]  ;;  %v2326_v39 = vld [vmem:[%s3320_s14 + $0xb8] sm:$0xf] }
  0xd3   : > { %v3724_v42 = vadd.f32 %v1658_v36, %v1630_v37  ;;  %v3006_v36 = vld [vmem:[%s3320_s14 + $0xec] sm:$0xf0]  ;;  %v2998_v37 = vld [vmem:[%s3320_s14 + $0xb4] sm:$0xf] }
  0xd4   : > { %v2319_v47 = vor.u32 %v3006_v36, %v2318_v35  ;;  %v2323_v48 = vor.u32 %v2998_v37, %v2320_v38  ;;  %v2454_v35 = vld [vmem:[%s3320_s14 + $0x1b8] sm:$0xf]  ;;  %v3031_v37 = vld [vmem:[%s3320_s14 + $0x1bc] sm:$0xf] }
  0xd5   : > { %v3039_v36 = vld [vmem:[%s3320_s14 + $0x1f4] sm:$0xf0]  ;;  %v2456_v38 = vld [vmem:[%s3320_s14 + $0x1f8] sm:$0xf0] }
  0xd8   : > { %v1631_v51 = vpop.f32.mrf.mxu2  ;;  %v1576_v56 = vpop.f32.mrf.mxu0 }
  0xd9   : > { %v1660_v52 = vpop.f32.mrf.mxu3  ;;  %v1632_v55 = vadd.f32 %v1631_v51, %v1603_v41  ;;  %v1605_v57 = vpop.f32.mrf.mxu1  ;;  %v3007_v41 = vld [vmem:[%s3320_s14 + $0xf4] sm:$0xf0] }
  0xda   : > { %v1606_v60 = vadd.f32 %v1605_v57, %v1576_v56 }
  0xdb   : > { %v3734_v61 = vadd.f32 %v1660_v52, %v1632_v55  ;;  %1807 = vmatmul.bf16.gmra.mxu0 %v2431_v53  ;;  %v2327_v52 = vor.u32 %v3007_v41, %v2326_v39 }
  0xdc   : > { %1836 = vmatmul.bf16.gmra.mxu1 %v2435_v54 }
  0xdd   : > { %1865 = vmatmul.bf16.gmra.mxu2 %v2439_v58 }
  0xde   : > { %1894 = vmatmul.bf16.gmra.mxu3 %v2443_v59 }
  0xe0   : > { %v1634_v62 = vpop.f32.mrf.mxu2  ;;  %v1578_v2 = vpop.f32.mrf.mxu0 }
  0xe1   : > { %v1663_v0 = vpop.f32.mrf.mxu3  ;;  %v1635_v1 = vadd.f32 %v1634_v62, %v1606_v60  ;;  %v1607_v3 = vpop.f32.mrf.mxu1 }
  0xe2   : > { %v1608_v4 = vadd.f32 %v1607_v3, %v1578_v2  ;;  %v3022_v2 = vld [vmem:[%s3320_s14 + $0x16c] sm:$0xf0]  ;;  %v3014_v3 = vld [vmem:[%s3320_s14 + $0x134] sm:$0xf] }
  0xe3   : > { %v3736_v5 = vadd.f32 %v1663_v0, %v1635_v1  ;;  %v2382_v1 = vld [vmem:[%s3320_s14 + $0x130] sm:$0xf] }
  0xe4   : > { %v2383_v13 = vor.u32 %v3022_v2, %v2382_v1 }
  0xe8   : > { %v1636_v15 = vpop.f32.mrf.mxu2  ;;  %v1677_v20 = vpop.f32.mrf.mxu0 }
  0xe9   : > { %v1665_v16 = vpop.f32.mrf.mxu3  ;;  %v1637_v19 = vadd.f32 %v1636_v15, %v1608_v4  ;;  %v1706_v21 = vpop.f32.mrf.mxu1  ;;  %v1678_v24 = vadd.f32 %v1677_v20, %v3661_v40  ;;  %v2384_v4 = vld [vmem:[%s3320_s14 + $0x170] sm:$0xf0] }
  0xea   : > { %v2387_v14 = vor.u32 %v3014_v3, %v2384_v4 }
  0xeb   : > { %v3747_v25 = vadd.f32 %v1665_v16, %v1637_v19  ;;  %v1707_v26 = vadd.f32 %v1706_v21, %v1678_v24  ;;  %1908 = vmatmul.bf16.vlgmr.msrb.gmra.mxu0 %v2255_v17 }
  0xec   : > { %1937 = vmatmul.bf16.vlgmr.msrb.gmra.mxu1 %v2259_v18  ;;  %v2391_v18 = vor.u32 %v3023_v7, %v2390_v6 }
  0xed   : > { %1966 = vmatmul.bf16.vlgmr.msrb.gmra.mxu2 %v2263_v22 }
  0xee   : > { %1995 = vmatmul.bf16.vlgmr.msrb.gmra.mxu3 %v2267_v23 }
  0xf0   : > { %v1735_v27 = vpop.f32.mrf.mxu2  ;;  %v1679_v30 = vpop.f32.mrf.mxu0 }
  0xf1   : > { %v1764_v28 = vpop.f32.mrf.mxu3  ;;  %v1736_v29 = vadd.f32 %v1735_v27, %v1707_v26  ;;  %v1708_v31 = vpop.f32.mrf.mxu1  ;;  %v1680_v40 = vadd.f32 %v1679_v30, %v3683_v63  ;;  %v2331_v63 = vor.u32 %v2999_v43, %v2328_v44  ;;  %v2446_v30 = vld [vmem:[%s3320_s14 + $0x1b0] sm:$0xf] }
  0xf3   : > { %v3750_v32 = vadd.f32 %v1764_v28, %v1736_v29  ;;  %v1709_v33 = vadd.f32 %v1708_v31, %v1680_v40  ;;  %v3038_v31 = vld [vmem:[%s3320_s14 + $0x1ec] sm:$0xf0]  ;;  %v3030_v40 = vld [vmem:[%s3320_s14 + $0x1b4] sm:$0xf] }
  0xf4   : > { %v2447_v43 = vor.u32 %v3038_v31, %v2446_v30 }
  0xf8   : > { %v1737_v45 = vpop.f32.mrf.mxu2  ;;  %v1682_v50 = vpop.f32.mrf.mxu0 }
  0xf9   : > { %v1766_v46 = vpop.f32.mrf.mxu3  ;;  %v1738_v49 = vadd.f32 %v1737_v45, %v1709_v33  ;;  %v1711_v51 = vpop.f32.mrf.mxu1  ;;  %v1683_v53 = vadd.f32 %v1682_v50, %v3697_v10  ;;  %v2448_v33 = vld [vmem:[%s3320_s14 + $0x1f0] sm:$0xf0]  ;;  %s2975_s14 = sshll.u32 %s3868_s10, 5 }
  0xfa   : > { %v2451_v44 = vor.u32 %v3030_v40, %v2448_v33  ;;  %s143_s10 = scalar_lea.vmem %s3866_s2, %s2975_s14 }
  0xfb   : > { %v3761_v54 = vadd.f32 %v1766_v46, %v1738_v49  ;;  %v1712_v55 = vadd.f32 %v1711_v51, %v1683_v53  ;;  %1913 = vmatmul.bf16.gmra.mxu0 %v2319_v47 }
  0xfc   : > { %1942 = vmatmul.bf16.gmra.mxu1 %v2323_v48  ;;  %v2455_v48 = vor.u32 %v3039_v36, %v2454_v35 }
  0xfd   : > { %1971 = vmatmul.bf16.gmra.mxu2 %v2327_v52 }
  0xfe   : > { %2000 = vmatmul.bf16.gmra.mxu3 %v2331_v63 }
 0x100   : > { %v1740_v56 = vpop.f32.mrf.mxu2  ;;  %v1684_v59 = vpop.f32.mrf.mxu0 }
 0x101   : > { %v1769_v57 = vpop.f32.mrf.mxu3  ;;  %v1741_v58 = vadd.f32 %v1740_v56, %v1712_v55  ;;  %v1713_v60 = vpop.f32.mrf.mxu1  ;;  %v1685_v10 = vadd.f32 %v1684_v59, %v3722_v34  ;;  %v2395_v34 = vor.u32 %v3015_v8, %v2392_v9 }
 0x103   : > { %v3764_v62 = vadd.f32 %v1769_v57, %v1741_v58  ;;  %v1714_v0 = vadd.f32 %v1713_v60, %v1685_v10 }
 0x108   : > { %v1742_v11 = vpop.f32.mrf.mxu2  ;;  %v1687_v16 = vpop.f32.mrf.mxu0 }
 0x109   : > { %v1771_v12 = vpop.f32.mrf.mxu3  ;;  %v1743_v15 = vadd.f32 %v1742_v11, %v1714_v0  ;;  %v1716_v17 = vpop.f32.mrf.mxu1  ;;  %v1688_v19 = vadd.f32 %v1687_v16, %v3724_v42 }
 0x10b   : > { %v3775_v20 = vadd.f32 %v1771_v12, %v1743_v15  ;;  %v1717_v21 = vadd.f32 %v1716_v17, %v1688_v19  ;;  %1918 = vmatmul.bf16.gmra.mxu0 %v2383_v13 }
 0x10c   : > { %1947 = vmatmul.bf16.gmra.mxu1 %v2387_v14 }
 0x10d   : > { %1976 = vmatmul.bf16.gmra.mxu2 %v2391_v18 }
 0x10e   : > { %2005 = vmatmul.bf16.gmra.mxu3 %v2395_v34 }
 0x110   : > { %v1745_v22 = vpop.f32.mrf.mxu2  ;;  %v1689_v26 = vpop.f32.mrf.mxu0 }
 0x111   : > { %v1774_v23 = vpop.f32.mrf.mxu3  ;;  %v1746_v24 = vadd.f32 %v1745_v22, %v1717_v21  ;;  %v1718_v27 = vpop.f32.mrf.mxu1  ;;  %v1690_v42 = vadd.f32 %v1689_v26, %v3734_v61  ;;  %v2459_v61 = vor.u32 %v3031_v37, %v2456_v38 }
 0x113   : > { %v3778_v28 = vadd.f32 %v1774_v23, %v1746_v24  ;;  %v1719_v29 = vadd.f32 %v1718_v27, %v1690_v42 }
 0x118   : > { %v1747_v39 = vpop.f32.mrf.mxu2  ;;  %v1692_v46 = vpop.f32.mrf.mxu0 }
 0x119   : > { %v1776_v41 = vpop.f32.mrf.mxu3  ;;  %v1748_v45 = vadd.f32 %v1747_v39, %v1719_v29  ;;  %v1721_v47 = vpop.f32.mrf.mxu1  ;;  %v1693_v49 = vadd.f32 %v1692_v46, %v3736_v5 }
 0x11b   : > { %v1777_v50 = vadd.f32 %v1776_v41, %v1748_v45  ;;  %v1722_v51 = vadd.f32 %v1721_v47, %v1693_v49  ;;  %1923 = vmatmul.bf16.gmra.mxu0 %v2447_v43 }
 0x11c   : > { %1952 = vmatmul.bf16.gmra.mxu1 %v2451_v44 }
 0x11d   : > { %1981 = vmatmul.bf16.gmra.mxu2 %v2455_v48 }
 0x11e   : > { %2010 = vmatmul.bf16.gmra.mxu3 %v2459_v61 }
 0x120   : > { %v1750_v52 = vpop.f32.mrf.mxu2  ;;  %v1694_v55 = vpop.f32.mrf.mxu0 }
 0x121   : > { %v1779_v63 = vpop.f32.mrf.mxu3  ;;  %v1751_v53 = vadd.f32 %v1750_v52, %v1722_v51  ;;  %v1723_v56 = vpop.f32.mrf.mxu1  ;;  %v1695_v57 = vadd.f32 %v1694_v55, %v3747_v25 }
 0x123   : > { %v3790_v58 = vadd.f32 %v1779_v63, %v1751_v53  ;;  %v1724_v59 = vadd.f32 %v1723_v56, %v1695_v57 }
 0x128   : > { %v1752_v60 = vpop.f32.mrf.mxu2  ;;  %v1793_v5 = vpop.f32.mrf.mxu0 }
 0x129   : > { %v1781_v10 = vpop.f32.mrf.mxu3  ;;  %v1753_v0 = vadd.f32 %v1752_v60, %v1724_v59  ;;  %v1822_v1 = vpop.f32.mrf.mxu1  ;;  %v1794_v2 = vadd.f32 %v1793_v5, %v3750_v32 }
 0x12b   : > { %v3793_v3 = vadd.f32 %v1781_v10, %v1753_v0  ;;  %v1823_v4 = vadd.f32 %v1822_v1, %v1794_v2 }
 0x130   : > { %v1851_v6 = vpop.f32.mrf.mxu2  ;;  %v1795_v9 = vpop.f32.mrf.mxu0 }
 0x131   : > { %v1880_v7 = vpop.f32.mrf.mxu3  ;;  %v1852_v8 = vadd.f32 %v1851_v6, %v1823_v4  ;;  %v1824_v11 = vpop.f32.mrf.mxu1  ;;  %v1796_v25 = vadd.f32 %v1795_v9, %v3761_v54 }
 0x133   : > { %v1881_v12 = vadd.f32 %v1880_v7, %v1852_v8  ;;  %v1825_v13 = vadd.f32 %v1824_v11, %v1796_v25 }
 0x138   : > { %v1853_v14 = vpop.f32.mrf.mxu2  ;;  %v1798_v17 = vpop.f32.mrf.mxu0 }
 0x139   : > { %v1882_v15 = vpop.f32.mrf.mxu3  ;;  %v1854_v16 = vadd.f32 %v1853_v14, %v1825_v13  ;;  %v1827_v18 = vpop.f32.mrf.mxu1  ;;  %v1799_v34 = vadd.f32 %v1798_v17, %v3764_v62 }
 0x13b   : > { %v1883_v32 = vadd.f32 %v1882_v15, %v1854_v16  ;;  %v1828_v19 = vadd.f32 %v1827_v18, %v1799_v34 }
 0x140   : > { %v1856_v21 = vpop.f32.mrf.mxu2  ;;  %v1800_v24 = vpop.f32.mrf.mxu0 }
 0x141   : > { %v1885_v22 = vpop.f32.mrf.mxu3  ;;  %v1857_v23 = vadd.f32 %v1856_v21, %v1828_v19  ;;  %v1829_v26 = vpop.f32.mrf.mxu1  ;;  %v1801_v27 = vadd.f32 %v1800_v24, %v3775_v20 }
 0x143   : > { %v1886_v42 = vadd.f32 %v1885_v22, %v1857_v23  ;;  %v1830_v54 = vadd.f32 %v1829_v26, %v1801_v27 }
 0x148   : > { %v1858_v29 = vpop.f32.mrf.mxu2  ;;  %v1803_v40 = vpop.f32.mrf.mxu0 }
 0x149   : > { %v1887_v30 = vpop.f32.mrf.mxu3  ;;  %v1859_v31 = vadd.f32 %v1858_v29, %v1830_v54  ;;  %v1832_v33 = vpop.f32.mrf.mxu1  ;;  %v1804_v35 = vadd.f32 %v1803_v40, %v3778_v28 }
 0x14b   : > { %v1888_v36 = vadd.f32 %v1887_v30, %v1859_v31  ;;  %v1833_v62 = vadd.f32 %v1832_v33, %v1804_v35 }
 0x150   : > { %v1861_v37 = vpop.f32.mrf.mxu2  ;;  %v1805_v41 = vpop.f32.mrf.mxu0 }
 0x151   : > { %v1890_v38 = vpop.f32.mrf.mxu3  ;;  %v1862_v39 = vadd.f32 %v1861_v37, %v1833_v62  ;;  %v1834_v43 = vpop.f32.mrf.mxu1  ;;  %v1806_v44 = vadd.f32 %v1805_v41, %v1777_v50 }
 0x153   : > { %v1891_v45 = vadd.f32 %v1890_v38, %v1862_v39  ;;  %v1835_v46 = vadd.f32 %v1834_v43, %v1806_v44 }
 0x158   : > { %v1863_v20 = vpop.f32.mrf.mxu2  ;;  %v1808_v61 = vpop.f32.mrf.mxu0 }
 0x159   : > { %v1892_v47 = vpop.f32.mrf.mxu3  ;;  %v1864_v48 = vadd.f32 %v1863_v20, %v1835_v46  ;;  %v1837_v49 = vpop.f32.mrf.mxu1  ;;  %v1809_v39 = vadd.f32 %v1808_v61, %v3790_v58 }
 0x15b   : > { %v1893_v51 = vadd.f32 %v1892_v47, %v1864_v48 }
 0x160   : > { %v1866_v52 = vpop.f32.mrf.mxu2  ;;  %v1810_v28 = vpop.f32.mrf.mxu0 }
 0x161   : > { %v3799_v63 = vpop.f32.mrf.mxu3  ;;  %v3801_v53 = vpop.f32.mrf.mxu1 }
 0x168   : > { %v3803_v55 = vpop.f32.mrf.mxu2  ;;  %v1909_v57 = vpop.f32.mrf.mxu0 }
 0x169   : > { %v3805_v56 = vpop.f32.mrf.mxu3  ;;  %v1938_v50 = vpop.f32.mrf.mxu1  ;;  %v1910_v59 = vadd.f32 %v1909_v57, %v1881_v12  ;;  %v1838_v57 = vadd.f32 %v1837_v49, %v1809_v39 }
 0x16b   : > { %v1939_v1 = vadd.f32 %v1938_v50, %v1910_v59 }
 0x170   : > { %v1967_v60 = vpop.f32.mrf.mxu2  ;;  %v1911_v0 = vpop.f32.mrf.mxu0 }
 0x171   : > { %v1996_v10 = vpop.f32.mrf.mxu3  ;;  %v1940_v5 = vpop.f32.mrf.mxu1  ;;  %v1912_v2 = vadd.f32 %v1911_v0, %v1883_v32  ;;  %v1968_v4 = vadd.f32 %v1967_v60, %v1939_v1  ;;  %v1867_v60 = vadd.f32 %v1866_v52, %v1838_v57  ;;  %v1811_v0 = vadd.f32 %v1810_v28, %v3793_v3 }
 0x173   : > { %v1941_v6 = vadd.f32 %v1940_v5, %v1912_v2  ;;  %v3807_v9 = vadd.f32 %v1996_v10, %v1968_v4  ;;  %v1896_v2 = vadd.f32 %v3799_v63, %v1867_v60  ;;  %v1840_v49 = vadd.f32 %v3801_v53, %v1811_v0 }
 0x175   : > { %v2038_v12 = vmul.f32 %v3807_v9, %v3807_v9 }
 0x178   : > { %v1969_v7 = vpop.f32.mrf.mxu2  ;;  %v1914_v25 = vpop.f32.mrf.mxu0 }
 0x179   : > { %v1998_v8 = vpop.f32.mrf.mxu3  ;;  %v1970_v11 = vadd.f32 %v1969_v7, %v1941_v6  ;;  %v1943_v13 = vpop.f32.mrf.mxu1  ;;  %v1915_v15 = vadd.f32 %v1914_v25, %v1886_v42 }
 0x17b   : > { %v3809_v14 = vadd.f32 %v1998_v8, %v1970_v11  ;;  %v1944_v34 = vadd.f32 %v1943_v13, %v1915_v15  ;;  %v1869_v8 = vadd.f32 %v3803_v55, %v1840_v49 }
 0x17d   : > { %v2024_v16 = vadd.f32 %v3809_v14, %v3807_v9  ;;  %v2039_v17 = vmul.f32 %v3809_v14, %v3809_v14  ;;  %v1898_v63 = vadd.f32 %v3805_v56, %v1869_v8 }
 0x17f   : > { %v2046_v18 = vadd.f32 %v2039_v17, %v2038_v12 }
 0x180   : > { %v1972_v32 = vpop.f32.mrf.mxu2  ;;  %v1916_v22 = vpop.f32.mrf.mxu0 }
 0x181   : > { %v2001_v19 = vpop.f32.mrf.mxu3  ;;  %v1973_v21 = vadd.f32 %v1972_v32, %v1944_v34  ;;  %v1945_v23 = vpop.f32.mrf.mxu1  ;;  %v1917_v26 = vadd.f32 %v1916_v22, %v1888_v36 }
 0x183   : > { %v3817_v24 = vadd.f32 %v2001_v19, %v1973_v21  ;;  %v1946_v29 = vadd.f32 %v1945_v23, %v1917_v26 }
 0x185   : > { %v2025_v27 = vadd.f32 %v2024_v16, %v3817_v24  ;;  %v2040_v42 = vmul.f32 %v3817_v24, %v3817_v24 }
 0x187   : > { %v2047_v54 = vadd.f32 %v2046_v18, %v2040_v42 }
 0x188   : > { %v1974_v30 = vpop.f32.mrf.mxu2  ;;  %v1919_v33 = vpop.f32.mrf.mxu0 }
 0x189   : > { %v2003_v31 = vpop.f32.mrf.mxu3  ;;  %v1975_v40 = vadd.f32 %v1974_v30, %v1946_v29  ;;  %v1948_v35 = vpop.f32.mrf.mxu1  ;;  %v1920_v37 = vadd.f32 %v1919_v33, %v1891_v45 }
 0x18b   : > { %v3822_v62 = vadd.f32 %v2003_v31, %v1975_v40  ;;  %v1949_v43 = vadd.f32 %v1948_v35, %v1920_v37 }
 0x18d   : > { %v2026_v38 = vadd.f32 %v2025_v27, %v3822_v62  ;;  %v2041_v36 = vmul.f32 %v3822_v62, %v3822_v62 }
 0x18f   : > { %v2048_v41 = vadd.f32 %v2047_v54, %v2041_v36 }
 0x190   : > { %v1977_v44 = vpop.f32.mrf.mxu2  ;;  %v1921_v47 = vpop.f32.mrf.mxu0 }
 0x191   : > { %v2006_v46 = vpop.f32.mrf.mxu3  ;;  %v1978_v20 = vadd.f32 %v1977_v44, %v1949_v43  ;;  %v1950_v48 = vpop.f32.mrf.mxu1  ;;  %v1922_v59 = vadd.f32 %v1921_v47, %v1893_v51 }
 0x193   : > { %v3828_v50 = vadd.f32 %v2006_v46, %v1978_v20  ;;  %v1951_v61 = vadd.f32 %v1950_v48, %v1922_v59 }
 0x195   : > { %v2027_v45 = vadd.f32 %v2026_v38, %v3828_v50  ;;  %v2042_v10 = vmul.f32 %v3828_v50, %v3828_v50 }
 0x197   : > { %v2049_v58 = vadd.f32 %v2048_v41, %v2042_v10 }
 0x198   : > { %v1979_v5 = vpop.f32.mrf.mxu2  ;;  %v1924_v6 = vpop.f32.mrf.mxu0 }
 0x199   : > { %v2008_v1 = vpop.f32.mrf.mxu3  ;;  %v1980_v4 = vadd.f32 %v1979_v5, %v1951_v61  ;;  %v1925_v51 = vadd.f32 %v1924_v6, %v1896_v2  ;;  %v1953_v52 = vpop.f32.mrf.mxu1 }
 0x19b   : > { %v3836_v7 = vadd.f32 %v2008_v1, %v1980_v4  ;;  %v1954_v25 = vadd.f32 %v1953_v52, %v1925_v51 }
 0x19d   : > { %v2028_v11 = vadd.f32 %v2027_v45, %v3836_v7  ;;  %v2043_v3 = vmul.f32 %v3836_v7, %v3836_v7 }
 0x19f   : > { %v2050_v28 = vadd.f32 %v2049_v58, %v2043_v3 }
 0x1a0   : > { %v1982_v13 = vpop.f32.mrf.mxu2  ;;  %v1926_v16 = vpop.f32.mrf.mxu0 }
 0x1a1   : > { %v2011_v15 = vpop.f32.mrf.mxu3  ;;  %v1983_v12 = vadd.f32 %v1982_v13, %v1954_v25  ;;  %v1927_v17 = vadd.f32 %v1926_v16, %v1898_v63  ;;  %v1955_v32 = vpop.f32.mrf.mxu1 }
 0x1a3   : > { %v2012_v53 = vadd.f32 %v2011_v15, %v1983_v12  ;;  %v1956_v55 = vadd.f32 %v1955_v32, %v1927_v17 }
 0x1a5   : > { %v2029_v18 = vadd.f32 %v2028_v11, %v2012_v53  ;;  %v2044_v34 = vmul.f32 %v2012_v53, %v2012_v53 }
 0x1a7   : > { %v2051_v19 = vadd.f32 %v2050_v28, %v2044_v34 }
 0x1a8   : > { %v1984_v21 = vpop.f32.mrf.mxu2 }
 0x1a9   : > { %v1985_v22 = vadd.f32 %v1984_v21, %v1956_v55  ;;  %v2013_v23 = vpop.f32.mrf.mxu3 }
 0x1ab   : > { %v2014_v26 = vadd.f32 %v2013_v23, %v1985_v22 }
 0x1ad   : > { %v2030_v27 = vadd.f32 %v2029_v18, %v2014_v26  ;;  %v2045_v42 = vmul.f32 %v2014_v26, %v2014_v26 }
 0x1af   : > { %v2031_v54 = vrot.slane %v2030_v27, 4  ;;  %v2052_v29 = vadd.f32 %v2051_v19, %v2045_v42 }
 0x1b1   : > { %v2032_v30 = vadd.f32 %v2031_v54, %v2030_v27  ;;  %v2053_v31 = vrot.slane %v2052_v29, 4 }
 0x1b3   : > { %v2033_v56 = vrot.slane %v2032_v30, 2  ;;  %v2054_v40 = vadd.f32 %v2053_v31, %v2052_v29 }
 0x1b5   : > { %v2034_v33 = vadd.f32 %v2033_v56, %v2032_v30  ;;  %v2055_v35 = vrot.slane %v2054_v40, 2 }
 0x1b7   : > { %v2035_v37 = vrot.slane %v2034_v33, 1  ;;  %v2056_v38 = vadd.f32 %v2055_v35, %v2054_v40 }
 0x1b9   : > { %v2036_v36 = vadd.f32 %v2035_v37, %v2034_v33  ;;  %v2057_v39 = vrot.slane %v2056_v38, 1 }
 0x1bb   : > { %v2058_v41 = vadd.f32 %v2057_v39, %v2056_v38  ;;  %v2060_v43 = vmul.f32 0.015625, %v2036_v36 }
 0x1bd   : > { %v2061_v44 = vmul.f32 0.015625, %v2058_v41  ;;  %v2062_v46 = vmul.f32 %v2060_v43, %v2060_v43  ;;  %v2084_v20 = vsub.f32 %v3807_v9, %v2060_v43  ;;  %v2085_v47 = vsub.f32 %v3809_v14, %v2060_v43 }
 0x1be   : > { %v2086_v48 = vsub.f32 %v3817_v24, %v2060_v43  ;;  %v2087_v57 = vsub.f32 %v3822_v62, %v2060_v43  ;;  %v2088_v59 = vsub.f32 %v3828_v50, %v2060_v43  ;;  %v2089_v60 = vsub.f32 %v3836_v7, %v2060_v43 }
 0x1bf   : > { %v2063_v45 = vsub.f32 %v2061_v44, %v2062_v46  ;;  %v2090_v10 = vsub.f32 %v2012_v53, %v2060_v43  ;;  %v2091_v0 = vsub.f32 %v2014_v26, %v2060_v43 }
 0x1c1   : > { %v2064_v58 = vmax.f32 %v2063_v45, 0.0 }
 0x1c3   : > { %v2065_v61 = vadd.f32 1e-05, %v2064_v58 }
 0x1c5   : > { %3199 = vrsqrt.f32 %v2065_v61  ;;  %vm2072_vm1 = vweird.f32 %v2065_v61 }
 0x1cb   : > { %v3200_v5 = vpop.eup %3199 }
 0x1cc   : > { %v2067_v1 = vmul.f32 %v3200_v5, %v2065_v61  ;;  %vm2073_vm0 = vweird.f32 %v3200_v5 }
 0x1cd   : > { %vm2074_vm2 = vmor %vm2072_vm1, %vm2073_vm0 }
 0x1ce   : > { %v2068_v2 = vmul.f32 %v3200_v5, %v2067_v1 }
 0x1d0   : > { %v2069_v9 = vmul.f32 0.5, %v2068_v2 }
 0x1d2   : > { %v2070_v4 = vsub.f32 1.5, %v2069_v9 }
 0x1d4   : > { %v2071_v14 = vmul.f32 %v3200_v5, %v2070_v4 }
 0x1d6   : > { %v2075_v24 = vsel %vm2074_vm2, %v3200_v5, %v2071_v14 }
 0x1d7   : > { %v2092_v62 = vmul.f32 %v2084_v20, %v2075_v24  ;;  %v2093_v50 = vmul.f32 %v2085_v47, %v2075_v24  ;;  %v2094_v6 = vmul.f32 %v2086_v48, %v2075_v24  ;;  %v2095_v49 = vmul.f32 %v2087_v57, %v2075_v24 }
 0x1d8   : > { %v2096_v7 = vmul.f32 %v2088_v59, %v2075_v24  ;;  %v2097_v51 = vmul.f32 %v2089_v60, %v2075_v24  ;;  %v2098_v52 = vmul.f32 %v2090_v10, %v2075_v24  ;;  %v2099_v8 = vmul.f32 %v2091_v0, %v2075_v24 }
 0x1d9   : > { %vm2100_vm3 = vcmp.ge.f32.partialorder %v2092_v62, 0.0  ;;  %vm2101_vm4 = vcmp.ge.f32.partialorder %v2093_v50, 0.0  ;;  %vm2102_vm5 = vcmp.ge.f32.partialorder %v2094_v6, 0.0  ;;  %vm2103_vm6 = vcmp.ge.f32.partialorder %v2095_v49, 0.0 }
 0x1da   : > { %vm2104_vm7 = vcmp.ge.f32.partialorder %v2096_v7, 0.0  ;;  %vm2105_vm8 = vcmp.ge.f32.partialorder %v2097_v51, 0.0  ;;  %vm2106_vm9 = vcmp.ge.f32.partialorder %v2098_v52, 0.0  ;;  %vm2107_vm10 = vcmp.ge.f32.partialorder %v2099_v8, 0.0 }
 0x1db   : > { %v2108_v11 = vmul.f32 0.2, %v2092_v62  ;;  %v2109_v3 = vmul.f32 0.2, %v2093_v50  ;;  %v2110_v28 = vmul.f32 0.2, %v2094_v6 }
 0x1dc   : > { %v2111_v25 = vmul.f32 0.2, %v2095_v49  ;;  %v2112_v13 = vmul.f32 0.2, %v2096_v7  ;;  %v2113_v15 = vmul.f32 0.2, %v2097_v51 }
 0x1dd   : > { %v2114_v63 = vmul.f32 0.2, %v2098_v52  ;;  %v2115_v12 = vmul.f32 0.2, %v2099_v8  ;;  %v2116_v16 = vsel %vm2100_vm3, %v2092_v62, %v2108_v11  ;;  %v2117_v53 = vsel %vm2101_vm4, %v2093_v50, %v2109_v3 }
 0x1de   : > { %v2118_v17 = vsel %vm2102_vm5, %v2094_v6, %v2110_v28  ;;  %v2119_v18 = vsel %vm2103_vm6, %v2095_v49, %v2111_v25  ;;  %v2120_v34 = vsel %vm2104_vm7, %v2096_v7, %v2112_v13  ;;  %v2121_v32 = vsel %vm2105_vm8, %v2097_v51, %v2113_v15 }
 0x1df   : > { %v2122_v19 = vsel %vm2106_vm9, %v2098_v52, %v2114_v63  ;;  %v2123_v55 = vsel %vm2107_vm10, %v2099_v8, %v2115_v12  ;;  %v3171_v21 = vpack.c.bf16 %v2117_v53, %v2116_v16  ;;  %v3176_v22 = vpack.c.bf16 %v2119_v18, %v2118_v17 }
 0x1e0   : > { %v3181_v23 = vpack.c.bf16 %v2121_v32, %v2120_v34  ;;  %v3186_v26 = vpack.c.bf16 %v2123_v55, %v2122_v19 }
 0x1e1   : > { %3172 = vst [vmem:[%s143_s10] sm:$0xff] %v3171_v21  }
 0x1e2   : > { %3188 = vst [vmem:[%s143_s10 + $0x8] sm:$0xff] %v3176_v22  }
 0x1e3   : > { %3189 = vst [vmem:[%s143_s10 + $0x10] sm:$0xff] %v3181_v23  }
 0x1e4   : > { %3190 = vst [vmem:[%s143_s10 + $0x18] sm:$0xff] %v3186_v26  }
 0x1e5 PF: > { %s12_s9 = sadd.s32 1, %s3207_s9  }
 0x1e6   : > { %p9_p4 = scmp.ge.s32.totalorder %s12_s9, 4  }
 0x1e8   :  { %11 = sbr.rel (!%p9_p4) target bundleno = 1 (0x1), region = 58 }

// kernel: _lambda_.9
= control target key start
LH: loop header
LB: loop body
LE: loop exit
PB: predicated region body
PF: predicated region fallthrough
CT: control target
= control target key end

     0   :  { %s2350_s1 = inlined_call_operand.vmem [shape: bf16[2048,128], index: 1, kind: input, shape index: {}]   ;;  %s2351_s0 = inlined_call_operand.vmem [shape: bf16[2,2048], index: 0, kind: input, shape index: {}]   ;;  %s2352_s2 = inlined_call_operand.vmem [shape: f32[1,128], index: 2, kind: input, shape index: {}]   ;;  %s2353_s3 = inlined_call_operand.vmem [shape: f32[2,128], index: 3, kind: output, shape index: {}]  }
   0x1   :  { %v1812_v0 = vld [vmem:[%s2350_s1 + $0x38] sm:$0xff]  ;;  %v1811_v4 = vld [vmem:[%s2350_s1 + $0x30] sm:$0xff]  ;;  %v1810_v8 = vld [vmem:[%s2350_s1 + $0x28] sm:$0xff] }
   0x2   :  { %v1820_v1 = vld [vmem:[%s2350_s1 + $0x78] sm:$0xff]  ;;  %1080 = vmatpush.bf16.msra.mxu0 %v1812_v0  ;;  %v1819_v5 = vld [vmem:[%s2350_s1 + $0x70] sm:$0xff]  ;;  %v1818_v9 = vld [vmem:[%s2350_s1 + $0x68] sm:$0xff] }
   0x3   :  { %v1828_v2 = vld [vmem:[%s2350_s1 + $0xb8] sm:$0xff]  ;;  %1093 = vmatpush.bf16.msra.mxu1 %v1820_v1  ;;  %v1827_v6 = vld [vmem:[%s2350_s1 + $0xb0] sm:$0xff]  ;;  %v1826_v10 = vld [vmem:[%s2350_s1 + $0xa8] sm:$0xff] }
   0x4   :  { %v1836_v3 = vld [vmem:[%s2350_s1 + $0xf8] sm:$0xff]  ;;  %1106 = vmatpush.bf16.msra.mxu2 %v1828_v2  ;;  %v1835_v7 = vld [vmem:[%s2350_s1 + $0xf0] sm:$0xff]  ;;  %v1834_v11 = vld [vmem:[%s2350_s1 + $0xe8] sm:$0xff] }
   0x5   :  { %1119 = vmatpush.bf16.msra.mxu3 %v1836_v3  ;;  %v1809_v12 = vld [vmem:[%s2350_s1 + $0x20] sm:$0xff]  ;;  %v1808_v16 = vld [vmem:[%s2350_s1 + $0x18] sm:$0xff]  ;;  %v1807_v21 = vld [vmem:[%s2350_s1 + $0x10] sm:$0xff] }
   0x6   :  { %1081 = vmatpush.bf16.msra.mxu0 %v1811_v4  ;;  %v1817_v13 = vld [vmem:[%s2350_s1 + $0x60] sm:$0xff]  ;;  %v1816_v17 = vld [vmem:[%s2350_s1 + $0x58] sm:$0xff]  ;;  %v1815_v22 = vld [vmem:[%s2350_s1 + $0x50] sm:$0xff] }
   0x7   :  { %1094 = vmatpush.bf16.msra.mxu1 %v1819_v5  ;;  %v1825_v14 = vld [vmem:[%s2350_s1 + $0xa0] sm:$0xff]  ;;  %v1824_v18 = vld [vmem:[%s2350_s1 + $0x98] sm:$0xff]  ;;  %v1823_v23 = vld [vmem:[%s2350_s1 + $0x90] sm:$0xff] }
   0x8   :  { %1107 = vmatpush.bf16.msra.mxu2 %v1827_v6  ;;  %v1833_v15 = vld [vmem:[%s2350_s1 + $0xe0] sm:$0xff]  ;;  %v1832_v19 = vld [vmem:[%s2350_s1 + $0xd8] sm:$0xff]  ;;  %v1831_v24 = vld [vmem:[%s2350_s1 + $0xd0] sm:$0xff] }
   0x9   :  { %1120 = vmatpush.bf16.msra.mxu3 %v1835_v7  ;;  %v14_v20 = vld [vmem:[%s2351_s0] sm:$0xff]  ;;  %v1806_v25 = vld [vmem:[%s2350_s1 + $0x8] sm:$0xff]  ;;  %v1844_v33 = vld [vmem:[%s2350_s1 + $0x138] sm:$0xff] }
   0xa   :  { %1082 = vmatpush.bf16.msra.mxu0 %v1810_v8  ;;  %277 = vst [vmem:[#allocation1] ss:$9 sm:$0xff] %v14_v20  ;;  %v1814_v26 = vld [vmem:[%s2350_s1 + $0x48] sm:$0xff]  ;;  %v1805_v29 = vld [vmem:[%s2350_s1] sm:$0xff]  ;;  %v1852_v34 = vld [vmem:[%s2350_s1 + $0x178] sm:$0xff] }
   0xb   :  { %1095 = vmatpush.bf16.msra.mxu1 %v1818_v9  ;;  %v1822_v27 = vld [vmem:[%s2350_s1 + $0x88] sm:$0xff]  ;;  %v1813_v30 = vld [vmem:[%s2350_s1 + $0x40] sm:$0xff]  ;;  %v1860_v35 = vld [vmem:[%s2350_s1 + $0x1b8] sm:$0xff] }
   0xc   :  { %1108 = vmatpush.bf16.msra.mxu2 %v1826_v10  ;;  %v1830_v28 = vld [vmem:[%s2350_s1 + $0xc8] sm:$0xff]  ;;  %v1821_v31 = vld [vmem:[%s2350_s1 + $0x80] sm:$0xff]  ;;  %v1868_v36 = vld [vmem:[%s2350_s1 + $0x1f8] sm:$0xff] }
   0xd   :  { %1121 = vmatpush.bf16.msra.mxu3 %v1834_v11  ;;  %v1829_v32 = vld [vmem:[%s2350_s1 + $0xc0] sm:$0xff]  ;;  %v1843_v37 = vld [vmem:[%s2350_s1 + $0x130] sm:$0xff]  ;;  %v1842_v45 = vld [vmem:[%s2350_s1 + $0x128] sm:$0xff] }
   0xe   :  { %1083 = vmatpush.bf16.msra.mxu0 %v1809_v12  ;;  %v1851_v40 = vld [vmem:[%s2350_s1 + $0x170] sm:$0xff]  ;;  %v1850_v46 = vld [vmem:[%s2350_s1 + $0x168] sm:$0xff]  ;;  %v1841_v54 = vld [vmem:[%s2350_s1 + $0x120] sm:$0xff] }
   0xf   :  { %1096 = vmatpush.bf16.msra.mxu1 %v1817_v13  ;;  %v1859_v43 = vld [vmem:[%s2350_s1 + $0x1b0] sm:$0xff]  ;;  %v1858_v47 = vld [vmem:[%s2350_s1 + $0x1a8] sm:$0xff]  ;;  %v1849_v55 = vld [vmem:[%s2350_s1 + $0x160] sm:$0xff] }
  0x10   :  { %1109 = vmatpush.bf16.msra.mxu2 %v1825_v14  ;;  %v1867_v44 = vld [vmem:[%s2350_s1 + $0x1f0] sm:$0xff]  ;;  %v1866_v48 = vld [vmem:[%s2350_s1 + $0x1e8] sm:$0xff]  ;;  %v1857_v56 = vld [vmem:[%s2350_s1 + $0x1a0] sm:$0xff] }
  0x11   :  { %1122 = vmatpush.bf16.msra.mxu3 %v1833_v15  ;;  %v280_v38 = vld [vmem:[#allocation1 + $0x12] sm:$0xff]  ;;  %v278_v39 = vld [vmem:[#allocation1] sm:$0xff]  ;;  %v279_v42 = vld [vmem:[#allocation1 + $0x9] sm:$0xff] }
  0x12   :  { %1084 = vmatpush.bf16.msra.mxu0 %v1808_v16  ;;  %v281_v41 = vld [vmem:[#allocation1 + $0x1b] sm:$0xff]  ;;  %v15_v49 = vld [vmem:[%s2351_s0 + $0x8] sm:$0xff]  ;;  %v1839_v62 = vld [vmem:[%s2350_s1 + $0x110] sm:$0xff] }
  0x13   :  { %1097 = vmatpush.bf16.msra.mxu1 %v1816_v17  ;;  %v284_v50 = vld [vmem:[#allocation1 + $0x36] sm:$0xff]  ;;  %v282_v51 = vld [vmem:[#allocation1 + $0x24] sm:$0xff]  ;;  %v283_v53 = vld [vmem:[#allocation1 + $0x2d] sm:$0xff] }
  0x14   :  { %1110 = vmatpush.bf16.msra.mxu2 %v1824_v18  ;;  %v285_v52 = vld [vmem:[#allocation1 + $0x3f] sm:$0xff]  ;;  %v1847_v63 = vld [vmem:[%s2350_s1 + $0x150] sm:$0xff]  ;;  %v1838_v2 = vld [vmem:[%s2350_s1 + $0x108] sm:$0xff] }
  0x15   :  { %1123 = vmatpush.bf16.msra.mxu3 %v1832_v19  ;;  %287 = vst [vmem:[#allocation1] ss:$9 sm:$0xff] %v15_v49  ;;  %v1865_v57 = vld [vmem:[%s2350_s1 + $0x1e0] sm:$0xff]  ;;  %v1840_v58 = vld [vmem:[%s2350_s1 + $0x118] sm:$0xff]  ;;  %v1855_v0 = vld [vmem:[%s2350_s1 + $0x190] sm:$0xff] }
  0x16   :  { %1085 = vmatpush.bf16.msra.mxu0 %v1807_v21  ;;  %v1848_v59 = vld [vmem:[%s2350_s1 + $0x158] sm:$0xff]  ;;  %v1863_v1 = vld [vmem:[%s2350_s1 + $0x1d0] sm:$0xff]  ;;  %v1846_v3 = vld [vmem:[%s2350_s1 + $0x148] sm:$0xff] }
  0x17   :  { %1098 = vmatpush.bf16.msra.mxu1 %v1815_v22  ;;  %v1856_v60 = vld [vmem:[%s2350_s1 + $0x198] sm:$0xff]  ;;  %v1854_v4 = vld [vmem:[%s2350_s1 + $0x188] sm:$0xff]  ;;  %v1837_v6 = vld [vmem:[%s2350_s1 + $0x100] sm:$0xff] }
  0x18   :  { %1111 = vmatpush.bf16.msra.mxu2 %v1823_v23  ;;  %v1864_v61 = vld [vmem:[%s2350_s1 + $0x1d8] sm:$0xff]  ;;  %v1862_v5 = vld [vmem:[%s2350_s1 + $0x1c8] sm:$0xff]  ;;  %v1845_v7 = vld [vmem:[%s2350_s1 + $0x140] sm:$0xff] }
  0x19   :  { %1124 = vmatpush.bf16.msra.mxu3 %v1831_v24  ;;  %v1853_v8 = vld [vmem:[%s2350_s1 + $0x180] sm:$0xff]  ;;  %v1876_v10 = vld [vmem:[%s2350_s1 + $0x238] sm:$0xff]  ;;  %v1875_v14 = vld [vmem:[%s2350_s1 + $0x230] sm:$0xff] }
  0x1a   :  { %1086 = vmatpush.bf16.msra.mxu0 %v1806_v25  ;;  %v1861_v9 = vld [vmem:[%s2350_s1 + $0x1c0] sm:$0xff]  ;;  %v1884_v11 = vld [vmem:[%s2350_s1 + $0x278] sm:$0xff]  ;;  %v1883_v15 = vld [vmem:[%s2350_s1 + $0x270] sm:$0xff] }
  0x1b   :  { %1099 = vmatpush.bf16.msra.mxu1 %v1814_v26  ;;  %v1892_v12 = vld [vmem:[%s2350_s1 + $0x2b8] sm:$0xff]  ;;  %v1891_v16 = vld [vmem:[%s2350_s1 + $0x2b0] sm:$0xff]  ;;  %v1874_v18 = vld [vmem:[%s2350_s1 + $0x228] sm:$0xff] }
  0x1c   :  { %1112 = vmatpush.bf16.msra.mxu2 %v1822_v27  ;;  %v1900_v13 = vld [vmem:[%s2350_s1 + $0x2f8] sm:$0xff]  ;;  %v1899_v17 = vld [vmem:[%s2350_s1 + $0x2f0] sm:$0xff]  ;;  %v1882_v19 = vld [vmem:[%s2350_s1 + $0x268] sm:$0xff] }
  0x1d   :  { %1125 = vmatpush.bf16.msra.mxu3 %v1830_v28  ;;  %v1890_v20 = vld [vmem:[%s2350_s1 + $0x2a8] sm:$0xff]  ;;  %v1873_v22 = vld [vmem:[%s2350_s1 + $0x220] sm:$0xff]  ;;  %v1872_v26 = vld [vmem:[%s2350_s1 + $0x218] sm:$0xff] }
  0x1e   :  { %1087 = vmatpush.bf16.msra.mxu0 %v1805_v29  ;;  %v1898_v21 = vld [vmem:[%s2350_s1 + $0x2e8] sm:$0xff]  ;;  %v1881_v23 = vld [vmem:[%s2350_s1 + $0x260] sm:$0xff]  ;;  %v1880_v27 = vld [vmem:[%s2350_s1 + $0x258] sm:$0xff] }
  0x1f   :  { %1100 = vmatpush.bf16.msra.mxu1 %v1813_v30  ;;  %v1889_v24 = vld [vmem:[%s2350_s1 + $0x2a0] sm:$0xff]  ;;  %v1888_v28 = vld [vmem:[%s2350_s1 + $0x298] sm:$0xff]  ;;  %v1871_v30 = vld [vmem:[%s2350_s1 + $0x210] sm:$0xff] }
  0x20   :  { %1113 = vmatpush.bf16.msra.mxu2 %v1821_v31  ;;  %v1897_v25 = vld [vmem:[%s2350_s1 + $0x2e0] sm:$0xff]  ;;  %v1896_v29 = vld [vmem:[%s2350_s1 + $0x2d8] sm:$0xff]  ;;  %v1879_v31 = vld [vmem:[%s2350_s1 + $0x250] sm:$0xff] }
  0x21   :  { %1126 = vmatpush.bf16.msra.mxu3 %v1829_v32  ;;  %1088 = vmatmul.bf16.vlgmr.msra.gmra.mxu0 %v278_v39  ;;  %v1887_v32 = vld [vmem:[%s2350_s1 + $0x290] sm:$0xff]  ;;  %v1877_v39 = vld [vmem:[%s2350_s1 + $0x240] sm:$0xff] }
  0x22   :  { %1132 = vmatpush.bf16.msrb.mxu0 %v1844_v33  ;;  %1101 = vmatmul.bf16.vlgmr.msra.gmra.mxu1 %v279_v42  ;;  %v1895_v33 = vld [vmem:[%s2350_s1 + $0x2d0] sm:$0xff]  ;;  %v1908_v42 = vld [vmem:[%s2350_s1 + $0x338] sm:$0xff] }
  0x23   :  { %1145 = vmatpush.bf16.msrb.mxu1 %v1852_v34  ;;  %1114 = vmatmul.bf16.vlgmr.msra.gmra.mxu2 %v280_v38  ;;  %v1870_v34 = vld [vmem:[%s2350_s1 + $0x208] sm:$0xff]  ;;  %v1869_v38 = vld [vmem:[%s2350_s1 + $0x200] sm:$0xff] }
  0x24   :  { %1158 = vmatpush.bf16.msrb.mxu2 %v1860_v35  ;;  %1127 = vmatmul.bf16.vlgmr.msra.gmra.mxu3 %v281_v41  ;;  %v1878_v35 = vld [vmem:[%s2350_s1 + $0x248] sm:$0xff]  ;;  %v1893_v41 = vld [vmem:[%s2350_s1 + $0x2c0] sm:$0xff] }
  0x25   :  { %1171 = vmatpush.bf16.msrb.mxu3 %v1868_v36  ;;  %v1886_v36 = vld [vmem:[%s2350_s1 + $0x288] sm:$0xff]  ;;  %v291_v49 = vld [vmem:[#allocation1 + $0x1b] sm:$0xff] }
  0x26   :  { %1133 = vmatpush.bf16.msrb.mxu0 %v1843_v37  ;;  %v1894_v37 = vld [vmem:[%s2350_s1 + $0x2c8] sm:$0xff] }
  0x27   :  { %1146 = vmatpush.bf16.msrb.mxu1 %v1851_v40  ;;  %v1885_v40 = vld [vmem:[%s2350_s1 + $0x280] sm:$0xff] }
  0x28   :  { %1159 = vmatpush.bf16.msrb.mxu2 %v1859_v43  ;;  %v1916_v43 = vld [vmem:[%s2350_s1 + $0x378] sm:$0xff] }
  0x29   :  { %1172 = vmatpush.bf16.msrb.mxu3 %v1867_v44  ;;  %v1924_v44 = vld [vmem:[%s2350_s1 + $0x3b8] sm:$0xff] }
  0x2a   :  { %1134 = vmatpush.bf16.msrb.mxu0 %v1842_v45  ;;  %v1932_v45 = vld [vmem:[%s2350_s1 + $0x3f8] sm:$0xff] }
  0x2b   :  { %1147 = vmatpush.bf16.msrb.mxu1 %v1850_v46  ;;  %v288_v46 = vld [vmem:[#allocation1] sm:$0xff] }
  0x2c   :  { %1160 = vmatpush.bf16.msrb.mxu2 %v1858_v47  ;;  %v290_v47 = vld [vmem:[#allocation1 + $0x12] sm:$0xff] }
  0x2d   :  { %1173 = vmatpush.bf16.msrb.mxu3 %v1866_v48  ;;  %v289_v48 = vld [vmem:[#allocation1 + $0x9] sm:$0xff] }
  0x2e   :  { %1135 = vmatpush.bf16.msrb.mxu0 %v1841_v54  ;;  %v1906_v54 = vld [vmem:[%s2350_s1 + $0x328] sm:$0xff] }
  0x2f   :  { %1148 = vmatpush.bf16.msrb.mxu1 %v1849_v55  ;;  %v1914_v55 = vld [vmem:[%s2350_s1 + $0x368] sm:$0xff] }
  0x30   :  { %1161 = vmatpush.bf16.msrb.mxu2 %v1857_v56  ;;  %v1922_v56 = vld [vmem:[%s2350_s1 + $0x3a8] sm:$0xff] }
  0x31   :  { %1174 = vmatpush.bf16.msrb.mxu3 %v1865_v57  ;;  %v1930_v57 = vld [vmem:[%s2350_s1 + $0x3e8] sm:$0xff] }
  0x32   :  { %1136 = vmatpush.bf16.msrb.mxu0 %v1840_v58  ;;  %v1905_v58 = vld [vmem:[%s2350_s1 + $0x320] sm:$0xff] }
  0x33   :  { %1149 = vmatpush.bf16.msrb.mxu1 %v1848_v59  ;;  %v1913_v59 = vld [vmem:[%s2350_s1 + $0x360] sm:$0xff] }
  0x34   :  { %1162 = vmatpush.bf16.msrb.mxu2 %v1856_v60  ;;  %v1921_v60 = vld [vmem:[%s2350_s1 + $0x3a0] sm:$0xff] }
  0x35   :  { %1175 = vmatpush.bf16.msrb.mxu3 %v1864_v61  ;;  %v1929_v61 = vld [vmem:[%s2350_s1 + $0x3e0] sm:$0xff] }
  0x36   :  { %1137 = vmatpush.bf16.msrb.mxu0 %v1839_v62  ;;  %v1904_v62 = vld [vmem:[%s2350_s1 + $0x318] sm:$0xff] }
  0x37   :  { %1150 = vmatpush.bf16.msrb.mxu1 %v1847_v63  ;;  %v1912_v63 = vld [vmem:[%s2350_s1 + $0x358] sm:$0xff] }
  0x38   :  { %1163 = vmatpush.bf16.msrb.mxu2 %v1855_v0  ;;  %v1920_v0 = vld [vmem:[%s2350_s1 + $0x398] sm:$0xff] }
  0x39   :  { %1176 = vmatpush.bf16.msrb.mxu3 %v1863_v1  ;;  %v1928_v1 = vld [vmem:[%s2350_s1 + $0x3d8] sm:$0xff] }
  0x3a   :  { %1138 = vmatpush.bf16.msrb.mxu0 %v1838_v2  ;;  %v1903_v2 = vld [vmem:[%s2350_s1 + $0x310] sm:$0xff] }
  0x3b   :  { %1151 = vmatpush.bf16.msrb.mxu1 %v1846_v3  ;;  %v1911_v3 = vld [vmem:[%s2350_s1 + $0x350] sm:$0xff] }
  0x3c   :  { %1164 = vmatpush.bf16.msrb.mxu2 %v1854_v4  ;;  %v1919_v4 = vld [vmem:[%s2350_s1 + $0x390] sm:$0xff] }
  0x3d   :  { %1177 = vmatpush.bf16.msrb.mxu3 %v1862_v5  ;;  %v1927_v5 = vld [vmem:[%s2350_s1 + $0x3d0] sm:$0xff] }
  0x3e   :  { %1139 = vmatpush.bf16.msrb.mxu0 %v1837_v6  ;;  %v1902_v6 = vld [vmem:[%s2350_s1 + $0x308] sm:$0xff] }
  0x3f   :  { %1152 = vmatpush.bf16.msrb.mxu1 %v1845_v7  ;;  %v1910_v7 = vld [vmem:[%s2350_s1 + $0x348] sm:$0xff] }
  0x40   :  { %1165 = vmatpush.bf16.msrb.mxu2 %v1853_v8  ;;  %v1918_v8 = vld [vmem:[%s2350_s1 + $0x388] sm:$0xff] }
  0x41   :  { %1178 = vmatpush.bf16.msrb.mxu3 %v1861_v9  ;;  %1140 = vmatmul.bf16.vlgmr.msrb.gmra.mxu0 %v282_v51  ;;  %v1915_v51 = vld [vmem:[%s2350_s1 + $0x370] sm:$0xff]  ;;  %v1926_v9 = vld [vmem:[%s2350_s1 + $0x3c8] sm:$0xff] }
  0x42   :  { %1184 = vmatpush.bf16.msra.mxu0 %v1876_v10  ;;  %1153 = vmatmul.bf16.vlgmr.msrb.gmra.mxu1 %v283_v53  ;;  %v1931_v53 = vld [vmem:[%s2350_s1 + $0x3f0] sm:$0xff]  ;;  %v1901_v10 = vld [vmem:[%s2350_s1 + $0x300] sm:$0xff] }
  0x43   :  { %1197 = vmatpush.bf16.msra.mxu1 %v1884_v11  ;;  %1166 = vmatmul.bf16.vlgmr.msrb.gmra.mxu2 %v284_v50  ;;  %v1907_v50 = vld [vmem:[%s2350_s1 + $0x330] sm:$0xff]  ;;  %v1909_v11 = vld [vmem:[%s2350_s1 + $0x340] sm:$0xff] }
  0x44   :  { %1210 = vmatpush.bf16.msra.mxu2 %v1892_v12  ;;  %1179 = vmatmul.bf16.vlgmr.msrb.gmra.mxu3 %v285_v52  ;;  %v1923_v52 = vld [vmem:[%s2350_s1 + $0x3b0] sm:$0xff]  ;;  %v1917_v12 = vld [vmem:[%s2350_s1 + $0x380] sm:$0xff] }
  0x45   :  { %1223 = vmatpush.bf16.msra.mxu3 %v1900_v13  ;;  %v1925_v13 = vld [vmem:[%s2350_s1 + $0x3c0] sm:$0xff] }
  0x46   :  { %1185 = vmatpush.bf16.msra.mxu0 %v1875_v14  ;;  %v292_v14 = vld [vmem:[#allocation1 + $0x24] sm:$0xff] }
  0x47   :  { %1198 = vmatpush.bf16.msra.mxu1 %v1883_v15  ;;  %v293_v15 = vld [vmem:[#allocation1 + $0x2d] sm:$0xff] }
  0x48   :  { %1211 = vmatpush.bf16.msra.mxu2 %v1891_v16  ;;  %v294_v16 = vld [vmem:[#allocation1 + $0x36] sm:$0xff] }
  0x49   :  { %1224 = vmatpush.bf16.msra.mxu3 %v1899_v17  ;;  %v295_v17 = vld [vmem:[#allocation1 + $0x3f] sm:$0xff] }
  0x4a   :  { %1186 = vmatpush.bf16.msra.mxu0 %v1874_v18  ;;  %v1933_v18 = vld [vmem:[%s2352_s2] ss:$0 sm:$0xff] }
  0x4b   :  { %1199 = vmatpush.bf16.msra.mxu1 %v1882_v19 }
  0x4c   :  { %1212 = vmatpush.bf16.msra.mxu2 %v1890_v20 }
  0x4d   :  { %1225 = vmatpush.bf16.msra.mxu3 %v1898_v21 }
  0x4e   :  { %1187 = vmatpush.bf16.msra.mxu0 %v1873_v22 }
  0x4f   :  { %1200 = vmatpush.bf16.msra.mxu1 %v1881_v23 }
  0x50   :  { %1213 = vmatpush.bf16.msra.mxu2 %v1889_v24 }
  0x51   :  { %1226 = vmatpush.bf16.msra.mxu3 %v1897_v25 }
  0x52   :  { %1188 = vmatpush.bf16.msra.mxu0 %v1872_v26 }
  0x53   :  { %1201 = vmatpush.bf16.msra.mxu1 %v1880_v27 }
  0x54   :  { %1214 = vmatpush.bf16.msra.mxu2 %v1888_v28 }
  0x55   :  { %1227 = vmatpush.bf16.msra.mxu3 %v1896_v29 }
  0x56   :  { %1189 = vmatpush.bf16.msra.mxu0 %v1871_v30 }
  0x57   :  { %1202 = vmatpush.bf16.msra.mxu1 %v1879_v31 }
  0x58   :  { %1215 = vmatpush.bf16.msra.mxu2 %v1887_v32 }
  0x59   :  { %1228 = vmatpush.bf16.msra.mxu3 %v1895_v33 }
  0x5a   :  { %1190 = vmatpush.bf16.msra.mxu0 %v1870_v34 }
  0x5b   :  { %1203 = vmatpush.bf16.msra.mxu1 %v1878_v35 }
  0x5c   :  { %1216 = vmatpush.bf16.msra.mxu2 %v1886_v36 }
  0x5d   :  { %1229 = vmatpush.bf16.msra.mxu3 %v1894_v37 }
  0x5e   :  { %1191 = vmatpush.bf16.msra.mxu0 %v1869_v38 }
  0x5f   :  { %1204 = vmatpush.bf16.msra.mxu1 %v1877_v39 }
  0x60   :  { %1217 = vmatpush.bf16.msra.mxu2 %v1885_v40 }
  0x61   :  { %1230 = vmatpush.bf16.msra.mxu3 %v1893_v41  ;;  %1192 = vmatmul.bf16.vlgmr.msra.gmra.mxu0 %v288_v46 }
  0x62   :  { %1236 = vmatpush.bf16.msrb.mxu0 %v1908_v42  ;;  %1205 = vmatmul.bf16.vlgmr.msra.gmra.mxu1 %v289_v48 }
  0x63   :  { %1249 = vmatpush.bf16.msrb.mxu1 %v1916_v43  ;;  %1218 = vmatmul.bf16.vlgmr.msra.gmra.mxu2 %v290_v47 }
  0x64   :  { %1262 = vmatpush.bf16.msrb.mxu2 %v1924_v44  ;;  %1231 = vmatmul.bf16.vlgmr.msra.gmra.mxu3 %v291_v49 }
  0x65   :  { %1275 = vmatpush.bf16.msrb.mxu3 %v1932_v45 }
  0x66   :  { %1237 = vmatpush.bf16.msrb.mxu0 %v1907_v50 }
  0x67   :  { %1250 = vmatpush.bf16.msrb.mxu1 %v1915_v51 }
  0x68   :  { %1263 = vmatpush.bf16.msrb.mxu2 %v1923_v52 }
  0x69   :  { %1276 = vmatpush.bf16.msrb.mxu3 %v1931_v53 }
  0x6a   :  { %1238 = vmatpush.bf16.msrb.mxu0 %v1906_v54 }
  0x6b   :  { %1251 = vmatpush.bf16.msrb.mxu1 %v1914_v55 }
  0x6c   :  { %1264 = vmatpush.bf16.msrb.mxu2 %v1922_v56 }
  0x6d   :  { %1277 = vmatpush.bf16.msrb.mxu3 %v1930_v57 }
  0x6e   :  { %1239 = vmatpush.bf16.msrb.mxu0 %v1905_v58 }
  0x6f   :  { %1252 = vmatpush.bf16.msrb.mxu1 %v1913_v59 }
  0x70   :  { %1265 = vmatpush.bf16.msrb.mxu2 %v1921_v60 }
  0x71   :  { %1278 = vmatpush.bf16.msrb.mxu3 %v1929_v61 }
  0x72   :  { %1240 = vmatpush.bf16.msrb.mxu0 %v1904_v62 }
  0x73   :  { %1253 = vmatpush.bf16.msrb.mxu1 %v1912_v63 }
  0x74   :  { %1266 = vmatpush.bf16.msrb.mxu2 %v1920_v0 }
  0x75   :  { %1279 = vmatpush.bf16.msrb.mxu3 %v1928_v1 }
  0x76   :  { %1241 = vmatpush.bf16.msrb.mxu0 %v1903_v2 }
  0x77   :  { %1254 = vmatpush.bf16.msrb.mxu1 %v1911_v3 }
  0x78   :  { %1267 = vmatpush.bf16.msrb.mxu2 %v1919_v4 }
  0x79   :  { %1280 = vmatpush.bf16.msrb.mxu3 %v1927_v5 }
  0x7a   :  { %1242 = vmatpush.bf16.msrb.mxu0 %v1902_v6 }
  0x7b   :  { %1255 = vmatpush.bf16.msrb.mxu1 %v1910_v7 }
  0x7c   :  { %1268 = vmatpush.bf16.msrb.mxu2 %v1918_v8 }
  0x7d   :  { %1281 = vmatpush.bf16.msrb.mxu3 %v1926_v9 }
  0x7e   :  { %1243 = vmatpush.bf16.msrb.mxu0 %v1901_v10 }
  0x7f   :  { %1256 = vmatpush.bf16.msrb.mxu1 %v1909_v11 }
  0x80   :  { %1269 = vmatpush.bf16.msrb.mxu2 %v1917_v12 }
  0x81   :  { %1282 = vmatpush.bf16.msrb.mxu3 %v1925_v13  ;;  %1244 = vmatmul.bf16.vlgmr.msrb.gmra.mxu0 %v292_v14 }
  0x82   :  { %1257 = vmatmul.bf16.vlgmr.msrb.gmra.mxu1 %v293_v15 }
  0x83   :  { %1270 = vmatmul.bf16.vlgmr.msrb.gmra.mxu2 %v294_v16 }
  0x84   :  { %1283 = vmatmul.bf16.vlgmr.msrb.gmra.mxu3 %v295_v17 }
  0x9e   :  { %v1089_v19 = vpop.f32.mrf.mxu0 }
  0x9f   :  { %v1090_v20 = vadd.f32 %v1933_v18, %v1089_v19  ;;  %v1102_v21 = vpop.f32.mrf.mxu1 }
  0xa1   :  { %v1103_v22 = vadd.f32 %v1102_v21, %v1090_v20 }
  0xa6   :  { %v1115_v23 = vpop.f32.mrf.mxu2  ;;  %v1091_v26 = vpop.f32.mrf.mxu0 }
  0xa7   :  { %v1116_v24 = vadd.f32 %v1115_v23, %v1103_v22  ;;  %v1128_v25 = vpop.f32.mrf.mxu3  ;;  %v1104_v28 = vpop.f32.mrf.mxu1 }
  0xa9   :  { %v1129_v27 = vadd.f32 %v1128_v25, %v1116_v24 }
  0xae   :  { %v1117_v29 = vpop.f32.mrf.mxu2 }
  0xaf   :  { %v1130_v30 = vpop.f32.mrf.mxu3 }
  0xbe   :  { %v1141_v31 = vpop.f32.mrf.mxu0 }
  0xbf   :  { %v1154_v32 = vpop.f32.mrf.mxu1  ;;  %v1142_v41 = vadd.f32 %v1141_v31, %v1129_v27 }
  0xc1   :  { %v1155_v45 = vadd.f32 %v1154_v32, %v1142_v41 }
  0xc6   :  { %v1167_v33 = vpop.f32.mrf.mxu2  ;;  %v1143_v35 = vpop.f32.mrf.mxu0 }
  0xc7   :  { %v1180_v34 = vpop.f32.mrf.mxu3  ;;  %v1156_v36 = vpop.f32.mrf.mxu1  ;;  %v1168_v47 = vadd.f32 %v1167_v33, %v1155_v45 }
  0xc9   :  { %v1181_v50 = vadd.f32 %v1180_v34, %v1168_v47 }
  0xce   :  { %v1169_v37 = vpop.f32.mrf.mxu2 }
  0xcf   :  { %v1182_v38 = vpop.f32.mrf.mxu3 }
  0xde   :  { %v1193_v39 = vpop.f32.mrf.mxu0 }
  0xdf   :  { %v1206_v40 = vpop.f32.mrf.mxu1  ;;  %v1194_v51 = vadd.f32 %v1193_v39, %v1181_v50 }
  0xe1   :  { %v1207_v52 = vadd.f32 %v1206_v40, %v1194_v51 }
  0xe6   :  { %v1219_v42 = vpop.f32.mrf.mxu2  ;;  %v1195_v44 = vpop.f32.mrf.mxu0 }
  0xe7   :  { %v1232_v43 = vpop.f32.mrf.mxu3  ;;  %v1208_v46 = vpop.f32.mrf.mxu1  ;;  %v1220_v53 = vadd.f32 %v1219_v42, %v1207_v52 }
  0xe9   :  { %v1233_v54 = vadd.f32 %v1232_v43, %v1220_v53 }
  0xee   :  { %v1221_v48 = vpop.f32.mrf.mxu2 }
  0xef   :  { %v1234_v49 = vpop.f32.mrf.mxu3 }
  0xfe   :  { %v1245_v55 = vpop.f32.mrf.mxu0 }
  0xff   :  { %v1258_v56 = vpop.f32.mrf.mxu1  ;;  %v1246_v57 = vadd.f32 %v1245_v55, %v1233_v54 }
 0x101   :  { %v1259_v58 = vadd.f32 %v1258_v56, %v1246_v57 }
 0x106   :  { %v1271_v59 = vpop.f32.mrf.mxu2  ;;  %v1247_v62 = vpop.f32.mrf.mxu0 }
 0x107   :  { %v1284_v60 = vpop.f32.mrf.mxu3  ;;  %v1272_v61 = vadd.f32 %v1271_v59, %v1259_v58  ;;  %v1260_v63 = vpop.f32.mrf.mxu1 }
 0x109   :  { %v1285_v0 = vadd.f32 %v1284_v60, %v1272_v61 }
 0x10b   :  { %1288 = vst [vmem:[%s2353_s3] sm:$0x3] %v1285_v0 }
 0x10e   :  { %v1273_v1 = vpop.f32.mrf.mxu2 }
 0x10f   :  { %v1286_v2 = vpop.f32.mrf.mxu3 }

// kernel: _lambda_.8
= control target key start
LH: loop header
LB: loop body
LE: loop exit
PB: predicated region body
PF: predicated region fallthrough
CT: control target
= control target key end

     0   :  { %s2366_s9 = smov 0   ;;  %s2809_s0 = inlined_call_operand.vmem [shape: bf16[2,16,2048], index: 0, kind: input, shape index: {}]   ;;  %s2810_s1 = inlined_call_operand.vmem [shape: bf16[2048,128], index: 1, kind: input, shape index: {}]   ;;  %s2811_s2 = inlined_call_operand.vmem [shape: bf16[2,16,128], index: 2, kind: output, shape index: {}]  }
   0x1 LB: > { %s1595_s10 = sadd.s32 4294967295, %s2349_s9   ;;  %p1599_p0 = scmp.ge.s32.totalorder %s2349_s9, 1  ;;  %s2349_s9 = sphi %s2366_s9, %s12_s9  }
   0x2   : > { %p112_p1 = scmp.lt.s32.totalorder %s2349_s9, 3 }
   0x4   : > { %p113_p2 = pnand %p1599_p0, %p112_p1 }
   0x5   : > { %p134_p3 = scmp.lt.s32.totalorder (!%p113_p2), %s1595_s10, 1 }
   0x6   : > { %116 = sbr.rel (%p113_p2) target bundleno = 335 (0x14f), region = 28 }
   0xb   : > { %v2207_v0 = vld [vmem:[%s2810_s1 + $0x38] sm:$0xff]  ;;  %v2206_v4 = vld [vmem:[%s2810_s1 + $0x30] sm:$0xff]  ;;  %v2205_v8 = vld [vmem:[%s2810_s1 + $0x28] sm:$0xff]  ;;  %s2813_s10 = smov (!%p134_p3, %s1595_s10), 1 }
   0xc   : > { %v2215_v1 = vld [vmem:[%s2810_s1 + $0x78] sm:$0xff]  ;;  %1264 = vmatpush.bf16.msra.mxu0 %v2207_v0  ;;  %v2214_v5 = vld [vmem:[%s2810_s1 + $0x70] sm:$0xff]  ;;  %v2213_v9 = vld [vmem:[%s2810_s1 + $0x68] sm:$0xff]  ;;  %s2182_s5 = sshll.u32 %s2813_s10, 7 }
   0xd   : > { %v2223_v2 = vld [vmem:[%s2810_s1 + $0xb8] sm:$0xff]  ;;  %1278 = vmatpush.bf16.msra.mxu1 %v2215_v1  ;;  %v2222_v6 = vld [vmem:[%s2810_s1 + $0xb0] sm:$0xff]  ;;  %v2221_v10 = vld [vmem:[%s2810_s1 + $0xa8] sm:$0xff]  ;;  %s2468_s18 = scalar_lea.vmem %s2809_s0, %s2182_s5 }
   0xe   : > { %v2231_v3 = vld [vmem:[%s2810_s1 + $0xf8] sm:$0xff]  ;;  %1292 = vmatpush.bf16.msra.mxu2 %v2223_v2  ;;  %v2230_v7 = vld [vmem:[%s2810_s1 + $0xf0] sm:$0xff]  ;;  %v2229_v11 = vld [vmem:[%s2810_s1 + $0xe8] sm:$0xff] }
   0xf   : > { %1306 = vmatpush.bf16.msra.mxu3 %v2231_v3  ;;  %v2204_v12 = vld [vmem:[%s2810_s1 + $0x20] sm:$0xff]  ;;  %v2203_v16 = vld [vmem:[%s2810_s1 + $0x18] sm:$0xff]  ;;  %v2202_v20 = vld [vmem:[%s2810_s1 + $0x10] sm:$0xff] }
  0x10   : > { %1265 = vmatpush.bf16.msra.mxu0 %v2206_v4  ;;  %v2212_v13 = vld [vmem:[%s2810_s1 + $0x60] sm:$0xff]  ;;  %v2211_v17 = vld [vmem:[%s2810_s1 + $0x58] sm:$0xff]  ;;  %v2210_v21 = vld [vmem:[%s2810_s1 + $0x50] sm:$0xff] }
  0x11   : > { %1279 = vmatpush.bf16.msra.mxu1 %v2214_v5  ;;  %v2220_v14 = vld [vmem:[%s2810_s1 + $0xa0] sm:$0xff]  ;;  %v2219_v18 = vld [vmem:[%s2810_s1 + $0x98] sm:$0xff]  ;;  %v2218_v22 = vld [vmem:[%s2810_s1 + $0x90] sm:$0xff] }
  0x12   : > { %1293 = vmatpush.bf16.msra.mxu2 %v2222_v6  ;;  %v2228_v15 = vld [vmem:[%s2810_s1 + $0xe0] sm:$0xff]  ;;  %v2227_v19 = vld [vmem:[%s2810_s1 + $0xd8] sm:$0xff]  ;;  %v2226_v23 = vld [vmem:[%s2810_s1 + $0xd0] sm:$0xff] }
  0x13   : > { %1307 = vmatpush.bf16.msra.mxu3 %v2230_v7  ;;  %v2201_v24 = vld [vmem:[%s2810_s1 + $0x8] sm:$0xff]  ;;  %v2200_v28 = vld [vmem:[%s2810_s1] sm:$0xff]  ;;  %v2239_v32 = vld [vmem:[%s2810_s1 + $0x138] sm:$0xff] }
  0x14   : > { %1266 = vmatpush.bf16.msra.mxu0 %v2205_v8  ;;  %v2209_v25 = vld [vmem:[%s2810_s1 + $0x48] sm:$0xff]  ;;  %v2208_v29 = vld [vmem:[%s2810_s1 + $0x40] sm:$0xff]  ;;  %v2247_v33 = vld [vmem:[%s2810_s1 + $0x178] sm:$0xff] }
  0x15   : > { %1280 = vmatpush.bf16.msra.mxu1 %v2213_v9  ;;  %v2217_v26 = vld [vmem:[%s2810_s1 + $0x88] sm:$0xff]  ;;  %v2216_v30 = vld [vmem:[%s2810_s1 + $0x80] sm:$0xff]  ;;  %v2255_v42 = vld [vmem:[%s2810_s1 + $0x1b8] sm:$0xff] }
  0x16   : > { %1294 = vmatpush.bf16.msra.mxu2 %v2221_v10  ;;  %v2225_v27 = vld [vmem:[%s2810_s1 + $0xc8] sm:$0xff]  ;;  %v2224_v31 = vld [vmem:[%s2810_s1 + $0xc0] sm:$0xff]  ;;  %v2263_v43 = vld [vmem:[%s2810_s1 + $0x1f8] sm:$0xff] }
  0x17   : > { %1308 = vmatpush.bf16.msra.mxu3 %v2229_v11  ;;  %v1606_v34 = vld [vmem:[%s2468_s18] sm:$0xf]  ;;  %v1614_v36 = vld [vmem:[%s2468_s18 + $0x8] sm:$0xf]  ;;  %v2184_v38 = vld [vmem:[%s2468_s18 + $0x4] sm:$0xf] }
  0x18   : > { %1267 = vmatpush.bf16.msra.mxu0 %v2204_v12  ;;  %v2192_v35 = vld [vmem:[%s2468_s18 + $0x3c] sm:$0xf0]  ;;  %v2193_v37 = vld [vmem:[%s2468_s18 + $0x44] sm:$0xf0]  ;;  %v1608_v39 = vld [vmem:[%s2468_s18 + $0x40] sm:$0xf0] }
  0x19   : > { %1281 = vmatpush.bf16.msra.mxu1 %v2212_v13  ;;  %v2185_v40 = vld [vmem:[%s2468_s18 + $0xc] sm:$0xf]  ;;  %v1607_v44 = vor.u32 %v2192_v35, %v1606_v34  ;;  %v1615_v45 = vor.u32 %v2193_v37, %v1614_v36  ;;  %v1611_v46 = vor.u32 %v2184_v38, %v1608_v39  ;;  %v2238_v48 = vld [vmem:[%s2810_s1 + $0x130] sm:$0xff]  ;;  %v2236_v56 = vld [vmem:[%s2810_s1 + $0x120] sm:$0xff] }
  0x1a   : > { %1295 = vmatpush.bf16.msra.mxu2 %v2220_v14  ;;  %v1616_v41 = vld [vmem:[%s2468_s18 + $0x48] sm:$0xf0]  ;;  %v2246_v49 = vld [vmem:[%s2810_s1 + $0x170] sm:$0xff]  ;;  %v2244_v57 = vld [vmem:[%s2810_s1 + $0x160] sm:$0xff] }
  0x1b   : > { %1309 = vmatpush.bf16.msra.mxu3 %v2228_v15  ;;  %v1619_v47 = vor.u32 %v2185_v40, %v1616_v41  ;;  %v2254_v50 = vld [vmem:[%s2810_s1 + $0x1b0] sm:$0xff]  ;;  %v2237_v52 = vld [vmem:[%s2810_s1 + $0x128] sm:$0xff]  ;;  %v2252_v58 = vld [vmem:[%s2810_s1 + $0x1a0] sm:$0xff] }
  0x1c   : > { %1268 = vmatpush.bf16.msra.mxu0 %v2203_v16  ;;  %v2262_v51 = vld [vmem:[%s2810_s1 + $0x1f0] sm:$0xff]  ;;  %v2245_v53 = vld [vmem:[%s2810_s1 + $0x168] sm:$0xff]  ;;  %v2260_v59 = vld [vmem:[%s2810_s1 + $0x1e0] sm:$0xff] }
  0x1d   : > { %1282 = vmatpush.bf16.msra.mxu1 %v2211_v17  ;;  %v2253_v54 = vld [vmem:[%s2810_s1 + $0x1a8] sm:$0xff]  ;;  %v2235_v60 = vld [vmem:[%s2810_s1 + $0x118] sm:$0xff]  ;;  %v2234_v0 = vld [vmem:[%s2810_s1 + $0x110] sm:$0xff] }
  0x1e   : > { %1296 = vmatpush.bf16.msra.mxu2 %v2219_v18  ;;  %v2261_v55 = vld [vmem:[%s2810_s1 + $0x1e8] sm:$0xff]  ;;  %v2243_v61 = vld [vmem:[%s2810_s1 + $0x158] sm:$0xff]  ;;  %v2242_v1 = vld [vmem:[%s2810_s1 + $0x150] sm:$0xff] }
  0x1f   : > { %1310 = vmatpush.bf16.msra.mxu3 %v2227_v19  ;;  %v2251_v62 = vld [vmem:[%s2810_s1 + $0x198] sm:$0xff]  ;;  %v2250_v2 = vld [vmem:[%s2810_s1 + $0x190] sm:$0xff]  ;;  %v2233_v4 = vld [vmem:[%s2810_s1 + $0x108] sm:$0xff] }
  0x20   : > { %1269 = vmatpush.bf16.msra.mxu0 %v2202_v20  ;;  %v2259_v63 = vld [vmem:[%s2810_s1 + $0x1d8] sm:$0xff]  ;;  %v2258_v3 = vld [vmem:[%s2810_s1 + $0x1d0] sm:$0xff]  ;;  %v2241_v5 = vld [vmem:[%s2810_s1 + $0x148] sm:$0xff] }
  0x21   : > { %1283 = vmatpush.bf16.msra.mxu1 %v2210_v21  ;;  %v2249_v6 = vld [vmem:[%s2810_s1 + $0x188] sm:$0xff]  ;;  %v2232_v8 = vld [vmem:[%s2810_s1 + $0x100] sm:$0xff]  ;;  %v2271_v12 = vld [vmem:[%s2810_s1 + $0x238] sm:$0xff] }
  0x22   : > { %1297 = vmatpush.bf16.msra.mxu2 %v2218_v22  ;;  %v2257_v7 = vld [vmem:[%s2810_s1 + $0x1c8] sm:$0xff]  ;;  %v2240_v9 = vld [vmem:[%s2810_s1 + $0x140] sm:$0xff]  ;;  %v2279_v13 = vld [vmem:[%s2810_s1 + $0x278] sm:$0xff] }
  0x23   : > { %1311 = vmatpush.bf16.msra.mxu3 %v2226_v23  ;;  %v2248_v10 = vld [vmem:[%s2810_s1 + $0x180] sm:$0xff]  ;;  %v1622_v14 = vld [vmem:[%s2468_s18 + $0x10] sm:$0xf]  ;;  %v1630_v16 = vld [vmem:[%s2468_s18 + $0x18] sm:$0xf] }
  0x24   : > { %1270 = vmatpush.bf16.msra.mxu0 %v2201_v24  ;;  %v2256_v11 = vld [vmem:[%s2810_s1 + $0x1c0] sm:$0xff]  ;;  %v2194_v15 = vld [vmem:[%s2468_s18 + $0x4c] sm:$0xf0]  ;;  %v2195_v17 = vld [vmem:[%s2468_s18 + $0x54] sm:$0xf0] }
  0x25   : > { %1284 = vmatpush.bf16.msra.mxu1 %v2209_v25  ;;  %v2186_v18 = vld [vmem:[%s2468_s18 + $0x14] sm:$0xf]  ;;  %v2187_v20 = vld [vmem:[%s2468_s18 + $0x1c] sm:$0xf]  ;;  %v1623_v24 = vor.u32 %v2194_v15, %v1622_v14  ;;  %v1631_v25 = vor.u32 %v2195_v17, %v1630_v16  ;;  %v2285_v34 = vld [vmem:[%s2810_s1 + $0x2a8] sm:$0xff] }
  0x26   : > { %1298 = vmatpush.bf16.msra.mxu2 %v2217_v26  ;;  %v1624_v19 = vld [vmem:[%s2468_s18 + $0x50] sm:$0xf0]  ;;  %v1632_v21 = vld [vmem:[%s2468_s18 + $0x58] sm:$0xf0]  ;;  %v2293_v35 = vld [vmem:[%s2810_s1 + $0x2e8] sm:$0xff] }
  0x27   : > { %1312 = vmatpush.bf16.msra.mxu3 %v2225_v27  ;;  %v2287_v22 = vld [vmem:[%s2810_s1 + $0x2b8] sm:$0xff]  ;;  %v1627_v26 = vor.u32 %v2186_v18, %v1624_v19  ;;  %v1635_v27 = vor.u32 %v2187_v20, %v1632_v21  ;;  %v2268_v36 = vld [vmem:[%s2810_s1 + $0x220] sm:$0xff]  ;;  %v2317_v14 = vld [vmem:[%s2810_s1 + $0x3a8] sm:$0xff] }
  0x28   : > { %1271 = vmatpush.bf16.msra.mxu0 %v2200_v28  ;;  %v2295_v23 = vld [vmem:[%s2810_s1 + $0x2f8] sm:$0xff]  ;;  %v2270_v28 = vld [vmem:[%s2810_s1 + $0x230] sm:$0xff]  ;;  %v2276_v37 = vld [vmem:[%s2810_s1 + $0x260] sm:$0xff] }
  0x29   : > { %1285 = vmatpush.bf16.msra.mxu1 %v2208_v29  ;;  %v2278_v29 = vld [vmem:[%s2810_s1 + $0x270] sm:$0xff]  ;;  %v2284_v38 = vld [vmem:[%s2810_s1 + $0x2a0] sm:$0xff]  ;;  %v2267_v40 = vld [vmem:[%s2810_s1 + $0x218] sm:$0xff] }
  0x2a   : > { %1299 = vmatpush.bf16.msra.mxu2 %v2216_v30  ;;  %v2286_v30 = vld [vmem:[%s2810_s1 + $0x2b0] sm:$0xff]  ;;  %v2292_v39 = vld [vmem:[%s2810_s1 + $0x2e0] sm:$0xff]  ;;  %v2275_v41 = vld [vmem:[%s2810_s1 + $0x258] sm:$0xff] }
  0x2b   : > { %1313 = vmatpush.bf16.msra.mxu3 %v2224_v31  ;;  %1272 = vmatmul.bf16.vlgmr.msra.gmra.mxu0 %v1607_v44  ;;  %v2294_v31 = vld [vmem:[%s2810_s1 + $0x2f0] sm:$0xff]  ;;  %v2325_v15 = vld [vmem:[%s2810_s1 + $0x3e8] sm:$0xff]  ;;  %v2300_v16 = vld [vmem:[%s2810_s1 + $0x320] sm:$0xff] }
  0x2c   : > { %1320 = vmatpush.bf16.msrb.mxu0 %v2239_v32  ;;  %1286 = vmatmul.bf16.vlgmr.msra.gmra.mxu1 %v1611_v46  ;;  %v2269_v32 = vld [vmem:[%s2810_s1 + $0x228] sm:$0xff]  ;;  %v2266_v44 = vld [vmem:[%s2810_s1 + $0x210] sm:$0xff]  ;;  %v2308_v17 = vld [vmem:[%s2810_s1 + $0x360] sm:$0xff] }
  0x2d   : > { %1334 = vmatpush.bf16.msrb.mxu1 %v2247_v33  ;;  %1300 = vmatmul.bf16.vlgmr.msra.gmra.mxu2 %v1615_v45  ;;  %v2277_v33 = vld [vmem:[%s2810_s1 + $0x268] sm:$0xff]  ;;  %v2274_v45 = vld [vmem:[%s2810_s1 + $0x250] sm:$0xff]  ;;  %v2316_v18 = vld [vmem:[%s2810_s1 + $0x3a0] sm:$0xff] }
  0x2e   : > { %1348 = vmatpush.bf16.msrb.mxu2 %v2255_v42  ;;  %1314 = vmatmul.bf16.vlgmr.msra.gmra.mxu3 %v1619_v47  ;;  %v2283_v42 = vld [vmem:[%s2810_s1 + $0x298] sm:$0xff]  ;;  %v2282_v46 = vld [vmem:[%s2810_s1 + $0x290] sm:$0xff]  ;;  %v2324_v19 = vld [vmem:[%s2810_s1 + $0x3e0] sm:$0xff] }
  0x2f   : > { %1362 = vmatpush.bf16.msrb.mxu3 %v2263_v43  ;;  %v2291_v43 = vld [vmem:[%s2810_s1 + $0x2d8] sm:$0xff]  ;;  %v2290_v47 = vld [vmem:[%s2810_s1 + $0x2d0] sm:$0xff] }
  0x30   : > { %1321 = vmatpush.bf16.msrb.mxu0 %v2238_v48  ;;  %v2265_v48 = vld [vmem:[%s2810_s1 + $0x208] sm:$0xff]  ;;  %v2299_v20 = vld [vmem:[%s2810_s1 + $0x318] sm:$0xff] }
  0x31   : > { %1335 = vmatpush.bf16.msrb.mxu1 %v2246_v49  ;;  %v2273_v49 = vld [vmem:[%s2810_s1 + $0x248] sm:$0xff]  ;;  %v2307_v21 = vld [vmem:[%s2810_s1 + $0x358] sm:$0xff] }
  0x32   : > { %1349 = vmatpush.bf16.msrb.mxu2 %v2254_v50  ;;  %v2281_v50 = vld [vmem:[%s2810_s1 + $0x288] sm:$0xff] }
  0x33   : > { %1363 = vmatpush.bf16.msrb.mxu3 %v2262_v51  ;;  %v2289_v51 = vld [vmem:[%s2810_s1 + $0x2c8] sm:$0xff] }
  0x34   : > { %1322 = vmatpush.bf16.msrb.mxu0 %v2237_v52  ;;  %v2264_v52 = vld [vmem:[%s2810_s1 + $0x200] sm:$0xff] }
  0x35   : > { %1336 = vmatpush.bf16.msrb.mxu1 %v2245_v53  ;;  %v2272_v53 = vld [vmem:[%s2810_s1 + $0x240] sm:$0xff] }
  0x36   : > { %1350 = vmatpush.bf16.msrb.mxu2 %v2253_v54  ;;  %v2280_v54 = vld [vmem:[%s2810_s1 + $0x280] sm:$0xff] }
  0x37   : > { %1364 = vmatpush.bf16.msrb.mxu3 %v2261_v55  ;;  %v2288_v55 = vld [vmem:[%s2810_s1 + $0x2c0] sm:$0xff] }
  0x38   : > { %1323 = vmatpush.bf16.msrb.mxu0 %v2236_v56  ;;  %v2303_v56 = vld [vmem:[%s2810_s1 + $0x338] sm:$0xff] }
  0x39   : > { %1337 = vmatpush.bf16.msrb.mxu1 %v2244_v57  ;;  %v2311_v57 = vld [vmem:[%s2810_s1 + $0x378] sm:$0xff] }
  0x3a   : > { %1351 = vmatpush.bf16.msrb.mxu2 %v2252_v58  ;;  %v1638_v58 = vld [vmem:[%s2468_s18 + $0x20] sm:$0xf] }
  0x3b   : > { %1365 = vmatpush.bf16.msrb.mxu3 %v2260_v59  ;;  %v2196_v59 = vld [vmem:[%s2468_s18 + $0x5c] sm:$0xf0] }
  0x3c   : > { %1324 = vmatpush.bf16.msrb.mxu0 %v2235_v60  ;;  %v1646_v60 = vld [vmem:[%s2468_s18 + $0x28] sm:$0xf] }
  0x3d   : > { %1338 = vmatpush.bf16.msrb.mxu1 %v2243_v61  ;;  %v2197_v61 = vld [vmem:[%s2468_s18 + $0x64] sm:$0xf0] }
  0x3e   : > { %1352 = vmatpush.bf16.msrb.mxu2 %v2251_v62  ;;  %v2188_v62 = vld [vmem:[%s2468_s18 + $0x24] sm:$0xf] }
  0x3f   : > { %1366 = vmatpush.bf16.msrb.mxu3 %v2259_v63  ;;  %v1640_v63 = vld [vmem:[%s2468_s18 + $0x60] sm:$0xf0] }
  0x40   : > { %1325 = vmatpush.bf16.msrb.mxu0 %v2234_v0  ;;  %v2189_v0 = vld [vmem:[%s2468_s18 + $0x2c] sm:$0xf] }
  0x41   : > { %1339 = vmatpush.bf16.msrb.mxu1 %v2242_v1  ;;  %v1648_v1 = vld [vmem:[%s2468_s18 + $0x68] sm:$0xf0] }
  0x42   : > { %1353 = vmatpush.bf16.msrb.mxu2 %v2250_v2  ;;  %v2319_v2 = vld [vmem:[%s2810_s1 + $0x3b8] sm:$0xff] }
  0x43   : > { %1367 = vmatpush.bf16.msrb.mxu3 %v2258_v3  ;;  %v2327_v3 = vld [vmem:[%s2810_s1 + $0x3f8] sm:$0xff] }
  0x44   : > { %1326 = vmatpush.bf16.msrb.mxu0 %v2233_v4  ;;  %v1639_v4 = vor.u32 %v2196_v59, %v1638_v58 }
  0x45   : > { %1340 = vmatpush.bf16.msrb.mxu1 %v2241_v5  ;;  %v1647_v5 = vor.u32 %v2197_v61, %v1646_v60 }
  0x46   : > { %1354 = vmatpush.bf16.msrb.mxu2 %v2249_v6  ;;  %v1643_v6 = vor.u32 %v2188_v62, %v1640_v63 }
  0x47   : > { %1368 = vmatpush.bf16.msrb.mxu3 %v2257_v7  ;;  %v1651_v7 = vor.u32 %v2189_v0, %v1648_v1 }
  0x48   : > { %1327 = vmatpush.bf16.msrb.mxu0 %v2232_v8  ;;  %v2302_v8 = vld [vmem:[%s2810_s1 + $0x330] sm:$0xff] }
  0x49   : > { %1341 = vmatpush.bf16.msrb.mxu1 %v2240_v9  ;;  %v2310_v9 = vld [vmem:[%s2810_s1 + $0x370] sm:$0xff] }
  0x4a   : > { %1355 = vmatpush.bf16.msrb.mxu2 %v2248_v10  ;;  %v2318_v10 = vld [vmem:[%s2810_s1 + $0x3b0] sm:$0xff] }
  0x4b   : > { %1369 = vmatpush.bf16.msrb.mxu3 %v2256_v11  ;;  %1328 = vmatmul.bf16.vlgmr.msrb.gmra.mxu0 %v1623_v24  ;;  %v2326_v11 = vld [vmem:[%s2810_s1 + $0x3f0] sm:$0xff] }
  0x4c   : > { %1376 = vmatpush.bf16.msra.mxu0 %v2271_v12  ;;  %1342 = vmatmul.bf16.vlgmr.msrb.gmra.mxu1 %v1627_v26  ;;  %v2301_v12 = vld [vmem:[%s2810_s1 + $0x328] sm:$0xff]  ;;  %v2298_v24 = vld [vmem:[%s2810_s1 + $0x310] sm:$0xff] }
  0x4d   : > { %1390 = vmatpush.bf16.msra.mxu1 %v2279_v13  ;;  %1356 = vmatmul.bf16.vlgmr.msrb.gmra.mxu2 %v1631_v25  ;;  %v2309_v13 = vld [vmem:[%s2810_s1 + $0x368] sm:$0xff]  ;;  %v2306_v25 = vld [vmem:[%s2810_s1 + $0x350] sm:$0xff] }
  0x4e   : > { %1404 = vmatpush.bf16.msra.mxu2 %v2287_v22  ;;  %1370 = vmatmul.bf16.vlgmr.msrb.gmra.mxu3 %v1635_v27  ;;  %v2315_v22 = vld [vmem:[%s2810_s1 + $0x398] sm:$0xff]  ;;  %v2314_v26 = vld [vmem:[%s2810_s1 + $0x390] sm:$0xff] }
  0x4f   : > { %1418 = vmatpush.bf16.msra.mxu3 %v2295_v23  ;;  %v2323_v23 = vld [vmem:[%s2810_s1 + $0x3d8] sm:$0xff]  ;;  %v2322_v27 = vld [vmem:[%s2810_s1 + $0x3d0] sm:$0xff] }
  0x50   : > { %1377 = vmatpush.bf16.msra.mxu0 %v2270_v28  ;;  %v2297_v28 = vld [vmem:[%s2810_s1 + $0x308] sm:$0xff] }
  0x51   : > { %1391 = vmatpush.bf16.msra.mxu1 %v2278_v29  ;;  %v2305_v29 = vld [vmem:[%s2810_s1 + $0x348] sm:$0xff] }
  0x52   : > { %1405 = vmatpush.bf16.msra.mxu2 %v2286_v30  ;;  %v2313_v30 = vld [vmem:[%s2810_s1 + $0x388] sm:$0xff] }
  0x53   : > { %1419 = vmatpush.bf16.msra.mxu3 %v2294_v31  ;;  %v2321_v31 = vld [vmem:[%s2810_s1 + $0x3c8] sm:$0xff] }
  0x54   : > { %1378 = vmatpush.bf16.msra.mxu0 %v2269_v32  ;;  %v2296_v32 = vld [vmem:[%s2810_s1 + $0x300] sm:$0xff] }
  0x55   : > { %1392 = vmatpush.bf16.msra.mxu1 %v2277_v33  ;;  %v2304_v33 = vld [vmem:[%s2810_s1 + $0x340] sm:$0xff] }
  0x56   : > { %1406 = vmatpush.bf16.msra.mxu2 %v2285_v34  ;;  %v2312_v34 = vld [vmem:[%s2810_s1 + $0x380] sm:$0xff] }
  0x57   : > { %1420 = vmatpush.bf16.msra.mxu3 %v2293_v35  ;;  %v2320_v35 = vld [vmem:[%s2810_s1 + $0x3c0] sm:$0xff] }
  0x58   : > { %1379 = vmatpush.bf16.msra.mxu0 %v2268_v36  ;;  %v1654_v36 = vld [vmem:[%s2468_s18 + $0x30] sm:$0xf] }
  0x59   : > { %1393 = vmatpush.bf16.msra.mxu1 %v2276_v37  ;;  %v2198_v37 = vld [vmem:[%s2468_s18 + $0x6c] sm:$0xf0] }
  0x5a   : > { %1407 = vmatpush.bf16.msra.mxu2 %v2284_v38  ;;  %v2190_v38 = vld [vmem:[%s2468_s18 + $0x34] sm:$0xf] }
  0x5b   : > { %1421 = vmatpush.bf16.msra.mxu3 %v2292_v39  ;;  %v1656_v39 = vld [vmem:[%s2468_s18 + $0x70] sm:$0xf0] }
  0x5c   : > { %1380 = vmatpush.bf16.msra.mxu0 %v2267_v40  ;;  %v1662_v40 = vld [vmem:[%s2468_s18 + $0x38] sm:$0xf] }
  0x5d   : > { %1394 = vmatpush.bf16.msra.mxu1 %v2275_v41  ;;  %v2199_v41 = vld [vmem:[%s2468_s18 + $0x74] sm:$0xf0] }
  0x5e   : > { %1408 = vmatpush.bf16.msra.mxu2 %v2283_v42  ;;  %v2191_v42 = vld [vmem:[%s2468_s18 + $0x3c] sm:$0xf] }
  0x5f   : > { %1422 = vmatpush.bf16.msra.mxu3 %v2291_v43  ;;  %v1664_v43 = vld [vmem:[%s2468_s18 + $0x78] sm:$0xf0]  ;;  %s2183_s18 = sshll.u32 %s2813_s10, 3 }
  0x60   : > { %1381 = vmatpush.bf16.msra.mxu0 %v2266_v44  ;;  %v1655_v44 = vor.u32 %v2198_v37, %v1654_v36  ;;  %s143_s21 = scalar_lea.vmem %s2811_s2, %s2183_s18 }
  0x61   : > { %1395 = vmatpush.bf16.msra.mxu1 %v2274_v45  ;;  %v1659_v45 = vor.u32 %v2190_v38, %v1656_v39 }
  0x62   : > { %1409 = vmatpush.bf16.msra.mxu2 %v2282_v46  ;;  %v1663_v46 = vor.u32 %v2199_v41, %v1662_v40 }
  0x63   : > { %1423 = vmatpush.bf16.msra.mxu3 %v2290_v47  ;;  %v1667_v47 = vor.u32 %v2191_v42, %v1664_v43 }
  0x64   : > { %1382 = vmatpush.bf16.msra.mxu0 %v2265_v48 }
  0x65   : > { %1396 = vmatpush.bf16.msra.mxu1 %v2273_v49 }
  0x66   : > { %1410 = vmatpush.bf16.msra.mxu2 %v2281_v50 }
  0x67   : > { %1424 = vmatpush.bf16.msra.mxu3 %v2289_v51 }
  0x68   : > { %1383 = vmatpush.bf16.msra.mxu0 %v2264_v52 }
  0x69   : > { %1397 = vmatpush.bf16.msra.mxu1 %v2272_v53 }
  0x6a   : > { %1411 = vmatpush.bf16.msra.mxu2 %v2280_v54 }
  0x6b   : > { %1425 = vmatpush.bf16.msra.mxu3 %v2288_v55  ;;  %1384 = vmatmul.bf16.vlgmr.msra.gmra.mxu0 %v1639_v4 }
  0x6c   : > { %1432 = vmatpush.bf16.msrb.mxu0 %v2303_v56  ;;  %1398 = vmatmul.bf16.vlgmr.msra.gmra.mxu1 %v1643_v6 }
  0x6d   : > { %1446 = vmatpush.bf16.msrb.mxu1 %v2311_v57  ;;  %1412 = vmatmul.bf16.vlgmr.msra.gmra.mxu2 %v1647_v5 }
  0x6e   : > { %1460 = vmatpush.bf16.msrb.mxu2 %v2319_v2  ;;  %1426 = vmatmul.bf16.vlgmr.msra.gmra.mxu3 %v1651_v7 }
  0x6f   : > { %1474 = vmatpush.bf16.msrb.mxu3 %v2327_v3 }
  0x70   : > { %1433 = vmatpush.bf16.msrb.mxu0 %v2302_v8 }
  0x71   : > { %1447 = vmatpush.bf16.msrb.mxu1 %v2310_v9 }
  0x72   : > { %1461 = vmatpush.bf16.msrb.mxu2 %v2318_v10 }
  0x73   : > { %1475 = vmatpush.bf16.msrb.mxu3 %v2326_v11 }
  0x74   : > { %1434 = vmatpush.bf16.msrb.mxu0 %v2301_v12 }
  0x75   : > { %1448 = vmatpush.bf16.msrb.mxu1 %v2309_v13 }
  0x76   : > { %1462 = vmatpush.bf16.msrb.mxu2 %v2317_v14 }
  0x77   : > { %1476 = vmatpush.bf16.msrb.mxu3 %v2325_v15 }
  0x78   : > { %1435 = vmatpush.bf16.msrb.mxu0 %v2300_v16 }
  0x79   : > { %1449 = vmatpush.bf16.msrb.mxu1 %v2308_v17 }
  0x7a   : > { %1463 = vmatpush.bf16.msrb.mxu2 %v2316_v18 }
  0x7b   : > { %1477 = vmatpush.bf16.msrb.mxu3 %v2324_v19 }
  0x7c   : > { %1436 = vmatpush.bf16.msrb.mxu0 %v2299_v20 }
  0x7d   : > { %1450 = vmatpush.bf16.msrb.mxu1 %v2307_v21 }
  0x7e   : > { %1464 = vmatpush.bf16.msrb.mxu2 %v2315_v22 }
  0x7f   : > { %1478 = vmatpush.bf16.msrb.mxu3 %v2323_v23 }
  0x80   : > { %1437 = vmatpush.bf16.msrb.mxu0 %v2298_v24 }
  0x81   : > { %1451 = vmatpush.bf16.msrb.mxu1 %v2306_v25 }
  0x82   : > { %1465 = vmatpush.bf16.msrb.mxu2 %v2314_v26 }
  0x83   : > { %1479 = vmatpush.bf16.msrb.mxu3 %v2322_v27 }
  0x84   : > { %1438 = vmatpush.bf16.msrb.mxu0 %v2297_v28 }
  0x85   : > { %1452 = vmatpush.bf16.msrb.mxu1 %v2305_v29 }
  0x86   : > { %1466 = vmatpush.bf16.msrb.mxu2 %v2313_v30 }
  0x87   : > { %1480 = vmatpush.bf16.msrb.mxu3 %v2321_v31 }
  0x88   : > { %1439 = vmatpush.bf16.msrb.mxu0 %v2296_v32 }
  0x89   : > { %1453 = vmatpush.bf16.msrb.mxu1 %v2304_v33 }
  0x8a   : > { %1467 = vmatpush.bf16.msrb.mxu2 %v2312_v34 }
  0x8b   : > { %1481 = vmatpush.bf16.msrb.mxu3 %v2320_v35  ;;  %1440 = vmatmul.bf16.vlgmr.msrb.gmra.mxu0 %v1655_v44 }
  0x8c   : > { %1454 = vmatmul.bf16.vlgmr.msrb.gmra.mxu1 %v1659_v45 }
  0x8d   : > { %1468 = vmatmul.bf16.vlgmr.msrb.gmra.mxu2 %v1663_v46 }
  0x8e   : > { %1482 = vmatmul.bf16.vlgmr.msrb.gmra.mxu3 %v1667_v47 }
  0xa8   : > { %v1273_v48 = vpop.f32.mrf.mxu0 }
  0xa9   : > { %v1287_v49 = vpop.f32.mrf.mxu1 }
  0xaa   : > { %v1288_v58 = vadd.f32 %v1287_v49, %v1273_v48 }
  0xb0   : > { %v1301_v50 = vpop.f32.mrf.mxu2  ;;  %v1275_v52 = vpop.f32.mrf.mxu0 }
  0xb1   : > { %v1315_v51 = vpop.f32.mrf.mxu3  ;;  %v1289_v53 = vpop.f32.mrf.mxu1  ;;  %v1302_v61 = vadd.f32 %v1301_v50, %v1288_v58 }
  0xb2   : > { %v1290_v0 = vadd.f32 %v1289_v53, %v1275_v52 }
  0xb3   : > { %v1316_v63 = vadd.f32 %v1315_v51, %v1302_v61 }
  0xb8   : > { %v1303_v54 = vpop.f32.mrf.mxu2 }
  0xb9   : > { %v1317_v55 = vpop.f32.mrf.mxu3  ;;  %v1304_v2 = vadd.f32 %v1303_v54, %v1290_v0 }
  0xbb   : > { %v1318_v7 = vadd.f32 %v1317_v55, %v1304_v2 }
  0xc8   : > { %v1329_v56 = vpop.f32.mrf.mxu0 }
  0xc9   : > { %v1343_v57 = vpop.f32.mrf.mxu1  ;;  %v1330_v3 = vadd.f32 %v1329_v56, %v1316_v63 }
  0xcb   : > { %v1344_v8 = vadd.f32 %v1343_v57, %v1330_v3 }
  0xd0   : > { %v1357_v59 = vpop.f32.mrf.mxu2  ;;  %v1331_v62 = vpop.f32.mrf.mxu0 }
  0xd1   : > { %v1371_v60 = vpop.f32.mrf.mxu3  ;;  %v1345_v1 = vpop.f32.mrf.mxu1  ;;  %v1332_v10 = vadd.f32 %v1331_v62, %v1318_v7  ;;  %v1358_v11 = vadd.f32 %v1357_v59, %v1344_v8 }
  0xd3   : > { %v1346_v14 = vadd.f32 %v1345_v1, %v1332_v10  ;;  %v1372_v15 = vadd.f32 %v1371_v60, %v1358_v11 }
  0xd8   : > { %v1359_v4 = vpop.f32.mrf.mxu2 }
  0xd9   : > { %v1373_v5 = vpop.f32.mrf.mxu3  ;;  %v1360_v16 = vadd.f32 %v1359_v4, %v1346_v14 }
  0xdb   : > { %v1374_v20 = vadd.f32 %v1373_v5, %v1360_v16 }
  0xe8   : > { %v1385_v6 = vpop.f32.mrf.mxu0 }
  0xe9   : > { %v1399_v9 = vpop.f32.mrf.mxu1  ;;  %v1386_v18 = vadd.f32 %v1385_v6, %v1372_v15 }
  0xeb   : > { %v1400_v21 = vadd.f32 %v1399_v9, %v1386_v18 }
  0xf0   : > { %v1413_v12 = vpop.f32.mrf.mxu2  ;;  %v1387_v17 = vpop.f32.mrf.mxu0 }
  0xf1   : > { %v1427_v13 = vpop.f32.mrf.mxu3  ;;  %v1401_v19 = vpop.f32.mrf.mxu1  ;;  %v1388_v22 = vadd.f32 %v1387_v17, %v1374_v20  ;;  %v1414_v25 = vadd.f32 %v1413_v12, %v1400_v21 }
  0xf3   : > { %v1402_v27 = vadd.f32 %v1401_v19, %v1388_v22  ;;  %v1428_v29 = vadd.f32 %v1427_v13, %v1414_v25 }
  0xf8   : > { %v1415_v23 = vpop.f32.mrf.mxu2 }
  0xf9   : > { %v1429_v24 = vpop.f32.mrf.mxu3  ;;  %v1416_v30 = vadd.f32 %v1415_v23, %v1402_v27 }
  0xfb   : > { %v1430_v34 = vadd.f32 %v1429_v24, %v1416_v30 }
 0x108   : > { %v1441_v26 = vpop.f32.mrf.mxu0 }
 0x109   : > { %v1455_v28 = vpop.f32.mrf.mxu1  ;;  %v1442_v31 = vadd.f32 %v1441_v26, %v1428_v29 }
 0x10b   : > { %v1456_v36 = vadd.f32 %v1455_v28, %v1442_v31 }
 0x110   : > { %v1469_v32 = vpop.f32.mrf.mxu2  ;;  %v1443_v35 = vpop.f32.mrf.mxu0 }
 0x111   : > { %v1483_v33 = vpop.f32.mrf.mxu3  ;;  %v1444_v37 = vadd.f32 %v1443_v35, %v1430_v34  ;;  %v1470_v38 = vadd.f32 %v1469_v32, %v1456_v36  ;;  %v1457_v39 = vpop.f32.mrf.mxu1 }
 0x113   : > { %v1458_v40 = vadd.f32 %v1457_v39, %v1444_v37  ;;  %v1484_v42 = vadd.f32 %v1483_v33, %v1470_v38 }
 0x115   : > { %v1498_v46 = vmul.f32 %v1484_v42, %v1484_v42 }
 0x118   : > { %v1471_v41 = vpop.f32.mrf.mxu2 }
 0x119   : > { %v1472_v43 = vadd.f32 %v1471_v41, %v1458_v40  ;;  %v1485_v44 = vpop.f32.mrf.mxu3 }
 0x11b   : > { %v1486_v45 = vadd.f32 %v1485_v44, %v1472_v43 }
 0x11d   : > { %v1490_v47 = vadd.f32 %v1486_v45, %v1484_v42  ;;  %v1499_v48 = vmul.f32 %v1486_v45, %v1486_v45 }
 0x11f   : > { %v1491_v49 = vrot.slane %v1490_v47, 4  ;;  %v1500_v50 = vadd.f32 %v1499_v48, %v1498_v46 }
 0x121   : > { %v1492_v51 = vadd.f32 %v1491_v49, %v1490_v47  ;;  %v1501_v52 = vrot.slane %v1500_v50, 4 }
 0x123   : > { %v1493_v53 = vrot.slane %v1492_v51, 2  ;;  %v1502_v54 = vadd.f32 %v1501_v52, %v1500_v50 }
 0x125   : > { %v1494_v55 = vadd.f32 %v1493_v53, %v1492_v51  ;;  %v1503_v56 = vrot.slane %v1502_v54, 2 }
 0x127   : > { %v1495_v57 = vrot.slane %v1494_v55, 1  ;;  %v1504_v58 = vadd.f32 %v1503_v56, %v1502_v54 }
 0x129   : > { %v1496_v59 = vadd.f32 %v1495_v57, %v1494_v55  ;;  %v1505_v60 = vrot.slane %v1504_v58, 1 }
 0x12b   : > { %v1506_v61 = vadd.f32 %v1505_v60, %v1504_v58  ;;  %v1508_v62 = vmul.f32 0.0625, %v1496_v59 }
 0x12d   : > { %v1509_v63 = vmul.f32 0.0625, %v1506_v61  ;;  %v1510_v0 = vmul.f32 %v1508_v62, %v1508_v62  ;;  %v1526_v10 = vsub.f32 %v1484_v42, %v1508_v62  ;;  %v1527_v11 = vsub.f32 %v1486_v45, %v1508_v62 }
 0x12f   : > { %v1511_v1 = vsub.f32 %v1509_v63, %v1510_v0 }
 0x131   : > { %v1512_v2 = vmax.f32 %v1511_v1, 0.0 }
 0x133   : > { %v1513_v3 = vadd.f32 1e-05, %v1512_v2 }
 0x135   : > { %2341 = vrsqrt.f32 %v1513_v3  ;;  %vm1520_vm1 = vweird.f32 %v1513_v3 }
 0x13b   : > { %v2342_v4 = vpop.eup %2341 }
 0x13c   : > { %v1515_v5 = vmul.f32 %v2342_v4, %v1513_v3  ;;  %vm1521_vm0 = vweird.f32 %v2342_v4 }
 0x13d   : > { %vm1522_vm2 = vmor %vm1520_vm1, %vm1521_vm0 }
 0x13e   : > { %v1516_v6 = vmul.f32 %v2342_v4, %v1515_v5 }
 0x140   : > { %v1517_v7 = vmul.f32 0.5, %v1516_v6 }
 0x142   : > { %v1518_v8 = vsub.f32 1.5, %v1517_v7 }
 0x144   : > { %v1519_v9 = vmul.f32 %v2342_v4, %v1518_v8 }
 0x146   : > { %v1523_v12 = vsel %vm1522_vm2, %v2342_v4, %v1519_v9 }
 0x147   : > { %v1528_v13 = vmul.f32 %v1526_v10, %v1523_v12  ;;  %v1529_v14 = vmul.f32 %v1527_v11, %v1523_v12 }
 0x149   : > { %vm1530_vm3 = vcmp.ge.f32.partialorder %v1528_v13, 0.0  ;;  %vm1531_vm4 = vcmp.ge.f32.partialorder %v1529_v14, 0.0  ;;  %v1532_v15 = vmul.f32 0.2, %v1528_v13  ;;  %v1533_v16 = vmul.f32 0.2, %v1529_v14 }
 0x14b   : > { %v1534_v17 = vsel %vm1530_vm3, %v1528_v13, %v1532_v15  ;;  %v1535_v18 = vsel %vm1531_vm4, %v1529_v14, %v1533_v16 }
 0x14c   : > { %v2331_v19 = vpack.c.bf16 %v1535_v18, %v1534_v17 }
 0x14e   : > { %2332 = vst [vmem:[%s143_s21] sm:$0xff] %v2331_v19  }
 0x14f PF: > { %s12_s9 = sadd.s32 1, %s2349_s9  }
 0x150   : > { %p9_p4 = scmp.ge.s32.totalorder %s12_s9, 4  }
 0x152   :  { %11 = sbr.rel (!%p9_p4) target bundleno = 1 (0x1), region = 58 }

</bundles_post_ra>
